<compile_context>
chip_gen: v7x
topology: tpu7x:2x2x1
jax: 0.10.0
libtpu: 0.0.40
codegen_flags: <defaults>
</compile_context>

<pallas_src>
import functools

import jax
import jax.numpy as jnp
import numpy as np
from jax import lax
from jax.experimental import pallas as pl
from jax.experimental.pallas import tpu as pltpu

BN_EPS = 1e-5

# BN stats are carried in VMEM scratch across P-blocks -> grid must stay
# sequential on every chip (see TODO above for the v7x megacore variant).
_DIM_SEMANTICS = ("arbitrary", "arbitrary")
# 32 MiB fits every chip's scoped VMEM budget (raises v5e's 16 MiB default,
# stays well under v7x's 64 MiB physical); per-block footprint here is < 4 MiB.
_VMEM_LIMIT = 32 * 1024 * 1024


# --------------------------------------------------------------------------
# In-kernel building blocks
# --------------------------------------------------------------------------
def _conv_block(p_ref, w_ref):
    """One fused MXU matmul for all 4 pool positions of this P-block.

    p_ref: (4, TP, Kp)   im2col patches (axis 0 = position in 2x2 pool window)
    w_ref: (Kp, C)       conv weight matrix (K zero-padded to 128-multiple)
    returns (4*TP, C) float32 conv outputs.
    """
    four, tp, kp = p_ref.shape
    p = p_ref[...].reshape(four * tp, kp)          # leading-dim merge: free
    return jnp.dot(p, w_ref[...], preferred_element_type=jnp.float32)


def _bn_stats_pass(c, blk, nblk, g_ref, b_ref, s1_ref, s2_ref, inv_ref,
                   shift_ref, total_n):
    """Pass 0: accumulate per-channel sum / sum-of-squares across P-blocks and
    finalize the BN scale/shift on the last block (training-mode batch stats,
    biased variance, eps=1e-5 -- PyTorch semantics).

    `blk` / `nblk` are the grid index / extent bound at the kernel top level
    (NOT re-bound here -- see BUGFIX note in the module docstring)."""

    @pl.when(blk == 0)
    def _():
        s1_ref[...] = jnp.zeros_like(s1_ref)
        s2_ref[...] = jnp.zeros_like(s2_ref)

    s1_ref[...] += jnp.sum(c, axis=0, keepdims=True)
    s2_ref[...] += jnp.sum(c * c, axis=0, keepdims=True)

    @pl.when(blk == nblk - 1)
    def _():
        n = jnp.float32(total_n)
        mean = s1_ref[...] / n
        # NOTE: E[x^2]-E[x]^2 in f32; activations are ~unit scale here so the
        # cancellation risk is benign (a centered pass would need a 3rd sweep).
        var = s2_ref[...] / n - mean * mean
        inv = g_ref[...] * lax.rsqrt(var + BN_EPS)     # rsqrt -> EUP (free slot)
        inv_ref[...] = inv
        shift_ref[...] = b_ref[...] - mean * inv


def _bn_pool_relu(c, tp, c_out, inv_ref, shift_ref):
    """Pass 1: BN affine + 2x2 maxpool + ReLU.  Returns (TP, C) float32."""
    y = c * inv_ref[...] + shift_ref[...]
    y4 = y.reshape(4, tp, c_out)                   # leading-dim split: free
    pooled = jnp.maximum(jnp.maximum(y4[0], y4[1]), jnp.maximum(y4[2], y4[3]))
    return jnp.maximum(pooled, 0.0)


# --------------------------------------------------------------------------
# Pallas kernels
# --------------------------------------------------------------------------
def _stage1_kernel(p_ref, w_ref, g_ref, b_ref, o_ref,
                   s1_ref, s2_ref, inv_ref, shift_ref, *, total_n):
    """conv1 + bn1 + maxpool2 + relu for one P-block (grid = (pass, block))."""
    # Bind grid indices ONCE, at the top level of the kernel body.
    pass_id = pl.program_id(0)
    blk = pl.program_id(1)
    nblk = pl.num_programs(1)
    _, tp, _ = p_ref.shape
    c_out = w_ref.shape[1]

    @pl.when(pass_id == 0)
    def _():
        c = _conv_block(p_ref, w_ref)
        _bn_stats_pass(c, blk, nblk, g_ref, b_ref, s1_ref, s2_ref,
                       inv_ref, shift_ref, total_n)

    @pl.when(pass_id == 1)
    def _():
        c = _conv_block(p_ref, w_ref)
        pooled = _bn_pool_relu(c, tp, c_out, inv_ref, shift_ref)
        o_ref[...] = pooled.astype(o_ref.dtype)


def _stage2_kernel(p_ref, w_ref, g_ref, b_ref, wfc_ref, fcb_ref, o_ref,
                   s1_ref, s2_ref, inv_ref, shift_ref, *, total_n):
    """conv2 + bn2 + maxpool2 + relu + fc1 for one P-block of whole images."""
    pass_id = pl.program_id(0)
    blk = pl.program_id(1)
    nblk = pl.num_programs(1)
    _, tp, _ = p_ref.shape
    c_out = w_ref.shape[1]

    @pl.when(pass_id == 0)
    def _():
        c = _conv_block(p_ref, w_ref)
        _bn_stats_pass(c, blk, nblk, g_ref, b_ref, s1_ref, s2_ref,
                       inv_ref, shift_ref, total_n)

    @pl.when(pass_id == 1)
    def _():
        c = _conv_block(p_ref, w_ref)
        pooled = _bn_pool_relu(c, tp, c_out, inv_ref, shift_ref)  # (TP, 32) f32
        n_img = tp // 16                           # 16 pooled pixels per image
        feats = pooled.reshape(n_img, 16, c_out)   # leading-dim split: free
        logits = jnp.zeros((n_img, fcb_ref.shape[1]), jnp.float32) + fcb_ref[...]
        # fc1 as 16 small (n_img,32)x(32,128) dots: avoids a sublane->lane
        # reshape of the 512-wide feature vector; weight rows were permuted
        # host-side to NHWC flatten order and padded to 128 output lanes, so
        # the final store is lane-dense.
        for s in range(16):
            logits = logits + jnp.dot(feats[:, s, :], wfc_ref[s],
                                      preferred_element_type=jnp.float32)
        o_ref[...] = logits


# --------------------------------------------------------------------------
# pallas_call wrappers
# --------------------------------------------------------------------------
def _pick_tile(p, cap, step):
    """Largest multiple of `step` that is <= min(p, cap) and divides p."""
    t = (min(p, cap) // step) * step
    while t >= step:
        if p % t == 0:
            return t
        t -= step
    return p


def _stage1_call(patches, w_mat, gamma, beta, out_dtype):
    _, p, kp = patches.shape
    c = w_mat.shape[1]
    tp = _pick_tile(p, 1024, 16)           # 16-multiple: valid for f32 & bf16
    nblk = p // tp
    kernel = functools.partial(_stage1_kernel, total_n=4 * p)
    return pl.pallas_call(
        kernel,
        out_shape=jax.ShapeDtypeStruct((p, c), out_dtype),
        grid_spec=pltpu.PrefetchScalarGridSpec(
            num_scalar_prefetch=0,
            grid=(2, nblk),                                   # (pass, P-block)
            in_specs=[
                pl.BlockSpec((4, tp, kp), lambda ps, i: (0, i, 0)),
                pl.BlockSpec((kp, c), lambda ps, i: (0, 0)),
                pl.BlockSpec((1, c), lambda ps, i: (0, 0)),
                pl.BlockSpec((1, c), lambda ps, i: (0, 0)),
            ],
            # Output is written only in pass 1; ps*i pins the block index to 0
            # during the stats pass, so the only block that could be flushed
            # early is fully rewritten by pass 1 before its final flush.
            out_specs=pl.BlockSpec((tp, c), lambda ps, i: (ps * i, 0)),
            scratch_shapes=[pltpu.VMEM((1, c), jnp.float32)] * 4,
        ),
        compiler_params=pltpu.CompilerParams(
            dimension_semantics=_DIM_SEMANTICS,
            vmem_limit_bytes=_VMEM_LIMIT),
    )(patches, w_mat,
      gamma.reshape(1, c).astype(jnp.float32),
      beta.reshape(1, c).astype(jnp.float32))


def _stage2_call(patches, w_mat, gamma, beta, wfc, fcb):
    _, p, kp = patches.shape
    c = w_mat.shape[1]
    no = wfc.shape[2]                       # 128 (padded number of classes)
    b = p // 16
    # Blocks of whole images; 128-multiples keep (tp//16) % 8 == 0 when tiled.
    tp = _pick_tile(p, 512, 128)
    nblk = p // tp
    kernel = functools.partial(_stage2_kernel, total_n=4 * p)
    return pl.pallas_call(
        kernel,
        out_shape=jax.ShapeDtypeStruct((b, no), jnp.float32),
        grid_spec=pltpu.PrefetchScalarGridSpec(
            num_scalar_prefetch=0,
            grid=(2, nblk),
            in_specs=[
                pl.BlockSpec((4, tp, kp), lambda ps, i: (0, i, 0)),
                pl.BlockSpec((kp, c), lambda ps, i: (0, 0)),
                pl.BlockSpec((1, c), lambda ps, i: (0, 0)),
                pl.BlockSpec((1, c), lambda ps, i: (0, 0)),
                pl.BlockSpec((16, c, no), lambda ps, i: (0, 0, 0)),
                pl.BlockSpec((1, no), lambda ps, i: (0, 0)),
            ],
            out_specs=pl.BlockSpec((tp // 16, no), lambda ps, i: (ps * i, 0)),
            scratch_shapes=[pltpu.VMEM((1, c), jnp.float32)] * 4,
        ),
        compiler_params=pltpu.CompilerParams(
            dimension_semantics=_DIM_SEMANTICS,
            vmem_limit_bytes=_VMEM_LIMIT),
    )(patches, w_mat,
      gamma.reshape(1, c).astype(jnp.float32),
      beta.reshape(1, c).astype(jnp.float32),
      wfc, fcb)


# --------------------------------------------------------------------------
# Host-side glue: im2col grouped by 2x2 pool window, zero-padded K, layouts
# --------------------------------------------------------------------------
def _im2col_pool_grouped(x_nhwc, ksize, stride, pad):
    """(4, B*Hp*Wp, ksize*ksize*Cin); axis 0 = position inside the 2x2 pool
    window, rows ordered (b, hp, wp)."""
    b, h, w, cin = x_nhwc.shape
    ho = (h + 2 * pad - ksize) // stride + 1
    wo = (w + 2 * pad - ksize) // stride + 1
    xp = jnp.pad(x_nhwc, ((0, 0), (pad, pad), (pad, pad), (0, 0)))
    slabs = []
    for kh in range(ksize):
        for kw in range(ksize):
            slabs.append(xp[:, kh:kh + stride * ho:stride,
                            kw:kw + stride * wo:stride, :])
    k = ksize * ksize * cin
    patches = jnp.stack(slabs, axis=3).reshape(b, ho, wo, k)
    hp, wp = ho // 2, wo // 2
    patches = patches.reshape(b, hp, 2, wp, 2, k)
    patches = jnp.transpose(patches, (2, 4, 0, 1, 3, 5)).reshape(4, b * hp * wp, k)
    return patches


def _pad_last(x, mult):
    k = x.shape[-1]
    kp = ((k + mult - 1) // mult) * mult
    if kp == k:
        return x
    widths = [(0, 0)] * (x.ndim - 1) + [(0, kp - k)]
    return jnp.pad(x, widths)


def _conv_weight_matrix(w_oihw, kp, dtype):
    co, ci, kh, kw = w_oihw.shape
    wm = jnp.transpose(w_oihw, (2, 3, 1, 0)).reshape(kh * kw * ci, co)
    wm = jnp.pad(wm, ((0, kp - kh * kw * ci), (0, 0)))
    return wm.astype(dtype)


@functools.partial(jax.jit, static_argnames=("compute_dtype",))
def convnet_forward(x_nchw, params, compute_dtype=jnp.bfloat16):
    """x_nchw: (B, 3, 32, 32) float32.  Returns (B, 10) float32 logits."""
    w1, g1, b1, w2, g2, b2, fcw, fcb = params
    bsz = x_nchw.shape[0]
    assert x_nchw.shape[1:] == (3, 32, 32), x_nchw.shape

    x = jnp.transpose(x_nchw, (0, 2, 3, 1)).astype(compute_dtype)     # NHWC

    # ---- stage 1: conv1(3->32, k5, s1, p2) + bn1 + maxpool2 + relu ----
    p1 = _pad_last(_im2col_pool_grouped(x, 5, 1, 2), 128)   # (4, B*256, 128)
    wm1 = _conv_weight_matrix(w1, 128, compute_dtype)       # (128, 32)
    y1 = _stage1_call(p1, wm1, g1, b1, out_dtype=compute_dtype)
    y1 = y1.reshape(bsz, 16, 16, 32)                        # pooled NHWC

    # ---- stage 2: conv2(32->32, k5, s2, p2) + bn2 + maxpool2 + relu + fc1 ----
    p2 = _pad_last(_im2col_pool_grouped(y1, 5, 2, 2), 128)  # (4, B*16, 896)
    wm2 = _conv_weight_matrix(w2, 896, compute_dtype)       # (896, 32)
    # fc1 weight: PyTorch flattens NCHW (c, hp, wp); the kernel's rows are
    # NHWC (hp, wp, c).  Permute once host-side and pad N: 10 -> 128 so the
    # MXU N-dim / final store are lane-dense.  FC math stays f32.
    nclass = fcw.shape[0]
    wfc = jnp.transpose(fcw.reshape(nclass, 32, 16), (2, 1, 0))       # (16,32,10)
    wfc = jnp.pad(wfc, ((0, 0), (0, 0), (0, 128 - nclass))).astype(jnp.float32)
    fcb_p = jnp.pad(fcb, (0, 128 - nclass)).reshape(1, 128).astype(jnp.float32)
    logits = _stage2_call(p2, wm2, g2, b2, wfc, fcb_p)                # (B, 128)
    return logits[:, :nclass]


# --------------------------------------------------------------------------
# Pure-JAX reference (mirrors PyTorch semantics) for verification
# --------------------------------------------------------------------------
def reference_forward(x_nchw, params):
    w1, g1, b1, w2, g2, b2, fcw, fcb = params

    def conv(x, w, stride):
        return lax.conv_general_dilated(
            x, w, window_strides=(stride, stride), padding=((2, 2), (2, 2)),
            dimension_numbers=("NCHW", "OIHW", "NCHW"))

    def bn_train(x, g, b):
        mean = x.mean(axis=(0, 2, 3), keepdims=True)
        var = x.var(axis=(0, 2, 3), keepdims=True)          # biased
        return (x - mean) / jnp.sqrt(var + BN_EPS) * g.reshape(1, -1, 1, 1) \
               + b.reshape(1, -1, 1, 1)

    def maxpool2(x):
        return lax.reduce_window(x, -jnp.inf, lax.max,
                                 (1, 1, 2, 2), (1, 1, 2, 2), "VALID")

    y = jnp.maximum(maxpool2(bn_train(conv(x_nchw, w1, 1), g1, b1)), 0.0)
    y = jnp.maximum(maxpool2(bn_train(conv(y, w2, 2), g2, b2)), 0.0)
    flat = y.reshape(y.shape[0], -1)
    return flat @ fcw.T + fcb


# --------------------------------------------------------------------------
if __name__ == "__main__":
    key = jax.random.PRNGKey(0)
    kx, k1, k2, k3, k4, k5, k6, k7, k8 = jax.random.split(key, 9)

    # Deterministic synthetic parameters (PyTorch layouts).
    w1 = jax.random.normal(k1, (32, 3, 5, 5), jnp.float32) * 0.10   # conv1.weight
    g1 = 1.0 + 0.1 * jax.random.normal(k2, (32,), jnp.float32)      # bn1.weight
    b1 = 0.1 * jax.random.normal(k3, (32,), jnp.float32)            # bn1.bias
    w2 = jax.random.normal(k4, (32, 32, 5, 5), jnp.float32) * 0.05  # conv2.weight
    g2 = 1.0 + 0.1 * jax.random.normal(k5, (32,), jnp.float32)      # bn2.weight
    b2 = 0.1 * jax.random.normal(k6, (32,), jnp.float32)            # bn2.bias
    fcw = jax.random.normal(k7, (10, 512), jnp.float32) * 0.05      # fc1.weight
    fcb = 0.1 * jax.random.normal(k8, (10,), jnp.float32)           # fc1.bias
    params = (w1, g1, b1, w2, g2, b2, fcw, fcb)

    # Run 1: batch 2, f32 conv operands -> strict check vs. the XLA reference.
    x2 = jax.random.normal(kx, (2, 3, 32, 32), jnp.float32)
    out2 = jax.block_until_ready(
        convnet_forward(x2, params, compute_dtype=jnp.float32))
    ref2 = jax.block_until_ready(reference_forward(x2, params))
    assert out2.shape == (2, 10), out2.shape
    np.testing.assert_allclose(np.asarray(out2), np.asarray(ref2),
                               rtol=1e-3, atol=1e-3)

    # Run 2: batch 8 (multi-block P grid in stage 1), bf16 conv operands with
    # f32 accumulation / f32 BN statistics -> looser tolerance vs f32 reference.
    x8 = jax.random.normal(kx, (8, 3, 32, 32), jnp.float32)
    out8 = jax.block_until_ready(
        convnet_forward(x8, params, compute_dtype=jnp.bfloat16))
    ref8 = jax.block_until_ready(reference_forward(x8, params))
    assert out8.shape == (8, 10), out8.shape
    np.testing.assert_allclose(np.asarray(out8), np.asarray(ref8),
                               rtol=5e-2, atol=5e-2)

    print("KERNEL_OK")
</pallas_src>

<mosaic_0001>
module attributes {stable_mosaic.version = 11 : i64} {
  func.func @_stage1_kernel(%arg0: i32, %arg1: i32, %arg2: memref<4x512x128xf32, #tpu.memory_space<vmem>>, %arg3: memref<128x32xf32, #tpu.memory_space<vmem>>, %arg4: memref<1x32xf32, #tpu.memory_space<vmem>>, %arg5: memref<1x32xf32, #tpu.memory_space<vmem>>, %arg6: memref<512x32xf32, #tpu.memory_space<vmem>>, %arg7: memref<1x32xf32, #tpu.memory_space<vmem>>, %arg8: memref<1x32xf32, #tpu.memory_space<vmem>>, %arg9: memref<1x32xf32, #tpu.memory_space<vmem>>, %arg10: memref<1x32xf32, #tpu.memory_space<vmem>>) attributes {dimension_semantics = [#tpu.dimension_semantics<arbitrary>, #tpu.dimension_semantics<arbitrary>], iteration_bounds = array<i64: 2, 1>, scalar_prefetch = 0 : i64, scratch_operands = 4 : i64, tpu.core_type = #tpu.core_type<tc>, window_params = [{transform_indices = @transform_0, window_bounds = array<i64: 4, 512, 128>}, {pipeline_mode = #tpu.pipeline_mode<synchronous>, transform_indices = @transform_1, window_bounds = array<i64: 128, 32>}, {pipeline_mode = #tpu.pipeline_mode<synchronous>, transform_indices = @transform_2, window_bounds = array<i64: 1, 32>}, {pipeline_mode = #tpu.pipeline_mode<synchronous>, transform_indices = @transform_3, window_bounds = array<i64: 1, 32>}, {transform_indices = @transform_4, window_bounds = array<i64: 512, 32>}]} {
    %c0_i32 = arith.constant 0 : i32
    %0 = arith.cmpi eq, %arg0, %c0_i32 : i32
    %1 = arith.extui %0 : i1 to i32
    %c0_i32_0 = arith.constant 0 : i32
    %2 = arith.cmpi ne, %1, %c0_i32_0 : i32
    scf.if %2 {
      %c0 = arith.constant 0 : index
      %c0_2 = arith.constant 0 : index
      %c0_3 = arith.constant 0 : index
      %6 = vector.load %arg2[%c0, %c0_2, %c0_3] : memref<4x512x128xf32, #tpu.memory_space<vmem>>, vector<4x512x128xf32>
      %7 = vector.shape_cast %6 : vector<4x512x128xf32> to vector<2048x128xf32>
      %c0_4 = arith.constant 0 : index
      %c0_5 = arith.constant 0 : index
      %8 = vector.load %arg3[%c0_4, %c0_5] : memref<128x32xf32, #tpu.memory_space<vmem>>, vector<128x32xf32>
      %cst = arith.constant dense<0.000000e+00> : vector<2048x32xf32>
      %9 = tpu.matmul %7, %8, %cst {dimension_numbers = #tpu.dot_dimension_numbers<[1], [0], [0], [1], [0, 0, 1, 1], [], []>} : vector<2048x128xf32>, vector<128x32xf32>, vector<2048x32xf32> -> vector<2048x32xf32>
      %c0_i32_6 = arith.constant 0 : i32
      %10 = arith.cmpi eq, %arg1, %c0_i32_6 : i32
      %11 = arith.extui %10 : i1 to i32
      %c0_i32_7 = arith.constant 0 : i32
      %12 = arith.cmpi ne, %11, %c0_i32_7 : i32
      scf.if %12 {
        %cst_20 = arith.constant 0.000000e+00 : f32
        %27 = vector.broadcast %cst_20 : f32 to vector<1x32xf32>
        %c0_21 = arith.constant 0 : index
        %c0_22 = arith.constant 0 : index
        %28 = vector.load %arg7[%c0_21, %c0_22] : memref<1x32xf32, #tpu.memory_space<vmem>>, vector<1x32xf32>
        tpu.vector_store %arg7[%c0_21, %c0_22], %27 {strides = array<i32>} : memref<1x32xf32, #tpu.memory_space<vmem>>, vector<1x32xf32>,
        %cst_23 = arith.constant 0.000000e+00 : f32
        %29 = vector.broadcast %cst_23 : f32 to vector<1x32xf32>
        %c0_24 = arith.constant 0 : index
        %c0_25 = arith.constant 0 : index
        %30 = vector.load %arg8[%c0_24, %c0_25] : memref<1x32xf32, #tpu.memory_space<vmem>>, vector<1x32xf32>
        tpu.vector_store %arg8[%c0_24, %c0_25], %29 {strides = array<i32>} : memref<1x32xf32, #tpu.memory_space<vmem>>, vector<1x32xf32>,
      } else {
      }
      %c0_8 = arith.constant 0 : index
      %c0_9 = arith.constant 0 : index
      %13 = vector.load %arg7[%c0_8, %c0_9] : memref<1x32xf32, #tpu.memory_space<vmem>>, vector<1x32xf32>
      %cst_10 = arith.constant dense<0.000000e+00> : vector<32xf32>
      %14 = vector.multi_reduction <add>, %9, %cst_10 [0] : vector<2048x32xf32> to vector<32xf32>
      %15 = vector.shape_cast %14 : vector<32xf32> to vector<1x32xf32>
      %16 = arith.addf %13, %15 : vector<1x32xf32>
      %c0_11 = arith.constant 0 : index
      %c0_12 = arith.constant 0 : index
      %17 = vector.load %arg7[%c0_11, %c0_12] : memref<1x32xf32, #tpu.memory_space<vmem>>, vector<1x32xf32>
      tpu.vector_store %arg7[%c0_11, %c0_12], %16 {strides = array<i32>} : memref<1x32xf32, #tpu.memory_space<vmem>>, vector<1x32xf32>,
      %c0_13 = arith.constant 0 : index
      %c0_14 = arith.constant 0 : index
      %18 = vector.load %arg8[%c0_13, %c0_14] : memref<1x32xf32, #tpu.memory_space<vmem>>, vector<1x32xf32>
      %19 = arith.mulf %9, %9 : vector<2048x32xf32>
      %cst_15 = arith.constant dense<0.000000e+00> : vector<32xf32>
      %20 = vector.multi_reduction <add>, %19, %cst_15 [0] : vector<2048x32xf32> to vector<32xf32>
      %21 = vector.shape_cast %20 : vector<32xf32> to vector<1x32xf32>
      %22 = arith.addf %18, %21 : vector<1x32xf32>
      %c0_16 = arith.constant 0 : index
      %c0_17 = arith.constant 0 : index
      %23 = vector.load %arg8[%c0_16, %c0_17] : memref<1x32xf32, #tpu.memory_space<vmem>>, vector<1x32xf32>
      tpu.vector_store %arg8[%c0_16, %c0_17], %22 {strides = array<i32>} : memref<1x32xf32, #tpu.memory_space<vmem>>, vector<1x32xf32>,
      %c0_i32_18 = arith.constant 0 : i32
      %24 = arith.cmpi eq, %arg1, %c0_i32_18 : i32
      %25 = arith.extui %24 : i1 to i32
      %c0_i32_19 = arith.constant 0 : i32
      %26 = arith.cmpi ne, %25, %c0_i32_19 : i32
      scf.if %26 {
        %c0_20 = arith.constant 0 : index
        %c0_21 = arith.constant 0 : index
        %27 = vector.load %arg7[%c0_20, %c0_21] : memref<1x32xf32, #tpu.memory_space<vmem>>, vector<1x32xf32>
        %cst_22 = arith.constant 2.048000e+03 : f32
        %28 = vector.broadcast %cst_22 : f32 to vector<1x32xf32>
        %29 = arith.divf %27, %28 : vector<1x32xf32>
        %c0_23 = arith.constant 0 : index
        %c0_24 = arith.constant 0 : index
        %30 = vector.load %arg8[%c0_23, %c0_24] : memref<1x32xf32, #tpu.memory_space<vmem>>, vector<1x32xf32>
        %cst_25 = arith.constant 2.048000e+03 : f32
        %31 = vector.broadcast %cst_25 : f32 to vector<1x32xf32>
        %32 = arith.divf %30, %31 : vector<1x32xf32>
        %33 = arith.mulf %29, %29 : vector<1x32xf32>
        %34 = arith.subf %32, %33 : vector<1x32xf32>
        %c0_26 = arith.constant 0 : index
        %c0_27 = arith.constant 0 : index
        %35 = vector.load %arg4[%c0_26, %c0_27] : memref<1x32xf32, #tpu.memory_space<vmem>>, vector<1x32xf32>
        %cst_28 = arith.constant 9.99999974E-6 : f32
        %36 = vector.broadcast %cst_28 : f32 to vector<1x32xf32>
        %37 = arith.addf %34, %36 : vector<1x32xf32>
        %38 = math.rsqrt %37 : vector<1x32xf32>
        %39 = arith.mulf %35, %38 : vector<1x32xf32>
        %c0_29 = arith.constant 0 : index
        %c0_30 = arith.constant 0 : index
        %40 = vector.load %arg9[%c0_29, %c0_30] : memref<1x32xf32, #tpu.memory_space<vmem>>, vector<1x32xf32>
        tpu.vector_store %arg9[%c0_29, %c0_30], %39 {strides = array<i32>} : memref<1x32xf32, #tpu.memory_space<vmem>>, vector<1x32xf32>,
        %c0_31 = arith.constant 0 : index
        %c0_32 = arith.constant 0 : index
        %41 = vector.load %arg5[%c0_31, %c0_32] : memref<1x32xf32, #tpu.memory_space<vmem>>, vector<1x32xf32>
        %42 = arith.mulf %29, %39 : vector<1x32xf32>
        %43 = arith.subf %41, %42 : vector<1x32xf32>
        %c0_33 = arith.constant 0 : index
        %c0_34 = arith.constant 0 : index
        %44 = vector.load %arg10[%c0_33, %c0_34] : memref<1x32xf32, #tpu.memory_space<vmem>>, vector<1x32xf32>
        tpu.vector_store %arg10[%c0_33, %c0_34], %43 {strides = array<i32>} : memref<1x32xf32, #tpu.memory_space<vmem>>, vector<1x32xf32>,
      } else {
      }
    } else {
    }
    %c1_i32 = arith.constant 1 : i32
    %3 = arith.cmpi eq, %arg0, %c1_i32 : i32
    %4 = arith.extui %3 : i1 to i32
    %c0_i32_1 = arith.constant 0 : i32
    %5 = arith.cmpi ne, %4, %c0_i32_1 : i32
    scf.if %5 {
      %c0 = arith.constant 0 : index
      %c0_2 = arith.constant 0 : index
      %c0_3 = arith.constant 0 : index
      %6 = vector.load %arg2[%c0, %c0_2, %c0_3] : memref<4x512x128xf32, #tpu.memory_space<vmem>>, vector<4x512x128xf32>
      %7 = vector.shape_cast %6 : vector<4x512x128xf32> to vector<2048x128xf32>
      %c0_4 = arith.constant 0 : index
      %c0_5 = arith.constant 0 : index
      %8 = vector.load %arg3[%c0_4, %c0_5] : memref<128x32xf32, #tpu.memory_space<vmem>>, vector<128x32xf32>
      %cst = arith.constant dense<0.000000e+00> : vector<2048x32xf32>
      %9 = tpu.matmul %7, %8, %cst {dimension_numbers = #tpu.dot_dimension_numbers<[1], [0], [0], [1], [0, 0, 1, 1], [], []>} : vector<2048x128xf32>, vector<128x32xf32>, vector<2048x32xf32> -> vector<2048x32xf32>
      %c0_6 = arith.constant 0 : index
      %c0_7 = arith.constant 0 : index
      %10 = vector.load %arg9[%c0_6, %c0_7] : memref<1x32xf32, #tpu.memory_space<vmem>>, vector<1x32xf32>
      %11 = vector.broadcast %10 : vector<1x32xf32> to vector<2048x32xf32>
      %12 = arith.mulf %9, %11 : vector<2048x32xf32>
      %c0_8 = arith.constant 0 : index
      %c0_9 = arith.constant 0 : index
      %13 = vector.load %arg10[%c0_8, %c0_9] : memref<1x32xf32, #tpu.memory_space<vmem>>, vector<1x32xf32>
      %14 = vector.broadcast %13 : vector<1x32xf32> to vector<2048x32xf32>
      %15 = arith.addf %12, %14 : vector<2048x32xf32>
      %16 = vector.shape_cast %15 : vector<2048x32xf32> to vector<4x512x32xf32>
      %17 = vector.extract_strided_slice %16 {offsets = [0, 0, 0], sizes = [1, 512, 32], strides = [1, 1, 1]} : vector<4x512x32xf32> to vector<1x512x32xf32>
      %18 = vector.shape_cast %17 : vector<1x512x32xf32> to vector<512x32xf32>
      %19 = vector.extract_strided_slice %16 {offsets = [1, 0, 0], sizes = [1, 512, 32], strides = [1, 1, 1]} : vector<4x512x32xf32> to vector<1x512x32xf32>
      %20 = vector.shape_cast %19 : vector<1x512x32xf32> to vector<512x32xf32>
      %21 = arith.maximumf %18, %20 : vector<512x32xf32>
      %22 = vector.extract_strided_slice %16 {offsets = [2, 0, 0], sizes = [1, 512, 32], strides = [1, 1, 1]} : vector<4x512x32xf32> to vector<1x512x32xf32>
      %23 = vector.shape_cast %22 : vector<1x512x32xf32> to vector<512x32xf32>
      %24 = vector.extract_strided_slice %16 {offsets = [3, 0, 0], sizes = [1, 512, 32], strides = [1, 1, 1]} : vector<4x512x32xf32> to vector<1x512x32xf32>
      %25 = vector.shape_cast %24 : vector<1x512x32xf32> to vector<512x32xf32>
      %26 = arith.maximumf %23, %25 : vector<512x32xf32>
      %27 = arith.maximumf %21, %26 : vector<512x32xf32>
      %cst_10 = arith.constant 0.000000e+00 : f32
      %28 = vector.broadcast %cst_10 : f32 to vector<512x32xf32>
      %29 = arith.maximumf %27, %28 : vector<512x32xf32>
      %c0_11 = arith.constant 0 : index
      %c0_12 = arith.constant 0 : index
      %30 = vector.load %arg6[%c0_11, %c0_12] : memref<512x32xf32, #tpu.memory_space<vmem>>, vector<512x32xf32>
      tpu.vector_store %arg6[%c0_11, %c0_12], %29 {strides = array<i32>} : memref<512x32xf32, #tpu.memory_space<vmem>>, vector<512x32xf32>,
    } else {
    }
    return
  }
  func.func @transform_0(%arg0: i32, %arg1: i32) -> (i32, i32, i32) {
    %c0_i32 = arith.constant 0 : i32
    %c0_i32_0 = arith.constant 0 : i32
    %c0_i32_1 = arith.constant 0 : i32
    return %c0_i32, %arg1, %c0_i32_0 : i32, i32, i32
  }
  func.func @transform_1(%arg0: i32, %arg1: i32) -> (i32, i32) {
    %c0_i32 = arith.constant 0 : i32
    %c0_i32_0 = arith.constant 0 : i32
    %c0_i32_1 = arith.constant 0 : i32
    return %c0_i32, %c0_i32_0 : i32, i32
  }
  func.func @transform_2(%arg0: i32, %arg1: i32) -> (i32, i32) {
    %c0_i32 = arith.constant 0 : i32
    %c0_i32_0 = arith.constant 0 : i32
    %c0_i32_1 = arith.constant 0 : i32
    return %c0_i32, %c0_i32_0 : i32, i32
  }
  func.func @transform_3(%arg0: i32, %arg1: i32) -> (i32, i32) {
    %c0_i32 = arith.constant 0 : i32
    %c0_i32_0 = arith.constant 0 : i32
    %c0_i32_1 = arith.constant 0 : i32
    return %c0_i32, %c0_i32_0 : i32, i32
  }
  func.func @transform_4(%arg0: i32, %arg1: i32) -> (i32, i32) {
    %0 = arith.muli %arg0, %arg1 : i32
    %c0_i32 = arith.constant 0 : i32
    %c0_i32_0 = arith.constant 0 : i32
    return %0, %c0_i32 : i32, i32
  }
}

module attributes {stable_mosaic.version = 11 : i64} {
  func.func @_stage2_kernel(%arg0: i32, %arg1: i32, %arg2: memref<4x32x896xf32, #tpu.memory_space<vmem>>, %arg3: memref<896x32xf32, #tpu.memory_space<vmem>>, %arg4: memref<1x32xf32, #tpu.memory_space<vmem>>, %arg5: memref<1x32xf32, #tpu.memory_space<vmem>>, %arg6: memref<16x32x128xf32, #tpu.memory_space<vmem>>, %arg7: memref<1x128xf32, #tpu.memory_space<vmem>>, %arg8: memref<2x128xf32, #tpu.memory_space<vmem>>, %arg9: memref<1x32xf32, #tpu.memory_space<vmem>>, %arg10: memref<1x32xf32, #tpu.memory_space<vmem>>, %arg11: memref<1x32xf32, #tpu.memory_space<vmem>>, %arg12: memref<1x32xf32, #tpu.memory_space<vmem>>) attributes {dimension_semantics = [#tpu.dimension_semantics<arbitrary>, #tpu.dimension_semantics<arbitrary>], iteration_bounds = array<i64: 2, 1>, scalar_prefetch = 0 : i64, scratch_operands = 4 : i64, tpu.core_type = #tpu.core_type<tc>, window_params = [{transform_indices = @transform_0, window_bounds = array<i64: 4, 32, 896>}, {pipeline_mode = #tpu.pipeline_mode<synchronous>, transform_indices = @transform_1, window_bounds = array<i64: 896, 32>}, {pipeline_mode = #tpu.pipeline_mode<synchronous>, transform_indices = @transform_2, window_bounds = array<i64: 1, 32>}, {pipeline_mode = #tpu.pipeline_mode<synchronous>, transform_indices = @transform_3, window_bounds = array<i64: 1, 32>}, {pipeline_mode = #tpu.pipeline_mode<synchronous>, transform_indices = @transform_4, window_bounds = array<i64: 16, 32, 128>}, {pipeline_mode = #tpu.pipeline_mode<synchronous>, transform_indices = @transform_5, window_bounds = array<i64: 1, 128>}, {transform_indices = @transform_6, window_bounds = array<i64: 2, 128>}]} {
    %c0_i32 = arith.constant 0 : i32
    %0 = arith.cmpi eq, %arg0, %c0_i32 : i32
    %1 = arith.extui %0 : i1 to i32
    %c0_i32_0 = arith.constant 0 : i32
    %2 = arith.cmpi ne, %1, %c0_i32_0 : i32
    scf.if %2 {
      %c0 = arith.constant 0 : index
      %c0_2 = arith.constant 0 : index
      %c0_3 = arith.constant 0 : index
      %6 = vector.load %arg2[%c0, %c0_2, %c0_3] : memref<4x32x896xf32, #tpu.memory_space<vmem>>, vector<4x32x896xf32>
      %7 = vector.shape_cast %6 : vector<4x32x896xf32> to vector<128x896xf32>
      %c0_4 = arith.constant 0 : index
      %c0_5 = arith.constant 0 : index
      %8 = vector.load %arg3[%c0_4, %c0_5] : memref<896x32xf32, #tpu.memory_space<vmem>>, vector<896x32xf32>
      %cst = arith.constant dense<0.000000e+00> : vector<128x32xf32>
      %9 = tpu.matmul %7, %8, %cst {dimension_numbers = #tpu.dot_dimension_numbers<[1], [0], [0], [1], [0, 0, 1, 1], [], []>} : vector<128x896xf32>, vector<896x32xf32>, vector<128x32xf32> -> vector<128x32xf32>
      %c0_i32_6 = arith.constant 0 : i32
      %10 = arith.cmpi eq, %arg1, %c0_i32_6 : i32
      %11 = arith.extui %10 : i1 to i32
      %c0_i32_7 = arith.constant 0 : i32
      %12 = arith.cmpi ne, %11, %c0_i32_7 : i32
      scf.if %12 {
        %cst_20 = arith.constant 0.000000e+00 : f32
        %27 = vector.broadcast %cst_20 : f32 to vector<1x32xf32>
        %c0_21 = arith.constant 0 : index
        %c0_22 = arith.constant 0 : index
        %28 = vector.load %arg9[%c0_21, %c0_22] : memref<1x32xf32, #tpu.memory_space<vmem>>, vector<1x32xf32>
        tpu.vector_store %arg9[%c0_21, %c0_22], %27 {strides = array<i32>} : memref<1x32xf32, #tpu.memory_space<vmem>>, vector<1x32xf32>,
        %cst_23 = arith.constant 0.000000e+00 : f32
        %29 = vector.broadcast %cst_23 : f32 to vector<1x32xf32>
        %c0_24 = arith.constant 0 : index
        %c0_25 = arith.constant 0 : index
        %30 = vector.load %arg10[%c0_24, %c0_25] : memref<1x32xf32, #tpu.memory_space<vmem>>, vector<1x32xf32>
        tpu.vector_store %arg10[%c0_24, %c0_25], %29 {strides = array<i32>} : memref<1x32xf32, #tpu.memory_space<vmem>>, vector<1x32xf32>,
      } else {
      }
      %c0_8 = arith.constant 0 : index
      %c0_9 = arith.constant 0 : index
      %13 = vector.load %arg9[%c0_8, %c0_9] : memref<1x32xf32, #tpu.memory_space<vmem>>, vector<1x32xf32>
      %cst_10 = arith.constant dense<0.000000e+00> : vector<32xf32>
      %14 = vector.multi_reduction <add>, %9, %cst_10 [0] : vector<128x32xf32> to vector<32xf32>
      %15 = vector.shape_cast %14 : vector<32xf32> to vector<1x32xf32>
      %16 = arith.addf %13, %15 : vector<1x32xf32>
      %c0_11 = arith.constant 0 : index
      %c0_12 = arith.constant 0 : index
      %17 = vector.load %arg9[%c0_11, %c0_12] : memref<1x32xf32, #tpu.memory_space<vmem>>, vector<1x32xf32>
      tpu.vector_store %arg9[%c0_11, %c0_12], %16 {strides = array<i32>} : memref<1x32xf32, #tpu.memory_space<vmem>>, vector<1x32xf32>,
      %c0_13 = arith.constant 0 : index
      %c0_14 = arith.constant 0 : index
      %18 = vector.load %arg10[%c0_13, %c0_14] : memref<1x32xf32, #tpu.memory_space<vmem>>, vector<1x32xf32>
      %19 = arith.mulf %9, %9 : vector<128x32xf32>
      %cst_15 = arith.constant dense<0.000000e+00> : vector<32xf32>
      %20 = vector.multi_reduction <add>, %19, %cst_15 [0] : vector<128x32xf32> to vector<32xf32>
      %21 = vector.shape_cast %20 : vector<32xf32> to vector<1x32xf32>
      %22 = arith.addf %18, %21 : vector<1x32xf32>
      %c0_16 = arith.constant 0 : index
      %c0_17 = arith.constant 0 : index
      %23 = vector.load %arg10[%c0_16, %c0_17] : memref<1x32xf32, #tpu.memory_space<vmem>>, vector<1x32xf32>
      tpu.vector_store %arg10[%c0_16, %c0_17], %22 {strides = array<i32>} : memref<1x32xf32, #tpu.memory_space<vmem>>, vector<1x32xf32>,
      %c0_i32_18 = arith.constant 0 : i32
      %24 = arith.cmpi eq, %arg1, %c0_i32_18 : i32
      %25 = arith.extui %24 : i1 to i32
      %c0_i32_19 = arith.constant 0 : i32
      %26 = arith.cmpi ne, %25, %c0_i32_19 : i32
      scf.if %26 {
        %c0_20 = arith.constant 0 : index
        %c0_21 = arith.constant 0 : index
        %27 = vector.load %arg9[%c0_20, %c0_21] : memref<1x32xf32, #tpu.memory_space<vmem>>, vector<1x32xf32>
        %cst_22 = arith.constant 1.280000e+02 : f32
        %28 = vector.broadcast %cst_22 : f32 to vector<1x32xf32>
        %29 = arith.divf %27, %28 : vector<1x32xf32>
        %c0_23 = arith.constant 0 : index
        %c0_24 = arith.constant 0 : index
        %30 = vector.load %arg10[%c0_23, %c0_24] : memref<1x32xf32, #tpu.memory_space<vmem>>, vector<1x32xf32>
        %cst_25 = arith.constant 1.280000e+02 : f32
        %31 = vector.broadcast %cst_25 : f32 to vector<1x32xf32>
        %32 = arith.divf %30, %31 : vector<1x32xf32>
        %33 = arith.mulf %29, %29 : vector<1x32xf32>
        %34 = arith.subf %32, %33 : vector<1x32xf32>
        %c0_26 = arith.constant 0 : index
        %c0_27 = arith.constant 0 : index
        %35 = vector.load %arg4[%c0_26, %c0_27] : memref<1x32xf32, #tpu.memory_space<vmem>>, vector<1x32xf32>
        %cst_28 = arith.constant 9.99999974E-6 : f32
        %36 = vector.broadcast %cst_28 : f32 to vector<1x32xf32>
        %37 = arith.addf %34, %36 : vector<1x32xf32>
        %38 = math.rsqrt %37 : vector<1x32xf32>
        %39 = arith.mulf %35, %38 : vector<1x32xf32>
        %c0_29 = arith.constant 0 : index
        %c0_30 = arith.constant 0 : index
        %40 = vector.load %arg11[%c0_29, %c0_30] : memref<1x32xf32, #tpu.memory_space<vmem>>, vector<1x32xf32>
        tpu.vector_store %arg11[%c0_29, %c0_30], %39 {strides = array<i32>} : memref<1x32xf32, #tpu.memory_space<vmem>>, vector<1x32xf32>,
        %c0_31 = arith.constant 0 : index
        %c0_32 = arith.constant 0 : index
        %41 = vector.load %arg5[%c0_31, %c0_32] : memref<1x32xf32, #tpu.memory_space<vmem>>, vector<1x32xf32>
        %42 = arith.mulf %29, %39 : vector<1x32xf32>
        %43 = arith.subf %41, %42 : vector<1x32xf32>
        %c0_33 = arith.constant 0 : index
        %c0_34 = arith.constant 0 : index
        %44 = vector.load %arg12[%c0_33, %c0_34] : memref<1x32xf32, #tpu.memory_space<vmem>>, vector<1x32xf32>
        tpu.vector_store %arg12[%c0_33, %c0_34], %43 {strides = array<i32>} : memref<1x32xf32, #tpu.memory_space<vmem>>, vector<1x32xf32>,
      } else {
      }
    } else {
    }
    %c1_i32 = arith.constant 1 : i32
    %3 = arith.cmpi eq, %arg0, %c1_i32 : i32
    %4 = arith.extui %3 : i1 to i32
    %c0_i32_1 = arith.constant 0 : i32
    %5 = arith.cmpi ne, %4, %c0_i32_1 : i32
    scf.if %5 {
      %c0 = arith.constant 0 : index
      %c0_2 = arith.constant 0 : index
      %c0_3 = arith.constant 0 : index
      %6 = vector.load %arg2[%c0, %c0_2, %c0_3] : memref<4x32x896xf32, #tpu.memory_space<vmem>>, vector<4x32x896xf32>
      %7 = vector.shape_cast %6 : vector<4x32x896xf32> to vector<128x896xf32>
      %c0_4 = arith.constant 0 : index
      %c0_5 = arith.constant 0 : index
      %8 = vector.load %arg3[%c0_4, %c0_5] : memref<896x32xf32, #tpu.memory_space<vmem>>, vector<896x32xf32>
      %cst = arith.constant dense<0.000000e+00> : vector<128x32xf32>
      %9 = tpu.matmul %7, %8, %cst {dimension_numbers = #tpu.dot_dimension_numbers<[1], [0], [0], [1], [0, 0, 1, 1], [], []>} : vector<128x896xf32>, vector<896x32xf32>, vector<128x32xf32> -> vector<128x32xf32>
      %c0_6 = arith.constant 0 : index
      %c0_7 = arith.constant 0 : index
      %10 = vector.load %arg11[%c0_6, %c0_7] : memref<1x32xf32, #tpu.memory_space<vmem>>, vector<1x32xf32>
      %11 = vector.broadcast %10 : vector<1x32xf32> to vector<128x32xf32>
      %12 = arith.mulf %9, %11 : vector<128x32xf32>
      %c0_8 = arith.constant 0 : index
      %c0_9 = arith.constant 0 : index
      %13 = vector.load %arg12[%c0_8, %c0_9] : memref<1x32xf32, #tpu.memory_space<vmem>>, vector<1x32xf32>
      %14 = vector.broadcast %13 : vector<1x32xf32> to vector<128x32xf32>
      %15 = arith.addf %12, %14 : vector<128x32xf32>
      %16 = vector.shape_cast %15 : vector<128x32xf32> to vector<4x32x32xf32>
      %17 = vector.extract_strided_slice %16 {offsets = [0, 0, 0], sizes = [1, 32, 32], strides = [1, 1, 1]} : vector<4x32x32xf32> to vector<1x32x32xf32>
      %18 = vector.shape_cast %17 : vector<1x32x32xf32> to vector<32x32xf32>
      %19 = vector.extract_strided_slice %16 {offsets = [1, 0, 0], sizes = [1, 32, 32], strides = [1, 1, 1]} : vector<4x32x32xf32> to vector<1x32x32xf32>
      %20 = vector.shape_cast %19 : vector<1x32x32xf32> to vector<32x32xf32>
      %21 = arith.maximumf %18, %20 : vector<32x32xf32>
      %22 = vector.extract_strided_slice %16 {offsets = [2, 0, 0], sizes = [1, 32, 32], strides = [1, 1, 1]} : vector<4x32x32xf32> to vector<1x32x32xf32>
      %23 = vector.shape_cast %22 : vector<1x32x32xf32> to vector<32x32xf32>
      %24 = vector.extract_strided_slice %16 {offsets = [3, 0, 0], sizes = [1, 32, 32], strides = [1, 1, 1]} : vector<4x32x32xf32> to vector<1x32x32xf32>
      %25 = vector.shape_cast %24 : vector<1x32x32xf32> to vector<32x32xf32>
      %26 = arith.maximumf %23, %25 : vector<32x32xf32>
      %27 = arith.maximumf %21, %26 : vector<32x32xf32>
      %cst_10 = arith.constant 0.000000e+00 : f32
      %28 = vector.broadcast %cst_10 : f32 to vector<32x32xf32>
      %29 = arith.maximumf %27, %28 : vector<32x32xf32>
      %30 = vector.shape_cast %29 : vector<32x32xf32> to vector<2x16x32xf32>
      %cst_11 = arith.constant 0.000000e+00 : f32
      %31 = vector.broadcast %cst_11 : f32 to vector<2x128xf32>
      %c0_12 = arith.constant 0 : index
      %c0_13 = arith.constant 0 : index
      %32 = vector.load %arg7[%c0_12, %c0_13] : memref<1x128xf32, #tpu.memory_space<vmem>>, vector<1x128xf32>
      %33 = vector.broadcast %32 : vector<1x128xf32> to vector<2x128xf32>
      %34 = arith.addf %31, %33 : vector<2x128xf32>
      %35 = vector.extract_strided_slice %30 {offsets = [0, 0, 0], sizes = [2, 1, 32], strides = [1, 1, 1]} : vector<2x16x32xf32> to vector<2x1x32xf32>
      %36 = vector.shape_cast %35 : vector<2x1x32xf32> to vector<2x32xf32>
      %c0_14 = arith.constant 0 : index
      %c0_15 = arith.constant 0 : index
      %c0_16 = arith.constant 0 : index
      %37 = vector.load %arg6[%c0_14, %c0_15, %c0_16] : memref<16x32x128xf32, #tpu.memory_space<vmem>>, vector<1x32x128xf32>
      %38 = vector.shape_cast %37 : vector<1x32x128xf32> to vector<32x128xf32>
      %cst_17 = arith.constant dense<0.000000e+00> : vector<2x128xf32>
      %39 = tpu.matmul %36, %38, %cst_17 {dimension_numbers = #tpu.dot_dimension_numbers<[1], [0], [0], [1], [0, 0, 1, 1], [], []>} : vector<2x32xf32>, vector<32x128xf32>, vector<2x128xf32> -> vector<2x128xf32>
      %40 = arith.addf %34, %39 : vector<2x128xf32>
      %41 = vector.extract_strided_slice %30 {offsets = [0, 1, 0], sizes = [2, 1, 32], strides = [1, 1, 1]} : vector<2x16x32xf32> to vector<2x1x32xf32>
      %42 = vector.shape_cast %41 : vector<2x1x32xf32> to vector<2x32xf32>
      %c1 = arith.constant 1 : index
      %c0_18 = arith.constant 0 : index
      %c0_19 = arith.constant 0 : index
      %43 = vector.load %arg6[%c1, %c0_18, %c0_19] : memref<16x32x128xf32, #tpu.memory_space<vmem>>, vector<1x32x128xf32>
      %44 = vector.shape_cast %43 : vector<1x32x128xf32> to vector<32x128xf32>
      %cst_20 = arith.constant dense<0.000000e+00> : vector<2x128xf32>
      %45 = tpu.matmul %42, %44, %cst_20 {dimension_numbers = #tpu.dot_dimension_numbers<[1], [0], [0], [1], [0, 0, 1, 1], [], []>} : vector<2x32xf32>, vector<32x128xf32>, vector<2x128xf32> -> vector<2x128xf32>
      %46 = arith.addf %40, %45 : vector<2x128xf32>
      %47 = vector.extract_strided_slice %30 {offsets = [0, 2, 0], sizes = [2, 1, 32], strides = [1, 1, 1]} : vector<2x16x32xf32> to vector<2x1x32xf32>
      %48 = vector.shape_cast %47 : vector<2x1x32xf32> to vector<2x32xf32>
      %c2 = arith.constant 2 : index
      %c0_21 = arith.constant 0 : index
      %c0_22 = arith.constant 0 : index
      %49 = vector.load %arg6[%c2, %c0_21, %c0_22] : memref<16x32x128xf32, #tpu.memory_space<vmem>>, vector<1x32x128xf32>
      %50 = vector.shape_cast %49 : vector<1x32x128xf32> to vector<32x128xf32>
      %cst_23 = arith.constant dense<0.000000e+00> : vector<2x128xf32>
      %51 = tpu.matmul %48, %50, %cst_23 {dimension_numbers = #tpu.dot_dimension_numbers<[1], [0], [0], [1], [0, 0, 1, 1], [], []>} : vector<2x32xf32>, vector<32x128xf32>, vector<2x128xf32> -> vector<2x128xf32>
      %52 = arith.addf %46, %51 : vector<2x128xf32>
      %53 = vector.extract_strided_slice %30 {offsets = [0, 3, 0], sizes = [2, 1, 32], strides = [1, 1, 1]} : vector<2x16x32xf32> to vector<2x1x32xf32>
      %54 = vector.shape_cast %53 : vector<2x1x32xf32> to vector<2x32xf32>
      %c3 = arith.constant 3 : index
      %c0_24 = arith.constant 0 : index
      %c0_25 = arith.constant 0 : index
      %55 = vector.load %arg6[%c3, %c0_24, %c0_25] : memref<16x32x128xf32, #tpu.memory_space<vmem>>, vector<1x32x128xf32>
      %56 = vector.shape_cast %55 : vector<1x32x128xf32> to vector<32x128xf32>
      %cst_26 = arith.constant dense<0.000000e+00> : vector<2x128xf32>
      %57 = tpu.matmul %54, %56, %cst_26 {dimension_numbers = #tpu.dot_dimension_numbers<[1], [0], [0], [1], [0, 0, 1, 1], [], []>} : vector<2x32xf32>, vector<32x128xf32>, vector<2x128xf32> -> vector<2x128xf32>
      %58 = arith.addf %52, %57 : vector<2x128xf32>
      %59 = vector.extract_strided_slice %30 {offsets = [0, 4, 0], sizes = [2, 1, 32], strides = [1, 1, 1]} : vector<2x16x32xf32> to vector<2x1x32xf32>
      %60 = vector.shape_cast %59 : vector<2x1x32xf32> to vector<2x32xf32>
      %c4 = arith.constant 4 : index
      %c0_27 = arith.constant 0 : index
      %c0_28 = arith.constant 0 : index
      %61 = vector.load %arg6[%c4, %c0_27, %c0_28] : memref<16x32x128xf32, #tpu.memory_space<vmem>>, vector<1x32x128xf32>
      %62 = vector.shape_cast %61 : vector<1x32x128xf32> to vector<32x128xf32>
      %cst_29 = arith.constant dense<0.000000e+00> : vector<2x128xf32>
      %63 = tpu.matmul %60, %62, %cst_29 {dimension_numbers = #tpu.dot_dimension_numbers<[1], [0], [0], [1], [0, 0, 1, 1], [], []>} : vector<2x32xf32>, vector<32x128xf32>, vector<2x128xf32> -> vector<2x128xf32>
      %64 = arith.addf %58, %63 : vector<2x128xf32>
      %65 = vector.extract_strided_slice %30 {offsets = [0, 5, 0], sizes = [2, 1, 32], strides = [1, 1, 1]} : vector<2x16x32xf32> to vector<2x1x32xf32>
      %66 = vector.shape_cast %65 : vector<2x1x32xf32> to vector<2x32xf32>
      %c5 = arith.constant 5 : index
      %c0_30 = arith.constant 0 : index
      %c0_31 = arith.constant 0 : index
      %67 = vector.load %arg6[%c5, %c0_30, %c0_31] : memref<16x32x128xf32, #tpu.memory_space<vmem>>, vector<1x32x128xf32>
      %68 = vector.shape_cast %67 : vector<1x32x128xf32> to vector<32x128xf32>
      %cst_32 = arith.constant dense<0.000000e+00> : vector<2x128xf32>
      %69 = tpu.matmul %66, %68, %cst_32 {dimension_numbers = #tpu.dot_dimension_numbers<[1], [0], [0], [1], [0, 0, 1, 1], [], []>} : vector<2x32xf32>, vector<32x128xf32>, vector<2x128xf32> -> vector<2x128xf32>
      %70 = arith.addf %64, %69 : vector<2x128xf32>
      %71 = vector.extract_strided_slice %30 {offsets = [0, 6, 0], sizes = [2, 1, 32], strides = [1, 1, 1]} : vector<2x16x32xf32> to vector<2x1x32xf32>
      %72 = vector.shape_cast %71 : vector<2x1x32xf32> to vector<2x32xf32>
      %c6 = arith.constant 6 : index
      %c0_33 = arith.constant 0 : index
      %c0_34 = arith.constant 0 : index
      %73 = vector.load %arg6[%c6, %c0_33, %c0_34] : memref<16x32x128xf32, #tpu.memory_space<vmem>>, vector<1x32x128xf32>
      %74 = vector.shape_cast %73 : vector<1x32x128xf32> to vector<32x128xf32>
      %cst_35 = arith.constant dense<0.000000e+00> : vector<2x128xf32>
      %75 = tpu.matmul %72, %74, %cst_35 {dimension_numbers = #tpu.dot_dimension_numbers<[1], [0], [0], [1], [0, 0, 1, 1], [], []>} : vector<2x32xf32>, vector<32x128xf32>, vector<2x128xf32> -> vector<2x128xf32>
      %76 = arith.addf %70, %75 : vector<2x128xf32>
      %77 = vector.extract_strided_slice %30 {offsets = [0, 7, 0], sizes = [2, 1, 32], strides = [1, 1, 1]} : vector<2x16x32xf32> to vector<2x1x32xf32>
      %78 = vector.shape_cast %77 : vector<2x1x32xf32> to vector<2x32xf32>
      %c7 = arith.constant 7 : index
      %c0_36 = arith.constant 0 : index
      %c0_37 = arith.constant 0 : index
      %79 = vector.load %arg6[%c7, %c0_36, %c0_37] : memref<16x32x128xf32, #tpu.memory_space<vmem>>, vector<1x32x128xf32>
      %80 = vector.shape_cast %79 : vector<1x32x128xf32> to vector<32x128xf32>
      %cst_38 = arith.constant dense<0.000000e+00> : vector<2x128xf32>
      %81 = tpu.matmul %78, %80, %cst_38 {dimension_numbers = #tpu.dot_dimension_numbers<[1], [0], [0], [1], [0, 0, 1, 1], [], []>} : vector<2x32xf32>, vector<32x128xf32>, vector<2x128xf32> -> vector<2x128xf32>
      %82 = arith.addf %76, %81 : vector<2x128xf32>
      %83 = vector.extract_strided_slice %30 {offsets = [0, 8, 0], sizes = [2, 1, 32], strides = [1, 1, 1]} : vector<2x16x32xf32> to vector<2x1x32xf32>
      %84 = vector.shape_cast %83 : vector<2x1x32xf32> to vector<2x32xf32>
      %c8 = arith.constant 8 : index
      %c0_39 = arith.constant 0 : index
      %c0_40 = arith.constant 0 : index
      %85 = vector.load %arg6[%c8, %c0_39, %c0_40] : memref<16x32x128xf32, #tpu.memory_space<vmem>>, vector<1x32x128xf32>
      %86 = vector.shape_cast %85 : vector<1x32x128xf32> to vector<32x128xf32>
      %cst_41 = arith.constant dense<0.000000e+00> : vector<2x128xf32>
      %87 = tpu.matmul %84, %86, %cst_41 {dimension_numbers = #tpu.dot_dimension_numbers<[1], [0], [0], [1], [0, 0, 1, 1], [], []>} : vector<2x32xf32>, vector<32x128xf32>, vector<2x128xf32> -> vector<2x128xf32>
      %88 = arith.addf %82, %87 : vector<2x128xf32>
      %89 = vector.extract_strided_slice %30 {offsets = [0, 9, 0], sizes = [2, 1, 32], strides = [1, 1, 1]} : vector<2x16x32xf32> to vector<2x1x32xf32>
      %90 = vector.shape_cast %89 : vector<2x1x32xf32> to vector<2x32xf32>
      %c9 = arith.constant 9 : index
      %c0_42 = arith.constant 0 : index
      %c0_43 = arith.constant 0 : index
      %91 = vector.load %arg6[%c9, %c0_42, %c0_43] : memref<16x32x128xf32, #tpu.memory_space<vmem>>, vector<1x32x128xf32>
      %92 = vector.shape_cast %91 : vector<1x32x128xf32> to vector<32x128xf32>
      %cst_44 = arith.constant dense<0.000000e+00> : vector<2x128xf32>
      %93 = tpu.matmul %90, %92, %cst_44 {dimension_numbers = #tpu.dot_dimension_numbers<[1], [0], [0], [1], [0, 0, 1, 1], [], []>} : vector<2x32xf32>, vector<32x128xf32>, vector<2x128xf32> -> vector<2x128xf32>
      %94 = arith.addf %88, %93 : vector<2x128xf32>
      %95 = vector.extract_strided_slice %30 {offsets = [0, 10, 0], sizes = [2, 1, 32], strides = [1, 1, 1]} : vector<2x16x32xf32> to vector<2x1x32xf32>
      %96 = vector.shape_cast %95 : vector<2x1x32xf32> to vector<2x32xf32>
      %c10 = arith.constant 10 : index
      %c0_45 = arith.constant 0 : index
      %c0_46 = arith.constant 0 : index
      %97 = vector.load %arg6[%c10, %c0_45, %c0_46] : memref<16x32x128xf32, #tpu.memory_space<vmem>>, vector<1x32x128xf32>
      %98 = vector.shape_cast %97 : vector<1x32x128xf32> to vector<32x128xf32>
      %cst_47 = arith.constant dense<0.000000e+00> : vector<2x128xf32>
      %99 = tpu.matmul %96, %98, %cst_47 {dimension_numbers = #tpu.dot_dimension_numbers<[1], [0], [0], [1], [0, 0, 1, 1], [], []>} : vector<2x32xf32>, vector<32x128xf32>, vector<2x128xf32> -> vector<2x128xf32>
      %100 = arith.addf %94, %99 : vector<2x128xf32>
      %101 = vector.extract_strided_slice %30 {offsets = [0, 11, 0], sizes = [2, 1, 32], strides = [1, 1, 1]} : vector<2x16x32xf32> to vector<2x1x32xf32>
      %102 = vector.shape_cast %101 : vector<2x1x32xf32> to vector<2x32xf32>
      %c11 = arith.constant 11 : index
      %c0_48 = arith.constant 0 : index
      %c0_49 = arith.constant 0 : index
      %103 = vector.load %arg6[%c11, %c0_48, %c0_49] : memref<16x32x128xf32, #tpu.memory_space<vmem>>, vector<1x32x128xf32>
      %104 = vector.shape_cast %103 : vector<1x32x128xf32> to vector<32x128xf32>
      %cst_50 = arith.constant dense<0.000000e+00> : vector<2x128xf32>
      %105 = tpu.matmul %102, %104, %cst_50 {dimension_numbers = #tpu.dot_dimension_numbers<[1], [0], [0], [1], [0, 0, 1, 1], [], []>} : vector<2x32xf32>, vector<32x128xf32>, vector<2x128xf32> -> vector<2x128xf32>
      %106 = arith.addf %100, %105 : vector<2x128xf32>
      %107 = vector.extract_strided_slice %30 {offsets = [0, 12, 0], sizes = [2, 1, 32], strides = [1, 1, 1]} : vector<2x16x32xf32> to vector<2x1x32xf32>
      %108 = vector.shape_cast %107 : vector<2x1x32xf32> to vector<2x32xf32>
      %c12 = arith.constant 12 : index
      %c0_51 = arith.constant 0 : index
      %c0_52 = arith.constant 0 : index
      %109 = vector.load %arg6[%c12, %c0_51, %c0_52] : memref<16x32x128xf32, #tpu.memory_space<vmem>>, vector<1x32x128xf32>
      %110 = vector.shape_cast %109 : vector<1x32x128xf32> to vector<32x128xf32>
      %cst_53 = arith.constant dense<0.000000e+00> : vector<2x128xf32>
      %111 = tpu.matmul %108, %110, %cst_53 {dimension_numbers = #tpu.dot_dimension_numbers<[1], [0], [0], [1], [0, 0, 1, 1], [], []>} : vector<2x32xf32>, vector<32x128xf32>, vector<2x128xf32> -> vector<2x128xf32>
      %112 = arith.addf %106, %111 : vector<2x128xf32>
      %113 = vector.extract_strided_slice %30 {offsets = [0, 13, 0], sizes = [2, 1, 32], strides = [1, 1, 1]} : vector<2x16x32xf32> to vector<2x1x32xf32>
      %114 = vector.shape_cast %113 : vector<2x1x32xf32> to vector<2x32xf32>
      %c13 = arith.constant 13 : index
      %c0_54 = arith.constant 0 : index
      %c0_55 = arith.constant 0 : index
      %115 = vector.load %arg6[%c13, %c0_54, %c0_55] : memref<16x32x128xf32, #tpu.memory_space<vmem>>, vector<1x32x128xf32>
      %116 = vector.shape_cast %115 : vector<1x32x128xf32> to vector<32x128xf32>
      %cst_56 = arith.constant dense<0.000000e+00> : vector<2x128xf32>
      %117 = tpu.matmul %114, %116, %cst_56 {dimension_numbers = #tpu.dot_dimension_numbers<[1], [0], [0], [1], [0, 0, 1, 1], [], []>} : vector<2x32xf32>, vector<32x128xf32>, vector<2x128xf32> -> vector<2x128xf32>
      %118 = arith.addf %112, %117 : vector<2x128xf32>
      %119 = vector.extract_strided_slice %30 {offsets = [0, 14, 0], sizes = [2, 1, 32], strides = [1, 1, 1]} : vector<2x16x32xf32> to vector<2x1x32xf32>
      %120 = vector.shape_cast %119 : vector<2x1x32xf32> to vector<2x32xf32>
      %c14 = arith.constant 14 : index
      %c0_57 = arith.constant 0 : index
      %c0_58 = arith.constant 0 : index
      %121 = vector.load %arg6[%c14, %c0_57, %c0_58] : memref<16x32x128xf32, #tpu.memory_space<vmem>>, vector<1x32x128xf32>
      %122 = vector.shape_cast %121 : vector<1x32x128xf32> to vector<32x128xf32>
      %cst_59 = arith.constant dense<0.000000e+00> : vector<2x128xf32>
      %123 = tpu.matmul %120, %122, %cst_59 {dimension_numbers = #tpu.dot_dimension_numbers<[1], [0], [0], [1], [0, 0, 1, 1], [], []>} : vector<2x32xf32>, vector<32x128xf32>, vector<2x128xf32> -> vector<2x128xf32>
      %124 = arith.addf %118, %123 : vector<2x128xf32>
      %125 = vector.extract_strided_slice %30 {offsets = [0, 15, 0], sizes = [2, 1, 32], strides = [1, 1, 1]} : vector<2x16x32xf32> to vector<2x1x32xf32>
      %126 = vector.shape_cast %125 : vector<2x1x32xf32> to vector<2x32xf32>
      %c15 = arith.constant 15 : index
      %c0_60 = arith.constant 0 : index
      %c0_61 = arith.constant 0 : index
      %127 = vector.load %arg6[%c15, %c0_60, %c0_61] : memref<16x32x128xf32, #tpu.memory_space<vmem>>, vector<1x32x128xf32>
      %128 = vector.shape_cast %127 : vector<1x32x128xf32> to vector<32x128xf32>
      %cst_62 = arith.constant dense<0.000000e+00> : vector<2x128xf32>
      %129 = tpu.matmul %126, %128, %cst_62 {dimension_numbers = #tpu.dot_dimension_numbers<[1], [0], [0], [1], [0, 0, 1, 1], [], []>} : vector<2x32xf32>, vector<32x128xf32>, vector<2x128xf32> -> vector<2x128xf32>
      %130 = arith.addf %124, %129 : vector<2x128xf32>
      %c0_63 = arith.constant 0 : index
      %c0_64 = arith.constant 0 : index
      %131 = vector.load %arg8[%c0_63, %c0_64] : memref<2x128xf32, #tpu.memory_space<vmem>>, vector<2x128xf32>
      tpu.vector_store %arg8[%c0_63, %c0_64], %130 {strides = array<i32>} : memref<2x128xf32, #tpu.memory_space<vmem>>, vector<2x128xf32>,
    } else {
    }
    return
  }
  func.func @transform_0(%arg0: i32, %arg1: i32) -> (i32, i32, i32) {
    %c0_i32 = arith.constant 0 : i32
    %c0_i32_0 = arith.constant 0 : i32
    %c0_i32_1 = arith.constant 0 : i32
    return %c0_i32, %arg1, %c0_i32_0 : i32, i32, i32
  }
  func.func @transform_1(%arg0: i32, %arg1: i32) -> (i32, i32) {
    %c0_i32 = arith.constant 0 : i32
    %c0_i32_0 = arith.constant 0 : i32
    %c0_i32_1 = arith.constant 0 : i32
    return %c0_i32, %c0_i32_0 : i32, i32
  }
  func.func @transform_2(%arg0: i32, %arg1: i32) -> (i32, i32) {
    %c0_i32 = arith.constant 0 : i32
    %c0_i32_0 = arith.constant 0 : i32
    %c0_i32_1 = arith.constant 0 : i32
    return %c0_i32, %c0_i32_0 : i32, i32
  }
  func.func @transform_3(%arg0: i32, %arg1: i32) -> (i32, i32) {
    %c0_i32 = arith.constant 0 : i32
    %c0_i32_0 = arith.constant 0 : i32
    %c0_i32_1 = arith.constant 0 : i32
    return %c0_i32, %c0_i32_0 : i32, i32
  }
  func.func @transform_4(%arg0: i32, %arg1: i32) -> (i32, i32, i32) {
    %c0_i32 = arith.constant 0 : i32
    %c0_i32_0 = arith.constant 0 : i32
    %c0_i32_1 = arith.constant 0 : i32
    %c0_i32_2 = arith.constant 0 : i32
    return %c0_i32, %c0_i32_0, %c0_i32_1 : i32, i32, i32
  }
  func.func @transform_5(%arg0: i32, %arg1: i32) -> (i32, i32) {
    %c0_i32 = arith.constant 0 : i32
    %c0_i32_0 = arith.constant 0 : i32
    %c0_i32_1 = arith.constant 0 : i32
    return %c0_i32, %c0_i32_0 : i32, i32
  }
  func.func @transform_6(%arg0: i32, %arg1: i32) -> (i32, i32) {
    %0 = arith.muli %arg0, %arg1 : i32
    %c0_i32 = arith.constant 0 : i32
    %c0_i32_0 = arith.constant 0 : i32
    return %0, %c0_i32 : i32, i32
  }
}

</mosaic_0001>

<bundles_post_ra>
// kernel: convnet_forward.2
= control target key start
LH: loop header
LB: loop body
LE: loop exit
PB: predicated region body
PF: predicated region fallthrough
CT: control target
= control target key end

     0   :  { %s7266_s15 = smov 0   ;;  %s7268_s16 = smov 0   ;;  %s11592_s0 = inlined_call_operand.vmem [shape: f32[4,512,128], index: 0, kind: input, shape index: {}]   ;;  %s11593_s1 = inlined_call_operand.vmem [shape: f32[128,32], index: 1, kind: input, shape index: {}]   ;;  %s11594_s2 = inlined_call_operand.vmem [shape: f32[1,32], index: 2, kind: input, shape index: {}]   ;;  %s11595_s3 = inlined_call_operand.vmem [shape: f32[1,32], index: 3, kind: input, shape index: {}]   ;;  %s11596_s4 = inlined_call_operand.vmem [shape: f32[512,32], index: 4, kind: output, shape index: {}]  }
   0x1   :  { %s7270_s17 = smov 0  }
   0x2 LB: > { %s26_s18 = sadd.s32 1, %s7234_s16  ;;  %p5706_p0 = scmp.ge.s32.totalorder %s7238_s17, 1  ;;  %s7238_s17 = sphi %s7270_s17, %s14_s17   ;;  %s7234_s16 = sphi %s7268_s16, %s11915_s16   ;;  %s7230_s15 = sphi %s7266_s15, %s11914_s15  }
   0x3   : > { %p28_p1 = scmp.ge.s32.totalorder %s26_s18, 2  ;;  %p177_p2 = scmp.lt.s32.totalorder %s7238_s17, 3 }
   0x5   : > { %s11917_s18 = smov (%p28_p1, %s26_s18), 0  ;;  %p178_p3 = pnand %p5706_p0, %p177_p2 }
   0x6   : > { %p5707_p4 = scmp.ne.s32.totalorder (!%p178_p3), %s7230_s15, 0 }
   0x7   : > { %181 = sbr.rel (%p178_p3) target bundleno = 1353 (0x549), region = 36 }
   0xe   : > { %221 = sbr.rel (%p5707_p4) target bundleno = 830 (0x33e), region = 40 }
  0x15   : > { %v478_v0 = vld [vmem:[%s11593_s1] sm:$0xff]  ;;  %v479_v1 = vld [vmem:[%s11593_s1 + $0x8] sm:$0xff]  ;;  %v480_v2 = vld [vmem:[%s11593_s1 + $0x10] sm:$0xff]  ;;  %vm1847_vm0 = vcmask 261120   ;;  %vm1843_vm1 = vcmask 253952  }
  0x16   : > { %v7091_v3 = vpack.c.bf16 %v479_v1, %v478_v0  ;;  %v481_v4 = vld [vmem:[%s11593_s1 + $0x18] sm:$0xff]  ;;  %v482_v6 = vld [vmem:[%s11593_s1 + $0x20] sm:$0xff]  ;;  %v483_v7 = vld [vmem:[%s11593_s1 + $0x28] sm:$0xff] }
  0x17   : > { %v7095_v5 = vpack.c.bf16 %v481_v4, %v480_v2  ;;  %v7099_v8 = vpack.c.bf16 %v483_v7, %v482_v6  ;;  %v222_v9 = vld [vmem:[%s11592_s0] sm:$0xff]  ;;  %v484_v10 = vld [vmem:[%s11593_s1 + $0x30] sm:$0xff]  ;;  %v485_v11 = vld [vmem:[%s11593_s1 + $0x38] sm:$0xff] }
  0x18   : > { %7092 = vmatprep.subr.bf16.mxu0 %v7091_v3  ;;  %7155 = vmatprep.subr.bf16.mxu1 %v7091_v3  ;;  %v7103_v12 = vpack.c.bf16 %v485_v11, %v484_v10  ;;  %v486_v13 = vld [vmem:[%s11593_s1 + $0x40] sm:$0xff]  ;;  %v487_v14 = vld [vmem:[%s11593_s1 + $0x48] sm:$0xff]  ;;  %v488_v16 = vld [vmem:[%s11593_s1 + $0x50] sm:$0xff] }
  0x19   : > { %7094 = vmatpush3.bf16.msra.mxu0 %v7091_v3  ;;  %7163 = vmatpush3.bf16.msra.mxu1 %v7091_v3  ;;  %v7107_v15 = vpack.c.bf16 %v487_v14, %v486_v13  ;;  %v489_v17 = vld [vmem:[%s11593_s1 + $0x58] sm:$0xff]  ;;  %v490_v19 = vld [vmem:[%s11593_s1 + $0x60] sm:$0xff]  ;;  %v491_v20 = vld [vmem:[%s11593_s1 + $0x68] sm:$0xff] }
  0x1a   : > { %7096 = vmatprep.subr.bf16.mxu0 %v7095_v5  ;;  %7156 = vmatprep.subr.bf16.mxu1 %v7095_v5  ;;  %v7111_v18 = vpack.c.bf16 %v489_v17, %v488_v16  ;;  %v7115_v21 = vpack.c.bf16 %v491_v20, %v490_v19  ;;  %v492_v22 = vld [vmem:[%s11593_s1 + $0x70] sm:$0xff]  ;;  %v493_v23 = vld [vmem:[%s11593_s1 + $0x78] sm:$0xff]  ;;  %v223_v25 = vld [vmem:[%s11592_s0 + $0x8] sm:$0xff] }
  0x1b   : > { %6291 = vmatprep.mubr.f32.mxu0 %v222_v9  ;;  %v7119_v24 = vpack.c.bf16 %v493_v23, %v492_v22  ;;  %v224_v26 = vld [vmem:[%s11592_s0 + $0x10] sm:$0xff]  ;;  %v225_v27 = vld [vmem:[%s11592_s0 + $0x18] sm:$0xff]  ;;  %v226_v28 = vld [vmem:[%s11592_s0 + $0x20] sm:$0xff] }
  0x1c   : > { %v227_v29 = vld [vmem:[%s11592_s0 + $0x28] sm:$0xff]  ;;  %v228_v30 = vld [vmem:[%s11592_s0 + $0x30] sm:$0xff]  ;;  %v229_v31 = vld [vmem:[%s11592_s0 + $0x38] sm:$0xff] }
  0x1d   : > { %7098 = vmatpush3.bf16.msra.mxu0 %v7095_v5  ;;  %7164 = vmatpush3.bf16.msra.mxu1 %v7095_v5  ;;  %v230_v32 = vld [vmem:[%s11592_s0 + $0x40] sm:$0xff]  ;;  %v231_v33 = vld [vmem:[%s11592_s0 + $0x48] sm:$0xff]  ;;  %v232_v34 = vld [vmem:[%s11592_s0 + $0x50] sm:$0xff] }
  0x1e   : > { %7100 = vmatprep.subr.bf16.mxu0 %v7099_v8  ;;  %7157 = vmatprep.subr.bf16.mxu1 %v7099_v8  ;;  %v233_v35 = vld [vmem:[%s11592_s0 + $0x58] sm:$0xff]  ;;  %v234_v36 = vld [vmem:[%s11592_s0 + $0x60] sm:$0xff]  ;;  %v235_v37 = vld [vmem:[%s11592_s0 + $0x68] sm:$0xff] }
  0x1f   : > { %v236_v38 = vld [vmem:[%s11592_s0 + $0x70] sm:$0xff]  ;;  %v237_v39 = vld [vmem:[%s11592_s0 + $0x78] sm:$0xff]  ;;  %v238_v40 = vld [vmem:[%s11592_s0 + $0x80] sm:$0xff] }
  0x20   : > { %v239_v41 = vld [vmem:[%s11592_s0 + $0x88] sm:$0xff]  ;;  %v240_v42 = vld [vmem:[%s11592_s0 + $0x90] sm:$0xff]  ;;  %v241_v43 = vld [vmem:[%s11592_s0 + $0x98] sm:$0xff] }
  0x21   : > { %7102 = vmatpush3.bf16.msra.mxu0 %v7099_v8  ;;  %7165 = vmatpush3.bf16.msra.mxu1 %v7099_v8  ;;  %v242_v44 = vld [vmem:[%s11592_s0 + $0xa0] sm:$0xff]  ;;  %v243_v45 = vld [vmem:[%s11592_s0 + $0xa8] sm:$0xff]  ;;  %v244_v46 = vld [vmem:[%s11592_s0 + $0xb0] sm:$0xff] }
  0x22   : > { %7104 = vmatprep.subr.bf16.mxu0 %v7103_v12  ;;  %7158 = vmatprep.subr.bf16.mxu1 %v7103_v12  ;;  %v245_v47 = vld [vmem:[%s11592_s0 + $0xb8] sm:$0xff]  ;;  %v246_v48 = vld [vmem:[%s11592_s0 + $0xc0] sm:$0xff]  ;;  %v247_v49 = vld [vmem:[%s11592_s0 + $0xc8] sm:$0xff] }
  0x23   : > { %v248_v50 = vld [vmem:[%s11592_s0 + $0xd0] sm:$0xff]  ;;  %v249_v51 = vld [vmem:[%s11592_s0 + $0xd8] sm:$0xff]  ;;  %v250_v52 = vld [vmem:[%s11592_s0 + $0xe0] sm:$0xff] }
  0x24   : > { %v251_v53 = vld [vmem:[%s11592_s0 + $0xe8] sm:$0xff]  ;;  %v252_v54 = vld [vmem:[%s11592_s0 + $0xf0] sm:$0xff]  ;;  %v253_v55 = vld [vmem:[%s11592_s0 + $0xf8] sm:$0xff] }
  0x25   : > { %7106 = vmatpush3.bf16.msra.mxu0 %v7103_v12  ;;  %7166 = vmatpush3.bf16.msra.mxu1 %v7103_v12  ;;  %v254_v56 = vld [vmem:[%s11592_s0 + $0x100] sm:$0xff]  ;;  %v255_v57 = vld [vmem:[%s11592_s0 + $0x108] sm:$0xff]  ;;  %v256_v58 = vld [vmem:[%s11592_s0 + $0x110] sm:$0xff] }
  0x26   : > { %7108 = vmatprep.subr.bf16.mxu0 %v7107_v15  ;;  %7159 = vmatprep.subr.bf16.mxu1 %v7107_v15  ;;  %v257_v59 = vld [vmem:[%s11592_s0 + $0x118] sm:$0xff]  ;;  %v258_v60 = vld [vmem:[%s11592_s0 + $0x120] sm:$0xff]  ;;  %v259_v61 = vld [vmem:[%s11592_s0 + $0x128] sm:$0xff] }
  0x27   : > { %v260_v62 = vld [vmem:[%s11592_s0 + $0x130] sm:$0xff]  ;;  %v261_v63 = vld [vmem:[%s11592_s0 + $0x138] sm:$0xff]  ;;  %v262_v0 = vld [vmem:[%s11592_s0 + $0x140] sm:$0xff] }
  0x28   : > { %v263_v1 = vld [vmem:[%s11592_s0 + $0x148] sm:$0xff]  ;;  %v264_v2 = vld [vmem:[%s11592_s0 + $0x150] sm:$0xff]  ;;  %v265_v3 = vld [vmem:[%s11592_s0 + $0x158] sm:$0xff] }
  0x29   : > { %7110 = vmatpush3.bf16.msra.mxu0 %v7107_v15  ;;  %7167 = vmatpush3.bf16.msra.mxu1 %v7107_v15  ;;  %v266_v4 = vld [vmem:[%s11592_s0 + $0x160] sm:$0xff]  ;;  %v267_v5 = vld [vmem:[%s11592_s0 + $0x168] sm:$0xff]  ;;  %v268_v6 = vld [vmem:[%s11592_s0 + $0x170] sm:$0xff] }
  0x2a   : > { %7112 = vmatprep.subr.bf16.mxu0 %v7111_v18  ;;  %7160 = vmatprep.subr.bf16.mxu1 %v7111_v18  ;;  %v269_v7 = vld [vmem:[%s11592_s0 + $0x178] sm:$0xff]  ;;  %v270_v8 = vld [vmem:[%s11592_s0 + $0x180] sm:$0xff]  ;;  %v271_v9 = vld [vmem:[%s11592_s0 + $0x188] sm:$0xff] }
  0x2b   : > { %v272_v10 = vld [vmem:[%s11592_s0 + $0x190] sm:$0xff]  ;;  %v273_v11 = vld [vmem:[%s11592_s0 + $0x198] sm:$0xff]  ;;  %v274_v12 = vld [vmem:[%s11592_s0 + $0x1a0] sm:$0xff] }
  0x2c   : > { %v275_v13 = vld [vmem:[%s11592_s0 + $0x1a8] sm:$0xff]  ;;  %v276_v14 = vld [vmem:[%s11592_s0 + $0x1b0] sm:$0xff]  ;;  %v277_v15 = vld [vmem:[%s11592_s0 + $0x1b8] sm:$0xff] }
  0x2d   : > { %7114 = vmatpush3.bf16.msra.mxu0 %v7111_v18  ;;  %7168 = vmatpush3.bf16.msra.mxu1 %v7111_v18  ;;  %v278_v16 = vld [vmem:[%s11592_s0 + $0x1c0] sm:$0xff]  ;;  %v279_v17 = vld [vmem:[%s11592_s0 + $0x1c8] sm:$0xff]  ;;  %v280_v18 = vld [vmem:[%s11592_s0 + $0x1d0] sm:$0xff] }
  0x2e   : > { %7116 = vmatprep.subr.bf16.mxu0 %v7115_v21  ;;  %7161 = vmatprep.subr.bf16.mxu1 %v7115_v21  ;;  %v281_v19 = vld [vmem:[%s11592_s0 + $0x1d8] sm:$0xff]  ;;  %v282_v20 = vld [vmem:[%s11592_s0 + $0x1e0] sm:$0xff]  ;;  %v284_v22 = vld [vmem:[%s11592_s0 + $0x1f0] sm:$0xff] }
  0x2f   : > { %v285_v23 = vld [vmem:[%s11592_s0 + $0x1f8] sm:$0xff] }
  0x31   : > { %7118 = vmatpush3.bf16.msra.mxu0 %v7115_v21  ;;  %7169 = vmatpush3.bf16.msra.mxu1 %v7115_v21  ;;  %v283_v21 = vld [vmem:[%s11592_s0 + $0x1e8] sm:$0xff] }
  0x32   : > { %7120 = vmatprep.subr.bf16.mxu0 %v7119_v24  ;;  %7162 = vmatprep.subr.bf16.mxu1 %v7119_v24 }
  0x35   : > { %7122 = vmatpush3.bf16.msra.mxu0 %v7119_v24  ;;  %7170 = vmatpush3.bf16.msra.mxu1 %v7119_v24  ;;  %v286_v24 = vld [vmem:[%s11592_s0 + $0x200] sm:$0xff] }
  0x38   : > { %6292 = vmatmul.mubr.f32.vlgmr.msra.gmra.mrb[0].mxu0 %v223_v25  ;;  %v287_v25 = vld [vmem:[%s11592_s0 + $0x208] sm:$0xff] }
  0x39   : > { %6294 = vmatprep.mubr.f32.mxu0 %v224_v26  ;;  %v350_v26 = vld [vmem:[%s11592_s0 + $0x400] sm:$0xff] }
  0x3a   : > { %6483 = vmatprep.mubr.f32.mxu1 %v350_v26  ;;  %v382_v26 = vld [vmem:[%s11592_s0 + $0x500] sm:$0xff] }
  0x3c   : > { %6295 = vmatmul.mubr.f32.gmra.mrb[2].mxu0 %v225_v27  ;;  %v288_v27 = vld [vmem:[%s11592_s0 + $0x210] sm:$0xff] }
  0x3d   : > { %6297 = vmatprep.mubr.f32.mxu0 %v226_v28  ;;  %v351_v28 = vld [vmem:[%s11592_s0 + $0x408] sm:$0xff] }
  0x3e   : > { %6484 = vmatmul.mubr.f32.vlgmr.msra.gmra.mrb[0].mxu1 %v351_v28  ;;  %v383_v28 = vld [vmem:[%s11592_s0 + $0x508] sm:$0xff] }
  0x40   : > { %6298 = vmatmul.mubr.f32.gmra.mrb[4].mxu0 %v227_v29  ;;  %v289_v29 = vld [vmem:[%s11592_s0 + $0x218] sm:$0xff] }
  0x41   : > { %6300 = vmatprep.mubr.f32.mxu0 %v228_v30  ;;  %v352_v30 = vld [vmem:[%s11592_s0 + $0x410] sm:$0xff] }
  0x42   : > { %6486 = vmatprep.mubr.f32.mxu1 %v352_v30  ;;  %v384_v30 = vld [vmem:[%s11592_s0 + $0x510] sm:$0xff] }
  0x44   : > { %6301 = vmatmul.mubr.f32.gmra.mrb[6].mxu0 %v229_v31  ;;  %v290_v31 = vld [vmem:[%s11592_s0 + $0x220] sm:$0xff] }
  0x45   : > { %6303 = vmatprep.mubr.f32.mxu0 %v230_v32  ;;  %v353_v32 = vld [vmem:[%s11592_s0 + $0x418] sm:$0xff] }
  0x46   : > { %6487 = vmatmul.mubr.f32.gmra.mrb[2].mxu1 %v353_v32  ;;  %v385_v32 = vld [vmem:[%s11592_s0 + $0x518] sm:$0xff] }
  0x48   : > { %6304 = vmatmul.mubr.f32.gmra.mrb[8].mxu0 %v231_v33  ;;  %v291_v33 = vld [vmem:[%s11592_s0 + $0x228] sm:$0xff] }
  0x49   : > { %6306 = vmatprep.mubr.f32.mxu0 %v232_v34  ;;  %v354_v34 = vld [vmem:[%s11592_s0 + $0x420] sm:$0xff] }
  0x4a   : > { %6489 = vmatprep.mubr.f32.mxu1 %v354_v34  ;;  %v386_v34 = vld [vmem:[%s11592_s0 + $0x520] sm:$0xff] }
  0x4c   : > { %6307 = vmatmul.mubr.f32.gmra.mrb[10].mxu0 %v233_v35  ;;  %v292_v35 = vld [vmem:[%s11592_s0 + $0x230] sm:$0xff] }
  0x4d   : > { %6309 = vmatprep.mubr.f32.mxu0 %v234_v36  ;;  %v355_v36 = vld [vmem:[%s11592_s0 + $0x428] sm:$0xff] }
  0x4e   : > { %6490 = vmatmul.mubr.f32.gmra.mrb[4].mxu1 %v355_v36  ;;  %v387_v36 = vld [vmem:[%s11592_s0 + $0x528] sm:$0xff] }
  0x50   : > { %6310 = vmatmul.mubr.f32.gmra.mrb[12].mxu0 %v235_v37  ;;  %v293_v37 = vld [vmem:[%s11592_s0 + $0x238] sm:$0xff] }
  0x51   : > { %6312 = vmatprep.mubr.f32.mxu0 %v236_v38  ;;  %v356_v38 = vld [vmem:[%s11592_s0 + $0x430] sm:$0xff] }
  0x52   : > { %6492 = vmatprep.mubr.f32.mxu1 %v356_v38  ;;  %v388_v38 = vld [vmem:[%s11592_s0 + $0x530] sm:$0xff] }
  0x54   : > { %6313 = vmatmul.mubr.f32.gmra.mrb[14].mxu0 %v237_v39  ;;  %v294_v39 = vld [vmem:[%s11592_s0 + $0x240] sm:$0xff] }
  0x55   : > { %6315 = vmatprep.mubr.f32.mxu0 %v238_v40  ;;  %v357_v40 = vld [vmem:[%s11592_s0 + $0x438] sm:$0xff] }
  0x56   : > { %6493 = vmatmul.mubr.f32.gmra.mrb[6].mxu1 %v357_v40  ;;  %v389_v40 = vld [vmem:[%s11592_s0 + $0x538] sm:$0xff] }
  0x58   : > { %6316 = vmatmul.mubr.f32.gmra.mrb[16].mxu0 %v239_v41  ;;  %v295_v41 = vld [vmem:[%s11592_s0 + $0x248] sm:$0xff] }
  0x59   : > { %6318 = vmatprep.mubr.f32.mxu0 %v240_v42  ;;  %v358_v42 = vld [vmem:[%s11592_s0 + $0x440] sm:$0xff] }
  0x5a   : > { %6495 = vmatprep.mubr.f32.mxu1 %v358_v42  ;;  %v390_v42 = vld [vmem:[%s11592_s0 + $0x540] sm:$0xff] }
  0x5c   : > { %6319 = vmatmul.mubr.f32.gmra.mrb[18].mxu0 %v241_v43  ;;  %v296_v43 = vld [vmem:[%s11592_s0 + $0x250] sm:$0xff] }
  0x5d   : > { %6321 = vmatprep.mubr.f32.mxu0 %v242_v44  ;;  %v359_v44 = vld [vmem:[%s11592_s0 + $0x448] sm:$0xff] }
  0x5e   : > { %6496 = vmatmul.mubr.f32.gmra.mrb[8].mxu1 %v359_v44  ;;  %v391_v44 = vld [vmem:[%s11592_s0 + $0x548] sm:$0xff] }
  0x60   : > { %6322 = vmatmul.mubr.f32.gmra.mrb[20].mxu0 %v243_v45  ;;  %v297_v45 = vld [vmem:[%s11592_s0 + $0x258] sm:$0xff] }
  0x61   : > { %6324 = vmatprep.mubr.f32.mxu0 %v244_v46  ;;  %v360_v46 = vld [vmem:[%s11592_s0 + $0x450] sm:$0xff] }
  0x62   : > { %6498 = vmatprep.mubr.f32.mxu1 %v360_v46  ;;  %v392_v46 = vld [vmem:[%s11592_s0 + $0x550] sm:$0xff] }
  0x64   : > { %6325 = vmatmul.mubr.f32.gmra.mrb[22].mxu0 %v245_v47  ;;  %v298_v47 = vld [vmem:[%s11592_s0 + $0x260] sm:$0xff] }
  0x65   : > { %6327 = vmatprep.mubr.f32.mxu0 %v246_v48  ;;  %v361_v48 = vld [vmem:[%s11592_s0 + $0x458] sm:$0xff] }
  0x66   : > { %6499 = vmatmul.mubr.f32.gmra.mrb[10].mxu1 %v361_v48  ;;  %v393_v48 = vld [vmem:[%s11592_s0 + $0x558] sm:$0xff] }
  0x68   : > { %6328 = vmatmul.mubr.f32.gmra.mrb[24].mxu0 %v247_v49  ;;  %v299_v49 = vld [vmem:[%s11592_s0 + $0x268] sm:$0xff] }
  0x69   : > { %6330 = vmatprep.mubr.f32.mxu0 %v248_v50  ;;  %v362_v50 = vld [vmem:[%s11592_s0 + $0x460] sm:$0xff] }
  0x6a   : > { %6501 = vmatprep.mubr.f32.mxu1 %v362_v50 }
  0x6c   : > { %6331 = vmatmul.mubr.f32.gmra.mrb[26].mxu0 %v249_v51  ;;  %v300_v51 = vld [vmem:[%s11592_s0 + $0x270] sm:$0xff] }
  0x6d   : > { %6333 = vmatprep.mubr.f32.mxu0 %v250_v52  ;;  %v363_v52 = vld [vmem:[%s11592_s0 + $0x468] sm:$0xff] }
  0x6e   : > { %6502 = vmatmul.mubr.f32.gmra.mrb[12].mxu1 %v363_v52 }
  0x70   : > { %6334 = vmatmul.mubr.f32.gmra.mrb[28].mxu0 %v251_v53  ;;  %v301_v53 = vld [vmem:[%s11592_s0 + $0x278] sm:$0xff] }
  0x71   : > { %6336 = vmatprep.mubr.f32.mxu0 %v252_v54  ;;  %v364_v54 = vld [vmem:[%s11592_s0 + $0x470] sm:$0xff] }
  0x72   : > { %6504 = vmatprep.mubr.f32.mxu1 %v364_v54 }
  0x74   : > { %6337 = vmatmul.mubr.f32.gmra.mrb[30].mxu0 %v253_v55  ;;  %v302_v55 = vld [vmem:[%s11592_s0 + $0x280] sm:$0xff] }
  0x75   : > { %6339 = vmatprep.mubr.f32.mxu0 %v254_v56  ;;  %v365_v56 = vld [vmem:[%s11592_s0 + $0x478] sm:$0xff] }
  0x76   : > { %6505 = vmatmul.mubr.f32.gmra.mrb[14].mxu1 %v365_v56  ;;  %v394_v56 = vld [vmem:[%s11592_s0 + $0x560] sm:$0xff] }
  0x78   : > { %6340 = vmatmul.mubr.f32.gmra.mrb[32].mxu0 %v255_v57  ;;  %v303_v57 = vld [vmem:[%s11592_s0 + $0x288] sm:$0xff] }
  0x79   : > { %6342 = vmatprep.mubr.f32.mxu0 %v256_v58  ;;  %v366_v58 = vld [vmem:[%s11592_s0 + $0x480] sm:$0xff] }
  0x7a   : > { %6507 = vmatprep.mubr.f32.mxu1 %v366_v58 }
  0x7c   : > { %6343 = vmatmul.mubr.f32.gmra.mrb[34].mxu0 %v257_v59  ;;  %v304_v59 = vld [vmem:[%s11592_s0 + $0x290] sm:$0xff] }
  0x7d   : > { %6345 = vmatprep.mubr.f32.mxu0 %v258_v60  ;;  %v367_v60 = vld [vmem:[%s11592_s0 + $0x488] sm:$0xff] }
  0x7e   : > { %6508 = vmatmul.mubr.f32.gmra.mrb[16].mxu1 %v367_v60  ;;  %v395_v60 = vld [vmem:[%s11592_s0 + $0x568] sm:$0xff] }
  0x80   : > { %6346 = vmatmul.mubr.f32.gmra.mrb[36].mxu0 %v259_v61  ;;  %v305_v61 = vld [vmem:[%s11592_s0 + $0x298] sm:$0xff] }
  0x81   : > { %6348 = vmatprep.mubr.f32.mxu0 %v260_v62  ;;  %v368_v62 = vld [vmem:[%s11592_s0 + $0x490] sm:$0xff] }
  0x82   : > { %6510 = vmatprep.mubr.f32.mxu1 %v368_v62 }
  0x84   : > { %6349 = vmatmul.mubr.f32.gmra.mrb[38].mxu0 %v261_v63  ;;  %v306_v63 = vld [vmem:[%s11592_s0 + $0x2a0] sm:$0xff] }
  0x85   : > { %6351 = vmatprep.mubr.f32.mxu0 %v262_v0  ;;  %v369_v0 = vld [vmem:[%s11592_s0 + $0x498] sm:$0xff] }
  0x86   : > { %6511 = vmatmul.mubr.f32.gmra.mrb[18].mxu1 %v369_v0 }
  0x88   : > { %6352 = vmatmul.mubr.f32.gmra.mrb[40].mxu0 %v263_v1  ;;  %v307_v1 = vld [vmem:[%s11592_s0 + $0x2a8] sm:$0xff] }
  0x89   : > { %6354 = vmatprep.mubr.f32.mxu0 %v264_v2  ;;  %v370_v2 = vld [vmem:[%s11592_s0 + $0x4a0] sm:$0xff] }
  0x8a   : > { %6513 = vmatprep.mubr.f32.mxu1 %v370_v2 }
  0x8c   : > { %6355 = vmatmul.mubr.f32.gmra.mrb[42].mxu0 %v265_v3  ;;  %v308_v3 = vld [vmem:[%s11592_s0 + $0x2b0] sm:$0xff] }
  0x8d   : > { %6357 = vmatprep.mubr.f32.mxu0 %v266_v4  ;;  %v371_v4 = vld [vmem:[%s11592_s0 + $0x4a8] sm:$0xff] }
  0x8e   : > { %6514 = vmatmul.mubr.f32.gmra.mrb[20].mxu1 %v371_v4  ;;  %v333_v4 = vld [vmem:[%s11592_s0 + $0x378] sm:$0xff] }
  0x90   : > { %6358 = vmatmul.mubr.f32.gmra.mrb[44].mxu0 %v267_v5  ;;  %v309_v5 = vld [vmem:[%s11592_s0 + $0x2b8] sm:$0xff] }
  0x91   : > { %6360 = vmatprep.mubr.f32.mxu0 %v268_v6  ;;  %v372_v6 = vld [vmem:[%s11592_s0 + $0x4b0] sm:$0xff] }
  0x92   : > { %6516 = vmatprep.mubr.f32.mxu1 %v372_v6 }
  0x94   : > { %6361 = vmatmul.mubr.f32.gmra.mrb[46].mxu0 %v269_v7  ;;  %v310_v7 = vld [vmem:[%s11592_s0 + $0x2c0] sm:$0xff] }
  0x95   : > { %6363 = vmatprep.mubr.f32.mxu0 %v270_v8  ;;  %v373_v8 = vld [vmem:[%s11592_s0 + $0x4b8] sm:$0xff] }
  0x96   : > { %6517 = vmatmul.mubr.f32.gmra.mrb[22].mxu1 %v373_v8  ;;  %v397_v8 = vld [vmem:[%s11592_s0 + $0x578] sm:$0xff] }
  0x98   : > { %6364 = vmatmul.mubr.f32.gmra.mrb[48].mxu0 %v271_v9  ;;  %v311_v9 = vld [vmem:[%s11592_s0 + $0x2c8] sm:$0xff] }
  0x99   : > { %6366 = vmatprep.mubr.f32.mxu0 %v272_v10  ;;  %v374_v10 = vld [vmem:[%s11592_s0 + $0x4c0] sm:$0xff] }
  0x9a   : > { %6519 = vmatprep.mubr.f32.mxu1 %v374_v10 }
  0x9c   : > { %6367 = vmatmul.mubr.f32.gmra.mrb[50].mxu0 %v273_v11  ;;  %v312_v11 = vld [vmem:[%s11592_s0 + $0x2d0] sm:$0xff] }
  0x9d   : > { %6369 = vmatprep.mubr.f32.mxu0 %v274_v12  ;;  %v375_v12 = vld [vmem:[%s11592_s0 + $0x4c8] sm:$0xff] }
  0x9e   : > { %6520 = vmatmul.mubr.f32.gmra.mrb[24].mxu1 %v375_v12 }
  0xa0   : > { %6370 = vmatmul.mubr.f32.gmra.mrb[52].mxu0 %v275_v13  ;;  %v313_v13 = vld [vmem:[%s11592_s0 + $0x2d8] sm:$0xff] }
  0xa1   : > { %6372 = vmatprep.mubr.f32.mxu0 %v276_v14  ;;  %v376_v14 = vld [vmem:[%s11592_s0 + $0x4d0] sm:$0xff] }
  0xa2   : > { %6522 = vmatprep.mubr.f32.mxu1 %v376_v14 }
  0xa4   : > { %6373 = vmatmul.mubr.f32.gmra.mrb[54].mxu0 %v277_v15  ;;  %v314_v15 = vld [vmem:[%s11592_s0 + $0x2e0] sm:$0xff] }
  0xa5   : > { %6375 = vmatprep.mubr.f32.mxu0 %v278_v16  ;;  %v377_v16 = vld [vmem:[%s11592_s0 + $0x4d8] sm:$0xff] }
  0xa6   : > { %6523 = vmatmul.mubr.f32.gmra.mrb[26].mxu1 %v377_v16 }
  0xa8   : > { %6376 = vmatmul.mubr.f32.gmra.mrb[56].mxu0 %v279_v17  ;;  %v315_v17 = vld [vmem:[%s11592_s0 + $0x2e8] sm:$0xff] }
  0xa9   : > { %6378 = vmatprep.mubr.f32.mxu0 %v280_v18  ;;  %v378_v18 = vld [vmem:[%s11592_s0 + $0x4e0] sm:$0xff] }
  0xaa   : > { %6525 = vmatprep.mubr.f32.mxu1 %v378_v18 }
  0xac   : > { %6379 = vmatmul.mubr.f32.gmra.mrb[58].mxu0 %v281_v19  ;;  %v316_v19 = vld [vmem:[%s11592_s0 + $0x2f0] sm:$0xff] }
  0xad   : > { %6381 = vmatprep.mubr.f32.mxu0 %v282_v20  ;;  %v379_v20 = vld [vmem:[%s11592_s0 + $0x4e8] sm:$0xff] }
  0xae   : > { %6526 = vmatmul.mubr.f32.gmra.mrb[28].mxu1 %v379_v20  ;;  %v398_v20 = vld [vmem:[%s11592_s0 + $0x580] sm:$0xff] }
  0xb0   : > { %6382 = vmatmul.mubr.f32.gmra.mrb[60].mxu0 %v283_v21  ;;  %v317_v21 = vld [vmem:[%s11592_s0 + $0x2f8] sm:$0xff] }
  0xb1   : > { %6384 = vmatprep.mubr.f32.mxu0 %v284_v22  ;;  %v380_v22 = vld [vmem:[%s11592_s0 + $0x4f0] sm:$0xff] }
  0xb2   : > { %6528 = vmatprep.mubr.f32.mxu1 %v380_v22 }
  0xb4   : > { %6385 = vmatmul.mubr.f32.gmra.mrb[62].mxu0 %v285_v23  ;;  %v318_v23 = vld [vmem:[%s11592_s0 + $0x300] sm:$0xff] }
  0xb5   : > { %6387 = vmatprep.mubr.f32.mxu0 %v286_v24  ;;  %v381_v24 = vld [vmem:[%s11592_s0 + $0x4f8] sm:$0xff] }
  0xb6   : > { %6529 = vmatmul.mubr.f32.gmra.mrb[30].mxu1 %v381_v24  ;;  %v399_v24 = vld [vmem:[%s11592_s0 + $0x588] sm:$0xff] }
  0xb7   : > { %6531 = vmatprep.mubr.f32.mxu1 %v382_v26 }
  0xb8   : > { %6388 = vmatmul.mubr.f32.gmra.mrb[64].mxu0 %v287_v25  ;;  %v319_v25 = vld [vmem:[%s11592_s0 + $0x308] sm:$0xff] }
  0xb9   : > { %6390 = vmatprep.mubr.f32.mxu0 %v288_v27  ;;  %v320_v27 = vld [vmem:[%s11592_s0 + $0x310] sm:$0xff] }
  0xba   : > { %6532 = vmatmul.mubr.f32.gmra.mrb[32].mxu1 %v383_v28 }
  0xbb   : > { %6534 = vmatprep.mubr.f32.mxu1 %v384_v30 }
  0xbc   : > { %6391 = vmatmul.mubr.f32.gmra.mrb[66].mxu0 %v289_v29  ;;  %v321_v29 = vld [vmem:[%s11592_s0 + $0x318] sm:$0xff] }
  0xbd   : > { %6393 = vmatprep.mubr.f32.mxu0 %v290_v31  ;;  %v322_v31 = vld [vmem:[%s11592_s0 + $0x320] sm:$0xff] }
  0xbe   : > { %6535 = vmatmul.mubr.f32.gmra.mrb[34].mxu1 %v385_v32 }
  0xbf   : > { %6537 = vmatprep.mubr.f32.mxu1 %v386_v34 }
  0xc0   : > { %6394 = vmatmul.mubr.f32.gmra.mrb[68].mxu0 %v291_v33  ;;  %v323_v33 = vld [vmem:[%s11592_s0 + $0x328] sm:$0xff] }
  0xc1   : > { %6396 = vmatprep.mubr.f32.mxu0 %v292_v35  ;;  %v324_v35 = vld [vmem:[%s11592_s0 + $0x330] sm:$0xff] }
  0xc2   : > { %6538 = vmatmul.mubr.f32.gmra.mrb[36].mxu1 %v387_v36  ;;  %v400_v36 = vld [vmem:[%s11592_s0 + $0x590] sm:$0xff] }
  0xc3   : > { %6540 = vmatprep.mubr.f32.mxu1 %v388_v38 }
  0xc4   : > { %6397 = vmatmul.mubr.f32.gmra.mrb[70].mxu0 %v293_v37  ;;  %v325_v37 = vld [vmem:[%s11592_s0 + $0x338] sm:$0xff] }
  0xc5   : > { %6399 = vmatprep.mubr.f32.mxu0 %v294_v39  ;;  %v326_v39 = vld [vmem:[%s11592_s0 + $0x340] sm:$0xff] }
  0xc6   : > { %6541 = vmatmul.mubr.f32.gmra.mrb[38].mxu1 %v389_v40  ;;  %v401_v40 = vld [vmem:[%s11592_s0 + $0x598] sm:$0xff] }
  0xc7   : > { %6543 = vmatprep.mubr.f32.mxu1 %v390_v42 }
  0xc8   : > { %6400 = vmatmul.mubr.f32.gmra.mrb[72].mxu0 %v295_v41  ;;  %v327_v41 = vld [vmem:[%s11592_s0 + $0x348] sm:$0xff] }
  0xc9   : > { %6402 = vmatprep.mubr.f32.mxu0 %v296_v43  ;;  %v328_v43 = vld [vmem:[%s11592_s0 + $0x350] sm:$0xff] }
  0xca   : > { %6544 = vmatmul.mubr.f32.gmra.mrb[40].mxu1 %v391_v44 }
  0xcb   : > { %6546 = vmatprep.mubr.f32.mxu1 %v392_v46 }
  0xcc   : > { %6403 = vmatmul.mubr.f32.gmra.mrb[74].mxu0 %v297_v45  ;;  %v329_v45 = vld [vmem:[%s11592_s0 + $0x358] sm:$0xff] }
  0xcd   : > { %6405 = vmatprep.mubr.f32.mxu0 %v298_v47  ;;  %v330_v47 = vld [vmem:[%s11592_s0 + $0x360] sm:$0xff] }
  0xce   : > { %6547 = vmatmul.mubr.f32.gmra.mrb[42].mxu1 %v393_v48 }
  0xcf   : > { %6549 = vmatprep.mubr.f32.mxu1 %v394_v56  ;;  %v403_v56 = vld [vmem:[%s11592_s0 + $0x5a8] sm:$0xff] }
  0xd0   : > { %6406 = vmatmul.mubr.f32.gmra.mrb[76].mxu0 %v299_v49 }
  0xd1   : > { %6408 = vmatprep.mubr.f32.mxu0 %v300_v51 }
  0xd2   : > { %6550 = vmatmul.mubr.f32.gmra.mrb[44].mxu1 %v395_v60 }
  0xd4   : > { %6409 = vmatmul.mubr.f32.gmra.mrb[78].mxu0 %v301_v53 }
  0xd5   : > { %6411 = vmatprep.mubr.f32.mxu0 %v302_v55  ;;  %v331_v55 = vld [vmem:[%s11592_s0 + $0x368] sm:$0xff] }
  0xd8   : > { %6412 = vmatmul.mubr.f32.gmra.mrb[80].mxu0 %v303_v57 }
  0xd9   : > { %6414 = vmatprep.mubr.f32.mxu0 %v304_v59  ;;  %v332_v59 = vld [vmem:[%s11592_s0 + $0x370] sm:$0xff] }
  0xdc   : > { %6415 = vmatmul.mubr.f32.gmra.mrb[82].mxu0 %v305_v61 }
  0xdd   : > { %6417 = vmatprep.mubr.f32.mxu0 %v306_v63 }
  0xe0   : > { %6418 = vmatmul.mubr.f32.gmra.mrb[84].mxu0 %v307_v1 }
  0xe1   : > { %6420 = vmatprep.mubr.f32.mxu0 %v308_v3 }
  0xe4   : > { %6421 = vmatmul.mubr.f32.gmra.mrb[86].mxu0 %v309_v5  ;;  %v396_v5 = vld [vmem:[%s11592_s0 + $0x570] sm:$0xff] }
  0xe5   : > { %6423 = vmatprep.mubr.f32.mxu0 %v310_v7  ;;  %v334_v7 = vld [vmem:[%s11592_s0 + $0x380] sm:$0xff]  ;;  %6552 = vmatprep.mubr.f32.mxu1 %v396_v5 }
  0xe6   : > { %6553 = vmatmul.mubr.f32.gmra.mrb[46].mxu1 %v397_v8  ;;  %v405_v8 = vld [vmem:[%s11592_s0 + $0x5b8] sm:$0xff] }
  0xe7   : > { %6555 = vmatprep.mubr.f32.mxu1 %v398_v20  ;;  %v406_v20 = vld [vmem:[%s11592_s0 + $0x5c0] sm:$0xff] }
  0xe8   : > { %6424 = vmatmul.mubr.f32.gmra.mrb[88].mxu0 %v311_v9 }
  0xe9   : > { %6426 = vmatprep.mubr.f32.mxu0 %v312_v11 }
  0xea   : > { %6556 = vmatmul.mubr.f32.gmra.mrb[48].mxu1 %v399_v24  ;;  %v407_v24 = vld [vmem:[%s11592_s0 + $0x5c8] sm:$0xff] }
  0xeb   : > { %6558 = vmatprep.mubr.f32.mxu1 %v400_v36  ;;  %v408_v36 = vld [vmem:[%s11592_s0 + $0x5d0] sm:$0xff] }
  0xec   : > { %6427 = vmatmul.mubr.f32.gmra.mrb[90].mxu0 %v313_v13 }
  0xed   : > { %6429 = vmatprep.mubr.f32.mxu0 %v314_v15 }
  0xee   : > { %6559 = vmatmul.mubr.f32.gmra.mrb[50].mxu1 %v401_v40  ;;  %v409_v40 = vld [vmem:[%s11592_s0 + $0x5d8] sm:$0xff] }
  0xf0   : > { %6430 = vmatmul.mubr.f32.gmra.mrb[92].mxu0 %v315_v17 }
  0xf1   : > { %6432 = vmatprep.mubr.f32.mxu0 %v316_v19  ;;  %v335_v19 = vld [vmem:[%s11592_s0 + $0x388] sm:$0xff] }
  0xf4   : > { %6433 = vmatmul.mubr.f32.gmra.mrb[94].mxu0 %v317_v21 }
  0xf5   : > { %6435 = vmatprep.mubr.f32.mxu0 %v318_v23  ;;  %v336_v23 = vld [vmem:[%s11592_s0 + $0x390] sm:$0xff] }
  0xf8   : > { %6436 = vmatmul.mubr.f32.gmra.mrb[96].mxu0 %v319_v25 }
  0xf9   : > { %6438 = vmatprep.mubr.f32.mxu0 %v320_v27 }
  0xfc   : > { %6439 = vmatmul.mubr.f32.gmra.mrb[98].mxu0 %v321_v29 }
  0xfd   : > { %6441 = vmatprep.mubr.f32.mxu0 %v322_v31 }
 0x100   : > { %6442 = vmatmul.mubr.f32.gmra.mrb[100].mxu0 %v323_v33 }
 0x101   : > { %6444 = vmatprep.mubr.f32.mxu0 %v324_v35  ;;  %v337_v35 = vld [vmem:[%s11592_s0 + $0x398] sm:$0xff] }
 0x104   : > { %6445 = vmatmul.mubr.f32.gmra.mrb[102].mxu0 %v325_v37 }
 0x105   : > { %6447 = vmatprep.mubr.f32.mxu0 %v326_v39  ;;  %v338_v39 = vld [vmem:[%s11592_s0 + $0x3a0] sm:$0xff] }
 0x108   : > { %6448 = vmatmul.mubr.f32.gmra.mrb[104].mxu0 %v327_v41 }
 0x109   : > { %6450 = vmatprep.mubr.f32.mxu0 %v328_v43 }
 0x10b   : > { %v6293_v49 = vpop.f32.mrb[0].mxu0 }
 0x10c   : > { %v1849_v50 = vsel %vm1847_vm0, %v6293_v49, 0.0  ;;  %v2370_v51 = vmul.f32 %v6293_v49, %v6293_v49  ;;  %v560_v52 = vpop.f32.mrb[1].mxu0  ;;  %6451 = vmatmul.mubr.f32.gmra.mrb[106].mxu0 %v329_v45 }
 0x10d   : > { %v1848_v53 = vsel %vm1847_vm0, %v560_v52, 0.0  ;;  %v2369_v54 = vmul.f32 %v560_v52, %v560_v52  ;;  %6453 = vmatprep.mubr.f32.mxu0 %v330_v47  ;;  %v402_v52 = vld [vmem:[%s11592_s0 + $0x5a0] sm:$0xff] }
 0x10e   : > { %v2626_v57 = vsel %vm1847_vm0, %v2370_v51, 0.0  ;;  %v1850_v58 = vadd.f32 %v1849_v50, %v1848_v53  ;;  %v339_v51 = vld [vmem:[%s11592_s0 + $0x3a8] sm:$0xff]  ;;  %6561 = vmatprep.mubr.f32.mxu1 %v402_v52  ;;  %v410_v52 = vld [vmem:[%s11592_s0 + $0x5e0] sm:$0xff] }
 0x10f   : > { %v2625_v61 = vsel %vm1847_vm0, %v2369_v54, 0.0  ;;  %v6296_v62 = vpop.f32.mrb[2].mxu0  ;;  %6562 = vmatmul.mubr.f32.gmra.mrb[52].mxu1 %v403_v56  ;;  %v411_v56 = vld [vmem:[%s11592_s0 + $0x5e8] sm:$0xff] }
 0x110   : > { %v2627_v63 = vadd.f32 %v2626_v57, %v2625_v61  ;;  %v570_v0 = vpop.f32.mrb[3].mxu0  ;;  %6454 = vmatmul.mubr.f32.gmra.mrb[108].mxu0 %v331_v55  ;;  %v2372_v1 = vmul.f32 %v6296_v62, %v6296_v62  ;;  %v1853_v9 = vsel %vm1847_vm0, %v6296_v62, 0.0  ;;  %v340_v55 = vld [vmem:[%s11592_s0 + $0x3b0] sm:$0xff] }
 0x111   : > { %v1851_v2 = vsel %vm1847_vm0, %v570_v0, 0.0  ;;  %v2371_v3 = vmul.f32 %v570_v0, %v570_v0  ;;  %6456 = vmatprep.mubr.f32.mxu0 %v332_v59 }
 0x112   : > { %v1852_v6 = vadd.f32 %v1851_v2, %v1850_v58  ;;  %v2630_v15 = vsel %vm1847_vm0, %v2372_v1, 0.0 }
 0x113   : > { %v2628_v10 = vsel %vm1847_vm0, %v2371_v3, 0.0  ;;  %v6299_v11 = vpop.f32.mrb[4].mxu0  ;;  %v341_v3 = vld [vmem:[%s11592_s0 + $0x3b8] sm:$0xff] }
 0x114   : > { %v1854_v12 = vadd.f32 %v1853_v9, %v1852_v6  ;;  %v2629_v13 = vadd.f32 %v2628_v10, %v2627_v63  ;;  %v580_v14 = vpop.f32.mrb[5].mxu0  ;;  %6457 = vmatmul.mubr.f32.gmra.mrb[110].mxu0 %v333_v4  ;;  %v2374_v16 = vmul.f32 %v6299_v11, %v6299_v11  ;;  %v1857_v25 = vsel %vm1847_vm0, %v6299_v11, 0.0  ;;  %v404_v4 = vld [vmem:[%s11592_s0 + $0x5b0] sm:$0xff] }
 0x115   : > { %v1855_v17 = vsel %vm1847_vm0, %v580_v14, 0.0  ;;  %v2373_v18 = vmul.f32 %v580_v14, %v580_v14  ;;  %6459 = vmatprep.mubr.f32.mxu0 %v334_v7  ;;  %v342_v7 = vld [vmem:[%s11592_s0 + $0x3c0] sm:$0xff]  ;;  %6564 = vmatprep.mubr.f32.mxu1 %v404_v4  ;;  %v412_v4 = vld [vmem:[%s11592_s0 + $0x5f0] sm:$0xff] }
 0x116   : > { %v2631_v21 = vadd.f32 %v2630_v15, %v2629_v13  ;;  %v1856_v22 = vadd.f32 %v1855_v17, %v1854_v12  ;;  %v2634_v31 = vsel %vm1847_vm0, %v2374_v16, 0.0  ;;  %6565 = vmatmul.mubr.f32.gmra.mrb[54].mxu1 %v405_v8 }
 0x117   : > { %v2632_v26 = vsel %vm1847_vm0, %v2373_v18, 0.0  ;;  %v6302_v27 = vpop.f32.mrb[6].mxu0  ;;  %6567 = vmatprep.mubr.f32.mxu1 %v406_v20 }
 0x118   : > { %v1858_v28 = vadd.f32 %v1857_v25, %v1856_v22  ;;  %v2633_v29 = vadd.f32 %v2632_v26, %v2631_v21  ;;  %v590_v30 = vpop.f32.mrb[7].mxu0  ;;  %6460 = vmatmul.mubr.f32.gmra.mrb[112].mxu0 %v335_v19  ;;  %v2376_v32 = vmul.f32 %v6302_v27, %v6302_v27  ;;  %v1861_v41 = vsel %vm1847_vm0, %v6302_v27, 0.0  ;;  %v343_v19 = vld [vmem:[%s11592_s0 + $0x3c8] sm:$0xff] }
 0x119   : > { %v1859_v33 = vsel %vm1847_vm0, %v590_v30, 0.0  ;;  %v2375_v34 = vmul.f32 %v590_v30, %v590_v30  ;;  %6462 = vmatprep.mubr.f32.mxu0 %v336_v23  ;;  %v344_v23 = vld [vmem:[%s11592_s0 + $0x3d0] sm:$0xff] }
 0x11a   : > { %v2635_v37 = vadd.f32 %v2634_v31, %v2633_v29  ;;  %v1860_v38 = vadd.f32 %v1859_v33, %v1858_v28  ;;  %v2638_v47 = vsel %vm1847_vm0, %v2376_v32, 0.0  ;;  %6568 = vmatmul.mubr.f32.gmra.mrb[56].mxu1 %v407_v24 }
 0x11b   : > { %v2636_v42 = vsel %vm1847_vm0, %v2375_v34, 0.0  ;;  %v6305_v43 = vpop.f32.mrb[8].mxu0  ;;  %6570 = vmatprep.mubr.f32.mxu1 %v408_v36 }
 0x11c   : > { %v1862_v44 = vadd.f32 %v1861_v41, %v1860_v38  ;;  %v2637_v45 = vadd.f32 %v2636_v42, %v2635_v37  ;;  %v600_v46 = vpop.f32.mrb[9].mxu0  ;;  %6463 = vmatmul.mubr.f32.gmra.mrb[114].mxu0 %v337_v35  ;;  %v2378_v48 = vmul.f32 %v6305_v43, %v6305_v43  ;;  %v1865_v57 = vsel %vm1847_vm0, %v6305_v43, 0.0  ;;  %v345_v35 = vld [vmem:[%s11592_s0 + $0x3d8] sm:$0xff] }
 0x11d   : > { %v1863_v49 = vsel %vm1847_vm0, %v600_v46, 0.0  ;;  %v2377_v50 = vmul.f32 %v600_v46, %v600_v46  ;;  %6465 = vmatprep.mubr.f32.mxu0 %v338_v39  ;;  %v346_v39 = vld [vmem:[%s11592_s0 + $0x3e0] sm:$0xff] }
 0x11e   : > { %v2639_v53 = vadd.f32 %v2638_v47, %v2637_v45  ;;  %v1864_v54 = vadd.f32 %v1863_v49, %v1862_v44  ;;  %v2642_v63 = vsel %vm1847_vm0, %v2378_v48, 0.0  ;;  %6571 = vmatmul.mubr.f32.gmra.mrb[58].mxu1 %v409_v40 }
 0x11f   : > { %v2640_v58 = vsel %vm1847_vm0, %v2377_v50, 0.0  ;;  %v6308_v59 = vpop.f32.mrb[10].mxu0  ;;  %6573 = vmatprep.mubr.f32.mxu1 %v410_v52 }
 0x120   : > { %v1866_v60 = vadd.f32 %v1865_v57, %v1864_v54  ;;  %v2641_v61 = vadd.f32 %v2640_v58, %v2639_v53  ;;  %v610_v62 = vpop.f32.mrb[11].mxu0  ;;  %6466 = vmatmul.mubr.f32.gmra.mrb[116].mxu0 %v339_v51  ;;  %v2380_v0 = vmul.f32 %v6308_v59, %v6308_v59  ;;  %v1869_v9 = vsel %vm1847_vm0, %v6308_v59, 0.0  ;;  %v347_v51 = vld [vmem:[%s11592_s0 + $0x3e8] sm:$0xff] }
 0x121   : > { %v1867_v1 = vsel %vm1847_vm0, %v610_v62, 0.0  ;;  %v2379_v2 = vmul.f32 %v610_v62, %v610_v62  ;;  %6468 = vmatprep.mubr.f32.mxu0 %v340_v55  ;;  %v348_v55 = vld [vmem:[%s11592_s0 + $0x3f0] sm:$0xff] }
 0x122   : > { %v2643_v5 = vadd.f32 %v2642_v63, %v2641_v61  ;;  %v1868_v6 = vadd.f32 %v1867_v1, %v1866_v60  ;;  %v2646_v15 = vsel %vm1847_vm0, %v2380_v0, 0.0  ;;  %6574 = vmatmul.mubr.f32.gmra.mrb[60].mxu1 %v411_v56 }
 0x123   : > { %v2644_v10 = vsel %vm1847_vm0, %v2379_v2, 0.0  ;;  %v6311_v11 = vpop.f32.mrb[12].mxu0  ;;  %6576 = vmatprep.mubr.f32.mxu1 %v412_v4 }
 0x124   : > { %v1870_v12 = vadd.f32 %v1869_v9, %v1868_v6  ;;  %v2645_v13 = vadd.f32 %v2644_v10, %v2643_v5  ;;  %v620_v14 = vpop.f32.mrb[13].mxu0  ;;  %6469 = vmatmul.mubr.f32.gmra.mrb[118].mxu0 %v341_v3  ;;  %v2382_v16 = vmul.f32 %v6311_v11, %v6311_v11  ;;  %v1873_v25 = vsel %vm1847_vm0, %v6311_v11, 0.0  ;;  %v349_v3 = vld [vmem:[%s11592_s0 + $0x3f8] sm:$0xff] }
 0x125   : > { %v1871_v17 = vsel %vm1847_vm0, %v620_v14, 0.0  ;;  %v2381_v18 = vmul.f32 %v620_v14, %v620_v14  ;;  %6471 = vmatprep.mubr.f32.mxu0 %v342_v7  ;;  %v413_v7 = vld [vmem:[%s11592_s0 + $0x5f8] sm:$0xff] }
 0x126   : > { %v2647_v21 = vadd.f32 %v2646_v15, %v2645_v13  ;;  %v1872_v22 = vadd.f32 %v1871_v17, %v1870_v12  ;;  %v2650_v31 = vsel %vm1847_vm0, %v2382_v16, 0.0  ;;  %6577 = vmatmul.mubr.f32.gmra.mrb[62].mxu1 %v413_v7 }
 0x127   : > { %v2648_v26 = vsel %vm1847_vm0, %v2381_v18, 0.0  ;;  %v6314_v27 = vpop.f32.mrb[14].mxu0  ;;  %v414_v18 = vld [vmem:[%s11592_s0 + $0x600] sm:$0xff] }
 0x128   : > { %v1874_v28 = vadd.f32 %v1873_v25, %v1872_v22  ;;  %v2649_v29 = vadd.f32 %v2648_v26, %v2647_v21  ;;  %v630_v30 = vpop.f32.mrb[15].mxu0  ;;  %6472 = vmatmul.mubr.f32.gmra.mrb[120].mxu0 %v343_v19  ;;  %v2384_v32 = vmul.f32 %v6314_v27, %v6314_v27  ;;  %v1877_v41 = vsel %vm1847_vm0, %v6314_v27, 0.0  ;;  %6579 = vmatprep.mubr.f32.mxu1 %v414_v18  ;;  %v415_v21 = vld [vmem:[%s11592_s0 + $0x608] sm:$0xff] }
 0x129   : > { %v1875_v33 = vsel %vm1847_vm0, %v630_v30, 0.0  ;;  %v2383_v34 = vmul.f32 %v630_v30, %v630_v30  ;;  %6474 = vmatprep.mubr.f32.mxu0 %v344_v23 }
 0x12a   : > { %v2651_v37 = vadd.f32 %v2650_v31, %v2649_v29  ;;  %v1876_v38 = vadd.f32 %v1875_v33, %v1874_v28  ;;  %v2654_v47 = vsel %vm1847_vm0, %v2384_v32, 0.0  ;;  %6580 = vmatmul.mubr.f32.gmra.mrb[64].mxu1 %v415_v21  ;;  %v416_v32 = vld [vmem:[%s11592_s0 + $0x610] sm:$0xff] }
 0x12b   : > { %v2652_v42 = vsel %vm1847_vm0, %v2383_v34, 0.0  ;;  %v6317_v43 = vpop.f32.mrb[16].mxu0  ;;  %6582 = vmatprep.mubr.f32.mxu1 %v416_v32 }
 0x12c   : > { %v1878_v44 = vadd.f32 %v1877_v41, %v1876_v38  ;;  %v2653_v45 = vadd.f32 %v2652_v42, %v2651_v37  ;;  %v640_v46 = vpop.f32.mrb[17].mxu0  ;;  %6475 = vmatmul.mubr.f32.gmra.mrb[122].mxu0 %v345_v35  ;;  %v2386_v48 = vmul.f32 %v6317_v43, %v6317_v43  ;;  %v1881_v57 = vsel %vm1847_vm0, %v6317_v43, 0.0  ;;  %v417_v35 = vld [vmem:[%s11592_s0 + $0x618] sm:$0xff] }
 0x12d   : > { %v1879_v49 = vsel %vm1847_vm0, %v640_v46, 0.0  ;;  %v2385_v50 = vmul.f32 %v640_v46, %v640_v46  ;;  %6477 = vmatprep.mubr.f32.mxu0 %v346_v39  ;;  %v418_v46 = vld [vmem:[%s11592_s0 + $0x620] sm:$0xff] }
 0x12e   : > { %v2655_v53 = vadd.f32 %v2654_v47, %v2653_v45  ;;  %v1880_v54 = vadd.f32 %v1879_v49, %v1878_v44  ;;  %v2658_v63 = vsel %vm1847_vm0, %v2386_v48, 0.0  ;;  %6583 = vmatmul.mubr.f32.gmra.mrb[66].mxu1 %v417_v35  ;;  %v419_v49 = vld [vmem:[%s11592_s0 + $0x628] sm:$0xff] }
 0x12f   : > { %v2656_v58 = vsel %vm1847_vm0, %v2385_v50, 0.0  ;;  %v6320_v59 = vpop.f32.mrb[18].mxu0  ;;  %6585 = vmatprep.mubr.f32.mxu1 %v418_v46 }
 0x130   : > { %v1882_v60 = vadd.f32 %v1881_v57, %v1880_v54  ;;  %v2657_v61 = vadd.f32 %v2656_v58, %v2655_v53  ;;  %v650_v62 = vpop.f32.mrb[19].mxu0  ;;  %6478 = vmatmul.mubr.f32.gmra.mrb[124].mxu0 %v347_v51  ;;  %v2388_v0 = vmul.f32 %v6320_v59, %v6320_v59  ;;  %v1885_v8 = vsel %vm1847_vm0, %v6320_v59, 0.0 }
 0x131   : > { %v1883_v1 = vsel %vm1847_vm0, %v650_v62, 0.0  ;;  %v2387_v2 = vmul.f32 %v650_v62, %v650_v62  ;;  %6480 = vmatprep.mubr.f32.mxu0 %v348_v55 }
 0x132   : > { %v2659_v5 = vadd.f32 %v2658_v63, %v2657_v61  ;;  %v1884_v6 = vadd.f32 %v1883_v1, %v1882_v60  ;;  %v2662_v14 = vsel %vm1847_vm0, %v2388_v0, 0.0  ;;  %6586 = vmatmul.mubr.f32.gmra.mrb[68].mxu1 %v419_v49  ;;  %v420_v60 = vld [vmem:[%s11592_s0 + $0x630] sm:$0xff]  ;;  %v421_v63 = vld [vmem:[%s11592_s0 + $0x638] sm:$0xff] }
 0x133   : > { %v2660_v9 = vsel %vm1847_vm0, %v2387_v2, 0.0  ;;  %v6323_v10 = vpop.f32.mrb[20].mxu0  ;;  %6588 = vmatprep.mubr.f32.mxu1 %v420_v60 }
 0x134   : > { %v1886_v11 = vadd.f32 %v1885_v8, %v1884_v6  ;;  %v2661_v12 = vadd.f32 %v2660_v9, %v2659_v5  ;;  %v660_v13 = vpop.f32.mrb[21].mxu0  ;;  %6481 = vmatmul.mubr.f32.gmra.mrb[126].mxu0 %v349_v3  ;;  %v2390_v15 = vmul.f32 %v6323_v10, %v6323_v10  ;;  %v1889_v22 = vsel %vm1847_vm0, %v6323_v10, 0.0  ;;  %v422_v10 = vld [vmem:[%s11592_s0 + $0x640] sm:$0xff] }
 0x135   : > { %v1887_v16 = vsel %vm1847_vm0, %v660_v13, 0.0  ;;  %v2389_v17 = vmul.f32 %v660_v13, %v660_v13  ;;  %v423_v13 = vld [vmem:[%s11592_s0 + $0x648] sm:$0xff] }
 0x136   : > { %v2663_v19 = vadd.f32 %v2662_v14, %v2661_v12  ;;  %v1888_v20 = vadd.f32 %v1887_v16, %v1886_v11  ;;  %v2666_v28 = vsel %vm1847_vm0, %v2390_v15, 0.0  ;;  %6589 = vmatmul.mubr.f32.gmra.mrb[70].mxu1 %v421_v63 }
 0x137   : > { %v2664_v23 = vsel %vm1847_vm0, %v2389_v17, 0.0  ;;  %v6326_v24 = vpop.f32.mrb[22].mxu0  ;;  %6591 = vmatprep.mubr.f32.mxu1 %v422_v10 }
 0x138   : > { %v1890_v25 = vadd.f32 %v1889_v22, %v1888_v20  ;;  %v2665_v26 = vadd.f32 %v2664_v23, %v2663_v19  ;;  %v670_v27 = vpop.f32.mrb[23].mxu0  ;;  %v2392_v29 = vmul.f32 %v6326_v24, %v6326_v24  ;;  %v1893_v36 = vsel %vm1847_vm0, %v6326_v24, 0.0  ;;  %v424_v24 = vld [vmem:[%s11592_s0 + $0x650] sm:$0xff] }
 0x139   : > { %v1891_v30 = vsel %vm1847_vm0, %v670_v27, 0.0  ;;  %v2391_v31 = vmul.f32 %v670_v27, %v670_v27  ;;  %v425_v27 = vld [vmem:[%s11592_s0 + $0x658] sm:$0xff] }
 0x13a   : > { %v2667_v33 = vadd.f32 %v2666_v28, %v2665_v26  ;;  %v1892_v34 = vadd.f32 %v1891_v30, %v1890_v25  ;;  %v2670_v42 = vsel %vm1847_vm0, %v2392_v29, 0.0  ;;  %6592 = vmatmul.mubr.f32.gmra.mrb[72].mxu1 %v423_v13 }
 0x13b   : > { %v2668_v37 = vsel %vm1847_vm0, %v2391_v31, 0.0  ;;  %v6329_v38 = vpop.f32.mrb[24].mxu0  ;;  %6594 = vmatprep.mubr.f32.mxu1 %v424_v24 }
 0x13c   : > { %v1894_v39 = vadd.f32 %v1893_v36, %v1892_v34  ;;  %v2669_v40 = vadd.f32 %v2668_v37, %v2667_v33  ;;  %v680_v41 = vpop.f32.mrb[25].mxu0  ;;  %v2394_v43 = vmul.f32 %v6329_v38, %v6329_v38  ;;  %v1897_v50 = vsel %vm1847_vm0, %v6329_v38, 0.0  ;;  %v426_v38 = vld [vmem:[%s11592_s0 + $0x660] sm:$0xff] }
 0x13d   : > { %v1895_v44 = vsel %vm1847_vm0, %v680_v41, 0.0  ;;  %v2393_v45 = vmul.f32 %v680_v41, %v680_v41  ;;  %v427_v41 = vld [vmem:[%s11592_s0 + $0x668] sm:$0xff] }
 0x13e   : > { %v2671_v47 = vadd.f32 %v2670_v42, %v2669_v40  ;;  %v1896_v48 = vadd.f32 %v1895_v44, %v1894_v39  ;;  %v2674_v56 = vsel %vm1847_vm0, %v2394_v43, 0.0  ;;  %6595 = vmatmul.mubr.f32.gmra.mrb[74].mxu1 %v425_v27 }
 0x13f   : > { %v2672_v51 = vsel %vm1847_vm0, %v2393_v45, 0.0  ;;  %v6332_v52 = vpop.f32.mrb[26].mxu0  ;;  %6597 = vmatprep.mubr.f32.mxu1 %v426_v38 }
 0x140   : > { %v1898_v53 = vadd.f32 %v1897_v50, %v1896_v48  ;;  %v2673_v54 = vadd.f32 %v2672_v51, %v2671_v47  ;;  %v690_v55 = vpop.f32.mrb[27].mxu0  ;;  %v2396_v57 = vmul.f32 %v6332_v52, %v6332_v52  ;;  %v1901_v0 = vsel %vm1847_vm0, %v6332_v52, 0.0  ;;  %v428_v52 = vld [vmem:[%s11592_s0 + $0x670] sm:$0xff] }
 0x141   : > { %v1899_v58 = vsel %vm1847_vm0, %v690_v55, 0.0  ;;  %v2395_v59 = vmul.f32 %v690_v55, %v690_v55  ;;  %v429_v55 = vld [vmem:[%s11592_s0 + $0x678] sm:$0xff] }
 0x142   : > { %v2675_v61 = vadd.f32 %v2674_v56, %v2673_v54  ;;  %v1900_v62 = vadd.f32 %v1899_v58, %v1898_v53  ;;  %v2678_v6 = vsel %vm1847_vm0, %v2396_v57, 0.0  ;;  %6598 = vmatmul.mubr.f32.gmra.mrb[76].mxu1 %v427_v41 }
 0x143   : > { %v2676_v1 = vsel %vm1847_vm0, %v2395_v59, 0.0  ;;  %v6335_v2 = vpop.f32.mrb[28].mxu0  ;;  %6600 = vmatprep.mubr.f32.mxu1 %v428_v52 }
 0x144   : > { %v1902_v3 = vadd.f32 %v1901_v0, %v1900_v62  ;;  %v2677_v4 = vadd.f32 %v2676_v1, %v2675_v61  ;;  %v700_v5 = vpop.f32.mrb[29].mxu0  ;;  %v2398_v7 = vmul.f32 %v6335_v2, %v6335_v2  ;;  %v1905_v14 = vsel %vm1847_vm0, %v6335_v2, 0.0  ;;  %v430_v2 = vld [vmem:[%s11592_s0 + $0x680] sm:$0xff] }
 0x145   : > { %v1903_v8 = vsel %vm1847_vm0, %v700_v5, 0.0  ;;  %v2397_v9 = vmul.f32 %v700_v5, %v700_v5  ;;  %v431_v5 = vld [vmem:[%s11592_s0 + $0x688] sm:$0xff] }
 0x146   : > { %v2679_v11 = vadd.f32 %v2678_v6, %v2677_v4  ;;  %v1904_v12 = vadd.f32 %v1903_v8, %v1902_v3  ;;  %v2682_v20 = vsel %vm1847_vm0, %v2398_v7, 0.0  ;;  %6601 = vmatmul.mubr.f32.gmra.mrb[78].mxu1 %v429_v55 }
 0x147   : > { %v2680_v15 = vsel %vm1847_vm0, %v2397_v9, 0.0  ;;  %v6338_v16 = vpop.f32.mrb[30].mxu0  ;;  %6603 = vmatprep.mubr.f32.mxu1 %v430_v2 }
 0x148   : > { %v1906_v17 = vadd.f32 %v1905_v14, %v1904_v12  ;;  %v2681_v18 = vadd.f32 %v2680_v15, %v2679_v11  ;;  %v710_v19 = vpop.f32.mrb[31].mxu0  ;;  %v2400_v21 = vmul.f32 %v6338_v16, %v6338_v16  ;;  %v1909_v28 = vsel %vm1847_vm0, %v6338_v16, 0.0  ;;  %v432_v16 = vld [vmem:[%s11592_s0 + $0x690] sm:$0xff] }
 0x149   : > { %v1907_v22 = vsel %vm1847_vm0, %v710_v19, 0.0  ;;  %v2399_v23 = vmul.f32 %v710_v19, %v710_v19  ;;  %v433_v19 = vld [vmem:[%s11592_s0 + $0x698] sm:$0xff] }
 0x14a   : > { %v2683_v25 = vadd.f32 %v2682_v20, %v2681_v18  ;;  %v1908_v26 = vadd.f32 %v1907_v22, %v1906_v17  ;;  %v2686_v34 = vsel %vm1847_vm0, %v2400_v21, 0.0  ;;  %6604 = vmatmul.mubr.f32.gmra.mrb[80].mxu1 %v431_v5 }
 0x14b   : > { %v2684_v29 = vsel %vm1847_vm0, %v2399_v23, 0.0  ;;  %v6341_v30 = vpop.f32.mrb[32].mxu0  ;;  %6606 = vmatprep.mubr.f32.mxu1 %v432_v16 }
 0x14c   : > { %v1910_v31 = vadd.f32 %v1909_v28, %v1908_v26  ;;  %v2685_v32 = vadd.f32 %v2684_v29, %v2683_v25  ;;  %v720_v33 = vpop.f32.mrb[33].mxu0  ;;  %v2402_v35 = vmul.f32 %v6341_v30, %v6341_v30  ;;  %v1913_v42 = vsel %vm1847_vm0, %v6341_v30, 0.0  ;;  %v434_v30 = vld [vmem:[%s11592_s0 + $0x6a0] sm:$0xff] }
 0x14d   : > { %v1911_v36 = vsel %vm1847_vm0, %v720_v33, 0.0  ;;  %v2401_v37 = vmul.f32 %v720_v33, %v720_v33  ;;  %v435_v33 = vld [vmem:[%s11592_s0 + $0x6a8] sm:$0xff] }
 0x14e   : > { %v2687_v39 = vadd.f32 %v2686_v34, %v2685_v32  ;;  %v1912_v40 = vadd.f32 %v1911_v36, %v1910_v31  ;;  %v2690_v48 = vsel %vm1847_vm0, %v2402_v35, 0.0  ;;  %6607 = vmatmul.mubr.f32.gmra.mrb[82].mxu1 %v433_v19 }
 0x14f   : > { %v2688_v43 = vsel %vm1847_vm0, %v2401_v37, 0.0  ;;  %v6344_v44 = vpop.f32.mrb[34].mxu0  ;;  %6609 = vmatprep.mubr.f32.mxu1 %v434_v30 }
 0x150   : > { %v1914_v45 = vadd.f32 %v1913_v42, %v1912_v40  ;;  %v2689_v46 = vadd.f32 %v2688_v43, %v2687_v39  ;;  %v730_v47 = vpop.f32.mrb[35].mxu0  ;;  %v2404_v49 = vmul.f32 %v6344_v44, %v6344_v44  ;;  %v1917_v56 = vsel %vm1847_vm0, %v6344_v44, 0.0  ;;  %v436_v44 = vld [vmem:[%s11592_s0 + $0x6b0] sm:$0xff] }
 0x151   : > { %v1915_v50 = vsel %vm1847_vm0, %v730_v47, 0.0  ;;  %v2403_v51 = vmul.f32 %v730_v47, %v730_v47  ;;  %v437_v47 = vld [vmem:[%s11592_s0 + $0x6b8] sm:$0xff] }
 0x152   : > { %v2691_v53 = vadd.f32 %v2690_v48, %v2689_v46  ;;  %v1916_v54 = vadd.f32 %v1915_v50, %v1914_v45  ;;  %v2694_v62 = vsel %vm1847_vm0, %v2404_v49, 0.0  ;;  %6610 = vmatmul.mubr.f32.gmra.mrb[84].mxu1 %v435_v33 }
 0x153   : > { %v2692_v57 = vsel %vm1847_vm0, %v2403_v51, 0.0  ;;  %v6347_v58 = vpop.f32.mrb[36].mxu0  ;;  %6612 = vmatprep.mubr.f32.mxu1 %v436_v44 }
 0x154   : > { %v1918_v59 = vadd.f32 %v1917_v56, %v1916_v54  ;;  %v2693_v60 = vadd.f32 %v2692_v57, %v2691_v53  ;;  %v740_v61 = vpop.f32.mrb[37].mxu0  ;;  %v2406_v63 = vmul.f32 %v6347_v58, %v6347_v58  ;;  %v1921_v6 = vsel %vm1847_vm0, %v6347_v58, 0.0  ;;  %v438_v58 = vld [vmem:[%s11592_s0 + $0x6c0] sm:$0xff] }
 0x155   : > { %v1919_v0 = vsel %vm1847_vm0, %v740_v61, 0.0  ;;  %v2405_v1 = vmul.f32 %v740_v61, %v740_v61  ;;  %v439_v61 = vld [vmem:[%s11592_s0 + $0x6c8] sm:$0xff] }
 0x156   : > { %v2695_v3 = vadd.f32 %v2694_v62, %v2693_v60  ;;  %v1920_v4 = vadd.f32 %v1919_v0, %v1918_v59  ;;  %v2698_v12 = vsel %vm1847_vm0, %v2406_v63, 0.0  ;;  %6613 = vmatmul.mubr.f32.gmra.mrb[86].mxu1 %v437_v47 }
 0x157   : > { %v2696_v7 = vsel %vm1847_vm0, %v2405_v1, 0.0  ;;  %v6350_v8 = vpop.f32.mrb[38].mxu0  ;;  %6615 = vmatprep.mubr.f32.mxu1 %v438_v58 }
 0x158   : > { %v1922_v9 = vadd.f32 %v1921_v6, %v1920_v4  ;;  %v2697_v10 = vadd.f32 %v2696_v7, %v2695_v3  ;;  %v750_v11 = vpop.f32.mrb[39].mxu0  ;;  %v2408_v13 = vmul.f32 %v6350_v8, %v6350_v8  ;;  %v1925_v20 = vsel %vm1847_vm0, %v6350_v8, 0.0  ;;  %v440_v8 = vld [vmem:[%s11592_s0 + $0x6d0] sm:$0xff] }
 0x159   : > { %v1923_v14 = vsel %vm1847_vm0, %v750_v11, 0.0  ;;  %v2407_v15 = vmul.f32 %v750_v11, %v750_v11  ;;  %v441_v11 = vld [vmem:[%s11592_s0 + $0x6d8] sm:$0xff] }
 0x15a   : > { %v2699_v17 = vadd.f32 %v2698_v12, %v2697_v10  ;;  %v1924_v18 = vadd.f32 %v1923_v14, %v1922_v9  ;;  %v2702_v26 = vsel %vm1847_vm0, %v2408_v13, 0.0  ;;  %6616 = vmatmul.mubr.f32.gmra.mrb[88].mxu1 %v439_v61 }
 0x15b   : > { %v2700_v21 = vsel %vm1847_vm0, %v2407_v15, 0.0  ;;  %v6353_v22 = vpop.f32.mrb[40].mxu0  ;;  %6618 = vmatprep.mubr.f32.mxu1 %v440_v8 }
 0x15c   : > { %v1926_v23 = vadd.f32 %v1925_v20, %v1924_v18  ;;  %v2701_v24 = vadd.f32 %v2700_v21, %v2699_v17  ;;  %v760_v25 = vpop.f32.mrb[41].mxu0  ;;  %v2410_v27 = vmul.f32 %v6353_v22, %v6353_v22  ;;  %v1929_v34 = vsel %vm1847_vm0, %v6353_v22, 0.0  ;;  %v442_v22 = vld [vmem:[%s11592_s0 + $0x6e0] sm:$0xff] }
 0x15d   : > { %v1927_v28 = vsel %vm1847_vm0, %v760_v25, 0.0  ;;  %v2409_v29 = vmul.f32 %v760_v25, %v760_v25  ;;  %v443_v25 = vld [vmem:[%s11592_s0 + $0x6e8] sm:$0xff] }
 0x15e   : > { %v2703_v31 = vadd.f32 %v2702_v26, %v2701_v24  ;;  %v1928_v32 = vadd.f32 %v1927_v28, %v1926_v23  ;;  %v2706_v40 = vsel %vm1847_vm0, %v2410_v27, 0.0  ;;  %6619 = vmatmul.mubr.f32.gmra.mrb[90].mxu1 %v441_v11 }
 0x15f   : > { %v2704_v35 = vsel %vm1847_vm0, %v2409_v29, 0.0  ;;  %v6356_v36 = vpop.f32.mrb[42].mxu0  ;;  %6621 = vmatprep.mubr.f32.mxu1 %v442_v22 }
 0x160   : > { %v1930_v37 = vadd.f32 %v1929_v34, %v1928_v32  ;;  %v2705_v38 = vadd.f32 %v2704_v35, %v2703_v31  ;;  %v770_v39 = vpop.f32.mrb[43].mxu0  ;;  %v2412_v41 = vmul.f32 %v6356_v36, %v6356_v36  ;;  %v1933_v48 = vsel %vm1847_vm0, %v6356_v36, 0.0  ;;  %v444_v36 = vld [vmem:[%s11592_s0 + $0x6f0] sm:$0xff] }
 0x161   : > { %v1931_v42 = vsel %vm1847_vm0, %v770_v39, 0.0  ;;  %v2411_v43 = vmul.f32 %v770_v39, %v770_v39  ;;  %v445_v39 = vld [vmem:[%s11592_s0 + $0x6f8] sm:$0xff] }
 0x162   : > { %v2707_v45 = vadd.f32 %v2706_v40, %v2705_v38  ;;  %v1932_v46 = vadd.f32 %v1931_v42, %v1930_v37  ;;  %v2710_v54 = vsel %vm1847_vm0, %v2412_v41, 0.0  ;;  %6622 = vmatmul.mubr.f32.gmra.mrb[92].mxu1 %v443_v25 }
 0x163   : > { %v2708_v49 = vsel %vm1847_vm0, %v2411_v43, 0.0  ;;  %v6359_v50 = vpop.f32.mrb[44].mxu0  ;;  %6624 = vmatprep.mubr.f32.mxu1 %v444_v36 }
 0x164   : > { %v1934_v51 = vadd.f32 %v1933_v48, %v1932_v46  ;;  %v2709_v52 = vadd.f32 %v2708_v49, %v2707_v45  ;;  %v780_v53 = vpop.f32.mrb[45].mxu0  ;;  %v2414_v55 = vmul.f32 %v6359_v50, %v6359_v50  ;;  %v1937_v62 = vsel %vm1847_vm0, %v6359_v50, 0.0  ;;  %v446_v50 = vld [vmem:[%s11592_s0 + $0x700] sm:$0xff] }
 0x165   : > { %v1935_v56 = vsel %vm1847_vm0, %v780_v53, 0.0  ;;  %v2413_v57 = vmul.f32 %v780_v53, %v780_v53  ;;  %v447_v53 = vld [vmem:[%s11592_s0 + $0x708] sm:$0xff] }
 0x166   : > { %v2711_v59 = vadd.f32 %v2710_v54, %v2709_v52  ;;  %v1936_v60 = vadd.f32 %v1935_v56, %v1934_v51  ;;  %v2714_v4 = vsel %vm1847_vm0, %v2414_v55, 0.0  ;;  %6625 = vmatmul.mubr.f32.gmra.mrb[94].mxu1 %v445_v39 }
 0x167   : > { %v2712_v63 = vsel %vm1847_vm0, %v2413_v57, 0.0  ;;  %v6362_v0 = vpop.f32.mrb[46].mxu0  ;;  %6627 = vmatprep.mubr.f32.mxu1 %v446_v50 }
 0x168   : > { %v1938_v1 = vadd.f32 %v1937_v62, %v1936_v60  ;;  %v2713_v2 = vadd.f32 %v2712_v63, %v2711_v59  ;;  %v790_v3 = vpop.f32.mrb[47].mxu0  ;;  %v2416_v5 = vmul.f32 %v6362_v0, %v6362_v0  ;;  %v1941_v12 = vsel %vm1847_vm0, %v6362_v0, 0.0  ;;  %v448_v0 = vld [vmem:[%s11592_s0 + $0x710] sm:$0xff] }
 0x169   : > { %v1939_v6 = vsel %vm1847_vm0, %v790_v3, 0.0  ;;  %v2415_v7 = vmul.f32 %v790_v3, %v790_v3  ;;  %v449_v3 = vld [vmem:[%s11592_s0 + $0x718] sm:$0xff] }
 0x16a   : > { %v2715_v9 = vadd.f32 %v2714_v4, %v2713_v2  ;;  %v1940_v10 = vadd.f32 %v1939_v6, %v1938_v1  ;;  %v2718_v18 = vsel %vm1847_vm0, %v2416_v5, 0.0  ;;  %6628 = vmatmul.mubr.f32.gmra.mrb[96].mxu1 %v447_v53 }
 0x16b   : > { %v2716_v13 = vsel %vm1847_vm0, %v2415_v7, 0.0  ;;  %v6365_v14 = vpop.f32.mrb[48].mxu0  ;;  %6630 = vmatprep.mubr.f32.mxu1 %v448_v0 }
 0x16c   : > { %v1942_v15 = vadd.f32 %v1941_v12, %v1940_v10  ;;  %v2717_v16 = vadd.f32 %v2716_v13, %v2715_v9  ;;  %v800_v17 = vpop.f32.mrb[49].mxu0  ;;  %v2418_v19 = vmul.f32 %v6365_v14, %v6365_v14  ;;  %v1945_v26 = vsel %vm1847_vm0, %v6365_v14, 0.0  ;;  %v450_v14 = vld [vmem:[%s11592_s0 + $0x720] sm:$0xff] }
 0x16d   : > { %v1943_v20 = vsel %vm1847_vm0, %v800_v17, 0.0  ;;  %v2417_v21 = vmul.f32 %v800_v17, %v800_v17  ;;  %v451_v17 = vld [vmem:[%s11592_s0 + $0x728] sm:$0xff] }
 0x16e   : > { %v2719_v23 = vadd.f32 %v2718_v18, %v2717_v16  ;;  %v1944_v24 = vadd.f32 %v1943_v20, %v1942_v15  ;;  %v2722_v32 = vsel %vm1847_vm0, %v2418_v19, 0.0  ;;  %6631 = vmatmul.mubr.f32.gmra.mrb[98].mxu1 %v449_v3 }
 0x16f   : > { %v2720_v27 = vsel %vm1847_vm0, %v2417_v21, 0.0  ;;  %v6368_v28 = vpop.f32.mrb[50].mxu0  ;;  %6633 = vmatprep.mubr.f32.mxu1 %v450_v14 }
 0x170   : > { %v1946_v29 = vadd.f32 %v1945_v26, %v1944_v24  ;;  %v2721_v30 = vadd.f32 %v2720_v27, %v2719_v23  ;;  %v810_v31 = vpop.f32.mrb[51].mxu0  ;;  %v2420_v33 = vmul.f32 %v6368_v28, %v6368_v28  ;;  %v1949_v40 = vsel %vm1847_vm0, %v6368_v28, 0.0  ;;  %v452_v28 = vld [vmem:[%s11592_s0 + $0x730] sm:$0xff] }
 0x171   : > { %v1947_v34 = vsel %vm1847_vm0, %v810_v31, 0.0  ;;  %v2419_v35 = vmul.f32 %v810_v31, %v810_v31  ;;  %v453_v31 = vld [vmem:[%s11592_s0 + $0x738] sm:$0xff] }
 0x172   : > { %v2723_v37 = vadd.f32 %v2722_v32, %v2721_v30  ;;  %v1948_v38 = vadd.f32 %v1947_v34, %v1946_v29  ;;  %v2726_v46 = vsel %vm1847_vm0, %v2420_v33, 0.0  ;;  %6634 = vmatmul.mubr.f32.gmra.mrb[100].mxu1 %v451_v17 }
 0x173   : > { %v2724_v41 = vsel %vm1847_vm0, %v2419_v35, 0.0  ;;  %v6371_v42 = vpop.f32.mrb[52].mxu0  ;;  %6636 = vmatprep.mubr.f32.mxu1 %v452_v28  ;;  %v461_v28 = vld [vmem:[%s11592_s0 + $0x778] sm:$0xff] }
 0x174   : > { %v1950_v43 = vadd.f32 %v1949_v40, %v1948_v38  ;;  %v2725_v44 = vadd.f32 %v2724_v41, %v2723_v37  ;;  %v820_v45 = vpop.f32.mrb[53].mxu0  ;;  %v2422_v47 = vmul.f32 %v6371_v42, %v6371_v42  ;;  %v1953_v54 = vsel %vm1847_vm0, %v6371_v42, 0.0  ;;  %v454_v42 = vld [vmem:[%s11592_s0 + $0x740] sm:$0xff] }
 0x175   : > { %v1951_v48 = vsel %vm1847_vm0, %v820_v45, 0.0  ;;  %v2421_v49 = vmul.f32 %v820_v45, %v820_v45  ;;  %v455_v45 = vld [vmem:[%s11592_s0 + $0x748] sm:$0xff] }
 0x176   : > { %v2727_v51 = vadd.f32 %v2726_v46, %v2725_v44  ;;  %v1952_v52 = vadd.f32 %v1951_v48, %v1950_v43  ;;  %v2730_v60 = vsel %vm1847_vm0, %v2422_v47, 0.0  ;;  %6637 = vmatmul.mubr.f32.gmra.mrb[102].mxu1 %v453_v31 }
 0x177   : > { %v2728_v55 = vsel %vm1847_vm0, %v2421_v49, 0.0  ;;  %v6374_v56 = vpop.f32.mrb[54].mxu0  ;;  %6639 = vmatprep.mubr.f32.mxu1 %v454_v42 }
 0x178   : > { %v1954_v57 = vadd.f32 %v1953_v54, %v1952_v52  ;;  %v2729_v58 = vadd.f32 %v2728_v55, %v2727_v51  ;;  %v830_v59 = vpop.f32.mrb[55].mxu0  ;;  %v2424_v61 = vmul.f32 %v6374_v56, %v6374_v56  ;;  %v1957_v4 = vsel %vm1847_vm0, %v6374_v56, 0.0  ;;  %v456_v56 = vld [vmem:[%s11592_s0 + $0x750] sm:$0xff] }
 0x179   : > { %v1955_v62 = vsel %vm1847_vm0, %v830_v59, 0.0  ;;  %v2423_v63 = vmul.f32 %v830_v59, %v830_v59  ;;  %v8165_v59 = vpop.f32.mrb[0].mxu1 }
 0x17a   : > { %v2731_v1 = vadd.f32 %v2730_v60, %v2729_v58  ;;  %v1956_v2 = vadd.f32 %v1955_v62, %v1954_v57  ;;  %v2734_v10 = vsel %vm1847_vm0, %v2424_v61, 0.0  ;;  %6640 = vmatmul.mubr.f32.gmra.mrb[104].mxu1 %v455_v45  ;;  %v457_v60 = vld [vmem:[%s11592_s0 + $0x758] sm:$0xff]  ;;  %v8172_v0 = vpop.f32.mrb[1].mxu1 }
 0x17b   : > { %v2732_v5 = vsel %vm1847_vm0, %v2423_v63, 0.0  ;;  %v6377_v6 = vpop.f32.mrb[56].mxu0  ;;  %6642 = vmatprep.mubr.f32.mxu1 %v456_v56  ;;  %v464_v56 = vld [vmem:[%s11592_s0 + $0x790] sm:$0xff] }
 0x17c   : > { %v1958_v7 = vadd.f32 %v1957_v4, %v1956_v2  ;;  %v2733_v8 = vadd.f32 %v2732_v5, %v2731_v1  ;;  %v840_v9 = vpop.f32.mrb[57].mxu0  ;;  %v2426_v11 = vmul.f32 %v6377_v6, %v6377_v6  ;;  %v1961_v18 = vsel %vm1847_vm0, %v6377_v6, 0.0 }
 0x17d   : > { %v1959_v12 = vsel %vm1847_vm0, %v840_v9, 0.0  ;;  %v2425_v13 = vmul.f32 %v840_v9, %v840_v9 }
 0x17e   : > { %v2735_v15 = vadd.f32 %v2734_v10, %v2733_v8  ;;  %v1960_v16 = vadd.f32 %v1959_v12, %v1958_v7  ;;  %v2738_v24 = vsel %vm1847_vm0, %v2426_v11, 0.0  ;;  %6643 = vmatmul.mubr.f32.gmra.mrb[106].mxu1 %v457_v60  ;;  %v458_v8 = vld [vmem:[%s11592_s0 + $0x760] sm:$0xff]  ;;  %v8179_v11 = vpop.f32.mrb[2].mxu1  ;;  %v459_v12 = vld [vmem:[%s11592_s0 + $0x768] sm:$0xff] }
 0x17f   : > { %v2736_v19 = vsel %vm1847_vm0, %v2425_v13, 0.0  ;;  %v6380_v20 = vpop.f32.mrb[58].mxu0  ;;  %6645 = vmatprep.mubr.f32.mxu1 %v458_v8 }
 0x180   : > { %v1962_v21 = vadd.f32 %v1961_v18, %v1960_v16  ;;  %v2737_v22 = vadd.f32 %v2736_v19, %v2735_v15  ;;  %v850_v23 = vpop.f32.mrb[59].mxu0  ;;  %v2428_v25 = vmul.f32 %v6380_v20, %v6380_v20  ;;  %v1965_v32 = vsel %vm1847_vm0, %v6380_v20, 0.0  ;;  %v8186_v16 = vpop.f32.mrb[3].mxu1 }
 0x181   : > { %v1963_v26 = vsel %vm1847_vm0, %v850_v23, 0.0  ;;  %v2427_v27 = vmul.f32 %v850_v23, %v850_v23 }
 0x182   : > { %v2739_v29 = vadd.f32 %v2738_v24, %v2737_v22  ;;  %v1964_v30 = vadd.f32 %v1963_v26, %v1962_v21  ;;  %v2742_v38 = vsel %vm1847_vm0, %v2428_v25, 0.0  ;;  %6646 = vmatmul.mubr.f32.gmra.mrb[108].mxu1 %v459_v12  ;;  %v460_v24 = vld [vmem:[%s11592_s0 + $0x770] sm:$0xff] }
 0x183   : > { %v2740_v33 = vsel %vm1847_vm0, %v2427_v27, 0.0  ;;  %v6383_v34 = vpop.f32.mrb[60].mxu0  ;;  %v8193_v27 = vpop.f32.mrb[4].mxu1  ;;  %6648 = vmatprep.mubr.f32.mxu1 %v460_v24 }
 0x184   : > { %v1966_v35 = vadd.f32 %v1965_v32, %v1964_v30  ;;  %v2741_v36 = vadd.f32 %v2740_v33, %v2739_v29  ;;  %v860_v37 = vpop.f32.mrb[61].mxu0  ;;  %v2430_v39 = vmul.f32 %v6383_v34, %v6383_v34  ;;  %v1969_v46 = vsel %vm1847_vm0, %v6383_v34, 0.0  ;;  %v8200_v32 = vpop.f32.mrb[5].mxu1 }
 0x185   : > { %v1967_v40 = vsel %vm1847_vm0, %v860_v37, 0.0  ;;  %v2429_v41 = vmul.f32 %v860_v37, %v860_v37 }
 0x186   : > { %v2743_v43 = vadd.f32 %v2742_v38, %v2741_v36  ;;  %v1968_v44 = vadd.f32 %v1967_v40, %v1966_v35  ;;  %v2746_v52 = vsel %vm1847_vm0, %v2430_v39, 0.0  ;;  %6649 = vmatmul.mubr.f32.gmra.mrb[110].mxu1 %v461_v28  ;;  %v462_v40 = vld [vmem:[%s11592_s0 + $0x780] sm:$0xff] }
 0x187   : > { %v2744_v47 = vsel %vm1847_vm0, %v2429_v41, 0.0  ;;  %v6386_v48 = vpop.f32.mrb[62].mxu0  ;;  %6651 = vmatprep.mubr.f32.mxu1 %v462_v40 }
 0x188   : > { %v1970_v49 = vadd.f32 %v1969_v46, %v1968_v44  ;;  %v2745_v50 = vadd.f32 %v2744_v47, %v2743_v43  ;;  %v870_v51 = vpop.f32.mrb[63].mxu0  ;;  %v2432_v53 = vmul.f32 %v6386_v48, %v6386_v48  ;;  %v1973_v61 = vsel %vm1847_vm0, %v6386_v48, 0.0  ;;  %v8207_v43 = vpop.f32.mrb[6].mxu1  ;;  %v463_v44 = vld [vmem:[%s11592_s0 + $0x788] sm:$0xff] }
 0x189   : > { %v1971_v54 = vsel %vm1847_vm0, %v870_v51, 0.0  ;;  %v2431_v55 = vmul.f32 %v870_v51, %v870_v51  ;;  %v8214_v48 = vpop.f32.mrb[7].mxu1 }
 0x18a   : > { %v2747_v57 = vadd.f32 %v2746_v52, %v2745_v50  ;;  %v1972_v58 = vadd.f32 %v1971_v54, %v1970_v49  ;;  %v2750_v4 = vsel %vm1847_vm0, %v2432_v53, 0.0  ;;  %6652 = vmatmul.mubr.f32.gmra.mrb[112].mxu1 %v463_v44  ;;  %v8221_v60 = vpop.f32.mrb[8].mxu1 }
 0x18b   : > { %v2748_v62 = vsel %vm1847_vm0, %v2431_v55, 0.0  ;;  %v6389_v63 = vpop.f32.mrb[64].mxu0  ;;  %6654 = vmatprep.mubr.f32.mxu1 %v464_v56 }
 0x18c   : > { %v1974_v1 = vadd.f32 %v1973_v61, %v1972_v58  ;;  %v2749_v2 = vadd.f32 %v2748_v62, %v2747_v57  ;;  %v880_v3 = vpop.f32.mrb[65].mxu0  ;;  %v2434_v5 = vmul.f32 %v6389_v63, %v6389_v63  ;;  %v1977_v13 = vsel %vm1847_vm0, %v6389_v63, 0.0  ;;  %v465_v61 = vld [vmem:[%s11592_s0 + $0x798] sm:$0xff] }
 0x18d   : > { %v1975_v6 = vsel %vm1847_vm0, %v880_v3, 0.0  ;;  %v2433_v7 = vmul.f32 %v880_v3, %v880_v3 }
 0x18e   : > { %v2751_v9 = vadd.f32 %v2750_v4, %v2749_v2  ;;  %v1976_v10 = vadd.f32 %v1975_v6, %v1974_v1  ;;  %v2754_v20 = vsel %vm1847_vm0, %v2434_v5, 0.0  ;;  %v8228_v2 = vpop.f32.mrb[9].mxu1  ;;  %6655 = vmatmul.mubr.f32.gmra.mrb[114].mxu1 %v465_v61 }
 0x18f   : > { %v2752_v14 = vsel %vm1847_vm0, %v2433_v7, 0.0  ;;  %v6392_v15 = vpop.f32.mrb[66].mxu0 }
 0x190   : > { %v1978_v17 = vadd.f32 %v1977_v13, %v1976_v10  ;;  %v2753_v18 = vadd.f32 %v2752_v14, %v2751_v9  ;;  %v890_v19 = vpop.f32.mrb[67].mxu0  ;;  %v2436_v21 = vmul.f32 %v6392_v15, %v6392_v15  ;;  %v1981_v29 = vsel %vm1847_vm0, %v6392_v15, 0.0  ;;  %v466_v10 = vld [vmem:[%s11592_s0 + $0x7a0] sm:$0xff]  ;;  %v8235_v14 = vpop.f32.mrb[10].mxu1  ;;  %v467_v15 = vld [vmem:[%s11592_s0 + $0x7a8] sm:$0xff] }
 0x191   : > { %v1979_v22 = vsel %vm1847_vm0, %v890_v19, 0.0  ;;  %v2435_v23 = vmul.f32 %v890_v19, %v890_v19  ;;  %6657 = vmatprep.mubr.f32.mxu1 %v466_v10 }
 0x192   : > { %v2755_v25 = vadd.f32 %v2754_v20, %v2753_v18  ;;  %v1980_v26 = vadd.f32 %v1979_v22, %v1978_v17  ;;  %v2758_v36 = vsel %vm1847_vm0, %v2436_v21, 0.0  ;;  %v8242_v20 = vpop.f32.mrb[11].mxu1  ;;  %6658 = vmatmul.mubr.f32.gmra.mrb[116].mxu1 %v467_v15 }
 0x193   : > { %v2756_v30 = vsel %vm1847_vm0, %v2435_v23, 0.0  ;;  %v6395_v31 = vpop.f32.mrb[68].mxu0 }
 0x194   : > { %v1982_v33 = vadd.f32 %v1981_v29, %v1980_v26  ;;  %v2757_v34 = vadd.f32 %v2756_v30, %v2755_v25  ;;  %v900_v35 = vpop.f32.mrb[69].mxu0  ;;  %v2438_v37 = vmul.f32 %v6395_v31, %v6395_v31  ;;  %v1985_v45 = vsel %vm1847_vm0, %v6395_v31, 0.0  ;;  %v468_v29 = vld [vmem:[%s11592_s0 + $0x7b0] sm:$0xff] }
 0x195   : > { %v1983_v38 = vsel %vm1847_vm0, %v900_v35, 0.0  ;;  %v2437_v39 = vmul.f32 %v900_v35, %v900_v35  ;;  %6660 = vmatprep.mubr.f32.mxu1 %v468_v29  ;;  %v475_v29 = vld [vmem:[%s11592_s0 + $0x7e8] sm:$0xff] }
 0x196   : > { %v2759_v41 = vadd.f32 %v2758_v36, %v2757_v34  ;;  %v1984_v42 = vadd.f32 %v1983_v38, %v1982_v33  ;;  %v2762_v52 = vsel %vm1847_vm0, %v2438_v37, 0.0  ;;  %v8249_v33 = vpop.f32.mrb[12].mxu1  ;;  %v469_v34 = vld [vmem:[%s11592_s0 + $0x7b8] sm:$0xff] }
 0x197   : > { %v2760_v46 = vsel %vm1847_vm0, %v2437_v39, 0.0  ;;  %v6398_v47 = vpop.f32.mrb[70].mxu0  ;;  %v8256_v38 = vpop.f32.mrb[13].mxu1  ;;  %6661 = vmatmul.mubr.f32.gmra.mrb[118].mxu1 %v469_v34 }
 0x198   : > { %v2761_v49 = vadd.f32 %v2760_v46, %v2759_v41  ;;  %v910_v50 = vpop.f32.mrb[71].mxu0  ;;  %v1986_v51 = vadd.f32 %v1985_v45, %v1984_v42  ;;  %v2440_v53 = vmul.f32 %v6398_v47, %v6398_v47  ;;  %v1989_v62 = vsel %vm1847_vm0, %v6398_v47, 0.0  ;;  %v470_v47 = vld [vmem:[%s11592_s0 + $0x7c0] sm:$0xff] }
 0x199   : > { %v1987_v54 = vsel %vm1847_vm0, %v910_v50, 0.0  ;;  %v2439_v55 = vmul.f32 %v910_v50, %v910_v50  ;;  %6663 = vmatprep.mubr.f32.mxu1 %v470_v47 }
 0x19a   : > { %v1988_v57 = vadd.f32 %v1987_v54, %v1986_v51  ;;  %v2763_v58 = vadd.f32 %v2762_v52, %v2761_v49  ;;  %v2766_v6 = vsel %vm1847_vm0, %v2440_v53, 0.0  ;;  %v8263_v51 = vpop.f32.mrb[14].mxu1  ;;  %v471_v52 = vld [vmem:[%s11592_s0 + $0x7c8] sm:$0xff] }
 0x19b   : > { %v2764_v63 = vsel %vm1847_vm0, %v2439_v55, 0.0  ;;  %v6401_v1 = vpop.f32.mrb[72].mxu0  ;;  %v8270_v56 = vpop.f32.mrb[15].mxu1  ;;  %6664 = vmatmul.mubr.f32.gmra.mrb[120].mxu1 %v471_v52 }
 0x19c   : > { %v2765_v3 = vadd.f32 %v2764_v63, %v2763_v58  ;;  %v920_v4 = vpop.f32.mrb[73].mxu0  ;;  %v1990_v5 = vadd.f32 %v1989_v62, %v1988_v57  ;;  %v2442_v7 = vmul.f32 %v6401_v1, %v6401_v1  ;;  %v1993_v17 = vsel %vm1847_vm0, %v6401_v1, 0.0 }
 0x19d   : > { %v1991_v8 = vsel %vm1847_vm0, %v920_v4, 0.0  ;;  %v2441_v9 = vmul.f32 %v920_v4, %v920_v4  ;;  %v472_v4 = vld [vmem:[%s11592_s0 + $0x7d0] sm:$0xff] }
 0x19e   : > { %v1992_v12 = vadd.f32 %v1991_v8, %v1990_v5  ;;  %v2767_v13 = vadd.f32 %v2766_v6, %v2765_v3  ;;  %v2770_v24 = vsel %vm1847_vm0, %v2442_v7, 0.0  ;;  %v8277_v7 = vpop.f32.mrb[16].mxu1  ;;  %6666 = vmatprep.mubr.f32.mxu1 %v472_v4  ;;  %v473_v8 = vld [vmem:[%s11592_s0 + $0x7d8] sm:$0xff] }
 0x19f   : > { %v2768_v18 = vsel %vm1847_vm0, %v2441_v9, 0.0  ;;  %v6404_v19 = vpop.f32.mrb[74].mxu0  ;;  %6667 = vmatmul.mubr.f32.gmra.mrb[122].mxu1 %v473_v8 }
 0x1a0   : > { %v2769_v21 = vadd.f32 %v2768_v18, %v2767_v13  ;;  %v930_v22 = vpop.f32.mrb[75].mxu0  ;;  %v1994_v23 = vadd.f32 %v1993_v17, %v1992_v12  ;;  %v2444_v25 = vmul.f32 %v6404_v19, %v6404_v19  ;;  %v1997_v35 = vsel %vm1847_vm0, %v6404_v19, 0.0  ;;  %v8284_v13 = vpop.f32.mrb[17].mxu1 }
 0x1a1   : > { %v1995_v26 = vsel %vm1847_vm0, %v930_v22, 0.0  ;;  %v2443_v28 = vmul.f32 %v930_v22, %v930_v22 }
 0x1a2   : > { %v1996_v30 = vadd.f32 %v1995_v26, %v1994_v23  ;;  %v2771_v31 = vadd.f32 %v2770_v24, %v2769_v21  ;;  %v2774_v42 = vsel %vm1847_vm0, %v2444_v25, 0.0  ;;  %v474_v24 = vld [vmem:[%s11592_s0 + $0x7e0] sm:$0xff] }
 0x1a3   : > { %v2772_v36 = vsel %vm1847_vm0, %v2443_v28, 0.0  ;;  %v6407_v37 = vpop.f32.mrb[76].mxu0  ;;  %v8291_v28 = vpop.f32.mrb[18].mxu1  ;;  %6669 = vmatprep.mubr.f32.mxu1 %v474_v24 }
 0x1a4   : > { %v2773_v39 = vadd.f32 %v2772_v36, %v2771_v31  ;;  %v940_v40 = vpop.f32.mrb[77].mxu0  ;;  %v1998_v41 = vadd.f32 %v1997_v35, %v1996_v30  ;;  %v2446_v44 = vmul.f32 %v6407_v37, %v6407_v37  ;;  %v2001_v53 = vsel %vm1847_vm0, %v6407_v37, 0.0  ;;  %v8298_v35 = vpop.f32.mrb[19].mxu1  ;;  %6670 = vmatmul.mubr.f32.gmra.mrb[124].mxu1 %v475_v29 }
 0x1a5   : > { %v1999_v45 = vsel %vm1847_vm0, %v940_v40, 0.0  ;;  %v2445_v46 = vmul.f32 %v940_v40, %v940_v40 }
 0x1a6   : > { %v2000_v49 = vadd.f32 %v1999_v45, %v1998_v41  ;;  %v2775_v50 = vadd.f32 %v2774_v42, %v2773_v39  ;;  %v2778_v62 = vsel %vm1847_vm0, %v2446_v44, 0.0  ;;  %v476_v45 = vld [vmem:[%s11592_s0 + $0x7f0] sm:$0xff] }
 0x1a7   : > { %v2776_v54 = vsel %vm1847_vm0, %v2445_v46, 0.0  ;;  %v6410_v55 = vpop.f32.mrb[78].mxu0  ;;  %6672 = vmatprep.mubr.f32.mxu1 %v476_v45 }
 0x1a8   : > { %v2777_v57 = vadd.f32 %v2776_v54, %v2775_v50  ;;  %v950_v58 = vpop.f32.mrb[79].mxu0  ;;  %v2002_v61 = vadd.f32 %v2001_v53, %v2000_v49  ;;  %v2448_v63 = vmul.f32 %v6410_v55, %v6410_v55  ;;  %v2005_v9 = vsel %vm1847_vm0, %v6410_v55, 0.0  ;;  %v8305_v49 = vpop.f32.mrb[20].mxu1  ;;  %v477_v50 = vld [vmem:[%s11592_s0 + $0x7f8] sm:$0xff] }
 0x1a9   : > { %v2003_v1 = vsel %vm1847_vm0, %v950_v58, 0.0  ;;  %v2447_v3 = vmul.f32 %v950_v58, %v950_v58  ;;  %v8312_v55 = vpop.f32.mrb[21].mxu1  ;;  %6673 = vmatmul.mubr.f32.gmra.mrb[126].mxu1 %v477_v50 }
 0x1aa   : > { %v2004_v5 = vadd.f32 %v2003_v1, %v2002_v61  ;;  %v2779_v6 = vadd.f32 %v2778_v62, %v2777_v57  ;;  %v2782_v19 = vsel %vm1847_vm0, %v2448_v63, 0.0 }
 0x1ab   : > { %v2780_v10 = vsel %vm1847_vm0, %v2447_v3, 0.0  ;;  %v6413_v12 = vpop.f32.mrb[80].mxu0 }
 0x1ac   : > { %v2781_v15 = vadd.f32 %v2780_v10, %v2779_v6  ;;  %v960_v17 = vpop.f32.mrb[81].mxu0  ;;  %v2006_v18 = vadd.f32 %v2005_v9, %v2004_v5  ;;  %v2450_v21 = vmul.f32 %v6413_v12, %v6413_v12  ;;  %v2009_v30 = vsel %vm1847_vm0, %v6413_v12, 0.0  ;;  %v8316_v6 = vpop.f32.mrb[22].mxu1 }
 0x1ad   : > { %v2007_v22 = vsel %vm1847_vm0, %v960_v17, 0.0  ;;  %v2449_v23 = vmul.f32 %v960_v17, %v960_v17  ;;  %v8320_v12 = vpop.f32.mrb[23].mxu1 }
 0x1ae   : > { %v2008_v25 = vadd.f32 %v2007_v22, %v2006_v18  ;;  %v2783_v26 = vadd.f32 %v2782_v19, %v2781_v15  ;;  %v2786_v40 = vsel %vm1847_vm0, %v2450_v21, 0.0 }
 0x1af   : > { %v2784_v31 = vsel %vm1847_vm0, %v2449_v23, 0.0  ;;  %v6416_v34 = vpop.f32.mrb[82].mxu0 }
 0x1b0   : > { %v2785_v36 = vadd.f32 %v2784_v31, %v2783_v26  ;;  %v970_v37 = vpop.f32.mrb[83].mxu0  ;;  %v2010_v39 = vadd.f32 %v2009_v30, %v2008_v25  ;;  %v2452_v41 = vmul.f32 %v6416_v34, %v6416_v34  ;;  %v2013_v52 = vsel %vm1847_vm0, %v6416_v34, 0.0  ;;  %v8324_v26 = vpop.f32.mrb[24].mxu1 }
 0x1b1   : > { %v2011_v42 = vsel %vm1847_vm0, %v970_v37, 0.0  ;;  %v2451_v44 = vmul.f32 %v970_v37, %v970_v37  ;;  %v8328_v34 = vpop.f32.mrb[25].mxu1 }
 0x1b2   : > { %v2012_v46 = vadd.f32 %v2011_v42, %v2010_v39  ;;  %v2787_v47 = vadd.f32 %v2786_v40, %v2785_v36  ;;  %v2790_v62 = vsel %vm1847_vm0, %v2452_v41, 0.0 }
 0x1b3   : > { %v2788_v53 = vsel %vm1847_vm0, %v2451_v44, 0.0  ;;  %v6419_v54 = vpop.f32.mrb[84].mxu0 }
 0x1b4   : > { %v2789_v57 = vadd.f32 %v2788_v53, %v2787_v47  ;;  %v980_v58 = vpop.f32.mrb[85].mxu0  ;;  %v2014_v61 = vadd.f32 %v2013_v52, %v2012_v46  ;;  %v2454_v63 = vmul.f32 %v6419_v54, %v6419_v54  ;;  %v2017_v8 = vsel %vm1847_vm0, %v6419_v54, 0.0  ;;  %v8332_v47 = vpop.f32.mrb[26].mxu1 }
 0x1b5   : > { %v2015_v1 = vsel %vm1847_vm0, %v980_v58, 0.0  ;;  %v2453_v3 = vmul.f32 %v980_v58, %v980_v58  ;;  %v8336_v54 = vpop.f32.mrb[27].mxu1 }
 0x1b6   : > { %v2016_v4 = vadd.f32 %v2015_v1, %v2014_v61  ;;  %v2791_v5 = vadd.f32 %v2790_v62, %v2789_v57  ;;  %v2794_v19 = vsel %vm1847_vm0, %v2454_v63, 0.0 }
 0x1b7   : > { %v2792_v9 = vsel %vm1847_vm0, %v2453_v3, 0.0  ;;  %v6422_v10 = vpop.f32.mrb[86].mxu0 }
 0x1b8   : > { %v2793_v15 = vadd.f32 %v2792_v9, %v2791_v5  ;;  %v990_v17 = vpop.f32.mrb[87].mxu0  ;;  %v2018_v18 = vadd.f32 %v2017_v8, %v2016_v4  ;;  %v2456_v21 = vmul.f32 %v6422_v10, %v6422_v10  ;;  %v2021_v29 = vsel %vm1847_vm0, %v6422_v10, 0.0  ;;  %v8340_v8 = vpop.f32.mrb[28].mxu1 }
 0x1b9   : > { %v2019_v22 = vsel %vm1847_vm0, %v990_v17, 0.0  ;;  %v2455_v23 = vmul.f32 %v990_v17, %v990_v17  ;;  %v8344_v17 = vpop.f32.mrb[29].mxu1 }
 0x1ba   : > { %v2020_v24 = vadd.f32 %v2019_v22, %v2018_v18  ;;  %v2795_v25 = vadd.f32 %v2794_v19, %v2793_v15  ;;  %v2798_v40 = vsel %vm1847_vm0, %v2456_v21, 0.0 }
 0x1bb   : > { %v2796_v30 = vsel %vm1847_vm0, %v2455_v23, 0.0  ;;  %v6425_v31 = vpop.f32.mrb[88].mxu0 }
 0x1bc   : > { %v2797_v36 = vadd.f32 %v2796_v30, %v2795_v25  ;;  %v1000_v37 = vpop.f32.mrb[89].mxu0  ;;  %v2022_v39 = vadd.f32 %v2021_v29, %v2020_v24  ;;  %v2458_v41 = vmul.f32 %v6425_v31, %v6425_v31  ;;  %v2025_v50 = vsel %vm1847_vm0, %v6425_v31, 0.0  ;;  %v8348_v31 = vpop.f32.mrb[30].mxu1 }
 0x1bd   : > { %v2023_v42 = vsel %vm1847_vm0, %v1000_v37, 0.0  ;;  %v2457_v44 = vmul.f32 %v1000_v37, %v1000_v37 }
 0x1be   : > { %v2024_v45 = vadd.f32 %v2023_v42, %v2022_v39  ;;  %v2799_v46 = vadd.f32 %v2798_v40, %v2797_v36  ;;  %v2802_v62 = vsel %vm1847_vm0, %v2458_v41, 0.0  ;;  %v8352_v40 = vpop.f32.mrb[31].mxu1 }
 0x1bf   : > { %v2800_v52 = vsel %vm1847_vm0, %v2457_v44, 0.0  ;;  %v6428_v53 = vpop.f32.mrb[90].mxu0 }
 0x1c0   : > { %v2801_v57 = vadd.f32 %v2800_v52, %v2799_v46  ;;  %v1010_v58 = vpop.f32.mrb[91].mxu0  ;;  %v2026_v61 = vadd.f32 %v2025_v50, %v2024_v45  ;;  %v2460_v63 = vmul.f32 %v6428_v53, %v6428_v53  ;;  %v2029_v9 = vsel %vm1847_vm0, %v6428_v53, 0.0 }
 0x1c1   : > { %v2027_v1 = vsel %vm1847_vm0, %v1010_v58, 0.0  ;;  %v2459_v3 = vmul.f32 %v1010_v58, %v1010_v58  ;;  %v8356_v58 = vpop.f32.mrb[32].mxu1 }
 0x1c2   : > { %v2028_v4 = vadd.f32 %v2027_v1, %v2026_v61  ;;  %v2803_v5 = vadd.f32 %v2802_v62, %v2801_v57  ;;  %v2806_v22 = vsel %vm1847_vm0, %v2460_v63, 0.0  ;;  %v8360_v1 = vpop.f32.mrb[33].mxu1 }
 0x1c3   : > { %v2804_v10 = vsel %vm1847_vm0, %v2459_v3, 0.0  ;;  %v6431_v15 = vpop.f32.mrb[92].mxu0 }
 0x1c4   : > { %v2805_v18 = vadd.f32 %v2804_v10, %v2803_v5  ;;  %v1020_v19 = vpop.f32.mrb[93].mxu0  ;;  %v2030_v21 = vadd.f32 %v2029_v9, %v2028_v4  ;;  %v2462_v23 = vmul.f32 %v6431_v15, %v6431_v15  ;;  %v2033_v36 = vsel %vm1847_vm0, %v6431_v15, 0.0 }
 0x1c5   : > { %v2031_v24 = vsel %vm1847_vm0, %v1020_v19, 0.0  ;;  %v2461_v25 = vmul.f32 %v1020_v19, %v1020_v19 }
 0x1c6   : > { %v2032_v29 = vadd.f32 %v2031_v24, %v2030_v21  ;;  %v2807_v30 = vadd.f32 %v2806_v22, %v2805_v18  ;;  %v2810_v45 = vsel %vm1847_vm0, %v2462_v23, 0.0  ;;  %v8364_v22 = vpop.f32.mrb[34].mxu1 }
 0x1c7   : > { %v2808_v37 = vsel %vm1847_vm0, %v2461_v25, 0.0  ;;  %v6434_v39 = vpop.f32.mrb[94].mxu0 }
 0x1c8   : > { %v2809_v41 = vadd.f32 %v2808_v37, %v2807_v30  ;;  %v1030_v42 = vpop.f32.mrb[95].mxu0  ;;  %v2034_v44 = vadd.f32 %v2033_v36, %v2032_v29  ;;  %v2464_v46 = vmul.f32 %v6434_v39, %v6434_v39  ;;  %v2037_v61 = vsel %vm1847_vm0, %v6434_v39, 0.0  ;;  %v8368_v29 = vpop.f32.mrb[35].mxu1 }
 0x1c9   : > { %v2035_v50 = vsel %vm1847_vm0, %v1030_v42, 0.0  ;;  %v2463_v52 = vmul.f32 %v1030_v42, %v1030_v42 }
 0x1ca   : > { %v2036_v53 = vadd.f32 %v2035_v50, %v2034_v44  ;;  %v2811_v57 = vadd.f32 %v2810_v45, %v2809_v41  ;;  %v2814_v9 = vsel %vm1847_vm0, %v2464_v46, 0.0  ;;  %v8372_v50 = vpop.f32.mrb[36].mxu1 }
 0x1cb   : > { %v2812_v62 = vsel %vm1847_vm0, %v2463_v52, 0.0  ;;  %v6437_v63 = vpop.f32.mrb[96].mxu0 }
 0x1cc   : > { %v2813_v3 = vadd.f32 %v2812_v62, %v2811_v57  ;;  %v1040_v4 = vpop.f32.mrb[97].mxu0  ;;  %v2038_v5 = vadd.f32 %v2037_v61, %v2036_v53  ;;  %v2466_v10 = vmul.f32 %v6437_v63, %v6437_v63  ;;  %v2041_v23 = vsel %vm1847_vm0, %v6437_v63, 0.0  ;;  %v8376_v61 = vpop.f32.mrb[37].mxu1 }
 0x1cd   : > { %v2039_v15 = vsel %vm1847_vm0, %v1040_v4, 0.0  ;;  %v2465_v18 = vmul.f32 %v1040_v4, %v1040_v4 }
 0x1ce   : > { %v2040_v19 = vadd.f32 %v2039_v15, %v2038_v5  ;;  %v2815_v21 = vadd.f32 %v2814_v9, %v2813_v3  ;;  %v2818_v39 = vsel %vm1847_vm0, %v2466_v10, 0.0 }
 0x1cf   : > { %v2816_v24 = vsel %vm1847_vm0, %v2465_v18, 0.0  ;;  %v6440_v25 = vpop.f32.mrb[98].mxu0 }
 0x1d0   : > { %v2817_v30 = vadd.f32 %v2816_v24, %v2815_v21  ;;  %v1050_v36 = vpop.f32.mrb[99].mxu0  ;;  %v2042_v37 = vadd.f32 %v2041_v23, %v2040_v19  ;;  %v2468_v41 = vmul.f32 %v6440_v25, %v6440_v25  ;;  %v2045_v52 = vsel %vm1847_vm0, %v6440_v25, 0.0  ;;  %v8380_v19 = vpop.f32.mrb[38].mxu1 }
 0x1d1   : > { %v2043_v42 = vsel %vm1847_vm0, %v1050_v36, 0.0  ;;  %v2467_v44 = vmul.f32 %v1050_v36, %v1050_v36  ;;  %v8384_v25 = vpop.f32.mrb[39].mxu1 }
 0x1d2   : > { %v2044_v45 = vadd.f32 %v2043_v42, %v2042_v37  ;;  %v2819_v46 = vadd.f32 %v2818_v39, %v2817_v30  ;;  %v2822_v4 = vsel %vm1847_vm0, %v2468_v41, 0.0 }
 0x1d3   : > { %v2820_v53 = vsel %vm1847_vm0, %v2467_v44, 0.0  ;;  %v6443_v57 = vpop.f32.mrb[100].mxu0 }
 0x1d4   : > { %v2821_v62 = vadd.f32 %v2820_v53, %v2819_v46  ;;  %v1060_v63 = vpop.f32.mrb[101].mxu0  ;;  %v2046_v3 = vadd.f32 %v2045_v52, %v2044_v45  ;;  %v2470_v5 = vmul.f32 %v6443_v57, %v6443_v57  ;;  %v2049_v21 = vsel %vm1847_vm0, %v6443_v57, 0.0  ;;  %v8388_v52 = vpop.f32.mrb[40].mxu1 }
 0x1d5   : > { %v2047_v9 = vsel %vm1847_vm0, %v1060_v63, 0.0  ;;  %v2469_v10 = vmul.f32 %v1060_v63, %v1060_v63  ;;  %v8392_v63 = vpop.f32.mrb[41].mxu1 }
 0x1d6   : > { %v2048_v15 = vadd.f32 %v2047_v9, %v2046_v3  ;;  %v2823_v18 = vadd.f32 %v2822_v4, %v2821_v62  ;;  %v2826_v39 = vsel %vm1847_vm0, %v2470_v5, 0.0 }
 0x1d7   : > { %v2824_v23 = vsel %vm1847_vm0, %v2469_v10, 0.0  ;;  %v6446_v24 = vpop.f32.mrb[102].mxu0 }
 0x1d8   : > { %v2825_v30 = vadd.f32 %v2824_v23, %v2823_v18  ;;  %v1070_v36 = vpop.f32.mrb[103].mxu0  ;;  %v2050_v37 = vadd.f32 %v2049_v21, %v2048_v15  ;;  %v2472_v41 = vmul.f32 %v6446_v24, %v6446_v24  ;;  %v2053_v53 = vsel %vm1847_vm0, %v6446_v24, 0.0 }
 0x1d9   : > { %v2051_v42 = vsel %vm1847_vm0, %v1070_v36, 0.0  ;;  %v2471_v44 = vmul.f32 %v1070_v36, %v1070_v36 }
 0x1da   : > { %v2052_v45 = vadd.f32 %v2051_v42, %v2050_v37  ;;  %v2827_v46 = vadd.f32 %v2826_v39, %v2825_v30  ;;  %v2830_v5 = vsel %vm1847_vm0, %v2472_v41, 0.0  ;;  %v8396_v30 = vpop.f32.mrb[42].mxu1 }
 0x1db   : > { %v2828_v57 = vsel %vm1847_vm0, %v2471_v44, 0.0  ;;  %v6449_v62 = vpop.f32.mrb[104].mxu0  ;;  %11634 = vst [vmem:[#allocation6_spill] sm:$0xff] %v8396_v30  ;;  %v8400_v39 = vpop.f32.mrb[43].mxu1 }
 0x1dc   : > { %v2829_v3 = vadd.f32 %v2828_v57, %v2827_v46  ;;  %v1080_v4 = vpop.f32.mrb[105].mxu0  ;;  %v2054_v9 = vadd.f32 %v2053_v53, %v2052_v45  ;;  %v2474_v10 = vmul.f32 %v6449_v62, %v6449_v62  ;;  %v2057_v24 = vsel %vm1847_vm0, %v6449_v62, 0.0 }
 0x1dd   : > { %v2055_v15 = vsel %vm1847_vm0, %v1080_v4, 0.0  ;;  %v2473_v18 = vmul.f32 %v1080_v4, %v1080_v4 }
 0x1de   : > { %v2056_v21 = vadd.f32 %v2055_v15, %v2054_v9  ;;  %v2831_v23 = vadd.f32 %v2830_v5, %v2829_v3  ;;  %v2834_v41 = vsel %vm1847_vm0, %v2474_v10, 0.0  ;;  %v8404_v9 = vpop.f32.mrb[44].mxu1 }
 0x1df   : > { %v2832_v36 = vsel %vm1847_vm0, %v2473_v18, 0.0  ;;  %v6452_v37 = vpop.f32.mrb[106].mxu0  ;;  %11635 = vst [vmem:[#allocation7_spill] sm:$0xff] %v8404_v9  ;;  %v8408_v18 = vpop.f32.mrb[45].mxu1 }
 0x1e0   : > { %v2833_v42 = vadd.f32 %v2832_v36, %v2831_v23  ;;  %v1090_v44 = vpop.f32.mrb[107].mxu0  ;;  %v2058_v45 = vadd.f32 %v2057_v24, %v2056_v21  ;;  %v2476_v46 = vmul.f32 %v6452_v37, %v6452_v37  ;;  %v2061_v62 = vsel %vm1847_vm0, %v6452_v37, 0.0  ;;  %11636 = vst [vmem:[#allocation8_spill] sm:$0xff] %v8408_v18 }
 0x1e1   : > { %v2059_v53 = vsel %vm1847_vm0, %v1090_v44, 0.0  ;;  %v2475_v57 = vmul.f32 %v1090_v44, %v1090_v44 }
 0x1e2   : > { %v2060_v4 = vadd.f32 %v2059_v53, %v2058_v45  ;;  %v2835_v3 = vadd.f32 %v2834_v41, %v2833_v42  ;;  %v2838_v10 = vsel %vm1847_vm0, %v2476_v46, 0.0  ;;  %v8412_v41 = vpop.f32.mrb[46].mxu1 }
 0x1e3   : > { %v2836_v5 = vsel %vm1847_vm0, %v2475_v57, 0.0  ;;  %v6455_v15 = vpop.f32.mrb[108].mxu0  ;;  %11637 = vst [vmem:[#allocation9_spill] sm:$0xff] %v8412_v41  ;;  %v8416_v9 = vpop.f32.mrb[47].mxu1 }
 0x1e4   : > { %v2837_v23 = vadd.f32 %v2836_v5, %v2835_v3  ;;  %v1100_v36 = vpop.f32.mrb[109].mxu0  ;;  %v2062_v21 = vadd.f32 %v2061_v62, %v2060_v4  ;;  %v2478_v24 = vmul.f32 %v6455_v15, %v6455_v15  ;;  %v2065_v37 = vsel %vm1847_vm0, %v6455_v15, 0.0  ;;  %11638 = vst [vmem:[#allocation10_spill] sm:$0xff] %v8416_v9 }
 0x1e5   : > { %v2063_v30 = vsel %vm1847_vm0, %v1100_v36, 0.0  ;;  %v2477_v44 = vmul.f32 %v1100_v36, %v1100_v36 }
 0x1e6   : > { %v2064_v45 = vadd.f32 %v2063_v30, %v2062_v21  ;;  %v2839_v42 = vadd.f32 %v2838_v10, %v2837_v23  ;;  %v2842_v46 = vsel %vm1847_vm0, %v2478_v24, 0.0  ;;  %v8420_v21 = vpop.f32.mrb[48].mxu1 }
 0x1e7   : > { %v2840_v53 = vsel %vm1847_vm0, %v2477_v44, 0.0  ;;  %v6458_v57 = vpop.f32.mrb[110].mxu0  ;;  %11639 = vst [vmem:[#allocation11_spill] sm:$0xff] %v8420_v21  ;;  %v8424_v41 = vpop.f32.mrb[49].mxu1 }
 0x1e8   : > { %v2841_v3 = vadd.f32 %v2840_v53, %v2839_v42  ;;  %v1110_v5 = vpop.f32.mrb[111].mxu0  ;;  %v2066_v4 = vadd.f32 %v2065_v37, %v2064_v45  ;;  %v2480_v62 = vmul.f32 %v6458_v57, %v6458_v57  ;;  %v2069_v15 = vsel %vm1847_vm0, %v6458_v57, 0.0  ;;  %11640 = vst [vmem:[#allocation12_spill] sm:$0xff] %v8424_v41 }
 0x1e9   : > { %v2067_v18 = vsel %vm1847_vm0, %v1110_v5, 0.0  ;;  %v2479_v36 = vmul.f32 %v1110_v5, %v1110_v5 }
 0x1ea   : > { %v2068_v30 = vadd.f32 %v2067_v18, %v2066_v4  ;;  %v2843_v23 = vadd.f32 %v2842_v46, %v2841_v3  ;;  %v2846_v24 = vsel %vm1847_vm0, %v2480_v62, 0.0  ;;  %v8428_v4 = vpop.f32.mrb[50].mxu1 }
 0x1eb   : > { %v2844_v10 = vsel %vm1847_vm0, %v2479_v36, 0.0  ;;  %v6461_v44 = vpop.f32.mrb[112].mxu0  ;;  %11641 = vst [vmem:[#allocation13_spill] sm:$0xff] %v8428_v4  ;;  %v8432_v21 = vpop.f32.mrb[51].mxu1 }
 0x1ec   : > { %v2845_v42 = vadd.f32 %v2844_v10, %v2843_v23  ;;  %v1120_v53 = vpop.f32.mrb[113].mxu0  ;;  %v2070_v45 = vadd.f32 %v2069_v15, %v2068_v30  ;;  %v2482_v37 = vmul.f32 %v6461_v44, %v6461_v44  ;;  %v2073_v57 = vsel %vm1847_vm0, %v6461_v44, 0.0  ;;  %11642 = vst [vmem:[#allocation14_spill] sm:$0xff] %v8432_v21 }
 0x1ed   : > { %v2071_v9 = vsel %vm1847_vm0, %v1120_v53, 0.0  ;;  %v2481_v5 = vmul.f32 %v1120_v53, %v1120_v53 }
 0x1ee   : > { %v2072_v18 = vadd.f32 %v2071_v9, %v2070_v45  ;;  %v2847_v3 = vadd.f32 %v2846_v24, %v2845_v42  ;;  %v2850_v62 = vsel %vm1847_vm0, %v2482_v37, 0.0  ;;  %v8436_v45 = vpop.f32.mrb[52].mxu1 }
 0x1ef   : > { %v2848_v46 = vsel %vm1847_vm0, %v2481_v5, 0.0  ;;  %v6464_v36 = vpop.f32.mrb[114].mxu0  ;;  %11643 = vst [vmem:[#allocation15_spill] sm:$0xff] %v8436_v45  ;;  %v8440_v4 = vpop.f32.mrb[53].mxu1 }
 0x1f0   : > { %v2849_v23 = vadd.f32 %v2848_v46, %v2847_v3  ;;  %v1130_v10 = vpop.f32.mrb[115].mxu0  ;;  %v2074_v30 = vadd.f32 %v2073_v57, %v2072_v18  ;;  %v2484_v15 = vmul.f32 %v6464_v36, %v6464_v36  ;;  %v2077_v44 = vsel %vm1847_vm0, %v6464_v36, 0.0  ;;  %11644 = vst [vmem:[#allocation16_spill] sm:$0xff] %v8440_v4 }
 0x1f1   : > { %v2075_v41 = vsel %vm1847_vm0, %v1130_v10, 0.0  ;;  %v2483_v53 = vmul.f32 %v1130_v10, %v1130_v10 }
 0x1f2   : > { %v2076_v9 = vadd.f32 %v2075_v41, %v2074_v30  ;;  %v2851_v42 = vadd.f32 %v2850_v62, %v2849_v23  ;;  %v2854_v37 = vsel %vm1847_vm0, %v2484_v15, 0.0  ;;  %v8444_v30 = vpop.f32.mrb[54].mxu1 }
 0x1f3   : > { %v2852_v24 = vsel %vm1847_vm0, %v2483_v53, 0.0  ;;  %v6467_v5 = vpop.f32.mrb[116].mxu0  ;;  %11645 = vst [vmem:[#allocation17_spill] sm:$0xff] %v8444_v30  ;;  %v8448_v45 = vpop.f32.mrb[55].mxu1 }
 0x1f4   : > { %v2853_v3 = vadd.f32 %v2852_v24, %v2851_v42  ;;  %v1140_v46 = vpop.f32.mrb[117].mxu0  ;;  %v2078_v18 = vadd.f32 %v2077_v44, %v2076_v9  ;;  %v2486_v57 = vmul.f32 %v6467_v5, %v6467_v5  ;;  %v2081_v36 = vsel %vm1847_vm0, %v6467_v5, 0.0  ;;  %11646 = vst [vmem:[#allocation18_spill] sm:$0xff] %v8448_v45 }
 0x1f5   : > { %v2079_v21 = vsel %vm1847_vm0, %v1140_v46, 0.0  ;;  %v2485_v10 = vmul.f32 %v1140_v46, %v1140_v46 }
 0x1f6   : > { %v2080_v41 = vadd.f32 %v2079_v21, %v2078_v18  ;;  %v2855_v23 = vadd.f32 %v2854_v37, %v2853_v3  ;;  %v2858_v15 = vsel %vm1847_vm0, %v2486_v57, 0.0  ;;  %v8452_v18 = vpop.f32.mrb[56].mxu1 }
 0x1f7   : > { %v2856_v62 = vsel %vm1847_vm0, %v2485_v10, 0.0  ;;  %v6470_v53 = vpop.f32.mrb[118].mxu0  ;;  %11647 = vst [vmem:[#allocation19_spill] sm:$0xff] %v8452_v18  ;;  %v8456_v30 = vpop.f32.mrb[57].mxu1 }
 0x1f8   : > { %v2857_v42 = vadd.f32 %v2856_v62, %v2855_v23  ;;  %v1150_v24 = vpop.f32.mrb[119].mxu0  ;;  %v2082_v9 = vadd.f32 %v2081_v36, %v2080_v41  ;;  %v2488_v44 = vmul.f32 %v6470_v53, %v6470_v53  ;;  %v2085_v5 = vsel %vm1847_vm0, %v6470_v53, 0.0  ;;  %11648 = vst [vmem:[#allocation20_spill] sm:$0xff] %v8456_v30 }
 0x1f9   : > { %v2083_v4 = vsel %vm1847_vm0, %v1150_v24, 0.0  ;;  %v2487_v46 = vmul.f32 %v1150_v24, %v1150_v24 }
 0x1fa   : > { %v2084_v21 = vadd.f32 %v2083_v4, %v2082_v9  ;;  %v2859_v3 = vadd.f32 %v2858_v15, %v2857_v42  ;;  %v2862_v57 = vsel %vm1847_vm0, %v2488_v44, 0.0  ;;  %v8460_v9 = vpop.f32.mrb[58].mxu1 }
 0x1fb   : > { %v2860_v37 = vsel %vm1847_vm0, %v2487_v46, 0.0  ;;  %v6473_v10 = vpop.f32.mrb[120].mxu0  ;;  %11649 = vst [vmem:[#allocation21_spill] sm:$0xff] %v8460_v9  ;;  %v8464_v18 = vpop.f32.mrb[59].mxu1 }
 0x1fc   : > { %v2861_v23 = vadd.f32 %v2860_v37, %v2859_v3  ;;  %v1160_v62 = vpop.f32.mrb[121].mxu0  ;;  %v2086_v41 = vadd.f32 %v2085_v5, %v2084_v21  ;;  %v2490_v36 = vmul.f32 %v6473_v10, %v6473_v10  ;;  %v2089_v53 = vsel %vm1847_vm0, %v6473_v10, 0.0  ;;  %11650 = vst [vmem:[#allocation22_spill] sm:$0xff] %v8464_v18 }
 0x1fd   : > { %v2087_v45 = vsel %vm1847_vm0, %v1160_v62, 0.0  ;;  %v2489_v24 = vmul.f32 %v1160_v62, %v1160_v62 }
 0x1fe   : > { %v2088_v4 = vadd.f32 %v2087_v45, %v2086_v41  ;;  %v2863_v42 = vadd.f32 %v2862_v57, %v2861_v23  ;;  %v2866_v44 = vsel %vm1847_vm0, %v2490_v36, 0.0  ;;  %v8468_v41 = vpop.f32.mrb[60].mxu1 }
 0x1ff   : > { %v2864_v15 = vsel %vm1847_vm0, %v2489_v24, 0.0  ;;  %v6476_v46 = vpop.f32.mrb[122].mxu0  ;;  %11651 = vst [vmem:[#allocation23_spill] sm:$0xff] %v8468_v41  ;;  %v8472_v9 = vpop.f32.mrb[61].mxu1 }
 0x200   : > { %v2865_v3 = vadd.f32 %v2864_v15, %v2863_v42  ;;  %v1170_v37 = vpop.f32.mrb[123].mxu0  ;;  %v2090_v21 = vadd.f32 %v2089_v53, %v2088_v4  ;;  %v2492_v5 = vmul.f32 %v6476_v46, %v6476_v46  ;;  %v2093_v10 = vsel %vm1847_vm0, %v6476_v46, 0.0 }
 0x201   : > { %v2091_v30 = vsel %vm1847_vm0, %v1170_v37, 0.0  ;;  %v2491_v62 = vmul.f32 %v1170_v37, %v1170_v37 }
 0x202   : > { %v2092_v45 = vadd.f32 %v2091_v30, %v2090_v21  ;;  %v2867_v23 = vadd.f32 %v2866_v44, %v2865_v3  ;;  %v2870_v36 = vsel %vm1847_vm0, %v2492_v5, 0.0  ;;  %v8476_v21 = vpop.f32.mrb[62].mxu1  ;;  %v2497_v5 = vmul.f32 %v8172_v0, %v8172_v0 }
 0x203   : > { %v2868_v57 = vsel %vm1847_vm0, %v2491_v62, 0.0  ;;  %v6479_v24 = vpop.f32.mrb[124].mxu0  ;;  %11652 = vst [vmem:[#allocation24_spill] sm:$0xff] %v8476_v21  ;;  %v8480_v41 = vpop.f32.mrb[63].mxu1 }
 0x204   : > { %v2869_v42 = vadd.f32 %v2868_v57, %v2867_v23  ;;  %v1180_v15 = vpop.f32.mrb[125].mxu0  ;;  %v2094_v4 = vadd.f32 %v2093_v10, %v2092_v45  ;;  %v2494_v53 = vmul.f32 %v6479_v24, %v6479_v24  ;;  %v2097_v46 = vsel %vm1847_vm0, %v6479_v24, 0.0  ;;  %v8486_v24 = vpop.f32.mrb[64].mxu1 }
 0x205   : > { %v2095_v18 = vsel %vm1847_vm0, %v1180_v15, 0.0  ;;  %v2493_v37 = vmul.f32 %v1180_v15, %v1180_v15 }
 0x206   : > { %v2096_v30 = vadd.f32 %v2095_v18, %v2094_v4  ;;  %v2871_v3 = vadd.f32 %v2870_v36, %v2869_v42  ;;  %v2874_v10 = vsel %vm1847_vm0, %v2494_v53, 0.0 }
 0x207   : > { %v2872_v44 = vsel %vm1847_vm0, %v2493_v37, 0.0  ;;  %v6482_v62 = vpop.f32.mrb[126].mxu0 }
 0x208   : > { %v2873_v23 = vadd.f32 %v2872_v44, %v2871_v3  ;;  %v1190_v57 = vpop.f32.mrb[127].mxu0  ;;  %v2098_v45 = vadd.f32 %v2097_v46, %v2096_v30  ;;  %v2496_v15 = vmul.f32 %v6482_v62, %v6482_v62  ;;  %v2101_v37 = vsel %vm1847_vm0, %v6482_v62, 0.0  ;;  %v8492_v3 = vpop.f32.mrb[65].mxu1 }
 0x209   : > { %v2099_v18 = vsel %vm1847_vm0, %v1190_v57, 0.0  ;;  %v2495_v42 = vmul.f32 %v1190_v57, %v1190_v57  ;;  %v2103_v30 = vsel %vm1847_vm0, %v8172_v0, 0.0  ;;  %v2498_v57 = vmul.f32 %v8165_v59, %v8165_v59 }
 0x20a   : > { %v2100_v4 = vadd.f32 %v2099_v18, %v2098_v45  ;;  %v2875_v36 = vadd.f32 %v2874_v10, %v2873_v23  ;;  %v2878_v53 = vsel %vm1847_vm0, %v2496_v15, 0.0  ;;  %v2880_v23 = vsel %vm1847_vm0, %v2497_v5, 0.0  ;;  %v8500_v18 = vpop.f32.mrb[66].mxu1 }
 0x20b   : > { %v2876_v21 = vsel %vm1847_vm0, %v2495_v42, 0.0  ;;  %v2499_v45 = vmul.f32 %v8186_v16, %v8186_v16  ;;  %v2105_v0 = vsel %vm1847_vm0, %v8165_v59, 0.0  ;;  %v8506_v42 = vpop.f32.mrb[67].mxu1  ;;  %v2500_v5 = vmul.f32 %v8179_v11, %v8179_v11 }
 0x20c   : > { %v2102_v46 = vadd.f32 %v2101_v37, %v2100_v4  ;;  %v2877_v44 = vadd.f32 %v2876_v21, %v2875_v36  ;;  %v2107_v21 = vsel %vm1847_vm0, %v8186_v16, 0.0  ;;  %v2882_v36 = vsel %vm1847_vm0, %v2498_v57, 0.0  ;;  %v8514_v59 = vpop.f32.mrb[68].mxu1 }
 0x20d   : > { %v2884_v37 = vsel %vm1847_vm0, %v2499_v45, 0.0  ;;  %v2109_v16 = vsel %vm1847_vm0, %v8179_v11, 0.0  ;;  %v2502_v45 = vmul.f32 %v8193_v27, %v8193_v27 }
 0x20e   : > { %v2879_v62 = vadd.f32 %v2878_v53, %v2877_v44  ;;  %v2104_v10 = vadd.f32 %v2103_v30, %v2102_v46  ;;  %v2501_v30 = vmul.f32 %v8200_v32, %v8200_v32  ;;  %v2111_v53 = vsel %vm1847_vm0, %v8200_v32, 0.0 }
 0x20f   : > { %v2113_v32 = vsel %vm1847_vm0, %v8193_v27, 0.0 }
 0x210   : > { %v2106_v15 = vadd.f32 %v2105_v0, %v2104_v10  ;;  %v2881_v4 = vadd.f32 %v2880_v23, %v2879_v62  ;;  %v8520_v23 = vpop.f32.mrb[69].mxu1  ;;  %v2886_v10 = vsel %vm1847_vm0, %v2500_v5, 0.0  ;;  %v2888_v0 = vsel %vm1847_vm0, %v2501_v30, 0.0 }
 0x211   : > { %v8528_v11 = vpop.f32.mrb[70].mxu1  ;;  %v2504_v30 = vmul.f32 %v8207_v43, %v8207_v43 }
 0x212   : > { %v2883_v46 = vadd.f32 %v2882_v36, %v2881_v4  ;;  %v2108_v44 = vadd.f32 %v2107_v21, %v2106_v15  ;;  %v2503_v21 = vmul.f32 %v8214_v48, %v8214_v48  ;;  %v2115_v36 = vsel %vm1847_vm0, %v8214_v48, 0.0 }
 0x213   : > { %v2117_v48 = vsel %vm1847_vm0, %v8207_v43, 0.0 }
 0x214   : > { %v2110_v57 = vadd.f32 %v2109_v16, %v2108_v44  ;;  %v2885_v62 = vadd.f32 %v2884_v37, %v2883_v46  ;;  %v8534_v37 = vpop.f32.mrb[71].mxu1  ;;  %v2890_v44 = vsel %vm1847_vm0, %v2502_v45, 0.0  ;;  %v2892_v16 = vsel %vm1847_vm0, %v2503_v21, 0.0 }
 0x215   : > { %v8542_v27 = vpop.f32.mrb[72].mxu1  ;;  %v2506_v21 = vmul.f32 %v8221_v60, %v8221_v60 }
 0x216   : > { %v2887_v15 = vadd.f32 %v2886_v10, %v2885_v62  ;;  %v2112_v4 = vadd.f32 %v2111_v53, %v2110_v57  ;;  %v2505_v53 = vmul.f32 %v8228_v2, %v8228_v2  ;;  %v2119_v10 = vsel %vm1847_vm0, %v8228_v2, 0.0 }
 0x217   : > { %v2121_v2 = vsel %vm1847_vm0, %v8221_v60, 0.0 }
 0x218   : > { %v2114_v5 = vadd.f32 %v2113_v32, %v2112_v4  ;;  %v2889_v46 = vadd.f32 %v2888_v0, %v2887_v15  ;;  %v8548_v0 = vpop.f32.mrb[73].mxu1  ;;  %v2894_v4 = vsel %vm1847_vm0, %v2504_v30, 0.0  ;;  %v2896_v32 = vsel %vm1847_vm0, %v2505_v53, 0.0 }
 0x219   : > { %v8556_v43 = vpop.f32.mrb[74].mxu1  ;;  %v2508_v53 = vmul.f32 %v8235_v14, %v8235_v14 }
 0x21a   : > { %v2891_v57 = vadd.f32 %v2890_v44, %v2889_v46  ;;  %v2116_v62 = vadd.f32 %v2115_v36, %v2114_v5  ;;  %v2507_v36 = vmul.f32 %v8242_v20, %v8242_v20  ;;  %v2123_v44 = vsel %vm1847_vm0, %v8242_v20, 0.0 }
 0x21b   : > { %v2125_v20 = vsel %vm1847_vm0, %v8235_v14, 0.0 }
 0x21c   : > { %v2118_v45 = vadd.f32 %v2117_v48, %v2116_v62  ;;  %v2893_v15 = vadd.f32 %v2892_v16, %v2891_v57  ;;  %v8562_v16 = vpop.f32.mrb[75].mxu1  ;;  %v2898_v62 = vsel %vm1847_vm0, %v2506_v21, 0.0  ;;  %v2900_v48 = vsel %vm1847_vm0, %v2507_v36, 0.0 }
 0x21d   : > { %v8570_v60 = vpop.f32.mrb[76].mxu1  ;;  %v2510_v36 = vmul.f32 %v8249_v33, %v8249_v33 }
 0x21e   : > { %v2895_v5 = vadd.f32 %v2894_v4, %v2893_v15  ;;  %v2120_v46 = vadd.f32 %v2119_v10, %v2118_v45  ;;  %v2509_v10 = vmul.f32 %v8256_v38, %v8256_v38  ;;  %v2127_v4 = vsel %vm1847_vm0, %v8256_v38, 0.0 }
 0x21f   : > { %v2129_v38 = vsel %vm1847_vm0, %v8249_v33, 0.0 }
 0x220   : > { %v2122_v30 = vadd.f32 %v2121_v2, %v2120_v46  ;;  %v2897_v57 = vadd.f32 %v2896_v32, %v2895_v5  ;;  %v8576_v32 = vpop.f32.mrb[77].mxu1  ;;  %v2902_v46 = vsel %vm1847_vm0, %v2508_v53, 0.0  ;;  %v2904_v2 = vsel %vm1847_vm0, %v2509_v10, 0.0 }
 0x221   : > { %v8584_v14 = vpop.f32.mrb[78].mxu1  ;;  %v2512_v10 = vmul.f32 %v8263_v51, %v8263_v51 }
 0x222   : > { %v2899_v45 = vadd.f32 %v2898_v62, %v2897_v57  ;;  %v2124_v15 = vadd.f32 %v2123_v44, %v2122_v30  ;;  %v2511_v44 = vmul.f32 %v8270_v56, %v8270_v56  ;;  %v2131_v62 = vsel %vm1847_vm0, %v8270_v56, 0.0 }
 0x223   : > { %v2133_v56 = vsel %vm1847_vm0, %v8263_v51, 0.0 }
 0x224   : > { %v2126_v21 = vadd.f32 %v2125_v20, %v2124_v15  ;;  %v2901_v5 = vadd.f32 %v2900_v48, %v2899_v45  ;;  %v8590_v48 = vpop.f32.mrb[79].mxu1  ;;  %v2906_v15 = vsel %vm1847_vm0, %v2510_v36, 0.0  ;;  %v2908_v20 = vsel %vm1847_vm0, %v2511_v44, 0.0 }
 0x225   : > { %v8598_v33 = vpop.f32.mrb[80].mxu1  ;;  %v2514_v44 = vmul.f32 %v8277_v7, %v8277_v7 }
 0x226   : > { %v2903_v30 = vadd.f32 %v2902_v46, %v2901_v5  ;;  %v2128_v57 = vadd.f32 %v2127_v4, %v2126_v21  ;;  %v2513_v4 = vmul.f32 %v8284_v13, %v8284_v13  ;;  %v2135_v46 = vsel %vm1847_vm0, %v8284_v13, 0.0 }
 0x227   : > { %v2137_v13 = vsel %vm1847_vm0, %v8277_v7, 0.0 }
 0x228   : > { %v2130_v53 = vadd.f32 %v2129_v38, %v2128_v57  ;;  %v2905_v45 = vadd.f32 %v2904_v2, %v2903_v30  ;;  %v8604_v2 = vpop.f32.mrb[81].mxu1  ;;  %v2910_v57 = vsel %vm1847_vm0, %v2512_v10, 0.0  ;;  %v2912_v38 = vsel %vm1847_vm0, %v2513_v4, 0.0 }
 0x229   : > { %v8612_v51 = vpop.f32.mrb[82].mxu1  ;;  %v2516_v4 = vmul.f32 %v8291_v28, %v8291_v28 }
 0x22a   : > { %v2907_v21 = vadd.f32 %v2906_v15, %v2905_v45  ;;  %v2132_v5 = vadd.f32 %v2131_v62, %v2130_v53  ;;  %v2515_v62 = vmul.f32 %v8298_v35, %v8298_v35  ;;  %v2139_v15 = vsel %vm1847_vm0, %v8298_v35, 0.0 }
 0x22b   : > { %v2141_v35 = vsel %vm1847_vm0, %v8291_v28, 0.0 }
 0x22c   : > { %v2134_v36 = vadd.f32 %v2133_v56, %v2132_v5  ;;  %v2909_v30 = vadd.f32 %v2908_v20, %v2907_v21  ;;  %v8618_v20 = vpop.f32.mrb[83].mxu1  ;;  %v2914_v5 = vsel %vm1847_vm0, %v2514_v44, 0.0  ;;  %v2916_v56 = vsel %vm1847_vm0, %v2515_v62, 0.0 }
 0x22d   : > { %v8626_v7 = vpop.f32.mrb[84].mxu1  ;;  %v2518_v62 = vmul.f32 %v8305_v49, %v8305_v49 }
 0x22e   : > { %v2911_v53 = vadd.f32 %v2910_v57, %v2909_v30  ;;  %v2136_v45 = vadd.f32 %v2135_v46, %v2134_v36  ;;  %v2517_v46 = vmul.f32 %v8312_v55, %v8312_v55  ;;  %v2143_v57 = vsel %vm1847_vm0, %v8312_v55, 0.0 }
 0x22f   : > { %v2145_v55 = vsel %vm1847_vm0, %v8305_v49, 0.0 }
 0x230   : > { %v2138_v10 = vadd.f32 %v2137_v13, %v2136_v45  ;;  %v2913_v21 = vadd.f32 %v2912_v38, %v2911_v53  ;;  %v8632_v38 = vpop.f32.mrb[85].mxu1  ;;  %v2918_v45 = vsel %vm1847_vm0, %v2516_v4, 0.0  ;;  %v2920_v13 = vsel %vm1847_vm0, %v2517_v46, 0.0 }
 0x231   : > { %v8640_v28 = vpop.f32.mrb[86].mxu1  ;;  %v2520_v46 = vmul.f32 %v8316_v6, %v8316_v6 }
 0x232   : > { %v2915_v36 = vadd.f32 %v2914_v5, %v2913_v21  ;;  %v2140_v30 = vadd.f32 %v2139_v15, %v2138_v10  ;;  %v2519_v15 = vmul.f32 %v8320_v12, %v8320_v12  ;;  %v2147_v5 = vsel %vm1847_vm0, %v8320_v12, 0.0 }
 0x233   : > { %v2149_v12 = vsel %vm1847_vm0, %v8316_v6, 0.0 }
 0x234   : > { %v2142_v44 = vadd.f32 %v2141_v35, %v2140_v30  ;;  %v2917_v53 = vadd.f32 %v2916_v56, %v2915_v36  ;;  %v8646_v56 = vpop.f32.mrb[87].mxu1  ;;  %v2922_v30 = vsel %vm1847_vm0, %v2518_v62, 0.0  ;;  %v2924_v35 = vsel %vm1847_vm0, %v2519_v15, 0.0 }
 0x235   : > { %v8654_v49 = vpop.f32.mrb[88].mxu1  ;;  %v2522_v15 = vmul.f32 %v8324_v26, %v8324_v26 }
 0x236   : > { %v2919_v10 = vadd.f32 %v2918_v45, %v2917_v53  ;;  %v2144_v21 = vadd.f32 %v2143_v57, %v2142_v44  ;;  %v2521_v57 = vmul.f32 %v8328_v34, %v8328_v34  ;;  %v2151_v45 = vsel %vm1847_vm0, %v8328_v34, 0.0 }
 0x237   : > { %v2153_v34 = vsel %vm1847_vm0, %v8324_v26, 0.0 }
 0x238   : > { %v2146_v4 = vadd.f32 %v2145_v55, %v2144_v21  ;;  %v2921_v36 = vadd.f32 %v2920_v13, %v2919_v10  ;;  %v8660_v13 = vpop.f32.mrb[89].mxu1  ;;  %v2926_v21 = vsel %vm1847_vm0, %v2520_v46, 0.0  ;;  %v2928_v55 = vsel %vm1847_vm0, %v2521_v57, 0.0 }
 0x239   : > { %v8668_v6 = vpop.f32.mrb[90].mxu1  ;;  %v2524_v57 = vmul.f32 %v8332_v47, %v8332_v47 }
 0x23a   : > { %v2923_v44 = vadd.f32 %v2922_v30, %v2921_v36  ;;  %v2148_v53 = vadd.f32 %v2147_v5, %v2146_v4  ;;  %v2523_v5 = vmul.f32 %v8336_v54, %v8336_v54  ;;  %v2155_v30 = vsel %vm1847_vm0, %v8336_v54, 0.0 }
 0x23b   : > { %v2157_v54 = vsel %vm1847_vm0, %v8332_v47, 0.0 }
 0x23c   : > { %v2150_v62 = vadd.f32 %v2149_v12, %v2148_v53  ;;  %v2925_v10 = vadd.f32 %v2924_v35, %v2923_v44  ;;  %v8674_v35 = vpop.f32.mrb[91].mxu1  ;;  %v2930_v53 = vsel %vm1847_vm0, %v2522_v15, 0.0  ;;  %v2932_v12 = vsel %vm1847_vm0, %v2523_v5, 0.0 }
 0x23d   : > { %v8682_v26 = vpop.f32.mrb[92].mxu1  ;;  %v2526_v5 = vmul.f32 %v8340_v8, %v8340_v8 }
 0x23e   : > { %v2927_v4 = vadd.f32 %v2926_v21, %v2925_v10  ;;  %v2152_v36 = vadd.f32 %v2151_v45, %v2150_v62  ;;  %v2525_v45 = vmul.f32 %v8344_v17, %v8344_v17  ;;  %v2159_v21 = vsel %vm1847_vm0, %v8344_v17, 0.0 }
 0x23f   : > { %v2161_v17 = vsel %vm1847_vm0, %v8340_v8, 0.0 }
 0x240   : > { %v2154_v46 = vadd.f32 %v2153_v34, %v2152_v36  ;;  %v2929_v44 = vadd.f32 %v2928_v55, %v2927_v4  ;;  %v8688_v55 = vpop.f32.mrb[93].mxu1  ;;  %v2934_v36 = vsel %vm1847_vm0, %v2524_v57, 0.0  ;;  %v2936_v34 = vsel %vm1847_vm0, %v2525_v45, 0.0 }
 0x241   : > { %v8696_v47 = vpop.f32.mrb[94].mxu1  ;;  %v2528_v45 = vmul.f32 %v8348_v31, %v8348_v31 }
 0x242   : > { %v2931_v62 = vadd.f32 %v2930_v53, %v2929_v44  ;;  %v2156_v10 = vadd.f32 %v2155_v30, %v2154_v46  ;;  %v2527_v30 = vmul.f32 %v8352_v40, %v8352_v40  ;;  %v2163_v53 = vsel %vm1847_vm0, %v8352_v40, 0.0 }
 0x243   : > { %v2165_v40 = vsel %vm1847_vm0, %v8348_v31, 0.0 }
 0x244   : > { %v2158_v15 = vadd.f32 %v2157_v54, %v2156_v10  ;;  %v2933_v4 = vadd.f32 %v2932_v12, %v2931_v62  ;;  %v8702_v12 = vpop.f32.mrb[95].mxu1  ;;  %v2938_v10 = vsel %vm1847_vm0, %v2526_v5, 0.0  ;;  %v2940_v54 = vsel %vm1847_vm0, %v2527_v30, 0.0 }
 0x245   : > { %v8710_v8 = vpop.f32.mrb[96].mxu1  ;;  %v2530_v30 = vmul.f32 %v8356_v58, %v8356_v58 }
 0x246   : > { %v2935_v46 = vadd.f32 %v2934_v36, %v2933_v4  ;;  %v2160_v44 = vadd.f32 %v2159_v21, %v2158_v15  ;;  %v2529_v21 = vmul.f32 %v8360_v1, %v8360_v1  ;;  %v2167_v36 = vsel %vm1847_vm0, %v8360_v1, 0.0 }
 0x247   : > { %v2169_v1 = vsel %vm1847_vm0, %v8356_v58, 0.0 }
 0x248   : > { %v2162_v57 = vadd.f32 %v2161_v17, %v2160_v44  ;;  %v2937_v62 = vadd.f32 %v2936_v34, %v2935_v46  ;;  %v8716_v34 = vpop.f32.mrb[97].mxu1  ;;  %v2942_v44 = vsel %vm1847_vm0, %v2528_v45, 0.0  ;;  %v2944_v17 = vsel %vm1847_vm0, %v2529_v21, 0.0 }
 0x249   : > { %v8724_v31 = vpop.f32.mrb[98].mxu1  ;;  %v2532_v21 = vmul.f32 %v8364_v22, %v8364_v22 }
 0x24a   : > { %v2939_v15 = vadd.f32 %v2938_v10, %v2937_v62  ;;  %v2164_v4 = vadd.f32 %v2163_v53, %v2162_v57  ;;  %v2531_v53 = vmul.f32 %v8368_v29, %v8368_v29  ;;  %v2171_v10 = vsel %vm1847_vm0, %v8368_v29, 0.0 }
 0x24b   : > { %v2173_v29 = vsel %vm1847_vm0, %v8364_v22, 0.0 }
 0x24c   : > { %v2166_v5 = vadd.f32 %v2165_v40, %v2164_v4  ;;  %v2941_v46 = vadd.f32 %v2940_v54, %v2939_v15  ;;  %v8730_v54 = vpop.f32.mrb[99].mxu1  ;;  %v2946_v4 = vsel %vm1847_vm0, %v2530_v30, 0.0  ;;  %v2948_v40 = vsel %vm1847_vm0, %v2531_v53, 0.0 }
 0x24d   : > { %v8738_v58 = vpop.f32.mrb[100].mxu1  ;;  %v2534_v53 = vmul.f32 %v8372_v50, %v8372_v50 }
 0x24e   : > { %v2943_v57 = vadd.f32 %v2942_v44, %v2941_v46  ;;  %v2168_v62 = vadd.f32 %v2167_v36, %v2166_v5  ;;  %v2533_v36 = vmul.f32 %v8376_v61, %v8376_v61  ;;  %v2175_v44 = vsel %vm1847_vm0, %v8376_v61, 0.0 }
 0x24f   : > { %v2177_v61 = vsel %vm1847_vm0, %v8372_v50, 0.0 }
 0x250   : > { %v2170_v45 = vadd.f32 %v2169_v1, %v2168_v62  ;;  %v2945_v15 = vadd.f32 %v2944_v17, %v2943_v57  ;;  %v8744_v17 = vpop.f32.mrb[101].mxu1  ;;  %v2950_v62 = vsel %vm1847_vm0, %v2532_v21, 0.0  ;;  %v2952_v1 = vsel %vm1847_vm0, %v2533_v36, 0.0 }
 0x251   : > { %v8752_v22 = vpop.f32.mrb[102].mxu1  ;;  %v2536_v36 = vmul.f32 %v8380_v19, %v8380_v19 }
 0x252   : > { %v2947_v5 = vadd.f32 %v2946_v4, %v2945_v15  ;;  %v2172_v46 = vadd.f32 %v2171_v10, %v2170_v45  ;;  %v2535_v10 = vmul.f32 %v8384_v25, %v8384_v25  ;;  %v2179_v4 = vsel %vm1847_vm0, %v8384_v25, 0.0 }
 0x253   : > { %v2181_v25 = vsel %vm1847_vm0, %v8380_v19, 0.0 }
 0x254   : > { %v2174_v30 = vadd.f32 %v2173_v29, %v2172_v46  ;;  %v2949_v57 = vadd.f32 %v2948_v40, %v2947_v5  ;;  %v8758_v40 = vpop.f32.mrb[103].mxu1  ;;  %v2954_v46 = vsel %vm1847_vm0, %v2534_v53, 0.0  ;;  %v2956_v29 = vsel %vm1847_vm0, %v2535_v10, 0.0 }
 0x255   : > { %v8766_v50 = vpop.f32.mrb[104].mxu1  ;;  %v2538_v10 = vmul.f32 %v8388_v52, %v8388_v52 }
 0x256   : > { %v2951_v45 = vadd.f32 %v2950_v62, %v2949_v57  ;;  %v2176_v15 = vadd.f32 %v2175_v44, %v2174_v30  ;;  %v2537_v44 = vmul.f32 %v8392_v63, %v8392_v63  ;;  %v2183_v62 = vsel %vm1847_vm0, %v8392_v63, 0.0 }
 0x257   : > { %v2185_v63 = vsel %vm1847_vm0, %v8388_v52, 0.0 }
 0x258   : > { %v2178_v21 = vadd.f32 %v2177_v61, %v2176_v15  ;;  %v2953_v5 = vadd.f32 %v2952_v1, %v2951_v45  ;;  %v8772_v1 = vpop.f32.mrb[105].mxu1  ;;  %v2958_v15 = vsel %vm1847_vm0, %v2536_v36, 0.0  ;;  %v2960_v61 = vsel %vm1847_vm0, %v2537_v44, 0.0  ;;  %v11655_v44 = vld [vmem:[#allocation6_spill] sm:$0xff] }
 0x259   : > { %v8780_v19 = vpop.f32.mrb[106].mxu1 }
 0x25a   : > { %v2955_v30 = vadd.f32 %v2954_v46, %v2953_v5  ;;  %v2180_v57 = vadd.f32 %v2179_v4, %v2178_v21  ;;  %v2539_v4 = vmul.f32 %v8400_v39, %v8400_v39  ;;  %11653 = vst [vmem:[#allocation25_spill] sm:$0xff] %v8780_v19  ;;  %v2187_v46 = vsel %vm1847_vm0, %v8400_v39, 0.0 }
 0x25b   : > { %v2189_v39 = vsel %vm1847_vm0, %v11655_v44, 0.0 }
 0x25c   : > { %v2182_v53 = vadd.f32 %v2181_v25, %v2180_v57  ;;  %v2957_v45 = vadd.f32 %v2956_v29, %v2955_v30  ;;  %v8786_v29 = vpop.f32.mrb[107].mxu1  ;;  %v2962_v57 = vsel %vm1847_vm0, %v2538_v10, 0.0  ;;  %v2540_v25 = vmul.f32 %v11655_v44, %v11655_v44 }
 0x25d   : > { %11654 = vst [vmem:[#allocation26_spill] sm:$0xff] %v8786_v29  ;;  %v8794_v52 = vpop.f32.mrb[108].mxu1 }
 0x25e   : > { %v2959_v21 = vadd.f32 %v2958_v15, %v2957_v45  ;;  %v2184_v5 = vadd.f32 %v2183_v62, %v2182_v53  ;;  %v2964_v45 = vsel %vm1847_vm0, %v2539_v4, 0.0  ;;  %v11656_v62 = vld [vmem:[#allocation8_spill] sm:$0xff]  ;;  %11657 = vst [vmem:[#allocation6_spill] sm:$0xff] %v8794_v52  ;;  %v11659_v4 = vld [vmem:[#allocation7_spill] sm:$0xff] }
 0x25f   : > { %v2541_v53 = vmul.f32 %v11656_v62, %v11656_v62  ;;  %v2542_v29 = vmul.f32 %v11659_v4, %v11659_v4 }
 0x260   : > { %v2186_v36 = vadd.f32 %v2185_v63, %v2184_v5  ;;  %v2961_v30 = vadd.f32 %v2960_v61, %v2959_v21  ;;  %v2191_v61 = vsel %vm1847_vm0, %v11656_v62, 0.0  ;;  %v8800_v21 = vpop.f32.mrb[109].mxu1  ;;  %v2966_v63 = vsel %vm1847_vm0, %v2540_v25, 0.0 }
 0x261   : > { %11658 = vst [vmem:[#allocation8_spill] sm:$0xff] %v8800_v21  ;;  %v8808_v44 = vpop.f32.mrb[110].mxu1  ;;  %v2193_v62 = vsel %vm1847_vm0, %v11659_v4, 0.0 }
 0x262   : > { %v2963_v15 = vadd.f32 %v2962_v57, %v2961_v30  ;;  %v2188_v19 = vadd.f32 %v2187_v46, %v2186_v36  ;;  %v2968_v30 = vsel %vm1847_vm0, %v2541_v53, 0.0  ;;  %v11660_v46 = vld [vmem:[#allocation10_spill] sm:$0xff]  ;;  %11661 = vst [vmem:[#allocation7_spill] sm:$0xff] %v8808_v44  ;;  %v11663_v53 = vld [vmem:[#allocation9_spill] sm:$0xff] }
 0x263   : > { %v2543_v36 = vmul.f32 %v11660_v46, %v11660_v46  ;;  %v2544_v21 = vmul.f32 %v11663_v53, %v11663_v53 }
 0x264   : > { %v2190_v10 = vadd.f32 %v2189_v39, %v2188_v19  ;;  %v2965_v5 = vadd.f32 %v2964_v45, %v2963_v15  ;;  %v2195_v19 = vsel %vm1847_vm0, %v11660_v46, 0.0  ;;  %v8814_v45 = vpop.f32.mrb[111].mxu1  ;;  %v2970_v39 = vsel %vm1847_vm0, %v2542_v29, 0.0 }
 0x265   : > { %11662 = vst [vmem:[#allocation10_spill] sm:$0xff] %v8814_v45  ;;  %v8822_v4 = vpop.f32.mrb[112].mxu1  ;;  %v2197_v46 = vsel %vm1847_vm0, %v11663_v53, 0.0 }
 0x266   : > { %v2967_v57 = vadd.f32 %v2966_v63, %v2965_v5  ;;  %v2192_v52 = vadd.f32 %v2191_v61, %v2190_v10  ;;  %v2972_v5 = vsel %vm1847_vm0, %v2543_v36, 0.0  ;;  %v11664_v61 = vld [vmem:[#allocation12_spill] sm:$0xff]  ;;  %11665 = vst [vmem:[#allocation9_spill] sm:$0xff] %v8822_v4  ;;  %v11667_v36 = vld [vmem:[#allocation11_spill] sm:$0xff] }
 0x267   : > { %v2545_v10 = vmul.f32 %v11664_v61, %v11664_v61  ;;  %v2546_v45 = vmul.f32 %v11667_v36, %v11667_v36 }
 0x268   : > { %v2194_v25 = vadd.f32 %v2193_v62, %v2192_v52  ;;  %v2969_v15 = vadd.f32 %v2968_v30, %v2967_v57  ;;  %v2199_v52 = vsel %vm1847_vm0, %v11664_v61, 0.0  ;;  %v8828_v30 = vpop.f32.mrb[113].mxu1  ;;  %v2974_v62 = vsel %vm1847_vm0, %v2544_v21, 0.0 }
 0x269   : > { %11666 = vst [vmem:[#allocation12_spill] sm:$0xff] %v8828_v30  ;;  %v8836_v53 = vpop.f32.mrb[114].mxu1  ;;  %v2201_v61 = vsel %vm1847_vm0, %v11667_v36, 0.0 }
 0x26a   : > { %v2971_v63 = vadd.f32 %v2970_v39, %v2969_v15  ;;  %v2196_v44 = vadd.f32 %v2195_v19, %v2194_v25  ;;  %v2976_v15 = vsel %vm1847_vm0, %v2545_v10, 0.0  ;;  %v11668_v19 = vld [vmem:[#allocation14_spill] sm:$0xff]  ;;  %11669 = vst [vmem:[#allocation11_spill] sm:$0xff] %v8836_v53  ;;  %v11671_v10 = vld [vmem:[#allocation13_spill] sm:$0xff] }
 0x26b   : > { %v2547_v25 = vmul.f32 %v11668_v19, %v11668_v19  ;;  %v2548_v30 = vmul.f32 %v11671_v10, %v11671_v10 }
 0x26c   : > { %v2198_v29 = vadd.f32 %v2197_v46, %v2196_v44  ;;  %v2973_v57 = vadd.f32 %v2972_v5, %v2971_v63  ;;  %v2203_v44 = vsel %vm1847_vm0, %v11668_v19, 0.0  ;;  %v8842_v5 = vpop.f32.mrb[115].mxu1  ;;  %v2978_v46 = vsel %vm1847_vm0, %v2546_v45, 0.0 }
 0x26d   : > { %11670 = vst [vmem:[#allocation14_spill] sm:$0xff] %v8842_v5  ;;  %v8850_v36 = vpop.f32.mrb[116].mxu1  ;;  %v2205_v19 = vsel %vm1847_vm0, %v11671_v10, 0.0 }
 0x26e   : > { %v2975_v39 = vadd.f32 %v2974_v62, %v2973_v57  ;;  %v2200_v4 = vadd.f32 %v2199_v52, %v2198_v29  ;;  %v2980_v57 = vsel %vm1847_vm0, %v2547_v25, 0.0  ;;  %v11672_v52 = vld [vmem:[#allocation16_spill] sm:$0xff]  ;;  %11673 = vst [vmem:[#allocation13_spill] sm:$0xff] %v8850_v36  ;;  %v11675_v25 = vld [vmem:[#allocation15_spill] sm:$0xff] }
 0x26f   : > { %v2549_v29 = vmul.f32 %v11672_v52, %v11672_v52  ;;  %v2550_v5 = vmul.f32 %v11675_v25, %v11675_v25 }
 0x270   : > { %v2202_v21 = vadd.f32 %v2201_v61, %v2200_v4  ;;  %v2977_v63 = vadd.f32 %v2976_v15, %v2975_v39  ;;  %v2207_v4 = vsel %vm1847_vm0, %v11672_v52, 0.0  ;;  %v8856_v15 = vpop.f32.mrb[117].mxu1  ;;  %v2982_v61 = vsel %vm1847_vm0, %v2548_v30, 0.0 }
 0x271   : > { %11674 = vst [vmem:[#allocation16_spill] sm:$0xff] %v8856_v15  ;;  %v8864_v10 = vpop.f32.mrb[118].mxu1  ;;  %v2209_v52 = vsel %vm1847_vm0, %v11675_v25, 0.0 }
 0x272   : > { %v2979_v62 = vadd.f32 %v2978_v46, %v2977_v63  ;;  %v2204_v53 = vadd.f32 %v2203_v44, %v2202_v21  ;;  %v2984_v63 = vsel %vm1847_vm0, %v2549_v29, 0.0  ;;  %v11676_v44 = vld [vmem:[#allocation18_spill] sm:$0xff]  ;;  %11677 = vst [vmem:[#allocation15_spill] sm:$0xff] %v8864_v10  ;;  %v11679_v29 = vld [vmem:[#allocation17_spill] sm:$0xff] }
 0x273   : > { %v2551_v21 = vmul.f32 %v11676_v44, %v11676_v44  ;;  %v2552_v15 = vmul.f32 %v11679_v29, %v11679_v29 }
 0x274   : > { %v2206_v45 = vadd.f32 %v2205_v19, %v2204_v53  ;;  %v2981_v39 = vadd.f32 %v2980_v57, %v2979_v62  ;;  %v2211_v53 = vsel %vm1847_vm0, %v11676_v44, 0.0  ;;  %v8870_v57 = vpop.f32.mrb[119].mxu1  ;;  %v2986_v19 = vsel %vm1847_vm0, %v2550_v5, 0.0 }
 0x275   : > { %11678 = vst [vmem:[#allocation18_spill] sm:$0xff] %v8870_v57  ;;  %v8878_v25 = vpop.f32.mrb[120].mxu1  ;;  %v2213_v44 = vsel %vm1847_vm0, %v11679_v29, 0.0 }
 0x276   : > { %v2983_v46 = vadd.f32 %v2982_v61, %v2981_v39  ;;  %v2208_v36 = vadd.f32 %v2207_v4, %v2206_v45  ;;  %v2988_v39 = vsel %vm1847_vm0, %v2551_v21, 0.0  ;;  %v11680_v4 = vld [vmem:[#allocation20_spill] sm:$0xff]  ;;  %11681 = vst [vmem:[#allocation17_spill] sm:$0xff] %v8878_v25  ;;  %v11683_v21 = vld [vmem:[#allocation19_spill] sm:$0xff] }
 0x277   : > { %v2553_v45 = vmul.f32 %v11680_v4, %v11680_v4  ;;  %v2554_v57 = vmul.f32 %v11683_v21, %v11683_v21 }
 0x278   : > { %v2210_v30 = vadd.f32 %v2209_v52, %v2208_v36  ;;  %v2985_v62 = vadd.f32 %v2984_v63, %v2983_v46  ;;  %v2215_v36 = vsel %vm1847_vm0, %v11680_v4, 0.0  ;;  %v8884_v63 = vpop.f32.mrb[121].mxu1  ;;  %v2990_v52 = vsel %vm1847_vm0, %v2552_v15, 0.0 }
 0x279   : > { %11682 = vst [vmem:[#allocation20_spill] sm:$0xff] %v8884_v63  ;;  %v8892_v29 = vpop.f32.mrb[122].mxu1  ;;  %v2217_v4 = vsel %vm1847_vm0, %v11683_v21, 0.0 }
 0x27a   : > { %v2987_v61 = vadd.f32 %v2986_v19, %v2985_v62  ;;  %v2212_v10 = vadd.f32 %v2211_v53, %v2210_v30  ;;  %v2992_v62 = vsel %vm1847_vm0, %v2553_v45, 0.0  ;;  %v11684_v53 = vld [vmem:[#allocation22_spill] sm:$0xff]  ;;  %11685 = vst [vmem:[#allocation19_spill] sm:$0xff] %v8892_v29  ;;  %v11686_v45 = vld [vmem:[#allocation21_spill] sm:$0xff] }
 0x27b   : > { %v2555_v30 = vmul.f32 %v11684_v53, %v11684_v53  ;;  %v2556_v63 = vmul.f32 %v11686_v45, %v11686_v45 }
 0x27c   : > { %v2214_v5 = vadd.f32 %v2213_v44, %v2212_v10  ;;  %v2989_v46 = vadd.f32 %v2988_v39, %v2987_v61  ;;  %v2219_v10 = vsel %vm1847_vm0, %v11684_v53, 0.0  ;;  %v8898_v39 = vpop.f32.mrb[123].mxu1  ;;  %v2994_v44 = vsel %vm1847_vm0, %v2554_v57, 0.0 }
 0x27d   : > { %v8906_v21 = vpop.f32.mrb[124].mxu1  ;;  %v2221_v53 = vsel %vm1847_vm0, %v11686_v45, 0.0  ;;  %v2998_v29 = vsel %vm1847_vm0, %v2556_v63, 0.0 }
 0x27e   : > { %v2991_v19 = vadd.f32 %v2990_v52, %v2989_v46  ;;  %v2216_v25 = vadd.f32 %v2215_v36, %v2214_v5  ;;  %v2996_v46 = vsel %vm1847_vm0, %v2555_v30, 0.0  ;;  %v2557_v36 = vmul.f32 %v8472_v9, %v8472_v9  ;;  %11687 = vst [vmem:[#allocation22_spill] sm:$0xff] %v8906_v21 }
 0x280   : > { %v2218_v15 = vadd.f32 %v2217_v4, %v2216_v25  ;;  %v2993_v61 = vadd.f32 %v2992_v62, %v2991_v19  ;;  %v2223_v25 = vsel %vm1847_vm0, %v8472_v9, 0.0  ;;  %v8912_v62 = vpop.f32.mrb[125].mxu1  ;;  %v11688_v4 = vld [vmem:[#allocation23_spill] sm:$0xff] }
 0x281   : > { %v2558_v30 = vmul.f32 %v11688_v4, %v11688_v4  ;;  %v8920_v45 = vpop.f32.mrb[126].mxu1  ;;  %v2225_v9 = vsel %vm1847_vm0, %v11688_v4, 0.0  ;;  %v7240_v4 = vmov 0.0  }
 0x282   : > { %v2995_v5 = vadd.f32 %v2994_v44, %v2993_v61  ;;  %v2220_v52 = vadd.f32 %v2219_v10, %v2218_v15  ;;  %v3000_v61 = vsel %vm1847_vm0, %v2557_v36, 0.0  ;;  %v2559_v10 = vmul.f32 %v8480_v41, %v8480_v41  ;;  %v11689_v36 = vld [vmem:[#allocation24_spill] sm:$0xff]  ;;  %1844 = vst.msk [vmem:[#allocation2] sm:$0x1] %vm1843_vm1, %v7240_v4  ;;  %1845 = vst.msk [vmem:[#allocation3] sm:$0x1] %vm1843_vm1, %v7240_v4 }
 0x283   : > { %v2560_v21 = vmul.f32 %v11689_v36, %v11689_v36 }
 0x284   : > { %v2222_v57 = vadd.f32 %v2221_v53, %v2220_v52  ;;  %v2997_v19 = vadd.f32 %v2996_v46, %v2995_v5  ;;  %v2227_v46 = vsel %vm1847_vm0, %v8480_v41, 0.0  ;;  %v8926_v5 = vpop.f32.mrb[127].mxu1  ;;  %v3002_v52 = vsel %vm1847_vm0, %v2558_v30, 0.0 }
 0x285   : > { %v2229_v41 = vsel %vm1847_vm0, %v11689_v36, 0.0  ;;  %v2231_v30 = vsel %vm1847_vm0, %v8492_v3, 0.0 }
 0x286   : > { %v2999_v15 = vadd.f32 %v2998_v29, %v2997_v19  ;;  %v2224_v44 = vadd.f32 %v2223_v25, %v2222_v57  ;;  %v3004_v29 = vsel %vm1847_vm0, %v2559_v10, 0.0  ;;  %v2561_v25 = vmul.f32 %v8492_v3, %v8492_v3 }
 0x287   : > { %v3006_v10 = vsel %vm1847_vm0, %v2560_v21, 0.0  ;;  %v2235_v3 = vsel %vm1847_vm0, %v8506_v42, 0.0 }
 0x288   : > { %v2226_v63 = vadd.f32 %v2225_v9, %v2224_v44  ;;  %v3001_v53 = vadd.f32 %v3000_v61, %v2999_v15  ;;  %v2562_v44 = vmul.f32 %v8486_v24, %v8486_v24  ;;  %v3008_v9 = vsel %vm1847_vm0, %v2561_v25, 0.0 }
 0x28a   : > { %v3003_v57 = vadd.f32 %v3002_v52, %v3001_v53  ;;  %v2228_v19 = vadd.f32 %v2227_v46, %v2226_v63  ;;  %v2563_v46 = vmul.f32 %v8506_v42, %v8506_v42  ;;  %v2233_v53 = vsel %vm1847_vm0, %v8486_v24, 0.0 }
 0x28b   : > { %v3010_v21 = vsel %vm1847_vm0, %v2562_v44, 0.0  ;;  %v2237_v24 = vsel %vm1847_vm0, %v8500_v18, 0.0  ;;  %v2239_v42 = vsel %vm1847_vm0, %v8520_v23, 0.0 }
 0x28c   : > { %v2230_v61 = vadd.f32 %v2229_v41, %v2228_v19  ;;  %v3005_v15 = vadd.f32 %v3004_v29, %v3003_v57  ;;  %v2564_v57 = vmul.f32 %v8500_v18, %v8500_v18  ;;  %v3012_v25 = vsel %vm1847_vm0, %v2563_v46, 0.0 }
 0x28d   : > { %v2565_v19 = vmul.f32 %v8520_v23, %v8520_v23  ;;  %v2241_v18 = vsel %vm1847_vm0, %v8514_v59, 0.0  ;;  %v2243_v23 = vsel %vm1847_vm0, %v8534_v37, 0.0 }
 0x28e   : > { %v3007_v52 = vadd.f32 %v3006_v10, %v3005_v15  ;;  %v2232_v63 = vadd.f32 %v2231_v30, %v2230_v61  ;;  %v3014_v15 = vsel %vm1847_vm0, %v2564_v57, 0.0  ;;  %v2566_v10 = vmul.f32 %v8514_v59, %v8514_v59 }
 0x28f   : > { %v3016_v44 = vsel %vm1847_vm0, %v2565_v19, 0.0  ;;  %v2245_v59 = vsel %vm1847_vm0, %v8528_v11, 0.0 }
 0x290   : > { %v2234_v36 = vadd.f32 %v2233_v53, %v2232_v63  ;;  %v3009_v29 = vadd.f32 %v3008_v9, %v3007_v52  ;;  %v2567_v9 = vmul.f32 %v8534_v37, %v8534_v37  ;;  %v2247_v37 = vsel %vm1847_vm0, %v8548_v0, 0.0 }
 0x292   : > { %v3011_v4 = vadd.f32 %v3010_v21, %v3009_v29  ;;  %v2236_v41 = vadd.f32 %v2235_v3, %v2234_v36  ;;  %v3018_v3 = vsel %vm1847_vm0, %v2566_v10, 0.0  ;;  %v2568_v36 = vmul.f32 %v8528_v11, %v8528_v11 }
 0x293   : > { %v3020_v29 = vsel %vm1847_vm0, %v2567_v9, 0.0  ;;  %v2569_v21 = vmul.f32 %v8548_v0, %v8548_v0  ;;  %v2249_v11 = vsel %vm1847_vm0, %v8542_v27, 0.0  ;;  %v2251_v0 = vsel %vm1847_vm0, %v8562_v16, 0.0 }
 0x294   : > { %v3013_v30 = vadd.f32 %v3012_v25, %v3011_v4  ;;  %v2238_v61 = vadd.f32 %v2237_v24, %v2236_v41  ;;  %v3022_v41 = vsel %vm1847_vm0, %v2568_v36, 0.0  ;;  %v2570_v24 = vmul.f32 %v8542_v27, %v8542_v27 }
 0x295   : > { %v2253_v27 = vsel %vm1847_vm0, %v8556_v43, 0.0 }
 0x296   : > { %v2240_v46 = vadd.f32 %v2239_v42, %v2238_v61  ;;  %v3015_v52 = vadd.f32 %v3014_v15, %v3013_v30  ;;  %v3024_v42 = vsel %vm1847_vm0, %v2569_v21, 0.0  ;;  %v2571_v30 = vmul.f32 %v8562_v16, %v8562_v16 }
 0x297   : > { %v3026_v9 = vsel %vm1847_vm0, %v2570_v24, 0.0  ;;  %v2255_v16 = vsel %vm1847_vm0, %v8576_v32, 0.0 }
 0x298   : > { %v3017_v63 = vadd.f32 %v3016_v44, %v3015_v52  ;;  %v2242_v53 = vadd.f32 %v2241_v18, %v2240_v46  ;;  %v2572_v46 = vmul.f32 %v8556_v43, %v8556_v43  ;;  %v3028_v52 = vsel %vm1847_vm0, %v2571_v30, 0.0 }
 0x299   : > { %v2573_v18 = vmul.f32 %v8576_v32, %v8576_v32  ;;  %v2257_v43 = vsel %vm1847_vm0, %v8570_v60, 0.0  ;;  %v2259_v32 = vsel %vm1847_vm0, %v8590_v48, 0.0 }
 0x29a   : > { %v2244_v57 = vadd.f32 %v2243_v23, %v2242_v53  ;;  %v3019_v25 = vadd.f32 %v3018_v3, %v3017_v63  ;;  %v3030_v36 = vsel %vm1847_vm0, %v2572_v46, 0.0 }
 0x29b   : > { %v3032_v21 = vsel %vm1847_vm0, %v2573_v18, 0.0 }
 0x29c   : > { %v3021_v19 = vadd.f32 %v3020_v29, %v3019_v25  ;;  %v2246_v4 = vadd.f32 %v2245_v59, %v2244_v57  ;;  %v2574_v29 = vmul.f32 %v8570_v60, %v8570_v60  ;;  %v2575_v57 = vmul.f32 %v8590_v48, %v8590_v48 }
 0x29d   : > { %v2261_v60 = vsel %vm1847_vm0, %v8584_v14, 0.0  ;;  %v2263_v48 = vsel %vm1847_vm0, %v8604_v2, 0.0 }
 0x29e   : > { %v2248_v61 = vadd.f32 %v2247_v37, %v2246_v4  ;;  %v3023_v15 = vadd.f32 %v3022_v41, %v3021_v19  ;;  %v3034_v4 = vsel %vm1847_vm0, %v2574_v29, 0.0  ;;  %v2576_v41 = vmul.f32 %v8584_v14, %v8584_v14 }
 0x29f   : > { %v3036_v24 = vsel %vm1847_vm0, %v2575_v57, 0.0  ;;  %v2265_v14 = vsel %vm1847_vm0, %v8598_v33, 0.0 }
 0x2a0   : > { %v3025_v10 = vadd.f32 %v3024_v42, %v3023_v15  ;;  %v2250_v44 = vadd.f32 %v2249_v11, %v2248_v61  ;;  %v2577_v42 = vmul.f32 %v8604_v2, %v8604_v2  ;;  %v2267_v2 = vsel %vm1847_vm0, %v8618_v20, 0.0 }
 0x2a2   : > { %v2252_v23 = vadd.f32 %v2251_v0, %v2250_v44  ;;  %v3027_v63 = vadd.f32 %v3026_v9, %v3025_v10  ;;  %v3038_v0 = vsel %vm1847_vm0, %v2576_v41, 0.0  ;;  %v2578_v10 = vmul.f32 %v8598_v33, %v8598_v33 }
 0x2a3   : > { %v3040_v44 = vsel %vm1847_vm0, %v2577_v42, 0.0  ;;  %v2579_v9 = vmul.f32 %v8618_v20, %v8618_v20  ;;  %v2269_v33 = vsel %vm1847_vm0, %v8612_v51, 0.0  ;;  %v2271_v20 = vsel %vm1847_vm0, %v8632_v38, 0.0 }
 0x2a4   : > { %v3029_v53 = vadd.f32 %v3028_v52, %v3027_v63  ;;  %v2254_v3 = vadd.f32 %v2253_v27, %v2252_v23  ;;  %v3042_v63 = vsel %vm1847_vm0, %v2578_v10, 0.0  ;;  %v2580_v27 = vmul.f32 %v8612_v51, %v8612_v51 }
 0x2a5   : > { %v2273_v51 = vsel %vm1847_vm0, %v8626_v7, 0.0 }
 0x2a6   : > { %v2256_v25 = vadd.f32 %v2255_v16, %v2254_v3  ;;  %v3031_v59 = vadd.f32 %v3030_v36, %v3029_v53  ;;  %v3044_v16 = vsel %vm1847_vm0, %v2579_v9, 0.0  ;;  %v2581_v53 = vmul.f32 %v8632_v38, %v8632_v38 }
 0x2a7   : > { %v3046_v57 = vsel %vm1847_vm0, %v2580_v27, 0.0  ;;  %v2275_v38 = vsel %vm1847_vm0, %v8646_v56, 0.0 }
 0x2a8   : > { %v3033_v37 = vadd.f32 %v3032_v21, %v3031_v59  ;;  %v2258_v19 = vadd.f32 %v2257_v43, %v2256_v25  ;;  %v2582_v25 = vmul.f32 %v8626_v7, %v8626_v7  ;;  %v3048_v59 = vsel %vm1847_vm0, %v2581_v53, 0.0 }
 0x2a9   : > { %v2583_v43 = vmul.f32 %v8646_v56, %v8646_v56  ;;  %v2277_v7 = vsel %vm1847_vm0, %v8640_v28, 0.0  ;;  %v2279_v56 = vsel %vm1847_vm0, %v8660_v13, 0.0 }
 0x2aa   : > { %v2260_v30 = vadd.f32 %v2259_v32, %v2258_v19  ;;  %v3035_v61 = vadd.f32 %v3034_v4, %v3033_v37  ;;  %v3050_v41 = vsel %vm1847_vm0, %v2582_v25, 0.0 }
 0x2ab   : > { %v3052_v42 = vsel %vm1847_vm0, %v2583_v43, 0.0 }
 0x2ac   : > { %v3037_v15 = vadd.f32 %v3036_v24, %v3035_v61  ;;  %v2262_v11 = vadd.f32 %v2261_v60, %v2260_v30  ;;  %v2584_v24 = vmul.f32 %v8640_v28, %v8640_v28  ;;  %v2585_v30 = vmul.f32 %v8660_v13, %v8660_v13 }
 0x2ad   : > { %v2281_v28 = vsel %vm1847_vm0, %v8654_v49, 0.0  ;;  %v2283_v13 = vsel %vm1847_vm0, %v8674_v35, 0.0 }
 0x2ae   : > { %v2264_v46 = vadd.f32 %v2263_v48, %v2262_v11  ;;  %v3039_v52 = vadd.f32 %v3038_v0, %v3037_v15  ;;  %v3054_v11 = vsel %vm1847_vm0, %v2584_v24, 0.0  ;;  %v2586_v0 = vmul.f32 %v8654_v49, %v8654_v49 }
 0x2af   : > { %v3056_v10 = vsel %vm1847_vm0, %v2585_v30, 0.0  ;;  %v2285_v49 = vsel %vm1847_vm0, %v8668_v6, 0.0 }
 0x2b0   : > { %v3041_v18 = vadd.f32 %v3040_v44, %v3039_v52  ;;  %v2266_v23 = vadd.f32 %v2265_v14, %v2264_v46  ;;  %v2587_v44 = vmul.f32 %v8674_v35, %v8674_v35  ;;  %v2287_v35 = vsel %vm1847_vm0, %v8688_v55, 0.0 }
 0x2b2   : > { %v2268_v3 = vadd.f32 %v2267_v2, %v2266_v23  ;;  %v3043_v36 = vadd.f32 %v3042_v63, %v3041_v18  ;;  %v3058_v2 = vsel %vm1847_vm0, %v2586_v0, 0.0  ;;  %v2588_v18 = vmul.f32 %v8668_v6, %v8668_v6 }
 0x2b3   : > { %v3060_v23 = vsel %vm1847_vm0, %v2587_v44, 0.0  ;;  %v2589_v63 = vmul.f32 %v8688_v55, %v8688_v55  ;;  %v2289_v6 = vsel %vm1847_vm0, %v8682_v26, 0.0  ;;  %v2291_v55 = vsel %vm1847_vm0, %v8702_v12, 0.0 }
 0x2b4   : > { %v3045_v29 = vadd.f32 %v3044_v16, %v3043_v36  ;;  %v2270_v21 = vadd.f32 %v2269_v33, %v2268_v3  ;;  %v3062_v36 = vsel %vm1847_vm0, %v2588_v18, 0.0  ;;  %v2590_v33 = vmul.f32 %v8682_v26, %v8682_v26 }
 0x2b5   : > { %v2293_v26 = vsel %vm1847_vm0, %v8696_v47, 0.0 }
 0x2b6   : > { %v2272_v32 = vadd.f32 %v2271_v20, %v2270_v21  ;;  %v3047_v37 = vadd.f32 %v3046_v57, %v3045_v29  ;;  %v3064_v20 = vsel %vm1847_vm0, %v2589_v63, 0.0  ;;  %v2591_v29 = vmul.f32 %v8702_v12, %v8702_v12 }
 0x2b7   : > { %v3066_v43 = vsel %vm1847_vm0, %v2590_v33, 0.0  ;;  %v2295_v12 = vsel %vm1847_vm0, %v8716_v34, 0.0 }
 0x2b8   : > { %v3049_v19 = vadd.f32 %v3048_v59, %v3047_v37  ;;  %v2274_v4 = vadd.f32 %v2273_v51, %v2272_v32  ;;  %v2592_v32 = vmul.f32 %v8696_v47, %v8696_v47  ;;  %v3068_v37 = vsel %vm1847_vm0, %v2591_v29, 0.0 }
 0x2b9   : > { %v2593_v51 = vmul.f32 %v8716_v34, %v8716_v34  ;;  %v2297_v47 = vsel %vm1847_vm0, %v8710_v8, 0.0  ;;  %v2299_v34 = vsel %vm1847_vm0, %v8730_v54, 0.0 }
 0x2ba   : > { %v2276_v61 = vadd.f32 %v2275_v38, %v2274_v4  ;;  %v3051_v60 = vadd.f32 %v3050_v41, %v3049_v19  ;;  %v3070_v24 = vsel %vm1847_vm0, %v2592_v32, 0.0 }
 0x2bb   : > { %v3072_v30 = vsel %vm1847_vm0, %v2593_v51, 0.0  ;;  %v11691_v51 = vld [vmem:[#allocation25_spill] sm:$0xff] }
 0x2bc   : > { %v3053_v48 = vadd.f32 %v3052_v42, %v3051_v60  ;;  %v2278_v15 = vadd.f32 %v2277_v7, %v2276_v61  ;;  %v2594_v42 = vmul.f32 %v8710_v8, %v8710_v8  ;;  %v2595_v61 = vmul.f32 %v8730_v54, %v8730_v54 }
 0x2bd   : > { %v2301_v8 = vsel %vm1847_vm0, %v8724_v31, 0.0  ;;  %v2303_v54 = vsel %vm1847_vm0, %v8744_v17, 0.0 }
 0x2be   : > { %v2280_v9 = vadd.f32 %v2279_v56, %v2278_v15  ;;  %v3055_v46 = vadd.f32 %v3054_v11, %v3053_v48  ;;  %v3074_v15 = vsel %vm1847_vm0, %v2594_v42, 0.0  ;;  %v2596_v11 = vmul.f32 %v8724_v31, %v8724_v31 }
 0x2bf   : > { %v3076_v0 = vsel %vm1847_vm0, %v2595_v61, 0.0  ;;  %v2305_v31 = vsel %vm1847_vm0, %v8738_v58, 0.0 }
 0x2c0   : > { %v3057_v52 = vadd.f32 %v3056_v10, %v3055_v46  ;;  %v2282_v14 = vadd.f32 %v2281_v28, %v2280_v9  ;;  %v2597_v10 = vmul.f32 %v8744_v17, %v8744_v17  ;;  %v2307_v17 = vsel %vm1847_vm0, %v8758_v40, 0.0 }
 0x2c2   : > { %v2284_v27 = vadd.f32 %v2283_v13, %v2282_v14  ;;  %v3059_v16 = vadd.f32 %v3058_v2, %v3057_v52  ;;  %v3078_v13 = vsel %vm1847_vm0, %v2596_v11, 0.0  ;;  %v2598_v52 = vmul.f32 %v8738_v58, %v8738_v58 }
 0x2c3   : > { %v3080_v14 = vsel %vm1847_vm0, %v2597_v10, 0.0  ;;  %v2599_v2 = vmul.f32 %v8758_v40, %v8758_v40  ;;  %v2309_v58 = vsel %vm1847_vm0, %v8752_v22, 0.0  ;;  %v2311_v40 = vsel %vm1847_vm0, %v8772_v1, 0.0 }
 0x2c4   : > { %v3061_v53 = vadd.f32 %v3060_v23, %v3059_v16  ;;  %v2286_v3 = vadd.f32 %v2285_v49, %v2284_v27  ;;  %v3082_v16 = vsel %vm1847_vm0, %v2598_v52, 0.0  ;;  %v2600_v49 = vmul.f32 %v8752_v22, %v8752_v22 }
 0x2c5   : > { %v2313_v22 = vsel %vm1847_vm0, %v8766_v50, 0.0 }
 0x2c6   : > { %v2288_v21 = vadd.f32 %v2287_v35, %v2286_v3  ;;  %v3063_v57 = vadd.f32 %v3062_v36, %v3061_v53  ;;  %v3084_v35 = vsel %vm1847_vm0, %v2599_v2, 0.0  ;;  %v2601_v53 = vmul.f32 %v8772_v1, %v8772_v1 }
 0x2c7   : > { %v3086_v29 = vsel %vm1847_vm0, %v2600_v49, 0.0  ;;  %v11698_v49 = vld [vmem:[#allocation14_spill] sm:$0xff] }
 0x2c8   : > { %v3065_v25 = vadd.f32 %v3064_v20, %v3063_v57  ;;  %v2290_v59 = vadd.f32 %v2289_v6, %v2288_v21  ;;  %v2602_v21 = vmul.f32 %v8766_v50, %v8766_v50  ;;  %v3088_v57 = vsel %vm1847_vm0, %v2601_v53, 0.0  ;;  %v11690_v6 = vld [vmem:[#allocation26_spill] sm:$0xff] }
 0x2c9   : > { %v2315_v1 = vsel %vm1847_vm0, %v11690_v6, 0.0  ;;  %v2317_v50 = vsel %vm1847_vm0, %v11691_v51, 0.0 }
 0x2ca   : > { %v2292_v38 = vadd.f32 %v2291_v55, %v2290_v59  ;;  %v3067_v19 = vadd.f32 %v3066_v43, %v3065_v25  ;;  %v2603_v55 = vmul.f32 %v11690_v6, %v11690_v6  ;;  %v11700_v6 = vld [vmem:[#allocation16_spill] sm:$0xff] }
 0x2cc   : > { %v3069_v4 = vadd.f32 %v3068_v37, %v3067_v19  ;;  %v2294_v41 = vadd.f32 %v2293_v26, %v2292_v38  ;;  %v3090_v37 = vsel %vm1847_vm0, %v2602_v21, 0.0  ;;  %v2604_v38 = vmul.f32 %v11691_v51, %v11691_v51  ;;  %v11692_v26 = vld [vmem:[#allocation8_spill] sm:$0xff]  ;;  %v11701_v51 = vld [vmem:[#allocation13_spill] sm:$0xff] }
 0x2cd   : > { %v3092_v19 = vsel %vm1847_vm0, %v2603_v55, 0.0  ;;  %v2613_v55 = vmul.f32 %v11700_v6, %v11700_v6 }
 0x2ce   : > { %v2296_v60 = vadd.f32 %v2295_v12, %v2294_v41  ;;  %v3071_v7 = vadd.f32 %v3070_v24, %v3069_v4  ;;  %v2605_v12 = vmul.f32 %v11692_v26, %v11692_v26  ;;  %v2319_v24 = vsel %vm1847_vm0, %v11692_v26, 0.0  ;;  %v11702_v26 = vld [vmem:[#allocation18_spill] sm:$0xff] }
 0x2cf   : > { %v3094_v61 = vsel %vm1847_vm0, %v2604_v38, 0.0  ;;  %v2614_v38 = vmul.f32 %v11701_v51, %v11701_v51 }
 0x2d0   : > { %v3073_v56 = vadd.f32 %v3072_v30, %v3071_v7  ;;  %v2298_v48 = vadd.f32 %v2297_v47, %v2296_v60  ;;  %v11693_v60 = vld [vmem:[#allocation6_spill] sm:$0xff]  ;;  %v3096_v47 = vsel %vm1847_vm0, %v2605_v12, 0.0  ;;  %v2615_v12 = vmul.f32 %v11702_v26, %v11702_v26 }
 0x2d1   : > { %v2606_v7 = vmul.f32 %v11693_v60, %v11693_v60  ;;  %v2321_v11 = vsel %vm1847_vm0, %v11693_v60, 0.0  ;;  %v11703_v60 = vld [vmem:[#allocation15_spill] sm:$0xff] }
 0x2d2   : > { %v2300_v44 = vadd.f32 %v2299_v34, %v2298_v48  ;;  %v3075_v9 = vadd.f32 %v3074_v15, %v3073_v56  ;;  %v11694_v34 = vld [vmem:[#allocation10_spill] sm:$0xff] }
 0x2d3   : > { %v2607_v56 = vmul.f32 %v11694_v34, %v11694_v34 }
 0x2d4   : > { %v3077_v46 = vadd.f32 %v3076_v0, %v3075_v9  ;;  %v2302_v28 = vadd.f32 %v2301_v8, %v2300_v44  ;;  %v2323_v0 = vsel %vm1847_vm0, %v11694_v34, 0.0  ;;  %v3098_v9 = vsel %vm1847_vm0, %v2606_v7, 0.0  ;;  %v11695_v8 = vld [vmem:[#allocation7_spill] sm:$0xff]  ;;  %v11704_v34 = vld [vmem:[#allocation20_spill] sm:$0xff] }
 0x2d5   : > { %v2325_v2 = vsel %vm1847_vm0, %v11695_v8, 0.0  ;;  %v2616_v7 = vmul.f32 %v11703_v60, %v11703_v60 }
 0x2d6   : > { %v2304_v18 = vadd.f32 %v2303_v54, %v2302_v28  ;;  %v3079_v23 = vadd.f32 %v3078_v13, %v3077_v46  ;;  %v2608_v54 = vmul.f32 %v11695_v8, %v11695_v8  ;;  %v3100_v46 = vsel %vm1847_vm0, %v2607_v56, 0.0  ;;  %v11696_v28 = vld [vmem:[#allocation12_spill] sm:$0xff]  ;;  %v11705_v8 = vld [vmem:[#allocation17_spill] sm:$0xff] }
 0x2d7   : > { %v2609_v13 = vmul.f32 %v11696_v28, %v11696_v28  ;;  %v2617_v56 = vmul.f32 %v11704_v34, %v11704_v34 }
 0x2d8   : > { %v3081_v63 = vadd.f32 %v3080_v14, %v3079_v23  ;;  %v2306_v27 = vadd.f32 %v2305_v31, %v2304_v18  ;;  %v2327_v18 = vsel %vm1847_vm0, %v11696_v28, 0.0  ;;  %v2619_v28 = vmul.f32 %v8898_v39, %v8898_v39 }
 0x2da   : > { %v2308_v3 = vadd.f32 %v2307_v17, %v2306_v27  ;;  %v3083_v36 = vadd.f32 %v3082_v16, %v3081_v63  ;;  %v3102_v17 = vsel %vm1847_vm0, %v2608_v54, 0.0  ;;  %v11697_v63 = vld [vmem:[#allocation9_spill] sm:$0xff]  ;;  %v3104_v16 = vsel %vm1847_vm0, %v2609_v13, 0.0 }
 0x2db   : > { %v2610_v27 = vmul.f32 %v11697_v63, %v11697_v63  ;;  %v2618_v54 = vmul.f32 %v11705_v8, %v11705_v8 }
 0x2dc   : > { %v3085_v33 = vadd.f32 %v3084_v35, %v3083_v36  ;;  %v2310_v20 = vadd.f32 %v2309_v58, %v2308_v3  ;;  %v2611_v35 = vmul.f32 %v11698_v49, %v11698_v49  ;;  %v2329_v36 = vsel %vm1847_vm0, %v11697_v63, 0.0 }
 0x2dd   : > { %v2331_v58 = vsel %vm1847_vm0, %v11698_v49, 0.0 }
 0x2de   : > { %v2312_v25 = vadd.f32 %v2311_v40, %v2310_v20  ;;  %v3087_v59 = vadd.f32 %v3086_v29, %v3085_v33  ;;  %v3106_v20 = vsel %vm1847_vm0, %v2610_v27, 0.0  ;;  %v11699_v29 = vld [vmem:[#allocation11_spill] sm:$0xff]  ;;  %v3124_v27 = vsel %vm1847_vm0, %v2619_v28, 0.0 }
 0x2df   : > { %v2612_v21 = vmul.f32 %v11699_v29, %v11699_v29 }
 0x2e0   : > { %v3089_v43 = vadd.f32 %v3088_v57, %v3087_v59  ;;  %v2314_v32 = vadd.f32 %v2313_v22, %v2312_v25  ;;  %v3108_v57 = vsel %vm1847_vm0, %v2611_v35, 0.0  ;;  %v2333_v22 = vsel %vm1847_vm0, %v11699_v29, 0.0 }
 0x2e1   : > { %v2623_v29 = vmul.f32 %v8926_v5, %v8926_v5 }
 0x2e2   : > { %v2316_v4 = vadd.f32 %v2315_v1, %v2314_v32  ;;  %v3091_v41 = vadd.f32 %v3090_v37, %v3089_v43  ;;  %v2335_v1 = vsel %vm1847_vm0, %v11700_v6, 0.0  ;;  %v3110_v37 = vsel %vm1847_vm0, %v2612_v21, 0.0 }
 0x2e4   : > { %v3093_v42 = vadd.f32 %v3092_v19, %v3091_v41  ;;  %v2318_v30 = vadd.f32 %v2317_v50, %v2316_v4  ;;  %v3112_v19 = vsel %vm1847_vm0, %v2613_v55, 0.0  ;;  %v2337_v50 = vsel %vm1847_vm0, %v11701_v51, 0.0 }
 0x2e6   : > { %v2320_v48 = vadd.f32 %v2319_v24, %v2318_v30  ;;  %v3095_v15 = vadd.f32 %v3094_v61, %v3093_v42  ;;  %v2339_v24 = vsel %vm1847_vm0, %v11702_v26, 0.0  ;;  %v3114_v61 = vsel %vm1847_vm0, %v2614_v38, 0.0 }
 0x2e8   : > { %v3097_v10 = vadd.f32 %v3096_v47, %v3095_v15  ;;  %v2322_v44 = vadd.f32 %v2321_v11, %v2320_v48  ;;  %v3116_v47 = vsel %vm1847_vm0, %v2615_v12, 0.0  ;;  %v2341_v11 = vsel %vm1847_vm0, %v11703_v60, 0.0  ;;  %v1846_v60 = vld [vmem:[#allocation2] sm:$0x1] }
 0x2ea   : > { %v2324_v52 = vadd.f32 %v2323_v0, %v2322_v44  ;;  %v3099_v14 = vadd.f32 %v3098_v9, %v3097_v10  ;;  %v2343_v0 = vsel %vm1847_vm0, %v11704_v34, 0.0  ;;  %v3118_v9 = vsel %vm1847_vm0, %v2616_v7, 0.0  ;;  %v2368_v34 = vld [vmem:[#allocation3] sm:$0x1] }
 0x2ec   : > { %v3101_v23 = vadd.f32 %v3100_v46, %v3099_v14  ;;  %v2326_v31 = vadd.f32 %v2325_v2, %v2324_v52  ;;  %v3120_v46 = vsel %vm1847_vm0, %v2617_v56, 0.0  ;;  %v2345_v14 = vsel %vm1847_vm0, %v11705_v8, 0.0 }
 0x2ed   : > { %v2347_v2 = vsel %vm1847_vm0, %v8898_v39, 0.0  ;;  %v2351_v39 = vsel %vm1847_vm0, %v8912_v62, 0.0 }
 0x2ee   : > { %v2328_v53 = vadd.f32 %v2327_v18, %v2326_v31  ;;  %v3103_v3 = vadd.f32 %v3102_v17, %v3101_v23  ;;  %v3122_v31 = vsel %vm1847_vm0, %v2618_v54, 0.0  ;;  %v11706_v17 = vld [vmem:[#allocation19_spill] sm:$0xff]  ;;  %v3154_v54 = vld [vmem:[%s11594_s2] sm:$0x1] }
 0x2ef   : > { %v2620_v63 = vmul.f32 %v11706_v17, %v11706_v17 }
 0x2f0   : > { %v3105_v40 = vadd.f32 %v3104_v16, %v3103_v3  ;;  %v2330_v33 = vadd.f32 %v2329_v36, %v2328_v53  ;;  %v2621_v16 = vmul.f32 %v8912_v62, %v8912_v62  ;;  %v2349_v53 = vsel %vm1847_vm0, %v11706_v17, 0.0 }
 0x2f1   : > { %v2355_v62 = vsel %vm1847_vm0, %v8926_v5, 0.0 }
 0x2f2   : > { %v2332_v25 = vadd.f32 %v2331_v58, %v2330_v33  ;;  %v3107_v59 = vadd.f32 %v3106_v20, %v3105_v40  ;;  %v3126_v58 = vsel %vm1847_vm0, %v2620_v63, 0.0  ;;  %v11707_v40 = vld [vmem:[#allocation22_spill] sm:$0xff]  ;;  %v3128_v20 = vsel %vm1847_vm0, %v2621_v16, 0.0 }
 0x2f3   : > { %v2622_v33 = vmul.f32 %v11707_v40, %v11707_v40  ;;  %v2353_v6 = vsel %vm1847_vm0, %v11707_v40, 0.0 }
 0x2f4   : > { %v3109_v43 = vadd.f32 %v3108_v57, %v3107_v59  ;;  %v2334_v32 = vadd.f32 %v2333_v22, %v2332_v25  ;;  %v2624_v22 = vmul.f32 %v8920_v45, %v8920_v45 }
 0x2f5   : > { %v3130_v59 = vsel %vm1847_vm0, %v2622_v33, 0.0 }
 0x2f6   : > { %v2336_v4 = vadd.f32 %v2335_v1, %v2334_v32  ;;  %v3111_v41 = vadd.f32 %v3110_v37, %v3109_v43  ;;  %v3132_v1 = vsel %vm1847_vm0, %v2623_v29, 0.0  ;;  %v2357_v37 = vsel %vm1847_vm0, %v8920_v45, 0.0 }
 0x2f8   : > { %v3113_v42 = vadd.f32 %v3112_v19, %v3111_v41  ;;  %v2338_v30 = vadd.f32 %v2337_v50, %v2336_v4  ;;  %v3134_v19 = vsel %vm1847_vm0, %v2624_v22, 0.0 }
 0x2fa   : > { %v2340_v48 = vadd.f32 %v2339_v24, %v2338_v30  ;;  %v3115_v15 = vadd.f32 %v3114_v61, %v3113_v42 }
 0x2fc   : > { %v3117_v10 = vadd.f32 %v3116_v47, %v3115_v15  ;;  %v2342_v44 = vadd.f32 %v2341_v11, %v2340_v48 }
 0x2fe   : > { %v2344_v13 = vadd.f32 %v2343_v0, %v2342_v44  ;;  %v3119_v52 = vadd.f32 %v3118_v9, %v3117_v10 }
 0x300   : > { %v3121_v18 = vadd.f32 %v3120_v46, %v3119_v52  ;;  %v2346_v23 = vadd.f32 %v2345_v14, %v2344_v13  ;;  %v3159_v13 = vld [vmem:[%s11595_s3] sm:$0x1] }
 0x302   : > { %v2348_v49 = vadd.f32 %v2347_v2, %v2346_v23  ;;  %v3123_v35 = vadd.f32 %v3122_v31, %v3121_v18 }
 0x304   : > { %v3125_v3 = vadd.f32 %v3124_v27, %v3123_v35  ;;  %v2350_v36 = vadd.f32 %v2349_v53, %v2348_v49 }
 0x306   : > { %v2352_v21 = vadd.f32 %v2351_v39, %v2350_v36  ;;  %v3127_v57 = vadd.f32 %v3126_v58, %v3125_v3 }
 0x308   : > { %v3129_v55 = vadd.f32 %v3128_v20, %v3127_v57  ;;  %v2354_v25 = vadd.f32 %v2353_v6, %v2352_v21 }
 0x30a   : > { %v2356_v43 = vadd.f32 %v2355_v62, %v2354_v25  ;;  %v3131_v32 = vadd.f32 %v3130_v59, %v3129_v55 }
 0x30c   : > { %v2358_v51 = vadd.f32 %v2357_v37, %v2356_v43  ;;  %v3133_v38 = vadd.f32 %v3132_v1, %v3131_v32 }
 0x30e   : > { %v2359_v26 = vrot.slane %v2358_v51, 4  ;;  %v3135_v5 = vadd.f32 %v3134_v19, %v3133_v38 }
 0x310   : > { %v2360_v12 = vadd.f32 %v2359_v26, %v2358_v51  ;;  %v3136_v4 = vrot.slane %v3135_v5, 4 }
 0x312   : > { %v2361_v41 = vrot.slane %v2360_v12, 2  ;;  %v3137_v50 = vadd.f32 %v3136_v4, %v3135_v5 }
 0x314   : > { %v2362_v24 = vadd.f32 %v2361_v41, %v2360_v12  ;;  %v3138_v42 = vrot.slane %v3137_v50, 2 }
 0x316   : > { %v2363_v30 = vrot.slane %v2362_v24, 1  ;;  %v3139_v61 = vadd.f32 %v3138_v42, %v3137_v50 }
 0x318   : > { %v2364_v7 = vadd.f32 %v2363_v30, %v2362_v24  ;;  %v3140_v47 = vrot.slane %v3139_v61, 1 }
 0x31a   : > { %v2365_v56 = vadd.f32 %v2364_v7, %v1846_v60  ;;  %v3141_v45 = vadd.f32 %v3140_v47, %v3139_v61 }
 0x31c   : > { %2367 = vst.msk [vmem:[#allocation2] sm:$0x1] %vm1843_vm1, %v2365_v56  ;;  %v3142_v48 = vadd.f32 %v3141_v45, %v2368_v34 }
 0x31e   : > { %3143 = vst.msk [vmem:[#allocation3] sm:$0x1] %vm1843_vm1, %v3142_v48 }
 0x323   : > { %v3147_v15 = vld [vmem:[#allocation2] sm:$0x1] }
 0x324   : > { %v3149_v11 = vmul.f32 0.00048828125, %v3147_v15 }
 0x325   : > { %v3150_v0 = vld [vmem:[#allocation3] sm:$0x1] }
 0x326   : > { %v3151_v10 = vmul.f32 0.00048828125, %v3150_v0  ;;  %v3152_v44 = vmul.f32 %v3149_v11, %v3149_v11 }
 0x328   : > { %v3153_v9 = vsub.f32 %v3151_v10, %v3152_v44 }
 0x32a   : > { %v3155_v8 = vadd.f32 1e-05, %v3153_v9 }
 0x32c   : > { %7212 = vrsqrt.f32 %v3155_v8 }
 0x336   : > { %v7213_v46 = vpop.eup %7212 }
 0x337   : > { %v3157_v28 = vmul.f32 %v7213_v46, %v3154_v54 }
 0x339   : > { %3158 = vst.msk [vmem:[#allocation4] sm:$0x1] %vm1843_vm1, %v3157_v28  ;;  %v3160_v52 = vmul.f32 %v3157_v28, %v3149_v11 }
 0x33b   : > { %v3161_v14 = vsub.f32 %v3159_v13, %v3160_v52 }
 0x33d   : > { %3162 = vst.msk [vmem:[#allocation5] sm:$0x1] %vm1843_vm1, %v3161_v14 }
 0x33e PF: > { %p5708_p5 = scmp.ne.s32.totalorder %s7230_s15, 1 }
 0x340   : > { %3166 = sbr.rel (%p5708_p5) target bundleno = 1353 (0x549), region = 52 }
 0x347   : > { %v3423_v2 = vld [vmem:[%s11593_s1] sm:$0xff]  ;;  %v3424_v18 = vld [vmem:[%s11593_s1 + $0x8] sm:$0xff]  ;;  %v3425_v23 = vld [vmem:[%s11593_s1 + $0x10] sm:$0xff]  ;;  %vm5566_vm2 = vcmask 261120  }
 0x348   : > { %v7123_v31 = vpack.c.bf16 %v3424_v18, %v3423_v2  ;;  %v3426_v17 = vld [vmem:[%s11593_s1 + $0x18] sm:$0xff]  ;;  %v3427_v27 = vld [vmem:[%s11593_s1 + $0x20] sm:$0xff]  ;;  %v3428_v16 = vld [vmem:[%s11593_s1 + $0x28] sm:$0xff] }
 0x349   : > { %v7127_v63 = vpack.c.bf16 %v3426_v17, %v3425_v23  ;;  %v7131_v49 = vpack.c.bf16 %v3428_v16, %v3427_v27  ;;  %v3167_v35 = vld [vmem:[%s11592_s0] sm:$0xff]  ;;  %v3429_v39 = vld [vmem:[%s11593_s1 + $0x30] sm:$0xff]  ;;  %v3430_v3 = vld [vmem:[%s11593_s1 + $0x38] sm:$0xff] }
 0x34a   : > { %7124 = vmatprep.subr.bf16.mxu0 %v7123_v31  ;;  %7171 = vmatprep.subr.bf16.mxu1 %v7123_v31  ;;  %v3295_v53 = vld [vmem:[%s11592_s0 + $0x400] sm:$0xff]  ;;  %v7135_v36 = vpack.c.bf16 %v3430_v3, %v3429_v39  ;;  %v3432_v40 = vld [vmem:[%s11593_s1 + $0x48] sm:$0xff]  ;;  %v3433_v20 = vld [vmem:[%s11593_s1 + $0x50] sm:$0xff] }
 0x34b   : > { %7126 = vmatpush3.bf16.msra.mxu0 %v7123_v31  ;;  %7179 = vmatpush3.bf16.msra.mxu1 %v7123_v31  ;;  %v3431_v58 = vld [vmem:[%s11593_s1 + $0x40] sm:$0xff]  ;;  %v3434_v29 = vld [vmem:[%s11593_s1 + $0x58] sm:$0xff]  ;;  %v3436_v6 = vld [vmem:[%s11593_s1 + $0x68] sm:$0xff] }
 0x34c   : > { %7128 = vmatprep.subr.bf16.mxu0 %v7127_v63  ;;  %7172 = vmatprep.subr.bf16.mxu1 %v7127_v63  ;;  %v7139_v33 = vpack.c.bf16 %v3432_v40, %v3431_v58  ;;  %v7143_v21 = vpack.c.bf16 %v3434_v29, %v3433_v20  ;;  %v3435_v57 = vld [vmem:[%s11593_s1 + $0x60] sm:$0xff]  ;;  %v3437_v55 = vld [vmem:[%s11593_s1 + $0x70] sm:$0xff]  ;;  %v3438_v25 = vld [vmem:[%s11593_s1 + $0x78] sm:$0xff] }
 0x34d   : > { %6707 = vmatprep.mubr.f32.mxu0 %v3167_v35  ;;  %6899 = vmatprep.mubr.f32.mxu1 %v3295_v53  ;;  %v7147_v62 = vpack.c.bf16 %v3436_v6, %v3435_v57  ;;  %v7151_v59 = vpack.c.bf16 %v3438_v25, %v3437_v55  ;;  %v3168_v22 = vld [vmem:[%s11592_s0 + $0x8] sm:$0xff]  ;;  %v3169_v43 = vld [vmem:[%s11592_s0 + $0x10] sm:$0xff]  ;;  %v3170_v37 = vld [vmem:[%s11592_s0 + $0x18] sm:$0xff] }
 0x34e   : > { %v3296_v1 = vld [vmem:[%s11592_s0 + $0x408] sm:$0xff]  ;;  %v3297_v32 = vld [vmem:[%s11592_s0 + $0x410] sm:$0xff]  ;;  %v3298_v51 = vld [vmem:[%s11592_s0 + $0x418] sm:$0xff] }
 0x34f   : > { %7130 = vmatpush3.bf16.msra.mxu0 %v7127_v63  ;;  %7180 = vmatpush3.bf16.msra.mxu1 %v7127_v63  ;;  %v3171_v38 = vld [vmem:[%s11592_s0 + $0x20] sm:$0xff]  ;;  %v3172_v26 = vld [vmem:[%s11592_s0 + $0x28] sm:$0xff]  ;;  %v3173_v12 = vld [vmem:[%s11592_s0 + $0x30] sm:$0xff] }
 0x350   : > { %7132 = vmatprep.subr.bf16.mxu0 %v7131_v49  ;;  %7173 = vmatprep.subr.bf16.mxu1 %v7131_v49  ;;  %v3299_v19 = vld [vmem:[%s11592_s0 + $0x420] sm:$0xff]  ;;  %v3300_v5 = vld [vmem:[%s11592_s0 + $0x428] sm:$0xff]  ;;  %v3301_v4 = vld [vmem:[%s11592_s0 + $0x430] sm:$0xff] }
 0x351   : > { %v3174_v41 = vld [vmem:[%s11592_s0 + $0x38] sm:$0xff]  ;;  %v3175_v24 = vld [vmem:[%s11592_s0 + $0x40] sm:$0xff]  ;;  %v3176_v30 = vld [vmem:[%s11592_s0 + $0x48] sm:$0xff] }
 0x352   : > { %v3302_v50 = vld [vmem:[%s11592_s0 + $0x438] sm:$0xff]  ;;  %v3303_v42 = vld [vmem:[%s11592_s0 + $0x440] sm:$0xff]  ;;  %v3304_v61 = vld [vmem:[%s11592_s0 + $0x448] sm:$0xff] }
 0x353   : > { %7134 = vmatpush3.bf16.msra.mxu0 %v7131_v49  ;;  %7181 = vmatpush3.bf16.msra.mxu1 %v7131_v49  ;;  %v3177_v60 = vld [vmem:[%s11592_s0 + $0x50] sm:$0xff]  ;;  %v3178_v47 = vld [vmem:[%s11592_s0 + $0x58] sm:$0xff]  ;;  %v3179_v56 = vld [vmem:[%s11592_s0 + $0x60] sm:$0xff] }
 0x354   : > { %7136 = vmatprep.subr.bf16.mxu0 %v7135_v36  ;;  %7174 = vmatprep.subr.bf16.mxu1 %v7135_v36  ;;  %v3305_v7 = vld [vmem:[%s11592_s0 + $0x450] sm:$0xff]  ;;  %v3306_v34 = vld [vmem:[%s11592_s0 + $0x458] sm:$0xff]  ;;  %v3307_v45 = vld [vmem:[%s11592_s0 + $0x460] sm:$0xff] }
 0x355   : > { %v3180_v48 = vld [vmem:[%s11592_s0 + $0x68] sm:$0xff]  ;;  %v3181_v11 = vld [vmem:[%s11592_s0 + $0x70] sm:$0xff]  ;;  %v3182_v10 = vld [vmem:[%s11592_s0 + $0x78] sm:$0xff] }
 0x356   : > { %v3308_v15 = vld [vmem:[%s11592_s0 + $0x468] sm:$0xff]  ;;  %v3309_v0 = vld [vmem:[%s11592_s0 + $0x470] sm:$0xff]  ;;  %v3310_v44 = vld [vmem:[%s11592_s0 + $0x478] sm:$0xff] }
 0x357   : > { %7138 = vmatpush3.bf16.msra.mxu0 %v7135_v36  ;;  %7182 = vmatpush3.bf16.msra.mxu1 %v7135_v36  ;;  %v3183_v9 = vld [vmem:[%s11592_s0 + $0x80] sm:$0xff]  ;;  %v3184_v54 = vld [vmem:[%s11592_s0 + $0x88] sm:$0xff]  ;;  %v3185_v28 = vld [vmem:[%s11592_s0 + $0x90] sm:$0xff] }
 0x358   : > { %7140 = vmatprep.subr.bf16.mxu0 %v7139_v33  ;;  %7175 = vmatprep.subr.bf16.mxu1 %v7139_v33  ;;  %v3311_v8 = vld [vmem:[%s11592_s0 + $0x480] sm:$0xff]  ;;  %v3312_v46 = vld [vmem:[%s11592_s0 + $0x488] sm:$0xff]  ;;  %v3313_v13 = vld [vmem:[%s11592_s0 + $0x490] sm:$0xff] }
 0x359   : > { %v3186_v52 = vld [vmem:[%s11592_s0 + $0x98] sm:$0xff]  ;;  %v3187_v2 = vld [vmem:[%s11592_s0 + $0xa0] sm:$0xff]  ;;  %v3188_v23 = vld [vmem:[%s11592_s0 + $0xa8] sm:$0xff] }
 0x35a   : > { %v3314_v14 = vld [vmem:[%s11592_s0 + $0x498] sm:$0xff]  ;;  %v3315_v18 = vld [vmem:[%s11592_s0 + $0x4a0] sm:$0xff]  ;;  %v3316_v31 = vld [vmem:[%s11592_s0 + $0x4a8] sm:$0xff] }
 0x35b   : > { %7142 = vmatpush3.bf16.msra.mxu0 %v7139_v33  ;;  %7183 = vmatpush3.bf16.msra.mxu1 %v7139_v33  ;;  %v3189_v17 = vld [vmem:[%s11592_s0 + $0xb0] sm:$0xff]  ;;  %v3190_v27 = vld [vmem:[%s11592_s0 + $0xb8] sm:$0xff]  ;;  %v3191_v49 = vld [vmem:[%s11592_s0 + $0xc0] sm:$0xff] }
 0x35c   : > { %7144 = vmatprep.subr.bf16.mxu0 %v7143_v21  ;;  %7176 = vmatprep.subr.bf16.mxu1 %v7143_v21  ;;  %v3317_v63 = vld [vmem:[%s11592_s0 + $0x4b0] sm:$0xff]  ;;  %v3318_v16 = vld [vmem:[%s11592_s0 + $0x4b8] sm:$0xff]  ;;  %v3319_v35 = vld [vmem:[%s11592_s0 + $0x4c0] sm:$0xff] }
 0x35d   : > { %v3192_v53 = vld [vmem:[%s11592_s0 + $0xc8] sm:$0xff]  ;;  %v3193_v3 = vld [vmem:[%s11592_s0 + $0xd0] sm:$0xff]  ;;  %v3194_v58 = vld [vmem:[%s11592_s0 + $0xd8] sm:$0xff] }
 0x35e   : > { %v3320_v39 = vld [vmem:[%s11592_s0 + $0x4c8] sm:$0xff]  ;;  %v3321_v36 = vld [vmem:[%s11592_s0 + $0x4d0] sm:$0xff]  ;;  %v3322_v40 = vld [vmem:[%s11592_s0 + $0x4d8] sm:$0xff] }
 0x35f   : > { %7146 = vmatpush3.bf16.msra.mxu0 %v7143_v21  ;;  %7184 = vmatpush3.bf16.msra.mxu1 %v7143_v21  ;;  %v3195_v33 = vld [vmem:[%s11592_s0 + $0xe0] sm:$0xff]  ;;  %v3196_v29 = vld [vmem:[%s11592_s0 + $0xe8] sm:$0xff]  ;;  %v3197_v57 = vld [vmem:[%s11592_s0 + $0xf0] sm:$0xff] }
 0x360   : > { %7148 = vmatprep.subr.bf16.mxu0 %v7147_v62  ;;  %7177 = vmatprep.subr.bf16.mxu1 %v7147_v62  ;;  %v3323_v20 = vld [vmem:[%s11592_s0 + $0x4e0] sm:$0xff]  ;;  %v3324_v21 = vld [vmem:[%s11592_s0 + $0x4e8] sm:$0xff]  ;;  %v3325_v6 = vld [vmem:[%s11592_s0 + $0x4f0] sm:$0xff] }
 0x361   : > { %v3326_v55 = vld [vmem:[%s11592_s0 + $0x4f8] sm:$0xff]  ;;  %v3199_v25 = vld [vmem:[%s11592_s0 + $0x100] sm:$0xff] }
 0x363   : > { %7150 = vmatpush3.bf16.msra.mxu0 %v7147_v62  ;;  %7185 = vmatpush3.bf16.msra.mxu1 %v7147_v62  ;;  %v3198_v62 = vld [vmem:[%s11592_s0 + $0xf8] sm:$0xff] }
 0x364   : > { %7152 = vmatprep.subr.bf16.mxu0 %v7151_v59  ;;  %7178 = vmatprep.subr.bf16.mxu1 %v7151_v59 }
 0x367   : > { %7154 = vmatpush3.bf16.msra.mxu0 %v7151_v59  ;;  %7186 = vmatpush3.bf16.msra.mxu1 %v7151_v59  ;;  %v3327_v59 = vld [vmem:[%s11592_s0 + $0x500] sm:$0xff] }
 0x36a   : > { %6708 = vmatmul.mubr.f32.vlgmr.msra.gmra.mrb[0].mxu0 %v3168_v22  ;;  %6900 = vmatmul.mubr.f32.vlgmr.msra.gmra.mrb[0].mxu1 %v3296_v1  ;;  %v3200_v22 = vld [vmem:[%s11592_s0 + $0x108] sm:$0xff] }
 0x36b   : > { %6710 = vmatprep.mubr.f32.mxu0 %v3169_v43  ;;  %6902 = vmatprep.mubr.f32.mxu1 %v3297_v32  ;;  %v3328_v1 = vld [vmem:[%s11592_s0 + $0x508] sm:$0xff]  ;;  %v3201_v43 = vld [vmem:[%s11592_s0 + $0x110] sm:$0xff] }
 0x36c   : > { %v3329_v32 = vld [vmem:[%s11592_s0 + $0x510] sm:$0xff] }
 0x36e   : > { %6711 = vmatmul.mubr.f32.gmra.mrb[2].mxu0 %v3170_v37  ;;  %6903 = vmatmul.mubr.f32.gmra.mrb[2].mxu1 %v3298_v51  ;;  %v3202_v37 = vld [vmem:[%s11592_s0 + $0x118] sm:$0xff] }
 0x36f   : > { %6713 = vmatprep.mubr.f32.mxu0 %v3171_v38  ;;  %6905 = vmatprep.mubr.f32.mxu1 %v3299_v19  ;;  %v3330_v51 = vld [vmem:[%s11592_s0 + $0x518] sm:$0xff]  ;;  %v3203_v38 = vld [vmem:[%s11592_s0 + $0x120] sm:$0xff] }
 0x370   : > { %v3331_v19 = vld [vmem:[%s11592_s0 + $0x520] sm:$0xff] }
 0x372   : > { %6714 = vmatmul.mubr.f32.gmra.mrb[4].mxu0 %v3172_v26  ;;  %6906 = vmatmul.mubr.f32.gmra.mrb[4].mxu1 %v3300_v5  ;;  %v3204_v26 = vld [vmem:[%s11592_s0 + $0x128] sm:$0xff] }
 0x373   : > { %6716 = vmatprep.mubr.f32.mxu0 %v3173_v12  ;;  %6908 = vmatprep.mubr.f32.mxu1 %v3301_v4  ;;  %v3332_v5 = vld [vmem:[%s11592_s0 + $0x528] sm:$0xff]  ;;  %v3205_v12 = vld [vmem:[%s11592_s0 + $0x130] sm:$0xff] }
 0x374   : > { %v3333_v4 = vld [vmem:[%s11592_s0 + $0x530] sm:$0xff] }
 0x376   : > { %6717 = vmatmul.mubr.f32.gmra.mrb[6].mxu0 %v3174_v41  ;;  %6909 = vmatmul.mubr.f32.gmra.mrb[6].mxu1 %v3302_v50  ;;  %v3206_v41 = vld [vmem:[%s11592_s0 + $0x138] sm:$0xff] }
 0x377   : > { %6719 = vmatprep.mubr.f32.mxu0 %v3175_v24  ;;  %6911 = vmatprep.mubr.f32.mxu1 %v3303_v42  ;;  %v3334_v50 = vld [vmem:[%s11592_s0 + $0x538] sm:$0xff]  ;;  %v3207_v24 = vld [vmem:[%s11592_s0 + $0x140] sm:$0xff] }
 0x378   : > { %v3335_v42 = vld [vmem:[%s11592_s0 + $0x540] sm:$0xff] }
 0x37a   : > { %6720 = vmatmul.mubr.f32.gmra.mrb[8].mxu0 %v3176_v30  ;;  %6912 = vmatmul.mubr.f32.gmra.mrb[8].mxu1 %v3304_v61  ;;  %v3208_v30 = vld [vmem:[%s11592_s0 + $0x148] sm:$0xff] }
 0x37b   : > { %6722 = vmatprep.mubr.f32.mxu0 %v3177_v60  ;;  %6914 = vmatprep.mubr.f32.mxu1 %v3305_v7  ;;  %v3336_v61 = vld [vmem:[%s11592_s0 + $0x548] sm:$0xff]  ;;  %v3209_v60 = vld [vmem:[%s11592_s0 + $0x150] sm:$0xff] }
 0x37c   : > { %v3337_v7 = vld [vmem:[%s11592_s0 + $0x550] sm:$0xff] }
 0x37e   : > { %6723 = vmatmul.mubr.f32.gmra.mrb[10].mxu0 %v3178_v47  ;;  %6915 = vmatmul.mubr.f32.gmra.mrb[10].mxu1 %v3306_v34  ;;  %v3210_v47 = vld [vmem:[%s11592_s0 + $0x158] sm:$0xff] }
 0x37f   : > { %6725 = vmatprep.mubr.f32.mxu0 %v3179_v56  ;;  %6917 = vmatprep.mubr.f32.mxu1 %v3307_v45  ;;  %v3338_v34 = vld [vmem:[%s11592_s0 + $0x558] sm:$0xff]  ;;  %v3211_v56 = vld [vmem:[%s11592_s0 + $0x160] sm:$0xff] }
 0x380   : > { %v3339_v45 = vld [vmem:[%s11592_s0 + $0x560] sm:$0xff] }
 0x382   : > { %6726 = vmatmul.mubr.f32.gmra.mrb[12].mxu0 %v3180_v48  ;;  %6918 = vmatmul.mubr.f32.gmra.mrb[12].mxu1 %v3308_v15  ;;  %v3212_v48 = vld [vmem:[%s11592_s0 + $0x168] sm:$0xff] }
 0x383   : > { %6728 = vmatprep.mubr.f32.mxu0 %v3181_v11  ;;  %6920 = vmatprep.mubr.f32.mxu1 %v3309_v0  ;;  %v3340_v15 = vld [vmem:[%s11592_s0 + $0x568] sm:$0xff]  ;;  %v3213_v11 = vld [vmem:[%s11592_s0 + $0x170] sm:$0xff] }
 0x384   : > { %v3341_v0 = vld [vmem:[%s11592_s0 + $0x570] sm:$0xff] }
 0x386   : > { %6729 = vmatmul.mubr.f32.gmra.mrb[14].mxu0 %v3182_v10  ;;  %6921 = vmatmul.mubr.f32.gmra.mrb[14].mxu1 %v3310_v44  ;;  %v3214_v10 = vld [vmem:[%s11592_s0 + $0x178] sm:$0xff] }
 0x387   : > { %6731 = vmatprep.mubr.f32.mxu0 %v3183_v9  ;;  %6923 = vmatprep.mubr.f32.mxu1 %v3311_v8  ;;  %v3342_v44 = vld [vmem:[%s11592_s0 + $0x578] sm:$0xff]  ;;  %v3215_v9 = vld [vmem:[%s11592_s0 + $0x180] sm:$0xff] }
 0x388   : > { %v3343_v8 = vld [vmem:[%s11592_s0 + $0x580] sm:$0xff] }
 0x38a   : > { %6732 = vmatmul.mubr.f32.gmra.mrb[16].mxu0 %v3184_v54  ;;  %6924 = vmatmul.mubr.f32.gmra.mrb[16].mxu1 %v3312_v46  ;;  %v3216_v54 = vld [vmem:[%s11592_s0 + $0x188] sm:$0xff] }
 0x38b   : > { %6734 = vmatprep.mubr.f32.mxu0 %v3185_v28  ;;  %6926 = vmatprep.mubr.f32.mxu1 %v3313_v13  ;;  %v3344_v46 = vld [vmem:[%s11592_s0 + $0x588] sm:$0xff]  ;;  %v3217_v28 = vld [vmem:[%s11592_s0 + $0x190] sm:$0xff] }
 0x38c   : > { %v3345_v13 = vld [vmem:[%s11592_s0 + $0x590] sm:$0xff] }
 0x38e   : > { %6735 = vmatmul.mubr.f32.gmra.mrb[18].mxu0 %v3186_v52  ;;  %6927 = vmatmul.mubr.f32.gmra.mrb[18].mxu1 %v3314_v14  ;;  %v3218_v52 = vld [vmem:[%s11592_s0 + $0x198] sm:$0xff] }
 0x38f   : > { %6737 = vmatprep.mubr.f32.mxu0 %v3187_v2  ;;  %6929 = vmatprep.mubr.f32.mxu1 %v3315_v18  ;;  %v3346_v14 = vld [vmem:[%s11592_s0 + $0x598] sm:$0xff]  ;;  %v3219_v2 = vld [vmem:[%s11592_s0 + $0x1a0] sm:$0xff] }
 0x390   : > { %v3347_v18 = vld [vmem:[%s11592_s0 + $0x5a0] sm:$0xff] }
 0x392   : > { %6738 = vmatmul.mubr.f32.gmra.mrb[20].mxu0 %v3188_v23  ;;  %6930 = vmatmul.mubr.f32.gmra.mrb[20].mxu1 %v3316_v31  ;;  %v3220_v23 = vld [vmem:[%s11592_s0 + $0x1a8] sm:$0xff] }
 0x393   : > { %6740 = vmatprep.mubr.f32.mxu0 %v3189_v17  ;;  %6932 = vmatprep.mubr.f32.mxu1 %v3317_v63  ;;  %v3348_v31 = vld [vmem:[%s11592_s0 + $0x5a8] sm:$0xff]  ;;  %v3221_v17 = vld [vmem:[%s11592_s0 + $0x1b0] sm:$0xff] }
 0x394   : > { %v3349_v63 = vld [vmem:[%s11592_s0 + $0x5b0] sm:$0xff] }
 0x396   : > { %6741 = vmatmul.mubr.f32.gmra.mrb[22].mxu0 %v3190_v27  ;;  %6933 = vmatmul.mubr.f32.gmra.mrb[22].mxu1 %v3318_v16  ;;  %v3222_v27 = vld [vmem:[%s11592_s0 + $0x1b8] sm:$0xff] }
 0x397   : > { %6743 = vmatprep.mubr.f32.mxu0 %v3191_v49  ;;  %6935 = vmatprep.mubr.f32.mxu1 %v3319_v35  ;;  %v3350_v16 = vld [vmem:[%s11592_s0 + $0x5b8] sm:$0xff]  ;;  %v3223_v49 = vld [vmem:[%s11592_s0 + $0x1c0] sm:$0xff] }
 0x398   : > { %v3351_v35 = vld [vmem:[%s11592_s0 + $0x5c0] sm:$0xff] }
 0x39a   : > { %6744 = vmatmul.mubr.f32.gmra.mrb[24].mxu0 %v3192_v53  ;;  %6936 = vmatmul.mubr.f32.gmra.mrb[24].mxu1 %v3320_v39  ;;  %v3224_v53 = vld [vmem:[%s11592_s0 + $0x1c8] sm:$0xff] }
 0x39b   : > { %6746 = vmatprep.mubr.f32.mxu0 %v3193_v3  ;;  %6938 = vmatprep.mubr.f32.mxu1 %v3321_v36  ;;  %v3352_v39 = vld [vmem:[%s11592_s0 + $0x5c8] sm:$0xff]  ;;  %v3225_v3 = vld [vmem:[%s11592_s0 + $0x1d0] sm:$0xff] }
 0x39c   : > { %v3353_v36 = vld [vmem:[%s11592_s0 + $0x5d0] sm:$0xff] }
 0x39e   : > { %6747 = vmatmul.mubr.f32.gmra.mrb[26].mxu0 %v3194_v58  ;;  %6939 = vmatmul.mubr.f32.gmra.mrb[26].mxu1 %v3322_v40  ;;  %v3226_v58 = vld [vmem:[%s11592_s0 + $0x1d8] sm:$0xff] }
 0x39f   : > { %6749 = vmatprep.mubr.f32.mxu0 %v3195_v33  ;;  %6941 = vmatprep.mubr.f32.mxu1 %v3323_v20  ;;  %v3354_v40 = vld [vmem:[%s11592_s0 + $0x5d8] sm:$0xff]  ;;  %v3227_v33 = vld [vmem:[%s11592_s0 + $0x1e0] sm:$0xff] }
 0x3a0   : > { %v3355_v20 = vld [vmem:[%s11592_s0 + $0x5e0] sm:$0xff] }
 0x3a2   : > { %6750 = vmatmul.mubr.f32.gmra.mrb[28].mxu0 %v3196_v29  ;;  %6942 = vmatmul.mubr.f32.gmra.mrb[28].mxu1 %v3324_v21  ;;  %v3228_v29 = vld [vmem:[%s11592_s0 + $0x1e8] sm:$0xff] }
 0x3a3   : > { %6752 = vmatprep.mubr.f32.mxu0 %v3197_v57  ;;  %6944 = vmatprep.mubr.f32.mxu1 %v3325_v6  ;;  %v3356_v21 = vld [vmem:[%s11592_s0 + $0x5e8] sm:$0xff]  ;;  %v3229_v57 = vld [vmem:[%s11592_s0 + $0x1f0] sm:$0xff] }
 0x3a4   : > { %v3357_v6 = vld [vmem:[%s11592_s0 + $0x5f0] sm:$0xff] }
 0x3a6   : > { %6753 = vmatmul.mubr.f32.gmra.mrb[30].mxu0 %v3198_v62  ;;  %6945 = vmatmul.mubr.f32.gmra.mrb[30].mxu1 %v3326_v55  ;;  %v3230_v62 = vld [vmem:[%s11592_s0 + $0x1f8] sm:$0xff] }
 0x3a7   : > { %6755 = vmatprep.mubr.f32.mxu0 %v3199_v25  ;;  %6947 = vmatprep.mubr.f32.mxu1 %v3327_v59  ;;  %v3358_v55 = vld [vmem:[%s11592_s0 + $0x5f8] sm:$0xff]  ;;  %v3231_v25 = vld [vmem:[%s11592_s0 + $0x200] sm:$0xff] }
 0x3a8   : > { %v3359_v59 = vld [vmem:[%s11592_s0 + $0x600] sm:$0xff] }
 0x3aa   : > { %6756 = vmatmul.mubr.f32.gmra.mrb[32].mxu0 %v3200_v22  ;;  %6948 = vmatmul.mubr.f32.gmra.mrb[32].mxu1 %v3328_v1  ;;  %v3232_v22 = vld [vmem:[%s11592_s0 + $0x208] sm:$0xff] }
 0x3ab   : > { %6758 = vmatprep.mubr.f32.mxu0 %v3201_v43  ;;  %6950 = vmatprep.mubr.f32.mxu1 %v3329_v32  ;;  %v3360_v1 = vld [vmem:[%s11592_s0 + $0x608] sm:$0xff]  ;;  %v3233_v43 = vld [vmem:[%s11592_s0 + $0x210] sm:$0xff] }
 0x3ac   : > { %v3361_v32 = vld [vmem:[%s11592_s0 + $0x610] sm:$0xff] }
 0x3ae   : > { %6759 = vmatmul.mubr.f32.gmra.mrb[34].mxu0 %v3202_v37  ;;  %6951 = vmatmul.mubr.f32.gmra.mrb[34].mxu1 %v3330_v51  ;;  %v3234_v37 = vld [vmem:[%s11592_s0 + $0x218] sm:$0xff] }
 0x3af   : > { %6761 = vmatprep.mubr.f32.mxu0 %v3203_v38  ;;  %6953 = vmatprep.mubr.f32.mxu1 %v3331_v19  ;;  %v3362_v51 = vld [vmem:[%s11592_s0 + $0x618] sm:$0xff]  ;;  %v3235_v38 = vld [vmem:[%s11592_s0 + $0x220] sm:$0xff] }
 0x3b0   : > { %v3363_v19 = vld [vmem:[%s11592_s0 + $0x620] sm:$0xff] }
 0x3b2   : > { %6762 = vmatmul.mubr.f32.gmra.mrb[36].mxu0 %v3204_v26  ;;  %6954 = vmatmul.mubr.f32.gmra.mrb[36].mxu1 %v3332_v5  ;;  %v3236_v26 = vld [vmem:[%s11592_s0 + $0x228] sm:$0xff] }
 0x3b3   : > { %6764 = vmatprep.mubr.f32.mxu0 %v3205_v12  ;;  %6956 = vmatprep.mubr.f32.mxu1 %v3333_v4  ;;  %v3364_v5 = vld [vmem:[%s11592_s0 + $0x628] sm:$0xff]  ;;  %v3237_v12 = vld [vmem:[%s11592_s0 + $0x230] sm:$0xff] }
 0x3b4   : > { %v3365_v4 = vld [vmem:[%s11592_s0 + $0x630] sm:$0xff] }
 0x3b6   : > { %6765 = vmatmul.mubr.f32.gmra.mrb[38].mxu0 %v3206_v41  ;;  %6957 = vmatmul.mubr.f32.gmra.mrb[38].mxu1 %v3334_v50  ;;  %v3238_v41 = vld [vmem:[%s11592_s0 + $0x238] sm:$0xff] }
 0x3b7   : > { %6767 = vmatprep.mubr.f32.mxu0 %v3207_v24  ;;  %6959 = vmatprep.mubr.f32.mxu1 %v3335_v42  ;;  %v3366_v50 = vld [vmem:[%s11592_s0 + $0x638] sm:$0xff]  ;;  %v3239_v24 = vld [vmem:[%s11592_s0 + $0x240] sm:$0xff] }
 0x3b8   : > { %v3367_v42 = vld [vmem:[%s11592_s0 + $0x640] sm:$0xff] }
 0x3ba   : > { %6768 = vmatmul.mubr.f32.gmra.mrb[40].mxu0 %v3208_v30  ;;  %6960 = vmatmul.mubr.f32.gmra.mrb[40].mxu1 %v3336_v61  ;;  %v3240_v30 = vld [vmem:[%s11592_s0 + $0x248] sm:$0xff] }
 0x3bb   : > { %6770 = vmatprep.mubr.f32.mxu0 %v3209_v60  ;;  %6962 = vmatprep.mubr.f32.mxu1 %v3337_v7  ;;  %v3368_v61 = vld [vmem:[%s11592_s0 + $0x648] sm:$0xff]  ;;  %v3241_v60 = vld [vmem:[%s11592_s0 + $0x250] sm:$0xff] }
 0x3bc   : > { %v3369_v7 = vld [vmem:[%s11592_s0 + $0x650] sm:$0xff] }
 0x3be   : > { %6771 = vmatmul.mubr.f32.gmra.mrb[42].mxu0 %v3210_v47  ;;  %6963 = vmatmul.mubr.f32.gmra.mrb[42].mxu1 %v3338_v34  ;;  %v3242_v47 = vld [vmem:[%s11592_s0 + $0x258] sm:$0xff] }
 0x3bf   : > { %6773 = vmatprep.mubr.f32.mxu0 %v3211_v56  ;;  %6965 = vmatprep.mubr.f32.mxu1 %v3339_v45  ;;  %v3370_v34 = vld [vmem:[%s11592_s0 + $0x658] sm:$0xff]  ;;  %v3243_v56 = vld [vmem:[%s11592_s0 + $0x260] sm:$0xff] }
 0x3c0   : > { %v3371_v45 = vld [vmem:[%s11592_s0 + $0x660] sm:$0xff] }
 0x3c2   : > { %6774 = vmatmul.mubr.f32.gmra.mrb[44].mxu0 %v3212_v48  ;;  %6966 = vmatmul.mubr.f32.gmra.mrb[44].mxu1 %v3340_v15  ;;  %v3244_v48 = vld [vmem:[%s11592_s0 + $0x268] sm:$0xff] }
 0x3c3   : > { %6776 = vmatprep.mubr.f32.mxu0 %v3213_v11  ;;  %6968 = vmatprep.mubr.f32.mxu1 %v3341_v0  ;;  %v3372_v15 = vld [vmem:[%s11592_s0 + $0x668] sm:$0xff]  ;;  %v3245_v11 = vld [vmem:[%s11592_s0 + $0x270] sm:$0xff] }
 0x3c4   : > { %v3373_v0 = vld [vmem:[%s11592_s0 + $0x670] sm:$0xff] }
 0x3c6   : > { %6777 = vmatmul.mubr.f32.gmra.mrb[46].mxu0 %v3214_v10  ;;  %6969 = vmatmul.mubr.f32.gmra.mrb[46].mxu1 %v3342_v44  ;;  %v3246_v10 = vld [vmem:[%s11592_s0 + $0x278] sm:$0xff] }
 0x3c7   : > { %6779 = vmatprep.mubr.f32.mxu0 %v3215_v9  ;;  %6971 = vmatprep.mubr.f32.mxu1 %v3343_v8  ;;  %v3374_v44 = vld [vmem:[%s11592_s0 + $0x678] sm:$0xff]  ;;  %v3247_v9 = vld [vmem:[%s11592_s0 + $0x280] sm:$0xff] }
 0x3c8   : > { %v3375_v8 = vld [vmem:[%s11592_s0 + $0x680] sm:$0xff] }
 0x3ca   : > { %6780 = vmatmul.mubr.f32.gmra.mrb[48].mxu0 %v3216_v54  ;;  %6972 = vmatmul.mubr.f32.gmra.mrb[48].mxu1 %v3344_v46  ;;  %v3248_v54 = vld [vmem:[%s11592_s0 + $0x288] sm:$0xff] }
 0x3cb   : > { %6782 = vmatprep.mubr.f32.mxu0 %v3217_v28  ;;  %6974 = vmatprep.mubr.f32.mxu1 %v3345_v13  ;;  %v3376_v46 = vld [vmem:[%s11592_s0 + $0x688] sm:$0xff]  ;;  %v3249_v28 = vld [vmem:[%s11592_s0 + $0x290] sm:$0xff] }
 0x3cc   : > { %v3377_v13 = vld [vmem:[%s11592_s0 + $0x690] sm:$0xff] }
 0x3ce   : > { %6783 = vmatmul.mubr.f32.gmra.mrb[50].mxu0 %v3218_v52  ;;  %6975 = vmatmul.mubr.f32.gmra.mrb[50].mxu1 %v3346_v14  ;;  %v3250_v52 = vld [vmem:[%s11592_s0 + $0x298] sm:$0xff] }
 0x3cf   : > { %6785 = vmatprep.mubr.f32.mxu0 %v3219_v2  ;;  %6977 = vmatprep.mubr.f32.mxu1 %v3347_v18  ;;  %v3378_v14 = vld [vmem:[%s11592_s0 + $0x698] sm:$0xff]  ;;  %v3251_v2 = vld [vmem:[%s11592_s0 + $0x2a0] sm:$0xff] }
 0x3d0   : > { %v3379_v18 = vld [vmem:[%s11592_s0 + $0x6a0] sm:$0xff] }
 0x3d2   : > { %6786 = vmatmul.mubr.f32.gmra.mrb[52].mxu0 %v3220_v23  ;;  %6978 = vmatmul.mubr.f32.gmra.mrb[52].mxu1 %v3348_v31  ;;  %v3252_v23 = vld [vmem:[%s11592_s0 + $0x2a8] sm:$0xff] }
 0x3d3   : > { %6788 = vmatprep.mubr.f32.mxu0 %v3221_v17  ;;  %6980 = vmatprep.mubr.f32.mxu1 %v3349_v63  ;;  %v3380_v31 = vld [vmem:[%s11592_s0 + $0x6a8] sm:$0xff]  ;;  %v3253_v17 = vld [vmem:[%s11592_s0 + $0x2b0] sm:$0xff] }
 0x3d4   : > { %v3381_v63 = vld [vmem:[%s11592_s0 + $0x6b0] sm:$0xff] }
 0x3d6   : > { %6789 = vmatmul.mubr.f32.gmra.mrb[54].mxu0 %v3222_v27  ;;  %6981 = vmatmul.mubr.f32.gmra.mrb[54].mxu1 %v3350_v16  ;;  %v3254_v27 = vld [vmem:[%s11592_s0 + $0x2b8] sm:$0xff] }
 0x3d7   : > { %6791 = vmatprep.mubr.f32.mxu0 %v3223_v49  ;;  %6983 = vmatprep.mubr.f32.mxu1 %v3351_v35  ;;  %v3382_v16 = vld [vmem:[%s11592_s0 + $0x6b8] sm:$0xff]  ;;  %v3255_v49 = vld [vmem:[%s11592_s0 + $0x2c0] sm:$0xff] }
 0x3d8   : > { %v3383_v35 = vld [vmem:[%s11592_s0 + $0x6c0] sm:$0xff] }
 0x3da   : > { %6792 = vmatmul.mubr.f32.gmra.mrb[56].mxu0 %v3224_v53  ;;  %6984 = vmatmul.mubr.f32.gmra.mrb[56].mxu1 %v3352_v39  ;;  %v3256_v53 = vld [vmem:[%s11592_s0 + $0x2c8] sm:$0xff] }
 0x3db   : > { %6794 = vmatprep.mubr.f32.mxu0 %v3225_v3  ;;  %6986 = vmatprep.mubr.f32.mxu1 %v3353_v36  ;;  %v3384_v39 = vld [vmem:[%s11592_s0 + $0x6c8] sm:$0xff]  ;;  %v3257_v3 = vld [vmem:[%s11592_s0 + $0x2d0] sm:$0xff] }
 0x3dc   : > { %v3385_v36 = vld [vmem:[%s11592_s0 + $0x6d0] sm:$0xff] }
 0x3de   : > { %6795 = vmatmul.mubr.f32.gmra.mrb[58].mxu0 %v3226_v58  ;;  %6987 = vmatmul.mubr.f32.gmra.mrb[58].mxu1 %v3354_v40  ;;  %v3258_v58 = vld [vmem:[%s11592_s0 + $0x2d8] sm:$0xff] }
 0x3df   : > { %6797 = vmatprep.mubr.f32.mxu0 %v3227_v33  ;;  %6989 = vmatprep.mubr.f32.mxu1 %v3355_v20  ;;  %v3386_v40 = vld [vmem:[%s11592_s0 + $0x6d8] sm:$0xff]  ;;  %v3259_v33 = vld [vmem:[%s11592_s0 + $0x2e0] sm:$0xff] }
 0x3e0   : > { %v3387_v20 = vld [vmem:[%s11592_s0 + $0x6e0] sm:$0xff] }
 0x3e2   : > { %6798 = vmatmul.mubr.f32.gmra.mrb[60].mxu0 %v3228_v29  ;;  %6990 = vmatmul.mubr.f32.gmra.mrb[60].mxu1 %v3356_v21  ;;  %v3260_v29 = vld [vmem:[%s11592_s0 + $0x2e8] sm:$0xff] }
 0x3e3   : > { %6800 = vmatprep.mubr.f32.mxu0 %v3229_v57  ;;  %6992 = vmatprep.mubr.f32.mxu1 %v3357_v6  ;;  %v3388_v21 = vld [vmem:[%s11592_s0 + $0x6e8] sm:$0xff]  ;;  %v3261_v57 = vld [vmem:[%s11592_s0 + $0x2f0] sm:$0xff] }
 0x3e4   : > { %v3389_v6 = vld [vmem:[%s11592_s0 + $0x6f0] sm:$0xff] }
 0x3e6   : > { %6801 = vmatmul.mubr.f32.gmra.mrb[62].mxu0 %v3230_v62  ;;  %6993 = vmatmul.mubr.f32.gmra.mrb[62].mxu1 %v3358_v55  ;;  %v3262_v62 = vld [vmem:[%s11592_s0 + $0x2f8] sm:$0xff] }
 0x3e7   : > { %6803 = vmatprep.mubr.f32.mxu0 %v3231_v25  ;;  %6995 = vmatprep.mubr.f32.mxu1 %v3359_v59  ;;  %v3390_v55 = vld [vmem:[%s11592_s0 + $0x6f8] sm:$0xff]  ;;  %v3263_v25 = vld [vmem:[%s11592_s0 + $0x300] sm:$0xff] }
 0x3e8   : > { %v3391_v59 = vld [vmem:[%s11592_s0 + $0x700] sm:$0xff] }
 0x3ea   : > { %6804 = vmatmul.mubr.f32.gmra.mrb[64].mxu0 %v3232_v22  ;;  %6996 = vmatmul.mubr.f32.gmra.mrb[64].mxu1 %v3360_v1  ;;  %v3264_v22 = vld [vmem:[%s11592_s0 + $0x308] sm:$0xff] }
 0x3eb   : > { %6806 = vmatprep.mubr.f32.mxu0 %v3233_v43  ;;  %6998 = vmatprep.mubr.f32.mxu1 %v3361_v32  ;;  %v3392_v1 = vld [vmem:[%s11592_s0 + $0x708] sm:$0xff]  ;;  %v3265_v43 = vld [vmem:[%s11592_s0 + $0x310] sm:$0xff] }
 0x3ec   : > { %v3393_v32 = vld [vmem:[%s11592_s0 + $0x710] sm:$0xff] }
 0x3ee   : > { %6807 = vmatmul.mubr.f32.gmra.mrb[66].mxu0 %v3234_v37  ;;  %6999 = vmatmul.mubr.f32.gmra.mrb[66].mxu1 %v3362_v51  ;;  %v3266_v37 = vld [vmem:[%s11592_s0 + $0x318] sm:$0xff] }
 0x3ef   : > { %6809 = vmatprep.mubr.f32.mxu0 %v3235_v38  ;;  %7001 = vmatprep.mubr.f32.mxu1 %v3363_v19  ;;  %v3394_v51 = vld [vmem:[%s11592_s0 + $0x718] sm:$0xff]  ;;  %v3267_v38 = vld [vmem:[%s11592_s0 + $0x320] sm:$0xff] }
 0x3f0   : > { %v3395_v19 = vld [vmem:[%s11592_s0 + $0x720] sm:$0xff] }
 0x3f2   : > { %6810 = vmatmul.mubr.f32.gmra.mrb[68].mxu0 %v3236_v26  ;;  %7002 = vmatmul.mubr.f32.gmra.mrb[68].mxu1 %v3364_v5  ;;  %v3268_v26 = vld [vmem:[%s11592_s0 + $0x328] sm:$0xff] }
 0x3f3   : > { %6812 = vmatprep.mubr.f32.mxu0 %v3237_v12  ;;  %7004 = vmatprep.mubr.f32.mxu1 %v3365_v4  ;;  %v3396_v5 = vld [vmem:[%s11592_s0 + $0x728] sm:$0xff]  ;;  %v3269_v12 = vld [vmem:[%s11592_s0 + $0x330] sm:$0xff] }
 0x3f4   : > { %v3397_v4 = vld [vmem:[%s11592_s0 + $0x730] sm:$0xff] }
 0x3f6   : > { %6813 = vmatmul.mubr.f32.gmra.mrb[70].mxu0 %v3238_v41  ;;  %7005 = vmatmul.mubr.f32.gmra.mrb[70].mxu1 %v3366_v50  ;;  %v3270_v41 = vld [vmem:[%s11592_s0 + $0x338] sm:$0xff] }
 0x3f7   : > { %6815 = vmatprep.mubr.f32.mxu0 %v3239_v24  ;;  %7007 = vmatprep.mubr.f32.mxu1 %v3367_v42  ;;  %v3398_v50 = vld [vmem:[%s11592_s0 + $0x738] sm:$0xff]  ;;  %v3271_v24 = vld [vmem:[%s11592_s0 + $0x340] sm:$0xff] }
 0x3f8   : > { %v3399_v42 = vld [vmem:[%s11592_s0 + $0x740] sm:$0xff] }
 0x3fa   : > { %6816 = vmatmul.mubr.f32.gmra.mrb[72].mxu0 %v3240_v30  ;;  %7008 = vmatmul.mubr.f32.gmra.mrb[72].mxu1 %v3368_v61  ;;  %v3272_v30 = vld [vmem:[%s11592_s0 + $0x348] sm:$0xff] }
 0x3fb   : > { %6818 = vmatprep.mubr.f32.mxu0 %v3241_v60  ;;  %7010 = vmatprep.mubr.f32.mxu1 %v3369_v7  ;;  %v3400_v61 = vld [vmem:[%s11592_s0 + $0x748] sm:$0xff]  ;;  %v3273_v60 = vld [vmem:[%s11592_s0 + $0x350] sm:$0xff] }
 0x3fc   : > { %v3401_v7 = vld [vmem:[%s11592_s0 + $0x750] sm:$0xff] }
 0x3fe   : > { %6819 = vmatmul.mubr.f32.gmra.mrb[74].mxu0 %v3242_v47  ;;  %7011 = vmatmul.mubr.f32.gmra.mrb[74].mxu1 %v3370_v34  ;;  %v3274_v47 = vld [vmem:[%s11592_s0 + $0x358] sm:$0xff] }
 0x3ff   : > { %6821 = vmatprep.mubr.f32.mxu0 %v3243_v56  ;;  %7013 = vmatprep.mubr.f32.mxu1 %v3371_v45  ;;  %v3402_v34 = vld [vmem:[%s11592_s0 + $0x758] sm:$0xff]  ;;  %v3275_v56 = vld [vmem:[%s11592_s0 + $0x360] sm:$0xff] }
 0x400   : > { %v3403_v45 = vld [vmem:[%s11592_s0 + $0x760] sm:$0xff] }
 0x402   : > { %6822 = vmatmul.mubr.f32.gmra.mrb[76].mxu0 %v3244_v48  ;;  %7014 = vmatmul.mubr.f32.gmra.mrb[76].mxu1 %v3372_v15 }
 0x403   : > { %6824 = vmatprep.mubr.f32.mxu0 %v3245_v11  ;;  %7016 = vmatprep.mubr.f32.mxu1 %v3373_v0 }
 0x406   : > { %6825 = vmatmul.mubr.f32.gmra.mrb[78].mxu0 %v3246_v10  ;;  %7017 = vmatmul.mubr.f32.gmra.mrb[78].mxu1 %v3374_v44  ;;  %v3276_v10 = vld [vmem:[%s11592_s0 + $0x368] sm:$0xff] }
 0x407   : > { %6827 = vmatprep.mubr.f32.mxu0 %v3247_v9  ;;  %7019 = vmatprep.mubr.f32.mxu1 %v3375_v8  ;;  %v3404_v44 = vld [vmem:[%s11592_s0 + $0x768] sm:$0xff]  ;;  %v3277_v9 = vld [vmem:[%s11592_s0 + $0x370] sm:$0xff] }
 0x408   : > { %v3405_v8 = vld [vmem:[%s11592_s0 + $0x770] sm:$0xff] }
 0x40a   : > { %6828 = vmatmul.mubr.f32.gmra.mrb[80].mxu0 %v3248_v54  ;;  %7020 = vmatmul.mubr.f32.gmra.mrb[80].mxu1 %v3376_v46 }
 0x40b   : > { %6830 = vmatprep.mubr.f32.mxu0 %v3249_v28  ;;  %7022 = vmatprep.mubr.f32.mxu1 %v3377_v13 }
 0x40e   : > { %6831 = vmatmul.mubr.f32.gmra.mrb[82].mxu0 %v3250_v52  ;;  %7023 = vmatmul.mubr.f32.gmra.mrb[82].mxu1 %v3378_v14  ;;  %v3278_v52 = vld [vmem:[%s11592_s0 + $0x378] sm:$0xff] }
 0x40f   : > { %6833 = vmatprep.mubr.f32.mxu0 %v3251_v2  ;;  %7025 = vmatprep.mubr.f32.mxu1 %v3379_v18  ;;  %v3406_v14 = vld [vmem:[%s11592_s0 + $0x778] sm:$0xff]  ;;  %v3279_v2 = vld [vmem:[%s11592_s0 + $0x380] sm:$0xff] }
 0x410   : > { %v3407_v18 = vld [vmem:[%s11592_s0 + $0x780] sm:$0xff] }
 0x412   : > { %6834 = vmatmul.mubr.f32.gmra.mrb[84].mxu0 %v3252_v23  ;;  %7026 = vmatmul.mubr.f32.gmra.mrb[84].mxu1 %v3380_v31 }
 0x413   : > { %6836 = vmatprep.mubr.f32.mxu0 %v3253_v17  ;;  %7028 = vmatprep.mubr.f32.mxu1 %v3381_v63 }
 0x416   : > { %6837 = vmatmul.mubr.f32.gmra.mrb[86].mxu0 %v3254_v27  ;;  %7029 = vmatmul.mubr.f32.gmra.mrb[86].mxu1 %v3382_v16  ;;  %v3280_v27 = vld [vmem:[%s11592_s0 + $0x388] sm:$0xff] }
 0x417   : > { %6839 = vmatprep.mubr.f32.mxu0 %v3255_v49  ;;  %7031 = vmatprep.mubr.f32.mxu1 %v3383_v35  ;;  %v3408_v16 = vld [vmem:[%s11592_s0 + $0x788] sm:$0xff]  ;;  %v3281_v49 = vld [vmem:[%s11592_s0 + $0x390] sm:$0xff] }
 0x418   : > { %v3409_v35 = vld [vmem:[%s11592_s0 + $0x790] sm:$0xff] }
 0x41a   : > { %6840 = vmatmul.mubr.f32.gmra.mrb[88].mxu0 %v3256_v53  ;;  %7032 = vmatmul.mubr.f32.gmra.mrb[88].mxu1 %v3384_v39 }
 0x41b   : > { %6842 = vmatprep.mubr.f32.mxu0 %v3257_v3  ;;  %7034 = vmatprep.mubr.f32.mxu1 %v3385_v36 }
 0x41e   : > { %6843 = vmatmul.mubr.f32.gmra.mrb[90].mxu0 %v3258_v58  ;;  %7035 = vmatmul.mubr.f32.gmra.mrb[90].mxu1 %v3386_v40  ;;  %v3282_v58 = vld [vmem:[%s11592_s0 + $0x398] sm:$0xff] }
 0x41f   : > { %6845 = vmatprep.mubr.f32.mxu0 %v3259_v33  ;;  %7037 = vmatprep.mubr.f32.mxu1 %v3387_v20  ;;  %v3410_v40 = vld [vmem:[%s11592_s0 + $0x798] sm:$0xff]  ;;  %v3283_v33 = vld [vmem:[%s11592_s0 + $0x3a0] sm:$0xff] }
 0x420   : > { %v3411_v20 = vld [vmem:[%s11592_s0 + $0x7a0] sm:$0xff] }
 0x422   : > { %6846 = vmatmul.mubr.f32.gmra.mrb[92].mxu0 %v3260_v29  ;;  %7038 = vmatmul.mubr.f32.gmra.mrb[92].mxu1 %v3388_v21 }
 0x423   : > { %6848 = vmatprep.mubr.f32.mxu0 %v3261_v57  ;;  %7040 = vmatprep.mubr.f32.mxu1 %v3389_v6 }
 0x426   : > { %6849 = vmatmul.mubr.f32.gmra.mrb[94].mxu0 %v3262_v62  ;;  %7041 = vmatmul.mubr.f32.gmra.mrb[94].mxu1 %v3390_v55  ;;  %v3284_v62 = vld [vmem:[%s11592_s0 + $0x3a8] sm:$0xff] }
 0x427   : > { %6851 = vmatprep.mubr.f32.mxu0 %v3263_v25  ;;  %7043 = vmatprep.mubr.f32.mxu1 %v3391_v59  ;;  %v3412_v55 = vld [vmem:[%s11592_s0 + $0x7a8] sm:$0xff]  ;;  %v3285_v25 = vld [vmem:[%s11592_s0 + $0x3b0] sm:$0xff] }
 0x428   : > { %v3413_v59 = vld [vmem:[%s11592_s0 + $0x7b0] sm:$0xff] }
 0x42a   : > { %6852 = vmatmul.mubr.f32.gmra.mrb[96].mxu0 %v3264_v22  ;;  %7044 = vmatmul.mubr.f32.gmra.mrb[96].mxu1 %v3392_v1 }
 0x42b   : > { %6854 = vmatprep.mubr.f32.mxu0 %v3265_v43  ;;  %7046 = vmatprep.mubr.f32.mxu1 %v3393_v32 }
 0x42e   : > { %6855 = vmatmul.mubr.f32.gmra.mrb[98].mxu0 %v3266_v37  ;;  %7047 = vmatmul.mubr.f32.gmra.mrb[98].mxu1 %v3394_v51  ;;  %v3286_v37 = vld [vmem:[%s11592_s0 + $0x3b8] sm:$0xff] }
 0x42f   : > { %6857 = vmatprep.mubr.f32.mxu0 %v3267_v38  ;;  %7049 = vmatprep.mubr.f32.mxu1 %v3395_v19  ;;  %v3414_v51 = vld [vmem:[%s11592_s0 + $0x7b8] sm:$0xff]  ;;  %v3287_v38 = vld [vmem:[%s11592_s0 + $0x3c0] sm:$0xff] }
 0x430   : > { %v3415_v19 = vld [vmem:[%s11592_s0 + $0x7c0] sm:$0xff] }
 0x432   : > { %6858 = vmatmul.mubr.f32.gmra.mrb[100].mxu0 %v3268_v26  ;;  %7050 = vmatmul.mubr.f32.gmra.mrb[100].mxu1 %v3396_v5 }
 0x433   : > { %6860 = vmatprep.mubr.f32.mxu0 %v3269_v12  ;;  %7052 = vmatprep.mubr.f32.mxu1 %v3397_v4 }
 0x436   : > { %6861 = vmatmul.mubr.f32.gmra.mrb[102].mxu0 %v3270_v41  ;;  %7053 = vmatmul.mubr.f32.gmra.mrb[102].mxu1 %v3398_v50  ;;  %v3288_v41 = vld [vmem:[%s11592_s0 + $0x3c8] sm:$0xff] }
 0x437   : > { %6863 = vmatprep.mubr.f32.mxu0 %v3271_v24  ;;  %7055 = vmatprep.mubr.f32.mxu1 %v3399_v42  ;;  %v3416_v50 = vld [vmem:[%s11592_s0 + $0x7c8] sm:$0xff]  ;;  %v3289_v24 = vld [vmem:[%s11592_s0 + $0x3d0] sm:$0xff] }
 0x438   : > { %v3417_v42 = vld [vmem:[%s11592_s0 + $0x7d0] sm:$0xff] }
 0x43a   : > { %6864 = vmatmul.mubr.f32.gmra.mrb[104].mxu0 %v3272_v30  ;;  %7056 = vmatmul.mubr.f32.gmra.mrb[104].mxu1 %v3400_v61 }
 0x43b   : > { %6866 = vmatprep.mubr.f32.mxu0 %v3273_v60  ;;  %7058 = vmatprep.mubr.f32.mxu1 %v3401_v7 }
 0x43d   : > { %v9970_v48 = vpop.f32.mrb[0].mxu0  ;;  %v9972_v15 = vpop.f32.mrb[0].mxu1 }
 0x43e   : > { %v9974_v11 = vpop.f32.mrb[1].mxu0  ;;  %6867 = vmatmul.mubr.f32.gmra.mrb[106].mxu0 %v3274_v47  ;;  %v9976_v0 = vpop.f32.mrb[1].mxu1  ;;  %7059 = vmatmul.mubr.f32.gmra.mrb[106].mxu1 %v3402_v34  ;;  %v3290_v47 = vld [vmem:[%s11592_s0 + $0x3d8] sm:$0xff] }
 0x43f   : > { %6869 = vmatprep.mubr.f32.mxu0 %v3275_v56  ;;  %7061 = vmatprep.mubr.f32.mxu1 %v3403_v45  ;;  %v3418_v34 = vld [vmem:[%s11592_s0 + $0x7d8] sm:$0xff]  ;;  %v3291_v56 = vld [vmem:[%s11592_s0 + $0x3e0] sm:$0xff] }
 0x440   : > { %v3419_v45 = vld [vmem:[%s11592_s0 + $0x7e0] sm:$0xff] }
 0x441   : > { %v9990_v54 = vpop.f32.mrb[2].mxu0  ;;  %v9992_v46 = vpop.f32.mrb[2].mxu1 }
 0x442   : > { %v9994_v28 = vpop.f32.mrb[3].mxu0  ;;  %6870 = vmatmul.mubr.f32.gmra.mrb[108].mxu0 %v3276_v10  ;;  %v9996_v13 = vpop.f32.mrb[3].mxu1  ;;  %7062 = vmatmul.mubr.f32.gmra.mrb[108].mxu1 %v3404_v44 }
 0x443   : > { %6872 = vmatprep.mubr.f32.mxu0 %v3277_v9  ;;  %7064 = vmatprep.mubr.f32.mxu1 %v3405_v8 }
 0x445   : > { %v10010_v23 = vpop.f32.mrb[4].mxu0  ;;  %v10012_v31 = vpop.f32.mrb[4].mxu1 }
 0x446   : > { %v10014_v17 = vpop.f32.mrb[5].mxu0  ;;  %6873 = vmatmul.mubr.f32.gmra.mrb[110].mxu0 %v3278_v52  ;;  %v10016_v63 = vpop.f32.mrb[5].mxu1  ;;  %7065 = vmatmul.mubr.f32.gmra.mrb[110].mxu1 %v3406_v14  ;;  %v3292_v52 = vld [vmem:[%s11592_s0 + $0x3e8] sm:$0xff] }
 0x447   : > { %6875 = vmatprep.mubr.f32.mxu0 %v3279_v2  ;;  %7067 = vmatprep.mubr.f32.mxu1 %v3407_v18  ;;  %v3420_v14 = vld [vmem:[%s11592_s0 + $0x7e8] sm:$0xff]  ;;  %v3293_v2 = vld [vmem:[%s11592_s0 + $0x3f0] sm:$0xff] }
 0x448   : > { %v3421_v18 = vld [vmem:[%s11592_s0 + $0x7f0] sm:$0xff] }
 0x449   : > { %v10030_v53 = vpop.f32.mrb[6].mxu0  ;;  %v10032_v39 = vpop.f32.mrb[6].mxu1 }
 0x44a   : > { %v10034_v3 = vpop.f32.mrb[7].mxu0  ;;  %6876 = vmatmul.mubr.f32.gmra.mrb[112].mxu0 %v3280_v27  ;;  %v10036_v36 = vpop.f32.mrb[7].mxu1  ;;  %7068 = vmatmul.mubr.f32.gmra.mrb[112].mxu1 %v3408_v16 }
 0x44b   : > { %6878 = vmatprep.mubr.f32.mxu0 %v3281_v49  ;;  %7070 = vmatprep.mubr.f32.mxu1 %v3409_v35 }
 0x44d   : > { %v10050_v29 = vpop.f32.mrb[8].mxu0  ;;  %v10052_v21 = vpop.f32.mrb[8].mxu1 }
 0x44e   : > { %v10054_v57 = vpop.f32.mrb[9].mxu0  ;;  %6879 = vmatmul.mubr.f32.gmra.mrb[114].mxu0 %v3282_v58  ;;  %v10056_v6 = vpop.f32.mrb[9].mxu1  ;;  %7071 = vmatmul.mubr.f32.gmra.mrb[114].mxu1 %v3410_v40  ;;  %v3294_v58 = vld [vmem:[%s11592_s0 + $0x3f8] sm:$0xff] }
 0x44f   : > { %6881 = vmatprep.mubr.f32.mxu0 %v3283_v33  ;;  %7073 = vmatprep.mubr.f32.mxu1 %v3411_v20  ;;  %v3422_v40 = vld [vmem:[%s11592_s0 + $0x7f8] sm:$0xff] }
 0x451   : > { %v10070_v22 = vpop.f32.mrb[10].mxu0  ;;  %v10072_v1 = vpop.f32.mrb[10].mxu1 }
 0x452   : > { %v10074_v43 = vpop.f32.mrb[11].mxu0  ;;  %6882 = vmatmul.mubr.f32.gmra.mrb[116].mxu0 %v3284_v62  ;;  %v10076_v32 = vpop.f32.mrb[11].mxu1  ;;  %7074 = vmatmul.mubr.f32.gmra.mrb[116].mxu1 %v3412_v55 }
 0x453   : > { %6884 = vmatprep.mubr.f32.mxu0 %v3285_v25  ;;  %7076 = vmatprep.mubr.f32.mxu1 %v3413_v59 }
 0x455   : > { %v10090_v26 = vpop.f32.mrb[12].mxu0  ;;  %v10092_v5 = vpop.f32.mrb[12].mxu1 }
 0x456   : > { %v10094_v12 = vpop.f32.mrb[13].mxu0  ;;  %6885 = vmatmul.mubr.f32.gmra.mrb[118].mxu0 %v3286_v37  ;;  %v10096_v4 = vpop.f32.mrb[13].mxu1  ;;  %7077 = vmatmul.mubr.f32.gmra.mrb[118].mxu1 %v3414_v51 }
 0x457   : > { %6887 = vmatprep.mubr.f32.mxu0 %v3287_v38  ;;  %7079 = vmatprep.mubr.f32.mxu1 %v3415_v19 }
 0x459   : > { %v10110_v30 = vpop.f32.mrb[14].mxu0  ;;  %v10112_v61 = vpop.f32.mrb[14].mxu1 }
 0x45a   : > { %v10114_v60 = vpop.f32.mrb[15].mxu0  ;;  %6888 = vmatmul.mubr.f32.gmra.mrb[120].mxu0 %v3288_v41  ;;  %v10116_v7 = vpop.f32.mrb[15].mxu1  ;;  %7080 = vmatmul.mubr.f32.gmra.mrb[120].mxu1 %v3416_v50 }
 0x45b   : > { %6890 = vmatprep.mubr.f32.mxu0 %v3289_v24  ;;  %7082 = vmatprep.mubr.f32.mxu1 %v3417_v42 }
 0x45d   : > { %v10130_v10 = vpop.f32.mrb[16].mxu0  ;;  %v10132_v44 = vpop.f32.mrb[16].mxu1 }
 0x45e   : > { %v10134_v9 = vpop.f32.mrb[17].mxu0  ;;  %6891 = vmatmul.mubr.f32.gmra.mrb[122].mxu0 %v3290_v47  ;;  %v10136_v8 = vpop.f32.mrb[17].mxu1  ;;  %7083 = vmatmul.mubr.f32.gmra.mrb[122].mxu1 %v3418_v34 }
 0x45f   : > { %6893 = vmatprep.mubr.f32.mxu0 %v3291_v56  ;;  %7085 = vmatprep.mubr.f32.mxu1 %v3419_v45 }
 0x461   : > { %v10150_v27 = vpop.f32.mrb[18].mxu0  ;;  %v10152_v16 = vpop.f32.mrb[18].mxu1 }
 0x462   : > { %v10154_v49 = vpop.f32.mrb[19].mxu0  ;;  %6894 = vmatmul.mubr.f32.gmra.mrb[124].mxu0 %v3292_v52  ;;  %v10156_v35 = vpop.f32.mrb[19].mxu1  ;;  %7086 = vmatmul.mubr.f32.gmra.mrb[124].mxu1 %v3420_v14 }
 0x463   : > { %6896 = vmatprep.mubr.f32.mxu0 %v3293_v2  ;;  %7088 = vmatprep.mubr.f32.mxu1 %v3421_v18 }
 0x465   : > { %v10164_v33 = vpop.f32.mrb[20].mxu0  ;;  %v10166_v20 = vpop.f32.mrb[20].mxu1 }
 0x466   : > { %v10168_v62 = vpop.f32.mrb[21].mxu0  ;;  %6897 = vmatmul.mubr.f32.gmra.mrb[126].mxu0 %v3294_v58  ;;  %v10170_v55 = vpop.f32.mrb[21].mxu1  ;;  %7089 = vmatmul.mubr.f32.gmra.mrb[126].mxu1 %v3422_v40 }
 0x469   : > { %v10172_v25 = vpop.f32.mrb[22].mxu0  ;;  %v10174_v59 = vpop.f32.mrb[22].mxu1 }
 0x46a   : > { %v10176_v37 = vpop.f32.mrb[23].mxu0  ;;  %v10178_v51 = vpop.f32.mrb[23].mxu1 }
 0x46d   : > { %v10180_v38 = vpop.f32.mrb[24].mxu0  ;;  %v10182_v19 = vpop.f32.mrb[24].mxu1 }
 0x46e   : > { %v10184_v41 = vpop.f32.mrb[25].mxu0  ;;  %v10186_v50 = vpop.f32.mrb[25].mxu1 }
 0x471   : > { %v10188_v24 = vpop.f32.mrb[26].mxu0  ;;  %v10190_v42 = vpop.f32.mrb[26].mxu1 }
 0x472   : > { %11708 = vst [vmem:[#allocation27_spill] sm:$0xff] %v10190_v42  ;;  %v10192_v47 = vpop.f32.mrb[27].mxu0  ;;  %v10194_v34 = vpop.f32.mrb[27].mxu1  ;;  %v10212_v42 = vld [vmem:[#allocation4] ss:$0 sm:$0xff] }
 0x473   : > { %11709 = vst [vmem:[#allocation28_spill] sm:$0xff] %v10192_v47  ;;  %11710 = vst [vmem:[#allocation29_spill] sm:$0xff] %v10194_v34 }
 0x475   : > { %v10196_v56 = vpop.f32.mrb[28].mxu0  ;;  %v10198_v45 = vpop.f32.mrb[28].mxu1 }
 0x476   : > { %11711 = vst [vmem:[#allocation30_spill] sm:$0xff] %v10196_v56  ;;  %11712 = vst [vmem:[#allocation31_spill] sm:$0xff] %v10198_v45  ;;  %v10200_v52 = vpop.f32.mrb[29].mxu0  ;;  %v10202_v14 = vpop.f32.mrb[29].mxu1 }
 0x477   : > { %11713 = vst [vmem:[#allocation32_spill] sm:$0xff] %v10200_v52  ;;  %11714 = vst [vmem:[#allocation33_spill] sm:$0xff] %v10202_v14  ;;  %v4792_v14 = vmul.f32 %v9970_v48, %v10212_v42  ;;  %v4922_v48 = vmul.f32 %v9992_v46, %v10212_v42  ;;  %v4924_v46 = vmul.f32 %v10012_v31, %v10212_v42 }
 0x479   : > { %v10204_v2 = vpop.f32.mrb[30].mxu0  ;;  %v10206_v18 = vpop.f32.mrb[30].mxu1 }
 0x47a   : > { %11715 = vst [vmem:[#allocation34_spill] sm:$0xff] %v10204_v2  ;;  %11716 = vst [vmem:[#allocation35_spill] sm:$0xff] %v10206_v18  ;;  %v10208_v58 = vpop.f32.mrb[31].mxu0  ;;  %v10210_v40 = vpop.f32.mrb[31].mxu1  ;;  %v4920_v18 = vmul.f32 %v9972_v15, %v10212_v42  ;;  %v10226_v2 = vld [vmem:[#allocation5] ss:$0 sm:$0xff]  ;;  %v4793_v15 = vmul.f32 %v10212_v42, %v9994_v28  ;;  %v4795_v28 = vmul.f32 %v10212_v42, %v10014_v17 }
 0x47b   : > { %11717 = vst [vmem:[#allocation36_spill] sm:$0xff] %v10208_v58  ;;  %11718 = vst [vmem:[#allocation37_spill] sm:$0xff] %v10210_v40  ;;  %v4791_v40 = vmul.f32 %v10212_v42, %v9974_v11  ;;  %v4921_v11 = vmul.f32 %v10212_v42, %v9996_v13  ;;  %v10276_v31 = vadd.f32 %v10226_v2, %v4922_v48 }
 0x47c   : > { %v10279_v17 = vadd.f32 %v10226_v2, %v4793_v15  ;;  %v4797_v48 = vmul.f32 %v10212_v42, %v10034_v3  ;;  %v4925_v15 = vmul.f32 %v10212_v42, %v10036_v36  ;;  %v4799_v3 = vmul.f32 %v10212_v42, %v10054_v57 }
 0x47d   : > { %v10214_v47 = vpop.f32.mrb[32].mxu0  ;;  %v10216_v34 = vpop.f32.mrb[32].mxu1  ;;  %v4927_v36 = vmul.f32 %v10212_v42, %v10056_v6  ;;  %v4801_v57 = vmul.f32 %v10212_v42, %v10074_v43 }
 0x47e   : > { %11719 = vst [vmem:[#allocation38_spill] sm:$0xff] %v10214_v47  ;;  %11720 = vst [vmem:[#allocation39_spill] sm:$0xff] %v10216_v34  ;;  %v10218_v56 = vpop.f32.mrb[33].mxu0  ;;  %v10220_v45 = vpop.f32.mrb[33].mxu1  ;;  %v4919_v47 = vmul.f32 %v10212_v42, %v9976_v0  ;;  %v4794_v34 = vmul.f32 %v9990_v54, %v10212_v42  ;;  %v4796_v0 = vmul.f32 %v10010_v23, %v10212_v42 }
 0x47f   : > { %11721 = vst [vmem:[#allocation40_spill] sm:$0xff] %v10218_v56  ;;  %11722 = vst [vmem:[#allocation41_spill] sm:$0xff] %v10220_v45  ;;  %v10251_v54 = vadd.f32 %v10226_v2, %v4792_v14  ;;  %v4923_v14 = vmul.f32 %v10212_v42, %v10016_v63  ;;  %v10290_v63 = vadd.f32 %v10226_v2, %v4921_v11 }
 0x480   : > { %v10264_v13 = vadd.f32 %v10226_v2, %v4919_v47  ;;  %v10267_v23 = vadd.f32 %v10226_v2, %v4794_v34  ;;  %11728 = vst [vmem:[#allocation47_spill] sm:$0xff] %v10279_v17  ;;  %v4798_v47 = vmul.f32 %v10030_v53, %v10212_v42  ;;  %v4926_v34 = vmul.f32 %v10032_v39, %v10212_v42 }
 0x481   : > { %v10234_v56 = vpop.f32.mrb[34].mxu0  ;;  %v10236_v45 = vpop.f32.mrb[34].mxu1  ;;  %v10300_v53 = vadd.f32 %v10226_v2, %v4924_v46  ;;  %v10303_v39 = vadd.f32 %v10226_v2, %v4795_v28  ;;  %v4800_v17 = vmul.f32 %v10050_v29, %v10212_v42  ;;  %v4928_v11 = vmul.f32 %v10052_v21, %v10212_v42 }
 0x482   : > { %11723 = vst [vmem:[#allocation42_spill] sm:$0xff] %v10236_v45  ;;  %v10242_v58 = vpop.f32.mrb[35].mxu0  ;;  %v10244_v52 = vpop.f32.mrb[35].mxu1  ;;  %v10254_v45 = vadd.f32 %v10226_v2, %v4920_v18  ;;  %11726 = vst [vmem:[#allocation45_spill] sm:$0xff] %v10264_v13  ;;  %v10293_v13 = vadd.f32 %v10226_v2, %v4796_v0  ;;  %v10310_v0 = vadd.f32 %v10226_v2, %v4923_v14 }
 0x483   : > { %11724 = vst [vmem:[#allocation43_spill] sm:$0xff] %v10244_v52  ;;  %v10261_v52 = vadd.f32 %v10226_v2, %v4791_v40  ;;  %11727 = vst [vmem:[#allocation46_spill] sm:$0xff] %v10267_v23  ;;  %v4802_v46 = vmul.f32 %v10070_v22, %v10212_v42  ;;  %v10323_v29 = vadd.f32 %v10226_v2, %v4798_v47 }
 0x484   : > { %11725 = vst [vmem:[#allocation44_spill] sm:$0xff] %v10254_v45  ;;  %11729 = vst [vmem:[#allocation48_spill] sm:$0xff] %v10300_v53  ;;  %v10326_v21 = vadd.f32 %v10226_v2, %v4926_v34  ;;  %v4930_v14 = vmul.f32 %v10072_v1, %v10212_v42  ;;  %v10337_v22 = vadd.f32 %v10226_v2, %v4797_v48 }
 0x485   : > { %v10271_v18 = vpop.f32.mrb[36].mxu0  ;;  %v10273_v45 = vpop.f32.mrb[36].mxu1  ;;  %11730 = vst [vmem:[#allocation49_spill] sm:$0xff] %v10303_v39  ;;  %11731 = vst [vmem:[#allocation50_spill] sm:$0xff] %v10310_v0  ;;  %v10340_v53 = vadd.f32 %v10226_v2, %v4925_v15  ;;  %v4929_v47 = vmul.f32 %v10212_v42, %v10076_v32  ;;  %v4804_v34 = vmul.f32 %v10090_v26, %v10212_v42 }
 0x486   : > { %v10285_v40 = vpop.f32.mrb[37].mxu0  ;;  %v10287_v23 = vpop.f32.mrb[37].mxu1  ;;  %11732 = vst [vmem:[#allocation51_spill] sm:$0xff] %v10326_v21  ;;  %v10347_v1 = vadd.f32 %v10226_v2, %v4800_v17  ;;  %v10350_v43 = vadd.f32 %v10226_v2, %v4928_v11  ;;  %v4932_v21 = vmul.f32 %v10092_v5, %v10212_v42  ;;  %v4803_v48 = vmul.f32 %v10212_v42, %v10094_v12 }
 0x487   : > { %v10357_v15 = vadd.f32 %v10226_v2, %v4799_v3  ;;  %v10360_v32 = vadd.f32 %v10226_v2, %v4927_v36  ;;  %v10363_v26 = vadd.f32 %v10226_v2, %v4802_v46  ;;  %v4931_v17 = vmul.f32 %v10212_v42, %v10096_v4 }
 0x488   : > { %11733 = vst [vmem:[#allocation52_spill] sm:$0xff] %v10350_v43  ;;  %v10372_v5 = vadd.f32 %v10226_v2, %v4930_v14  ;;  %v10375_v12 = vadd.f32 %v10226_v2, %v4801_v57  ;;  %v4806_v3 = vmul.f32 %v10110_v30, %v10212_v42  ;;  %v4934_v36 = vmul.f32 %v10112_v61, %v10212_v42 }
 0x489   : > { %v10318_v28 = vpop.f32.mrb[38].mxu0  ;;  %v10320_v39 = vpop.f32.mrb[38].mxu1  ;;  %11734 = vst [vmem:[#allocation53_spill] sm:$0xff] %v10360_v32  ;;  %11735 = vst [vmem:[#allocation54_spill] sm:$0xff] %v10363_v26  ;;  %v10386_v4 = vadd.f32 %v10226_v2, %v4929_v47  ;;  %v10389_v32 = vadd.f32 %v10226_v2, %v4804_v34  ;;  %v4805_v14 = vmul.f32 %v10212_v42, %v10114_v60 }
 0x48a   : > { %v10332_v6 = vpop.f32.mrb[39].mxu0  ;;  %v10334_v0 = vpop.f32.mrb[39].mxu1  ;;  %11736 = vst [vmem:[#allocation55_spill] sm:$0xff] %v10375_v12  ;;  %v4933_v57 = vmul.f32 %v10212_v42, %v10116_v7  ;;  %v10396_v30 = vadd.f32 %v10226_v2, %v4932_v21  ;;  %v10399_v61 = vadd.f32 %v10226_v2, %v4803_v48  ;;  %v4808_v12 = vmul.f32 %v10130_v10, %v10212_v42 }
 0x48b   : > { %v4936_v47 = vmul.f32 %v10132_v44, %v10212_v42  ;;  %v10406_v34 = vadd.f32 %v10226_v2, %v4931_v17  ;;  %v4807_v60 = vmul.f32 %v10212_v42, %v10134_v9  ;;  %v4935_v7 = vmul.f32 %v10212_v42, %v10136_v8 }
 0x48c   : > { %11737 = vst [vmem:[#allocation56_spill] sm:$0xff] %v10396_v30  ;;  %11738 = vst [vmem:[#allocation57_spill] sm:$0xff] %v10399_v61  ;;  %v4810_v21 = vmul.f32 %v10150_v27, %v10212_v42  ;;  %v10419_v10 = vadd.f32 %v10226_v2, %v4806_v3  ;;  %v10422_v44 = vadd.f32 %v10226_v2, %v4934_v36 }
 0x48d   : > { %v10367_v11 = vpop.f32.mrb[40].mxu0  ;;  %v10369_v43 = vpop.f32.mrb[40].mxu1  ;;  %11739 = vst [vmem:[#allocation58_spill] sm:$0xff] %v10406_v34  ;;  %v4938_v17 = vmul.f32 %v10152_v16, %v10212_v42  ;;  %v4809_v9 = vmul.f32 %v10212_v42, %v10154_v49  ;;  %v10433_v27 = vadd.f32 %v10226_v2, %v4805_v14  ;;  %v10436_v30 = vadd.f32 %v10226_v2, %v4933_v57 }
 0x48e   : > { %v10381_v46 = vpop.f32.mrb[41].mxu0  ;;  %v10383_v26 = vpop.f32.mrb[41].mxu1  ;;  %11740 = vst [vmem:[#allocation59_spill] sm:$0xff] %v10419_v10  ;;  %11741 = vst [vmem:[#allocation60_spill] sm:$0xff] %v10422_v44  ;;  %v4937_v3 = vmul.f32 %v10212_v42, %v10156_v35  ;;  %v4812_v36 = vmul.f32 %v10164_v33, %v10212_v42  ;;  %v10443_v16 = vadd.f32 %v10226_v2, %v4808_v12 }
 0x48f   : > { %11742 = vst [vmem:[#allocation61_spill] sm:$0xff] %v10433_v27  ;;  %11743 = vst [vmem:[#allocation62_spill] sm:$0xff] %v10436_v30  ;;  %v10446_v49 = vadd.f32 %v10226_v2, %v4936_v47  ;;  %v4940_v44 = vmul.f32 %v10166_v20, %v10212_v42  ;;  %v4811_v14 = vmul.f32 %v10212_v42, %v10168_v62  ;;  %v11786_v27 = vld [vmem:[#allocation41_spill] sm:$0xff] }
 0x490   : > { %11744 = vst [vmem:[#allocation63_spill] sm:$0xff] %v10443_v16  ;;  %v10453_v57 = vadd.f32 %v10226_v2, %v4807_v60  ;;  %v10456_v35 = vadd.f32 %v10226_v2, %v4935_v7  ;;  %v10459_v33 = vadd.f32 %v10226_v2, %v4810_v21  ;;  %v4939_v12 = vmul.f32 %v10212_v42, %v10170_v55  ;;  %v11782_v16 = vld [vmem:[#allocation38_spill] sm:$0xff] }
 0x491   : > { %v10414_v48 = vpop.f32.mrb[42].mxu0  ;;  %v10416_v61 = vpop.f32.mrb[42].mxu1  ;;  %11745 = vst [vmem:[#allocation64_spill] sm:$0xff] %v10446_v49  ;;  %v10468_v20 = vadd.f32 %v10226_v2, %v4938_v17  ;;  %v10471_v62 = vadd.f32 %v10226_v2, %v4809_v9  ;;  %v4814_v60 = vmul.f32 %v10172_v25, %v10212_v42  ;;  %v4942_v7 = vmul.f32 %v10174_v59, %v10212_v42 }
 0x492   : > { %v10428_v8 = vpop.f32.mrb[43].mxu0  ;;  %v10430_v34 = vpop.f32.mrb[43].mxu1  ;;  %11746 = vst [vmem:[#allocation65_spill] sm:$0xff] %v10453_v57  ;;  %11747 = vst [vmem:[#allocation66_spill] sm:$0xff] %v10456_v35  ;;  %v10482_v55 = vadd.f32 %v10226_v2, %v4937_v3  ;;  %v10485_v35 = vadd.f32 %v10226_v2, %v4812_v36  ;;  %v4813_v17 = vmul.f32 %v10212_v42, %v10176_v37 }
 0x493   : > { %11748 = vst [vmem:[#allocation67_spill] sm:$0xff] %v10459_v33  ;;  %11749 = vst [vmem:[#allocation68_spill] sm:$0xff] %v10468_v20  ;;  %v4941_v9 = vmul.f32 %v10212_v42, %v10178_v51  ;;  %v10492_v25 = vadd.f32 %v10226_v2, %v4940_v44  ;;  %v10495_v59 = vadd.f32 %v10226_v2, %v4811_v14  ;;  %v11766_v20 = vld [vmem:[#allocation31_spill] sm:$0xff] }
 0x494   : > { %11750 = vst [vmem:[#allocation69_spill] sm:$0xff] %v10471_v62  ;;  %11751 = vst [vmem:[#allocation70_spill] sm:$0xff] %v10482_v55  ;;  %v4816_v62 = vmul.f32 %v10180_v38, %v10212_v42  ;;  %v4944_v3 = vmul.f32 %v10182_v19, %v10212_v42  ;;  %v10502_v36 = vadd.f32 %v10226_v2, %v4939_v12  ;;  %v11758_v12 = vld [vmem:[#allocation27_spill] sm:$0xff] }
 0x495   : > { %v10463_v47 = vpop.f32.mrb[44].mxu0  ;;  %v10465_v49 = vpop.f32.mrb[44].mxu1  ;;  %11752 = vst [vmem:[#allocation71_spill] sm:$0xff] %v10485_v35  ;;  %11753 = vst [vmem:[#allocation72_spill] sm:$0xff] %v10492_v25  ;;  %v4815_v37 = vmul.f32 %v10212_v42, %v10184_v41  ;;  %v4943_v51 = vmul.f32 %v10212_v42, %v10186_v50  ;;  %v4818_v44 = vmul.f32 %v10188_v24, %v10212_v42  ;;  %v11759_v41 = vld [vmem:[#allocation28_spill] sm:$0xff] }
 0x496   : > { %v10477_v21 = vpop.f32.mrb[45].mxu0  ;;  %v10479_v33 = vpop.f32.mrb[45].mxu1  ;;  %11754 = vst [vmem:[#allocation73_spill] sm:$0xff] %v10495_v59  ;;  %11755 = vst [vmem:[#allocation74_spill] sm:$0xff] %v10502_v36  ;;  %v10515_v38 = vadd.f32 %v10226_v2, %v4814_v60  ;;  %v10518_v19 = vadd.f32 %v10226_v2, %v4942_v7  ;;  %v4946_v36 = vmul.f32 %v11758_v12, %v10212_v42  ;;  %v11762_v60 = vld [vmem:[#allocation29_spill] sm:$0xff] }
 0x497   : > { %v4817_v25 = vmul.f32 %v10212_v42, %v11759_v41  ;;  %v10529_v24 = vadd.f32 %v10226_v2, %v4813_v17  ;;  %v10532_v55 = vadd.f32 %v10226_v2, %v4941_v9  ;;  %v4945_v7 = vmul.f32 %v10212_v42, %v11762_v60  ;;  %v11767_v17 = vld [vmem:[#allocation32_spill] sm:$0xff] }
 0x498   : > { %11756 = vst [vmem:[#allocation75_spill] sm:$0xff] %v10515_v38  ;;  %11757 = vst [vmem:[#allocation76_spill] sm:$0xff] %v10518_v19  ;;  %v11763_v19 = vld [vmem:[#allocation30_spill] sm:$0xff]  ;;  %v10539_v12 = vadd.f32 %v10226_v2, %v4816_v62  ;;  %v10542_v41 = vadd.f32 %v10226_v2, %v4944_v3  ;;  %v4948_v57 = vmul.f32 %v11766_v20, %v10212_v42  ;;  %v11771_v62 = vld [vmem:[#allocation33_spill] sm:$0xff] }
 0x499   : > { %v10510_v14 = vpop.f32.mrb[46].mxu0  ;;  %v10512_v59 = vpop.f32.mrb[46].mxu1  ;;  %11760 = vst [vmem:[#allocation27_spill] sm:$0xff] %v10529_v24  ;;  %11761 = vst [vmem:[#allocation28_spill] sm:$0xff] %v10532_v55  ;;  %v4820_v38 = vmul.f32 %v11763_v19, %v10212_v42  ;;  %v4819_v24 = vmul.f32 %v10212_v42, %v11767_v17  ;;  %v10549_v9 = vadd.f32 %v10226_v2, %v4815_v37  ;;  %v11774_v37 = vld [vmem:[#allocation34_spill] sm:$0xff] }
 0x49a   : > { %v10524_v50 = vpop.f32.mrb[47].mxu0  ;;  %v10526_v35 = vpop.f32.mrb[47].mxu1  ;;  %11764 = vst [vmem:[#allocation29_spill] sm:$0xff] %v10539_v12  ;;  %11765 = vst [vmem:[#allocation30_spill] sm:$0xff] %v10542_v41  ;;  %v10552_v60 = vadd.f32 %v10226_v2, %v4943_v51  ;;  %v10555_v19 = vadd.f32 %v10226_v2, %v4818_v44  ;;  %v4947_v12 = vmul.f32 %v10212_v42, %v11771_v62 }
 0x49b   : > { %11768 = vst [vmem:[#allocation31_spill] sm:$0xff] %v10549_v9  ;;  %v10564_v20 = vadd.f32 %v10226_v2, %v4946_v36  ;;  %v10567_v17 = vadd.f32 %v10226_v2, %v4817_v25  ;;  %v4822_v51 = vmul.f32 %v11774_v37, %v10212_v42  ;;  %v10578_v62 = vadd.f32 %v10226_v2, %v4945_v7  ;;  %v11778_v36 = vld [vmem:[#allocation36_spill] sm:$0xff]  ;;  %v11783_v7 = vld [vmem:[#allocation39_spill] sm:$0xff] }
 0x49c   : > { %11769 = vst [vmem:[#allocation32_spill] sm:$0xff] %v10552_v60  ;;  %11770 = vst [vmem:[#allocation77_spill] sm:$0xff] %v10555_v19  ;;  %v11775_v60 = vld [vmem:[#allocation35_spill] sm:$0xff]  ;;  %v10581_v55 = vadd.f32 %v10226_v2, %v4820_v38  ;;  %v4821_v25 = vmul.f32 %v10212_v42, %v11778_v36  ;;  %v10588_v37 = vadd.f32 %v10226_v2, %v4948_v57 }
 0x49d   : > { %v10559_v3 = vpop.f32.mrb[48].mxu0  ;;  %v10561_v41 = vpop.f32.mrb[48].mxu1  ;;  %11772 = vst [vmem:[#allocation33_spill] sm:$0xff] %v10564_v20  ;;  %11773 = vst [vmem:[#allocation78_spill] sm:$0xff] %v10567_v17  ;;  %v4950_v44 = vmul.f32 %v11775_v60, %v10212_v42  ;;  %v11779_v17 = vld [vmem:[#allocation37_spill] sm:$0xff]  ;;  %v10591_v60 = vadd.f32 %v10226_v2, %v4819_v24  ;;  %v4824_v30 = vmul.f32 %v11782_v16, %v10212_v42 }
 0x49e   : > { %v10573_v19 = vpop.f32.mrb[49].mxu0  ;;  %v10575_v9 = vpop.f32.mrb[49].mxu1  ;;  %11776 = vst [vmem:[#allocation34_spill] sm:$0xff] %v10578_v62  ;;  %11777 = vst [vmem:[#allocation35_spill] sm:$0xff] %v10581_v55  ;;  %v4949_v20 = vmul.f32 %v10212_v42, %v11779_v17  ;;  %v4952_v62 = vmul.f32 %v11783_v7, %v10212_v42  ;;  %v10598_v38 = vadd.f32 %v10226_v2, %v4947_v12  ;;  %v11785_v55 = vld [vmem:[#allocation40_spill] sm:$0xff]  ;;  %v11789_v12 = vld [vmem:[#allocation42_spill] sm:$0xff] }
 0x49f   : > { %11780 = vst [vmem:[#allocation36_spill] sm:$0xff] %v10588_v37  ;;  %11781 = vst [vmem:[#allocation37_spill] sm:$0xff] %v10591_v60  ;;  %v4823_v36 = vmul.f32 %v10212_v42, %v11785_v55  ;;  %v4951_v17 = vmul.f32 %v10212_v42, %v11786_v27  ;;  %v4826_v57 = vmul.f32 %v10234_v56, %v10212_v42 }
 0x4a0   : > { %11784 = vst [vmem:[#allocation38_spill] sm:$0xff] %v10598_v38  ;;  %v10611_v16 = vadd.f32 %v10226_v2, %v4822_v51  ;;  %v10614_v7 = vadd.f32 %v10226_v2, %v4950_v44  ;;  %v4954_v38 = vmul.f32 %v11789_v12, %v10212_v42  ;;  %v4825_v55 = vmul.f32 %v10212_v42, %v10242_v58  ;;  %v11790_v51 = vld [vmem:[#allocation43_spill] sm:$0xff] }
 0x4a1   : > { %v10606_v24 = vpop.f32.mrb[50].mxu0  ;;  %v10608_v60 = vpop.f32.mrb[50].mxu1  ;;  %v10625_v56 = vadd.f32 %v10226_v2, %v4821_v25  ;;  %v10628_v10 = vadd.f32 %v10226_v2, %v4949_v20  ;;  %v4953_v44 = vmul.f32 %v10212_v42, %v11790_v51  ;;  %v10635_v12 = vadd.f32 %v10226_v2, %v4824_v30 }
 0x4a2   : > { %11787 = vst [vmem:[#allocation39_spill] sm:$0xff] %v10611_v16  ;;  %11788 = vst [vmem:[#allocation40_spill] sm:$0xff] %v10614_v7  ;;  %v10620_v27 = vpop.f32.mrb[51].mxu0  ;;  %v10622_v37 = vpop.f32.mrb[51].mxu1  ;;  %v4828_v7 = vmul.f32 %v10271_v18, %v10212_v42  ;;  %v10638_v58 = vadd.f32 %v10226_v2, %v4952_v62  ;;  %v4956_v16 = vmul.f32 %v10273_v45, %v10212_v42 }
 0x4a3   : > { %v4827_v25 = vmul.f32 %v10212_v42, %v10285_v40  ;;  %v10645_v20 = vadd.f32 %v10226_v2, %v4823_v36  ;;  %v10648_v51 = vadd.f32 %v10226_v2, %v4951_v17  ;;  %v10651_v18 = vadd.f32 %v10226_v2, %v4826_v57 }
 0x4a4   : > { %11791 = vst [vmem:[#allocation41_spill] sm:$0xff] %v10638_v58  ;;  %v4955_v30 = vmul.f32 %v10212_v42, %v10287_v23  ;;  %v10660_v45 = vadd.f32 %v10226_v2, %v4954_v38  ;;  %v10663_v40 = vadd.f32 %v10226_v2, %v4825_v55  ;;  %v4830_v36 = vmul.f32 %v10318_v28, %v10212_v42 }
 0x4a5   : > { %11792 = vst [vmem:[#allocation42_spill] sm:$0xff] %v10648_v51  ;;  %11793 = vst [vmem:[#allocation43_spill] sm:$0xff] %v10651_v18  ;;  %v10655_v62 = vpop.f32.mrb[52].mxu0  ;;  %v10657_v58 = vpop.f32.mrb[52].mxu1  ;;  %v4958_v17 = vmul.f32 %v10320_v39, %v10212_v42  ;;  %v10674_v23 = vadd.f32 %v10226_v2, %v4953_v44  ;;  %v10677_v51 = vadd.f32 %v10226_v2, %v4828_v7 }
 0x4a6   : > { %11794 = vst [vmem:[#allocation79_spill] sm:$0xff] %v10663_v40  ;;  %v10669_v57 = vpop.f32.mrb[53].mxu0  ;;  %v10671_v18 = vpop.f32.mrb[53].mxu1  ;;  %v4829_v38 = vmul.f32 %v10212_v42, %v10332_v6  ;;  %v4957_v55 = vmul.f32 %v10212_v42, %v10334_v0  ;;  %v10684_v28 = vadd.f32 %v10226_v2, %v4956_v16  ;;  %v10687_v39 = vadd.f32 %v10226_v2, %v4827_v25 }
 0x4a7   : > { %v4832_v40 = vmul.f32 %v10367_v11, %v10212_v42  ;;  %v4960_v44 = vmul.f32 %v10369_v43, %v10212_v42  ;;  %v10694_v7 = vadd.f32 %v10226_v2, %v4955_v30  ;;  %v4831_v6 = vmul.f32 %v10212_v42, %v10381_v46 }
 0x4a8   : > { %11795 = vst [vmem:[#allocation80_spill] sm:$0xff] %v10684_v28  ;;  %11796 = vst [vmem:[#allocation81_spill] sm:$0xff] %v10687_v39  ;;  %v4959_v0 = vmul.f32 %v10212_v42, %v10383_v26  ;;  %v4834_v16 = vmul.f32 %v10414_v48, %v10212_v42  ;;  %v10707_v11 = vadd.f32 %v10226_v2, %v4830_v36 }
 0x4a9   : > { %11797 = vst [vmem:[#allocation82_spill] sm:$0xff] %v10694_v7  ;;  %v10702_v25 = vpop.f32.mrb[54].mxu0  ;;  %v10704_v39 = vpop.f32.mrb[54].mxu1  ;;  %v10710_v43 = vadd.f32 %v10226_v2, %v4958_v17  ;;  %v4962_v30 = vmul.f32 %v10416_v61, %v10212_v42  ;;  %v4833_v46 = vmul.f32 %v10212_v42, %v10428_v8  ;;  %v10721_v48 = vadd.f32 %v10226_v2, %v4829_v38 }
 0x4aa   : > { %v10716_v26 = vpop.f32.mrb[55].mxu0  ;;  %v10718_v7 = vpop.f32.mrb[55].mxu1  ;;  %v10724_v28 = vadd.f32 %v10226_v2, %v4957_v55  ;;  %v4961_v36 = vmul.f32 %v10212_v42, %v10430_v34  ;;  %v4836_v17 = vmul.f32 %v10463_v47, %v10212_v42  ;;  %v10731_v61 = vadd.f32 %v10226_v2, %v4832_v40 }
 0x4ab   : > { %11798 = vst [vmem:[#allocation83_spill] sm:$0xff] %v10710_v43  ;;  %v10734_v8 = vadd.f32 %v10226_v2, %v4960_v44  ;;  %v4964_v43 = vmul.f32 %v10465_v49, %v10212_v42  ;;  %v4835_v38 = vmul.f32 %v10212_v42, %v10477_v21  ;;  %v10741_v55 = vadd.f32 %v10226_v2, %v4831_v6 }
 0x4ac   : > { %11799 = vst [vmem:[#allocation84_spill] sm:$0xff] %v10731_v61  ;;  %v10744_v34 = vadd.f32 %v10226_v2, %v4959_v0  ;;  %v10747_v47 = vadd.f32 %v10226_v2, %v4834_v16  ;;  %v4963_v40 = vmul.f32 %v10212_v42, %v10479_v33  ;;  %v10752_v61 = vadd.f32 %v10226_v2, %v4962_v30 }
 0x4ad   : > { %11800 = vst [vmem:[#allocation85_spill] sm:$0xff] %v10734_v8  ;;  %v6793_v44 = vpop.f32.mrb[56].mxu0  ;;  %v6985_v8 = vpop.f32.mrb[56].mxu1  ;;  %v10755_v49 = vadd.f32 %v10226_v2, %v4833_v46  ;;  %v4838_v21 = vmul.f32 %v10510_v14, %v10212_v42  ;;  %v4966_v6 = vmul.f32 %v10512_v59, %v10212_v42  ;;  %v10765_v33 = vadd.f32 %v10226_v2, %v4836_v17 }
 0x4ae   : > { %11801 = vst [vmem:[#allocation86_spill] sm:$0xff] %v10747_v47  ;;  %v3785_v0 = vpop.f32.mrb[57].mxu0  ;;  %v4425_v16 = vpop.f32.mrb[57].mxu1  ;;  %v10762_v47 = vadd.f32 %v10226_v2, %v4961_v36  ;;  %v4837_v30 = vmul.f32 %v10212_v42, %v10524_v50  ;;  %v4965_v46 = vmul.f32 %v10212_v42, %v10526_v35  ;;  %v10775_v14 = vadd.f32 %v10226_v2, %v4835_v38 }
 0x4af   : > { %11802 = vst [vmem:[#allocation87_spill] sm:$0xff] %v10755_v49  ;;  %v10772_v49 = vadd.f32 %v10226_v2, %v4964_v43  ;;  %v4840_v59 = vmul.f32 %v10559_v3, %v10212_v42  ;;  %v4968_v36 = vmul.f32 %v10561_v41, %v10212_v42  ;;  %v10782_v17 = vadd.f32 %v10226_v2, %v4963_v40 }
 0x4b0   : > { %11804 = vst [vmem:[#allocation89_spill] sm:$0xff] %v10775_v14  ;;  %v4839_v50 = vmul.f32 %v10212_v42, %v10573_v19  ;;  %v4967_v35 = vmul.f32 %v10212_v42, %v10575_v9  ;;  %v4842_v43 = vmul.f32 %v10606_v24, %v10212_v42  ;;  %v10794_v3 = vadd.f32 %v10226_v2, %v4966_v6 }
 0x4b1   : > { %11803 = vst [vmem:[#allocation88_spill] sm:$0xff] %v10772_v49  ;;  %11805 = vst [vmem:[#allocation90_spill] sm:$0xff] %v10782_v17  ;;  %v6796_v38 = vpop.f32.mrb[58].mxu0  ;;  %v6988_v14 = vpop.f32.mrb[58].mxu1  ;;  %v10791_v49 = vadd.f32 %v10226_v2, %v4838_v21  ;;  %v4970_v41 = vmul.f32 %v10608_v60, %v10212_v42  ;;  %v4841_v19 = vmul.f32 %v10212_v42, %v10620_v27 }
 0x4b2   : > { %11806 = vst [vmem:[#allocation91_spill] sm:$0xff] %v10794_v3  ;;  %v3795_v40 = vpop.f32.mrb[59].mxu0  ;;  %v4435_v17 = vpop.f32.mrb[59].mxu1  ;;  %v10801_v9 = vadd.f32 %v10226_v2, %v4837_v30  ;;  %v10804_v24 = vadd.f32 %v10226_v2, %v4965_v46  ;;  %v4969_v21 = vmul.f32 %v10212_v42, %v10622_v37  ;;  %v4844_v6 = vmul.f32 %v10655_v62, %v10212_v42 }
 0x4b3   : > { %v10811_v3 = vadd.f32 %v10226_v2, %v4840_v59  ;;  %v10814_v60 = vadd.f32 %v10226_v2, %v4968_v36  ;;  %v4972_v27 = vmul.f32 %v10657_v58, %v10212_v42  ;;  %v4843_v30 = vmul.f32 %v10212_v42, %v10669_v57 }
 0x4b4   : > { %v10821_v46 = vadd.f32 %v10226_v2, %v4839_v50  ;;  %v10824_v37 = vadd.f32 %v10226_v2, %v4967_v35  ;;  %v10827_v62 = vadd.f32 %v10226_v2, %v4842_v43  ;;  %v4971_v59 = vmul.f32 %v10212_v42, %v10671_v18 }
 0x4b5   : > { %11807 = vst [vmem:[#allocation92_spill] sm:$0xff] %v10811_v3  ;;  %11808 = vst [vmem:[#allocation93_spill] sm:$0xff] %v10814_v60  ;;  %v6799_v36 = vpop.f32.mrb[60].mxu0  ;;  %v6991_v60 = vpop.f32.mrb[60].mxu1  ;;  %v10832_v3 = vadd.f32 %v10226_v2, %v4970_v41  ;;  %v10835_v58 = vadd.f32 %v10226_v2, %v4841_v19  ;;  %v4846_v57 = vmul.f32 %v10702_v25, %v10212_v42 }
 0x4b6   : > { %11809 = vst [vmem:[#allocation94_spill] sm:$0xff] %v10827_v62  ;;  %v4974_v50 = vmul.f32 %v10704_v39, %v10212_v42  ;;  %v3805_v35 = vpop.f32.mrb[61].mxu0  ;;  %v4445_v43 = vpop.f32.mrb[61].mxu1  ;;  %v10842_v62 = vadd.f32 %v10226_v2, %v4969_v21  ;;  %v10845_v18 = vadd.f32 %v10226_v2, %v4844_v6  ;;  %v4845_v41 = vmul.f32 %v10212_v42, %v10716_v26 }
 0x4b7   : > { %11810 = vst [vmem:[#allocation95_spill] sm:$0xff] %v10832_v3  ;;  %11811 = vst [vmem:[#allocation96_spill] sm:$0xff] %v10835_v58  ;;  %v4973_v19 = vmul.f32 %v10212_v42, %v10718_v7  ;;  %v10852_v58 = vadd.f32 %v10226_v2, %v4972_v27  ;;  %v10855_v25 = vadd.f32 %v10226_v2, %v4843_v30 }
 0x4b8   : > { %11812 = vst [vmem:[#allocation97_spill] sm:$0xff] %v10842_v62  ;;  %11813 = vst [vmem:[#allocation98_spill] sm:$0xff] %v10845_v18  ;;  %v4848_v39 = vmul.f32 %v6793_v44, %v10212_v42  ;;  %v4976_v21 = vmul.f32 %v6985_v8, %v10212_v42  ;;  %v10860_v62 = vadd.f32 %v10226_v2, %v4971_v59 }
 0x4b9   : > { %v4847_v6 = vmul.f32 %v10212_v42, %v3785_v0  ;;  %v4975_v26 = vmul.f32 %v10212_v42, %v4425_v16  ;;  %v4850_v18 = vmul.f32 %v6796_v38, %v10212_v42  ;;  %v6802_v7 = vpop.f32.mrb[62].mxu0  ;;  %v6994_v3 = vpop.f32.mrb[62].mxu1  ;;  %v10866_v27 = vadd.f32 %v10226_v2, %v4846_v57 }
 0x4ba   : > { %11814 = vst [vmem:[#allocation99_spill] sm:$0xff] %v10860_v62  ;;  %v10869_v30 = vadd.f32 %v10226_v2, %v4974_v50  ;;  %v4978_v44 = vmul.f32 %v6988_v14, %v10212_v42  ;;  %v4849_v8 = vmul.f32 %v10212_v42, %v3795_v40  ;;  %v3815_v59 = vpop.f32.mrb[63].mxu0  ;;  %v10873_v62 = vpop.f32.mrb[63].mxu1  ;;  %v10876_v0 = vadd.f32 %v10226_v2, %v4845_v41 }
 0x4bb   : > { %v10879_v16 = vadd.f32 %v10226_v2, %v4973_v19  ;;  %v4977_v38 = vmul.f32 %v10212_v42, %v4435_v17  ;;  %v4852_v57 = vmul.f32 %v6799_v36, %v10212_v42  ;;  %v10884_v50 = vadd.f32 %v10226_v2, %v4848_v39 }
 0x4bc   : > { %11815 = vst [vmem:[#allocation100_spill] sm:$0xff] %v10869_v30  ;;  %v10887_v14 = vadd.f32 %v10226_v2, %v4976_v21  ;;  %v4980_v40 = vmul.f32 %v6991_v60, %v10212_v42  ;;  %v4851_v30 = vmul.f32 %v10212_v42, %v3805_v35  ;;  %v10892_v41 = vadd.f32 %v10226_v2, %v4847_v6 }
 0x4bd   : > { %11816 = vst [vmem:[#allocation101_spill] sm:$0xff] %v10884_v50  ;;  %v10895_v19 = vadd.f32 %v10226_v2, %v4975_v26  ;;  %v10898_v17 = vadd.f32 %v10226_v2, %v4850_v18  ;;  %v4979_v36 = vmul.f32 %v10212_v42, %v4445_v43  ;;  %v6805_v39 = vpop.f32.mrb[64].mxu0  ;;  %v6997_v50 = vpop.f32.mrb[64].mxu1  ;;  %v10902_v21 = vadd.f32 %v10226_v2, %v4978_v44 }
 0x4be   : > { %11817 = vst [vmem:[#allocation102_spill] sm:$0xff] %v10887_v14  ;;  %11818 = vst [vmem:[#allocation103_spill] sm:$0xff] %v10892_v41  ;;  %v10905_v60 = vadd.f32 %v10226_v2, %v4849_v8  ;;  %v4856_v35 = vmul.f32 %v6805_v39, %v10212_v42  ;;  %v4984_v6 = vmul.f32 %v6997_v50, %v10212_v42  ;;  %v3825_v26 = vpop.f32.mrb[65].mxu0 }
 0x4bf   : > { %11819 = vst [vmem:[#allocation104_spill] sm:$0xff] %v10895_v19  ;;  %11820 = vst [vmem:[#allocation105_spill] sm:$0xff] %v10898_v17  ;;  %v4465_v19 = vpop.f32.mrb[65].mxu1  ;;  %v10910_v18 = vadd.f32 %v10226_v2, %v4977_v38  ;;  %v10913_v43 = vadd.f32 %v10226_v2, %v4852_v57  ;;  %v4855_v17 = vmul.f32 %v10212_v42, %v3825_v26 }
 0x4c0   : > { %11821 = vst [vmem:[#allocation106_spill] sm:$0xff] %v10902_v21  ;;  %11822 = vst [vmem:[#allocation107_spill] sm:$0xff] %v10905_v60  ;;  %v4983_v44 = vmul.f32 %v10212_v42, %v4465_v19  ;;  %v10918_v21 = vadd.f32 %v10226_v2, %v4980_v40  ;;  %v10921_v8 = vadd.f32 %v10226_v2, %v4851_v30 }
 0x4c1   : > { %11823 = vst [vmem:[#allocation108_spill] sm:$0xff] %v10910_v18  ;;  %11824 = vst [vmem:[#allocation109_spill] sm:$0xff] %v10913_v43  ;;  %v5119_v50 = vadd.f32 %v10226_v2, %v4856_v35  ;;  %v5247_v39 = vadd.f32 %v10226_v2, %v4984_v6  ;;  %v10926_v38 = vadd.f32 %v10226_v2, %v4979_v36  ;;  %v6808_v19 = vpop.f32.mrb[66].mxu0  ;;  %v7000_v18 = vpop.f32.mrb[66].mxu1 }
 0x4c2   : > { %11825 = vst [vmem:[#allocation110_spill] sm:$0xff] %v10918_v21  ;;  %11826 = vst [vmem:[#allocation111_spill] sm:$0xff] %v10921_v8  ;;  %v4854_v57 = vmul.f32 %v6802_v7, %v10212_v42  ;;  %v5118_v43 = vadd.f32 %v10226_v2, %v4855_v17  ;;  %v5246_v26 = vadd.f32 %v10226_v2, %v4983_v44  ;;  %v11828_v21 = vld [vmem:[#allocation44_spill] sm:$0xff]  ;;  %v3835_v6 = vpop.f32.mrb[67].mxu0  ;;  %v4475_v60 = vpop.f32.mrb[67].mxu1 }
 0x4c3   : > { %11827 = vst [vmem:[#allocation112_spill] sm:$0xff] %v10926_v38  ;;  %v5311_v40 = vmax.f32 %v10251_v54, %v5119_v50  ;;  %v5375_v30 = vmax.f32 %v11828_v21, %v5247_v39  ;;  %v4858_v8 = vmul.f32 %v6808_v19, %v10212_v42  ;;  %v4986_v35 = vmul.f32 %v7000_v18, %v10212_v42  ;;  %v11829_v38 = vld [vmem:[#allocation45_spill] sm:$0xff]  ;;  %v11830_v19 = vld [vmem:[#allocation46_spill] sm:$0xff] }
 0x4c4   : > { %v5310_v36 = vmax.f32 %v10261_v52, %v5118_v43  ;;  %v5374_v7 = vmax.f32 %v11829_v38, %v5246_v26  ;;  %v4857_v17 = vmul.f32 %v10212_v42, %v3835_v6  ;;  %v4985_v44 = vmul.f32 %v10212_v42, %v4475_v60  ;;  %v11831_v6 = vld [vmem:[#allocation47_spill] sm:$0xff] }
 0x4c5   : > { %v4982_v41 = vmul.f32 %v6994_v3, %v10212_v42  ;;  %v5439_v14 = vmax.f32 %v5311_v40, %v5375_v30  ;;  %v5121_v54 = vadd.f32 %v10226_v2, %v4858_v8  ;;  %v5249_v21 = vadd.f32 %v10226_v2, %v4986_v35  ;;  %v6811_v43 = vpop.f32.mrb[68].mxu0  ;;  %v7003_v38 = vpop.f32.mrb[68].mxu1 }
 0x4c6   : > { %v10943_v50 = vmul.f32 %v10212_v42, %v3815_v59  ;;  %v5438_v18 = vmax.f32 %v5310_v36, %v5374_v7  ;;  %v5120_v39 = vadd.f32 %v10226_v2, %v4857_v17  ;;  %v5248_v52 = vadd.f32 %v10226_v2, %v4985_v44  ;;  %v3845_v8 = vpop.f32.mrb[69].mxu0  ;;  %v4485_v30 = vpop.f32.mrb[69].mxu1 }
 0x4c7   : > { %v5503_v26 = vmax.f32 %v5439_v14, 0.0  ;;  %v5313_v60 = vmax.f32 %v11830_v19, %v5121_v54  ;;  %v5377_v3 = vmax.f32 %v10276_v31, %v5249_v21  ;;  %v4860_v40 = vmul.f32 %v6811_v43, %v10212_v42 }
 0x4c8   : > { %v5502_v35 = vmax.f32 %v5438_v18, 0.0  ;;  %v5312_v59 = vmax.f32 %v11831_v6, %v5120_v39  ;;  %v5376_v36 = vmax.f32 %v10290_v63, %v5248_v52  ;;  %v4988_v7 = vmul.f32 %v7003_v38, %v10212_v42  ;;  %v11834_v6 = vld [vmem:[#allocation50_spill] sm:$0xff] }
 0x4c9   : > { %5568 = vst.msk [vmem:[%s11596_s4 + $0x8] sm:$0xff] %vm5566_vm2, %v5503_v26  ;;  %v5441_v14 = vmax.f32 %v5313_v60, %v5377_v3  ;;  %v5123_v17 = vadd.f32 %v10226_v2, %v4860_v40  ;;  %v4859_v31 = vmul.f32 %v10212_v42, %v3845_v8  ;;  %v4987_v44 = vmul.f32 %v10212_v42, %v4485_v30  ;;  %v6814_v39 = vpop.f32.mrb[70].mxu0  ;;  %v7006_v52 = vpop.f32.mrb[70].mxu1  ;;  %v11832_v3 = vld [vmem:[#allocation48_spill] sm:$0xff] }
 0x4ca   : > { %v10961_v54 = vadd.f32 %v10226_v2, %v4854_v57  ;;  %v10965_v63 = vmul.f32 %v10212_v42, %v10873_v62  ;;  %5567 = vst.msk [vmem:[%s11596_s4] sm:$0xff] %vm5566_vm2, %v5502_v35  ;;  %v5440_v21 = vmax.f32 %v5312_v59, %v5376_v36  ;;  %v5251_v18 = vadd.f32 %v10226_v2, %v4988_v7  ;;  %v3855_v19 = vpop.f32.mrb[71].mxu0  ;;  %v4495_v62 = vpop.f32.mrb[71].mxu1  ;;  %v11833_v35 = vld [vmem:[#allocation49_spill] sm:$0xff] }
 0x4cb   : > { %v5505_v43 = vmax.f32 %v5441_v14, 0.0  ;;  %v5315_v38 = vmax.f32 %v10293_v13, %v5123_v17  ;;  %v5122_v57 = vadd.f32 %v10226_v2, %v4859_v31  ;;  %v5250_v26 = vadd.f32 %v10226_v2, %v4987_v44 }
 0x4cc   : > { %v5504_v60 = vmax.f32 %v5440_v21, 0.0  ;;  %v5379_v40 = vmax.f32 %v11832_v3, %v5251_v18  ;;  %v4862_v8 = vmul.f32 %v6814_v39, %v10212_v42  ;;  %v4990_v30 = vmul.f32 %v7006_v52, %v10212_v42 }
 0x4cd   : > { %5570 = vst.msk [vmem:[%s11596_s4 + $0x18] sm:$0xff] %vm5566_vm2, %v5505_v43  ;;  %v5314_v13 = vmax.f32 %v11833_v35, %v5122_v57  ;;  %v5378_v59 = vmax.f32 %v11834_v6, %v5250_v26  ;;  %v4861_v36 = vmul.f32 %v10212_v42, %v3855_v19  ;;  %v4989_v7 = vmul.f32 %v10212_v42, %v4495_v62  ;;  %v6817_v21 = vpop.f32.mrb[72].mxu0  ;;  %v7009_v18 = vpop.f32.mrb[72].mxu1 }
 0x4ce   : > { %v10987_v14 = vadd.f32 %v10226_v2, %v4982_v41  ;;  %5569 = vst.msk [vmem:[%s11596_s4 + $0x10] sm:$0xff] %vm5566_vm2, %v5504_v60  ;;  %v5443_v17 = vmax.f32 %v5315_v38, %v5379_v40  ;;  %v5125_v31 = vadd.f32 %v10226_v2, %v4862_v8  ;;  %v5253_v44 = vadd.f32 %v10226_v2, %v4990_v30  ;;  %v3865_v57 = vpop.f32.mrb[73].mxu0  ;;  %v4505_v26 = vpop.f32.mrb[73].mxu1  ;;  %v11835_v60 = vld [vmem:[#allocation51_spill] sm:$0xff] }
 0x4cf   : > { %v5442_v39 = vmax.f32 %v5314_v13, %v5378_v59  ;;  %v5124_v52 = vadd.f32 %v10226_v2, %v4861_v36  ;;  %v5252_v43 = vadd.f32 %v10226_v2, %v4989_v7  ;;  %v4864_v41 = vmul.f32 %v6817_v21, %v10212_v42 }
 0x4d0   : > { %v5507_v19 = vmax.f32 %v5443_v17, 0.0  ;;  %v5317_v62 = vmax.f32 %v10323_v29, %v5125_v31  ;;  %v5381_v38 = vmax.f32 %v11835_v60, %v5253_v44  ;;  %v4992_v3 = vmul.f32 %v7009_v18, %v10212_v42 }
 0x4d1   : > { %v5506_v40 = vmax.f32 %v5442_v39, 0.0  ;;  %v5316_v8 = vmax.f32 %v10337_v22, %v5124_v52  ;;  %v5380_v30 = vmax.f32 %v10340_v53, %v5252_v43  ;;  %v5127_v35 = vadd.f32 %v10226_v2, %v4864_v41  ;;  %v6820_v36 = vpop.f32.mrb[74].mxu0  ;;  %v7012_v7 = vpop.f32.mrb[74].mxu1  ;;  %v11836_v39 = vld [vmem:[#allocation52_spill] sm:$0xff] }
 0x4d2   : > { %5572 = vst.msk [vmem:[%s11596_s4 + $0x28] sm:$0xff] %vm5566_vm2, %v5507_v19  ;;  %v5445_v13 = vmax.f32 %v5317_v62, %v5381_v38  ;;  %v5255_v6 = vadd.f32 %v10226_v2, %v4992_v3  ;;  %v4863_v29 = vmul.f32 %v10212_v42, %v3865_v57  ;;  %v4991_v59 = vmul.f32 %v10212_v42, %v4505_v26  ;;  %v3875_v44 = vpop.f32.mrb[75].mxu0  ;;  %v4515_v21 = vpop.f32.mrb[75].mxu1  ;;  %v11837_v38 = vld [vmem:[#allocation53_spill] sm:$0xff] }
 0x4d3   : > { %5571 = vst.msk [vmem:[%s11596_s4 + $0x20] sm:$0xff] %vm5566_vm2, %v5506_v40  ;;  %v5444_v53 = vmax.f32 %v5316_v8, %v5380_v30  ;;  %v5319_v22 = vmax.f32 %v10347_v1, %v5127_v35  ;;  %v4866_v17 = vmul.f32 %v6820_v36, %v10212_v42  ;;  %v4994_v31 = vmul.f32 %v7012_v7, %v10212_v42  ;;  %v11838_v35 = vld [vmem:[#allocation54_spill] sm:$0xff] }
 0x4d4   : > { %v5509_v18 = vmax.f32 %v5445_v13, 0.0  ;;  %v5383_v52 = vmax.f32 %v11836_v39, %v5255_v6  ;;  %v5126_v43 = vadd.f32 %v10226_v2, %v4863_v29  ;;  %v5254_v41 = vadd.f32 %v10226_v2, %v4991_v59 }
 0x4d5   : > { %v5508_v57 = vmax.f32 %v5444_v53, 0.0  ;;  %v5129_v26 = vadd.f32 %v10226_v2, %v4866_v17  ;;  %v5257_v19 = vadd.f32 %v10226_v2, %v4994_v31  ;;  %v4865_v1 = vmul.f32 %v10212_v42, %v3875_v44  ;;  %v6823_v8 = vpop.f32.mrb[76].mxu0  ;;  %v7015_v30 = vpop.f32.mrb[76].mxu1  ;;  %v11839_v44 = vld [vmem:[#allocation55_spill] sm:$0xff] }
 0x4d6   : > { %5574 = vst.msk [vmem:[%s11596_s4 + $0x38] sm:$0xff] %vm5566_vm2, %v5509_v18  ;;  %v5447_v62 = vmax.f32 %v5319_v22, %v5383_v52  ;;  %v5318_v60 = vmax.f32 %v10357_v15, %v5126_v43  ;;  %v5382_v3 = vmax.f32 %v11837_v38, %v5254_v41  ;;  %v4993_v40 = vmul.f32 %v10212_v42, %v4515_v21  ;;  %v3885_v15 = vpop.f32.mrb[77].mxu0  ;;  %v4525_v36 = vpop.f32.mrb[77].mxu1 }
 0x4d7   : > { %5573 = vst.msk [vmem:[%s11596_s4 + $0x30] sm:$0xff] %vm5566_vm2, %v5508_v57  ;;  %v5321_v13 = vmax.f32 %v11838_v35, %v5129_v26  ;;  %v5385_v6 = vmax.f32 %v10372_v5, %v5257_v19  ;;  %v5128_v29 = vadd.f32 %v10226_v2, %v4865_v1  ;;  %v4868_v59 = vmul.f32 %v6823_v8, %v10212_v42 }
 0x4d8   : > { %v5511_v7 = vmax.f32 %v5447_v62, 0.0  ;;  %v5446_v53 = vmax.f32 %v5318_v60, %v5382_v3  ;;  %v5256_v22 = vadd.f32 %v10226_v2, %v4993_v40  ;;  %v4996_v17 = vmul.f32 %v7015_v30, %v10212_v42  ;;  %v11840_v40 = vld [vmem:[#allocation56_spill] sm:$0xff] }
 0x4d9   : > { %v5449_v31 = vmax.f32 %v5321_v13, %v5385_v6  ;;  %v5320_v21 = vmax.f32 %v11839_v44, %v5128_v29  ;;  %v5131_v18 = vadd.f32 %v10226_v2, %v4868_v59  ;;  %v4867_v39 = vmul.f32 %v10212_v42, %v3885_v15  ;;  %v6826_v57 = vpop.f32.mrb[78].mxu0  ;;  %v7018_v26 = vpop.f32.mrb[78].mxu1  ;;  %v11843_v44 = vld [vmem:[#allocation59_spill] sm:$0xff] }
 0x4da   : > { %5576 = vst.msk [vmem:[%s11596_s4 + $0x48] sm:$0xff] %vm5566_vm2, %v5511_v7  ;;  %v5510_v5 = vmax.f32 %v5446_v53, 0.0  ;;  %v5384_v52 = vmax.f32 %v10386_v4, %v5256_v22  ;;  %v5259_v43 = vadd.f32 %v10226_v2, %v4996_v17  ;;  %v4995_v41 = vmul.f32 %v10212_v42, %v4525_v36  ;;  %v3895_v38 = vpop.f32.mrb[79].mxu0  ;;  %v4535_v3 = vpop.f32.mrb[79].mxu1  ;;  %v11842_v7 = vld [vmem:[#allocation58_spill] sm:$0xff] }
 0x4db   : > { %v5513_v19 = vmax.f32 %v5449_v31, 0.0  ;;  %v5323_v1 = vmax.f32 %v10389_v32, %v5131_v18  ;;  %v5130_v62 = vadd.f32 %v10226_v2, %v4867_v39  ;;  %v4870_v60 = vmul.f32 %v6826_v57, %v10212_v42  ;;  %v11841_v32 = vld [vmem:[#allocation57_spill] sm:$0xff] }
 0x4dc   : > { %5575 = vst.msk [vmem:[%s11596_s4 + $0x40] sm:$0xff] %vm5566_vm2, %v5510_v5  ;;  %v5448_v4 = vmax.f32 %v5320_v21, %v5384_v52  ;;  %v5387_v8 = vmax.f32 %v11840_v40, %v5259_v43  ;;  %v5258_v30 = vadd.f32 %v10226_v2, %v4995_v41  ;;  %v4998_v35 = vmul.f32 %v7018_v26, %v10212_v42  ;;  %v11844_v26 = vld [vmem:[#allocation60_spill] sm:$0xff] }
 0x4dd   : > { %5578 = vst.msk [vmem:[%s11596_s4 + $0x58] sm:$0xff] %vm5566_vm2, %v5513_v19  ;;  %v5322_v13 = vmax.f32 %v11841_v32, %v5130_v62  ;;  %v5133_v6 = vadd.f32 %v10226_v2, %v4870_v60  ;;  %v4869_v29 = vmul.f32 %v10212_v42, %v3895_v38  ;;  %v4997_v59 = vmul.f32 %v10212_v42, %v4535_v3  ;;  %v6829_v17 = vpop.f32.mrb[80].mxu0  ;;  %v7021_v31 = vpop.f32.mrb[80].mxu1  ;;  %v11845_v62 = vld [vmem:[#allocation61_spill] sm:$0xff]  ;;  %v11846_v38 = vld [vmem:[#allocation62_spill] sm:$0xff] }
 0x4de   : > { %v5512_v15 = vmax.f32 %v5448_v4, 0.0  ;;  %v5451_v36 = vmax.f32 %v5323_v1, %v5387_v8  ;;  %v5386_v53 = vmax.f32 %v11842_v7, %v5258_v30  ;;  %v5261_v22 = vadd.f32 %v10226_v2, %v4998_v35  ;;  %v3905_v52 = vpop.f32.mrb[81].mxu0  ;;  %v4545_v43 = vpop.f32.mrb[81].mxu1 }
 0x4df   : > { %v5325_v21 = vmax.f32 %v11843_v44, %v5133_v6  ;;  %v5132_v18 = vadd.f32 %v10226_v2, %v4869_v29  ;;  %v5260_v39 = vadd.f32 %v10226_v2, %v4997_v59  ;;  %v4872_v5 = vmul.f32 %v6829_v17, %v10212_v42  ;;  %v11847_v59 = vld [vmem:[#allocation63_spill] sm:$0xff] }
 0x4e0   : > { %5577 = vst.msk [vmem:[%s11596_s4 + $0x50] sm:$0xff] %vm5566_vm2, %v5512_v15  ;;  %v5515_v41 = vmax.f32 %v5451_v36, 0.0  ;;  %v5450_v57 = vmax.f32 %v5322_v13, %v5386_v53  ;;  %v5389_v19 = vmax.f32 %v11844_v26, %v5261_v22  ;;  %v5000_v1 = vmul.f32 %v7021_v31, %v10212_v42  ;;  %v11848_v31 = vld [vmem:[#allocation64_spill] sm:$0xff]  ;;  %v11850_v26 = vld [vmem:[#allocation66_spill] sm:$0xff] }
 0x4e1   : > { %v5324_v60 = vmax.f32 %v11845_v62, %v5132_v18  ;;  %v5388_v3 = vmax.f32 %v11846_v38, %v5260_v39  ;;  %v5135_v4 = vadd.f32 %v10226_v2, %v4872_v5  ;;  %v4871_v40 = vmul.f32 %v10212_v42, %v3905_v52  ;;  %v6832_v13 = vpop.f32.mrb[82].mxu0  ;;  %v7024_v6 = vpop.f32.mrb[82].mxu1  ;;  %v11100_v18 = vld [vmem:[#allocation4] ss:$0 sm:$0xff]  ;;  %v11849_v52 = vld [vmem:[#allocation65_spill] sm:$0xff] }
 0x4e2   : > { %5580 = vst.msk [vmem:[%s11596_s4 + $0x68] sm:$0xff] %vm5566_vm2, %v5515_v41  ;;  %v5514_v8 = vmax.f32 %v5450_v57, 0.0  ;;  %v5453_v30 = vmax.f32 %v5325_v21, %v5389_v19  ;;  %v5263_v35 = vadd.f32 %v10226_v2, %v5000_v1  ;;  %v4999_v32 = vmul.f32 %v10212_v42, %v4545_v43  ;;  %v3915_v53 = vpop.f32.mrb[83].mxu0  ;;  %v4555_v22 = vpop.f32.mrb[83].mxu1  ;;  %v11111_v1 = vld [vmem:[#allocation5] ss:$0 sm:$0xff] }
 0x4e3   : > { %v5452_v29 = vmax.f32 %v5324_v60, %v5388_v3  ;;  %v5327_v15 = vmax.f32 %v11847_v59, %v5135_v4  ;;  %v5134_v36 = vadd.f32 %v10226_v2, %v4871_v40  ;;  %v4874_v7 = vmul.f32 %v6832_v13, %v10212_v42 }
 0x4e4   : > { %5579 = vst.msk [vmem:[%s11596_s4 + $0x60] sm:$0xff] %vm5566_vm2, %v5514_v8  ;;  %v5517_v17 = vmax.f32 %v5453_v30, 0.0  ;;  %v5391_v44 = vmax.f32 %v11848_v31, %v5263_v35  ;;  %v5262_v21 = vadd.f32 %v10226_v2, %v4999_v32  ;;  %v5002_v39 = vmul.f32 %v11100_v18, %v7024_v6 }
 0x4e5   : > { %v5516_v5 = vmax.f32 %v5452_v29, 0.0  ;;  %v5326_v43 = vmax.f32 %v11849_v52, %v5134_v36  ;;  %v5137_v42 = vadd.f32 %v10226_v2, %v4874_v7  ;;  %v4873_v41 = vmul.f32 %v11100_v18, %v3915_v53  ;;  %v6835_v38 = vpop.f32.mrb[84].mxu0  ;;  %v7027_v3 = vpop.f32.mrb[84].mxu1  ;;  %v11851_v2 = vld [vmem:[#allocation67_spill] sm:$0xff]  ;;  %v11852_v29 = vld [vmem:[#allocation68_spill] sm:$0xff]  ;;  %v11853_v36 = vld [vmem:[#allocation69_spill] sm:$0xff] }
 0x4e6   : > { %5582 = vst.msk [vmem:[%s11596_s4 + $0x78] sm:$0xff] %vm5566_vm2, %v5517_v17  ;;  %v5455_v57 = vmax.f32 %v5327_v15, %v5391_v44  ;;  %v5390_v19 = vmax.f32 %v11850_v26, %v5262_v21  ;;  %v5265_v62 = vadd.f32 %v11111_v1, %v5002_v39  ;;  %v5001_v60 = vmul.f32 %v11100_v18, %v4555_v22  ;;  %v3925_v35 = vpop.f32.mrb[85].mxu0  ;;  %v4565_v32 = vpop.f32.mrb[85].mxu1  ;;  %v11854_v21 = vld [vmem:[#allocation70_spill] sm:$0xff] }
 0x4e7   : > { %5581 = vst.msk [vmem:[%s11596_s4 + $0x70] sm:$0xff] %vm5566_vm2, %v5516_v5  ;;  %v5329_v4 = vmax.f32 %v11851_v2, %v5137_v42  ;;  %v5136_v40 = vadd.f32 %v11111_v1, %v4873_v41  ;;  %v4876_v8 = vmul.f32 %v11100_v18, %v6835_v38  ;;  %v5004_v30 = vmul.f32 %v11100_v18, %v7027_v3  ;;  %v11855_v42 = vld [vmem:[#allocation71_spill] sm:$0xff] }
 0x4e8   : > { %v5519_v13 = vmax.f32 %v5455_v57, 0.0  ;;  %v5454_v6 = vmax.f32 %v5326_v43, %v5390_v19  ;;  %v5393_v59 = vmax.f32 %v11852_v29, %v5265_v62  ;;  %v5264_v15 = vadd.f32 %v11111_v1, %v5001_v60  ;;  %v11856_v57 = vld [vmem:[#allocation72_spill] sm:$0xff]  ;;  %v11858_v29 = vld [vmem:[#allocation74_spill] sm:$0xff] }
 0x4e9   : > { %v5328_v7 = vmax.f32 %v11853_v36, %v5136_v40  ;;  %v5139_v53 = vadd.f32 %v11111_v1, %v4876_v8  ;;  %v5267_v22 = vadd.f32 %v11111_v1, %v5004_v30  ;;  %v4875_v17 = vmul.f32 %v11100_v18, %v3925_v35  ;;  %v6838_v52 = vpop.f32.mrb[86].mxu0  ;;  %v7030_v43 = vpop.f32.mrb[86].mxu1  ;;  %v11857_v30 = vld [vmem:[#allocation73_spill] sm:$0xff] }
 0x4ea   : > { %5584 = vst.msk [vmem:[%s11596_s4 + $0x88] sm:$0xff] %vm5566_vm2, %v5519_v13  ;;  %v5518_v31 = vmax.f32 %v5454_v6, 0.0  ;;  %v5457_v44 = vmax.f32 %v5329_v4, %v5393_v59  ;;  %v5392_v39 = vmax.f32 %v11854_v21, %v5264_v15  ;;  %v5003_v5 = vmul.f32 %v11100_v18, %v4565_v32  ;;  %v3935_v60 = vpop.f32.mrb[87].mxu0  ;;  %v4575_v38 = vpop.f32.mrb[87].mxu1 }
 0x4eb   : > { %v5331_v41 = vmax.f32 %v11855_v42, %v5139_v53  ;;  %v5395_v26 = vmax.f32 %v11856_v57, %v5267_v22  ;;  %v5138_v19 = vadd.f32 %v11111_v1, %v4875_v17  ;;  %v4878_v62 = vmul.f32 %v11100_v18, %v6838_v52  ;;  %v11859_v17 = vld [vmem:[#allocation75_spill] sm:$0xff] }
 0x4ec   : > { %5583 = vst.msk [vmem:[%s11596_s4 + $0x80] sm:$0xff] %vm5566_vm2, %v5518_v31  ;;  %v5521_v3 = vmax.f32 %v5457_v44, 0.0  ;;  %v5456_v2 = vmax.f32 %v5328_v7, %v5392_v39  ;;  %v5266_v4 = vadd.f32 %v11111_v1, %v5003_v5  ;;  %v5006_v40 = vmul.f32 %v11100_v18, %v7030_v43  ;;  %v11860_v43 = vld [vmem:[#allocation76_spill] sm:$0xff] }
 0x4ed   : > { %v5459_v8 = vmax.f32 %v5331_v41, %v5395_v26  ;;  %v5330_v35 = vmax.f32 %v11857_v30, %v5138_v19  ;;  %v5141_v32 = vadd.f32 %v11111_v1, %v4878_v62  ;;  %v4877_v13 = vmul.f32 %v11100_v18, %v3935_v60  ;;  %v6841_v7 = vpop.f32.mrb[88].mxu0  ;;  %v7033_v53 = vpop.f32.mrb[88].mxu1  ;;  %v11861_v26 = vld [vmem:[#allocation27_spill] sm:$0xff] }
 0x4ee   : > { %5586 = vst.msk [vmem:[%s11596_s4 + $0x98] sm:$0xff] %vm5566_vm2, %v5521_v3  ;;  %v5520_v6 = vmax.f32 %v5456_v2, 0.0  ;;  %v5394_v59 = vmax.f32 %v11858_v29, %v5266_v4  ;;  %v5269_v15 = vadd.f32 %v11111_v1, %v5006_v40  ;;  %v5005_v36 = vmul.f32 %v11100_v18, %v4575_v38  ;;  %v3945_v39 = vpop.f32.mrb[89].mxu0  ;;  %v4585_v5 = vpop.f32.mrb[89].mxu1  ;;  %v11862_v4 = vld [vmem:[#allocation28_spill] sm:$0xff] }
 0x4ef   : > { %v5523_v22 = vmax.f32 %v5459_v8, 0.0  ;;  %v5333_v31 = vmax.f32 %v11859_v17, %v5141_v32  ;;  %v5140_v44 = vadd.f32 %v11111_v1, %v4877_v13  ;;  %v4880_v21 = vmul.f32 %v11100_v18, %v6841_v7  ;;  %v11863_v32 = vld [vmem:[#allocation29_spill] sm:$0xff] }
 0x4f0   : > { %5585 = vst.msk [vmem:[%s11596_s4 + $0x90] sm:$0xff] %vm5566_vm2, %v5520_v6  ;;  %v5458_v52 = vmax.f32 %v5330_v35, %v5394_v59  ;;  %v5397_v42 = vmax.f32 %v11860_v43, %v5269_v15  ;;  %v5268_v41 = vadd.f32 %v11111_v1, %v5005_v36  ;;  %v5008_v57 = vmul.f32 %v11100_v18, %v7033_v53 }
 0x4f1   : > { %5588 = vst.msk [vmem:[%s11596_s4 + $0xa8] sm:$0xff] %vm5566_vm2, %v5523_v22  ;;  %v5332_v19 = vmax.f32 %v11861_v26, %v5140_v44  ;;  %v5143_v62 = vadd.f32 %v11111_v1, %v4880_v21  ;;  %v4879_v60 = vmul.f32 %v11100_v18, %v3945_v39  ;;  %v5007_v38 = vmul.f32 %v11100_v18, %v4585_v5  ;;  %v6844_v30 = vpop.f32.mrb[90].mxu0  ;;  %v7036_v35 = vpop.f32.mrb[90].mxu1  ;;  %v11864_v22 = vld [vmem:[#allocation30_spill] sm:$0xff]  ;;  %v11865_v44 = vld [vmem:[#allocation31_spill] sm:$0xff]  ;;  %v11866_v39 = vld [vmem:[#allocation32_spill] sm:$0xff] }
 0x4f2   : > { %v5522_v3 = vmax.f32 %v5458_v52, 0.0  ;;  %v5461_v2 = vmax.f32 %v5333_v31, %v5397_v42  ;;  %v5396_v40 = vmax.f32 %v11862_v4, %v5268_v41  ;;  %v5271_v8 = vadd.f32 %v11111_v1, %v5008_v57  ;;  %v3955_v15 = vpop.f32.mrb[91].mxu0  ;;  %v4595_v36 = vpop.f32.mrb[91].mxu1 }
 0x4f3   : > { %v5335_v13 = vmax.f32 %v11863_v32, %v5143_v62  ;;  %v5142_v6 = vadd.f32 %v11111_v1, %v4879_v60  ;;  %v5270_v29 = vadd.f32 %v11111_v1, %v5007_v38  ;;  %v4882_v59 = vmul.f32 %v11100_v18, %v6844_v30  ;;  %v11867_v38 = vld [vmem:[#allocation77_spill] sm:$0xff] }
 0x4f4   : > { %5587 = vst.msk [vmem:[%s11596_s4 + $0xa0] sm:$0xff] %vm5566_vm2, %v5522_v3  ;;  %v5525_v7 = vmax.f32 %v5461_v2, 0.0  ;;  %v5460_v53 = vmax.f32 %v5332_v19, %v5396_v40  ;;  %v5399_v17 = vmax.f32 %v11864_v22, %v5271_v8  ;;  %v5010_v31 = vmul.f32 %v11100_v18, %v7036_v35  ;;  %v11868_v35 = vld [vmem:[#allocation33_spill] sm:$0xff]  ;;  %v11870_v22 = vld [vmem:[#allocation34_spill] sm:$0xff] }
 0x4f5   : > { %v5334_v21 = vmax.f32 %v11865_v44, %v5142_v6  ;;  %v5398_v5 = vmax.f32 %v11866_v39, %v5270_v29  ;;  %v5145_v52 = vadd.f32 %v11111_v1, %v4882_v59  ;;  %v4881_v43 = vmul.f32 %v11100_v18, %v3955_v15  ;;  %v6847_v19 = vpop.f32.mrb[92].mxu0  ;;  %v7039_v62 = vpop.f32.mrb[92].mxu1  ;;  %v11869_v59 = vld [vmem:[#allocation78_spill] sm:$0xff] }
 0x4f6   : > { %5590 = vst.msk [vmem:[%s11596_s4 + $0xb8] sm:$0xff] %vm5566_vm2, %v5525_v7  ;;  %v5524_v42 = vmax.f32 %v5460_v53, 0.0  ;;  %v5463_v41 = vmax.f32 %v5335_v13, %v5399_v17  ;;  %v5273_v57 = vadd.f32 %v11111_v1, %v5010_v31  ;;  %v5009_v26 = vmul.f32 %v11100_v18, %v4595_v36  ;;  %v3965_v40 = vpop.f32.mrb[93].mxu0  ;;  %v4605_v8 = vpop.f32.mrb[93].mxu1 }
 0x4f7   : > { %v5462_v60 = vmax.f32 %v5334_v21, %v5398_v5  ;;  %v5337_v3 = vmax.f32 %v11867_v38, %v5145_v52  ;;  %v5144_v2 = vadd.f32 %v11111_v1, %v4881_v43  ;;  %v4884_v4 = vmul.f32 %v11100_v18, %v6847_v19  ;;  %v11871_v5 = vld [vmem:[#allocation35_spill] sm:$0xff] }
 0x4f8   : > { %5589 = vst.msk [vmem:[%s11596_s4 + $0xb0] sm:$0xff] %vm5566_vm2, %v5524_v42  ;;  %v5527_v30 = vmax.f32 %v5463_v41, 0.0  ;;  %v5401_v32 = vmax.f32 %v11868_v35, %v5273_v57  ;;  %v5272_v13 = vadd.f32 %v11111_v1, %v5009_v26  ;;  %v5012_v6 = vmul.f32 %v11100_v18, %v7039_v62 }
 0x4f9   : > { %v5526_v29 = vmax.f32 %v5462_v60, 0.0  ;;  %v5336_v15 = vmax.f32 %v11869_v59, %v5144_v2  ;;  %v5147_v36 = vadd.f32 %v11111_v1, %v4884_v4  ;;  %v4883_v7 = vmul.f32 %v11100_v18, %v3965_v40  ;;  %v6850_v21 = vpop.f32.mrb[94].mxu0  ;;  %v7042_v39 = vpop.f32.mrb[94].mxu1  ;;  %v11872_v60 = vld [vmem:[#allocation36_spill] sm:$0xff]  ;;  %v11873_v2 = vld [vmem:[#allocation37_spill] sm:$0xff] }
 0x4fa   : > { %5592 = vst.msk [vmem:[%s11596_s4 + $0xc8] sm:$0xff] %vm5566_vm2, %v5527_v30  ;;  %v5465_v53 = vmax.f32 %v5337_v3, %v5401_v32  ;;  %v5400_v17 = vmax.f32 %v11870_v22, %v5272_v13  ;;  %v5275_v31 = vadd.f32 %v11111_v1, %v5012_v6  ;;  %v5011_v44 = vmul.f32 %v11100_v18, %v4605_v8  ;;  %v3975_v57 = vpop.f32.mrb[95].mxu0  ;;  %v4615_v26 = vpop.f32.mrb[95].mxu1  ;;  %v11874_v13 = vld [vmem:[#allocation38_spill] sm:$0xff] }
 0x4fb   : > { %5591 = vst.msk [vmem:[%s11596_s4 + $0xc0] sm:$0xff] %vm5566_vm2, %v5526_v29  ;;  %v5339_v52 = vmax.f32 %v11871_v5, %v5147_v36  ;;  %v5146_v43 = vadd.f32 %v11111_v1, %v4883_v7  ;;  %v4886_v42 = vmul.f32 %v11100_v18, %v6850_v21  ;;  %v5014_v41 = vmul.f32 %v11100_v18, %v7042_v39  ;;  %v11875_v36 = vld [vmem:[#allocation39_spill] sm:$0xff] }
 0x4fc   : > { %v5529_v19 = vmax.f32 %v5465_v53, 0.0  ;;  %v5464_v62 = vmax.f32 %v5336_v15, %v5400_v17  ;;  %v5403_v38 = vmax.f32 %v11872_v60, %v5275_v31  ;;  %v5274_v3 = vadd.f32 %v11111_v1, %v5011_v44  ;;  %v11876_v53 = vld [vmem:[#allocation40_spill] sm:$0xff] }
 0x4fd   : > { %v5338_v4 = vmax.f32 %v11873_v2, %v5146_v43  ;;  %v5149_v40 = vadd.f32 %v11111_v1, %v4886_v42  ;;  %v5277_v8 = vadd.f32 %v11111_v1, %v5014_v41  ;;  %v4885_v30 = vmul.f32 %v11100_v18, %v3975_v57  ;;  %v6853_v59 = vpop.f32.mrb[96].mxu0  ;;  %v7045_v15 = vpop.f32.mrb[96].mxu1 }
 0x4fe   : > { %5594 = vst.msk [vmem:[%s11596_s4 + $0xd8] sm:$0xff] %vm5566_vm2, %v5529_v19  ;;  %v5528_v35 = vmax.f32 %v5464_v62, 0.0  ;;  %v5467_v32 = vmax.f32 %v5339_v52, %v5403_v38  ;;  %v5402_v6 = vmax.f32 %v11874_v13, %v5274_v3  ;;  %v5013_v29 = vmul.f32 %v11100_v18, %v4615_v26  ;;  %v3985_v44 = vpop.f32.mrb[97].mxu0  ;;  %v4625_v21 = vpop.f32.mrb[97].mxu1 }
 0x4ff   : > { %v5341_v7 = vmax.f32 %v11875_v36, %v5149_v40  ;;  %v5405_v22 = vmax.f32 %v11876_v53, %v5277_v8  ;;  %v5148_v17 = vadd.f32 %v11111_v1, %v4885_v30  ;;  %v4888_v31 = vmul.f32 %v11100_v18, %v6853_v59 }
 0x500   : > { %5593 = vst.msk [vmem:[%s11596_s4 + $0xd0] sm:$0xff] %vm5566_vm2, %v5528_v35  ;;  %v5531_v39 = vmax.f32 %v5467_v32, 0.0  ;;  %v5466_v5 = vmax.f32 %v5338_v4, %v5402_v6  ;;  %v5276_v52 = vadd.f32 %v11111_v1, %v5013_v29  ;;  %v5016_v43 = vmul.f32 %v11100_v18, %v7045_v15  ;;  %v11877_v32 = vld [vmem:[#allocation41_spill] sm:$0xff] }
 0x501   : > { %v5469_v42 = vmax.f32 %v5341_v7, %v5405_v22  ;;  %v5340_v41 = vmax.f32 %v10625_v56, %v5148_v17  ;;  %v5151_v57 = vadd.f32 %v11111_v1, %v4888_v31  ;;  %v4887_v26 = vmul.f32 %v11100_v18, %v3985_v44  ;;  %v6856_v3 = vpop.f32.mrb[98].mxu0  ;;  %v7048_v2 = vpop.f32.mrb[98].mxu1  ;;  %v11878_v22 = vld [vmem:[#allocation42_spill] sm:$0xff] }
 0x502   : > { %5596 = vst.msk [vmem:[%s11596_s4 + $0xe8] sm:$0xff] %vm5566_vm2, %v5531_v39  ;;  %v5530_v19 = vmax.f32 %v5466_v5, 0.0  ;;  %v5404_v62 = vmax.f32 %v10628_v10, %v5276_v52  ;;  %v5279_v60 = vadd.f32 %v11111_v1, %v5016_v43  ;;  %v5015_v38 = vmul.f32 %v11100_v18, %v4625_v21  ;;  %v3995_v30 = vpop.f32.mrb[99].mxu0  ;;  %v4635_v35 = vpop.f32.mrb[99].mxu1  ;;  %v11879_v39 = vld [vmem:[#allocation43_spill] sm:$0xff] }
 0x503   : > { %v5533_v4 = vmax.f32 %v5469_v42, 0.0  ;;  %v5343_v56 = vmax.f32 %v10635_v12, %v5151_v57  ;;  %v5150_v40 = vadd.f32 %v11111_v1, %v4887_v26  ;;  %v4890_v8 = vmul.f32 %v11100_v18, %v6856_v3 }
 0x504   : > { %5595 = vst.msk [vmem:[%s11596_s4 + $0xe0] sm:$0xff] %vm5566_vm2, %v5530_v19  ;;  %v5468_v10 = vmax.f32 %v5340_v41, %v5404_v62  ;;  %v5407_v13 = vmax.f32 %v11877_v32, %v5279_v60  ;;  %v5278_v6 = vadd.f32 %v11111_v1, %v5015_v38  ;;  %v5018_v29 = vmul.f32 %v11100_v18, %v7048_v2  ;;  %v11880_v60 = vld [vmem:[#allocation79_spill] sm:$0xff] }
 0x505   : > { %5598 = vst.msk [vmem:[%s11596_s4 + $0xf8] sm:$0xff] %vm5566_vm2, %v5533_v4  ;;  %v5342_v12 = vmax.f32 %v10645_v20, %v5150_v40  ;;  %v5153_v59 = vadd.f32 %v11111_v1, %v4890_v8  ;;  %v4889_v15 = vmul.f32 %v11100_v18, %v3995_v30  ;;  %v5017_v36 = vmul.f32 %v11100_v18, %v4635_v35  ;;  %v6859_v44 = vpop.f32.mrb[100].mxu0  ;;  %v7051_v21 = vpop.f32.mrb[100].mxu1 }
 0x506   : > { %v5532_v7 = vmax.f32 %v5468_v10, 0.0  ;;  %v5471_v53 = vmax.f32 %v5343_v56, %v5407_v13  ;;  %v5406_v17 = vmax.f32 %v11878_v22, %v5278_v6  ;;  %v5281_v31 = vadd.f32 %v11111_v1, %v5018_v29  ;;  %v4005_v42 = vpop.f32.mrb[101].mxu0  ;;  %v4645_v41 = vpop.f32.mrb[101].mxu1 }
 0x507   : > { %v5345_v5 = vmax.f32 %v11879_v39, %v5153_v59  ;;  %v5152_v52 = vadd.f32 %v11111_v1, %v4889_v15  ;;  %v5280_v20 = vadd.f32 %v11111_v1, %v5017_v36  ;;  %v4892_v43 = vmul.f32 %v11100_v18, %v6859_v44  ;;  %v11881_v59 = vld [vmem:[#allocation80_spill] sm:$0xff] }
 0x508   : > { %5597 = vst.msk [vmem:[%s11596_s4 + $0xf0] sm:$0xff] %vm5566_vm2, %v5532_v7  ;;  %v5535_v57 = vmax.f32 %v5471_v53, 0.0  ;;  %v5470_v26 = vmax.f32 %v5342_v12, %v5406_v17  ;;  %v5409_v19 = vmax.f32 %v10660_v45, %v5281_v31  ;;  %v5020_v62 = vmul.f32 %v11100_v18, %v7051_v21  ;;  %v11883_v21 = vld [vmem:[#allocation82_spill] sm:$0xff] }
 0x509   : > { %v5344_v38 = vmax.f32 %v11880_v60, %v5152_v52  ;;  %v5408_v3 = vmax.f32 %v10674_v23, %v5280_v20  ;;  %v5155_v2 = vadd.f32 %v11111_v1, %v4892_v43  ;;  %v4891_v4 = vmul.f32 %v11100_v18, %v4005_v42  ;;  %v6862_v30 = vpop.f32.mrb[102].mxu0  ;;  %v7054_v35 = vpop.f32.mrb[102].mxu1 }
 0x50a   : > { %5600 = vst.msk [vmem:[%s11596_s4 + $0x108] sm:$0xff] %vm5566_vm2, %v5535_v57  ;;  %v5534_v56 = vmax.f32 %v5470_v26, 0.0  ;;  %v5473_v40 = vmax.f32 %v5345_v5, %v5409_v19  ;;  %v5283_v8 = vadd.f32 %v11111_v1, %v5020_v62  ;;  %v5019_v45 = vmul.f32 %v11100_v18, %v4645_v41  ;;  %v4015_v6 = vpop.f32.mrb[103].mxu0  ;;  %v4655_v29 = vpop.f32.mrb[103].mxu1 }
 0x50b   : > { %v5472_v10 = vmax.f32 %v5344_v38, %v5408_v3  ;;  %v5347_v23 = vmax.f32 %v10677_v51, %v5155_v2  ;;  %v5154_v32 = vadd.f32 %v11111_v1, %v4891_v4  ;;  %v4894_v13 = vmul.f32 %v11100_v18, %v6862_v30  ;;  %v11882_v51 = vld [vmem:[#allocation81_spill] sm:$0xff]  ;;  %v11884_v3 = vld [vmem:[#allocation83_spill] sm:$0xff] }
 0x50c   : > { %5599 = vst.msk [vmem:[%s11596_s4 + $0x100] sm:$0xff] %vm5566_vm2, %v5534_v56  ;;  %v5537_v12 = vmax.f32 %v5473_v40, 0.0  ;;  %v5411_v15 = vmax.f32 %v11881_v59, %v5283_v8  ;;  %v5282_v36 = vadd.f32 %v11111_v1, %v5019_v45  ;;  %v5022_v7 = vmul.f32 %v11100_v18, %v7054_v35 }
 0x50d   : > { %v5536_v53 = vmax.f32 %v5472_v10, 0.0  ;;  %v5346_v22 = vmax.f32 %v11882_v51, %v5154_v32  ;;  %v5157_v17 = vadd.f32 %v11111_v1, %v4894_v13  ;;  %v4893_v31 = vmul.f32 %v11100_v18, %v4015_v6  ;;  %v6865_v20 = vpop.f32.mrb[104].mxu0  ;;  %v7057_v43 = vpop.f32.mrb[104].mxu1  ;;  %v11886_v6 = vld [vmem:[#allocation85_spill] sm:$0xff] }
 0x50e   : > { %5602 = vst.msk [vmem:[%s11596_s4 + $0x118] sm:$0xff] %vm5566_vm2, %v5537_v12  ;;  %v5475_v44 = vmax.f32 %v5347_v23, %v5411_v15  ;;  %v5410_v39 = vmax.f32 %v11883_v21, %v5282_v36  ;;  %v5285_v5 = vadd.f32 %v11111_v1, %v5022_v7  ;;  %v5021_v52 = vmul.f32 %v11100_v18, %v4655_v29  ;;  %v4025_v19 = vpop.f32.mrb[105].mxu0  ;;  %v4665_v62 = vpop.f32.mrb[105].mxu1 }
 0x50f   : > { %5601 = vst.msk [vmem:[%s11596_s4 + $0x110] sm:$0xff] %vm5566_vm2, %v5536_v53  ;;  %v5349_v42 = vmax.f32 %v10707_v11, %v5157_v17  ;;  %v5156_v41 = vadd.f32 %v11111_v1, %v4893_v31  ;;  %v4896_v57 = vmul.f32 %v11100_v18, %v6865_v20  ;;  %v5024_v26 = vmul.f32 %v11100_v18, %v7057_v43 }
 0x510   : > { %v5539_v60 = vmax.f32 %v5475_v44, 0.0  ;;  %v5474_v38 = vmax.f32 %v5346_v22, %v5410_v39  ;;  %v5413_v2 = vmax.f32 %v11884_v3, %v5285_v5  ;;  %v5284_v4 = vadd.f32 %v11111_v1, %v5021_v52 }
 0x511   : > { %v5348_v56 = vmax.f32 %v10721_v48, %v5156_v41  ;;  %v5159_v40 = vadd.f32 %v11111_v1, %v4896_v57  ;;  %v5287_v11 = vadd.f32 %v11111_v1, %v5024_v26  ;;  %v4895_v8 = vmul.f32 %v11100_v18, %v4025_v19  ;;  %v6868_v23 = vpop.f32.mrb[106].mxu0  ;;  %v7060_v32 = vpop.f32.mrb[106].mxu1  ;;  %v11885_v48 = vld [vmem:[#allocation84_spill] sm:$0xff] }
 0x512   : > { %5604 = vst.msk [vmem:[%s11596_s4 + $0x128] sm:$0xff] %vm5566_vm2, %v5539_v60  ;;  %v5538_v45 = vmax.f32 %v5474_v38, 0.0  ;;  %v5477_v30 = vmax.f32 %v5349_v42, %v5413_v2  ;;  %v5412_v35 = vmax.f32 %v10724_v28, %v5284_v4  ;;  %v5023_v10 = vmul.f32 %v11100_v18, %v4665_v62  ;;  %v4035_v15 = vpop.f32.mrb[107].mxu0  ;;  %v4675_v36 = vpop.f32.mrb[107].mxu1  ;;  %v11888_v2 = vld [vmem:[#allocation87_spill] sm:$0xff] }
 0x513   : > { %v5351_v13 = vmax.f32 %v11885_v48, %v5159_v40  ;;  %v5415_v29 = vmax.f32 %v11886_v6, %v5287_v11  ;;  %v5158_v12 = vadd.f32 %v11111_v1, %v4895_v8  ;;  %v4898_v59 = vmul.f32 %v11100_v18, %v6868_v23 }
 0x514   : > { %5603 = vst.msk [vmem:[%s11596_s4 + $0x120] sm:$0xff] %vm5566_vm2, %v5538_v45  ;;  %v5541_v28 = vmax.f32 %v5477_v30, 0.0  ;;  %v5476_v7 = vmax.f32 %v5348_v56, %v5412_v35  ;;  %v5286_v53 = vadd.f32 %v11111_v1, %v5023_v10  ;;  %v5026_v51 = vmul.f32 %v11100_v18, %v7060_v32 }
 0x515   : > { %v5479_v22 = vmax.f32 %v5351_v13, %v5415_v29  ;;  %v5350_v17 = vmax.f32 %v10741_v55, %v5158_v12  ;;  %v5161_v31 = vadd.f32 %v11111_v1, %v4898_v59  ;;  %v4897_v44 = vmul.f32 %v11100_v18, %v4035_v15  ;;  %v6871_v20 = vpop.f32.mrb[108].mxu0  ;;  %v7063_v43 = vpop.f32.mrb[108].mxu1  ;;  %v11887_v55 = vld [vmem:[#allocation86_spill] sm:$0xff]  ;;  %v11889_v59 = vld [vmem:[#allocation88_spill] sm:$0xff] }
 0x516   : > { %5606 = vst.msk [vmem:[%s11596_s4 + $0x138] sm:$0xff] %vm5566_vm2, %v5541_v28  ;;  %v5540_v21 = vmax.f32 %v5476_v7, 0.0  ;;  %v5414_v39 = vmax.f32 %v10744_v34, %v5286_v53  ;;  %v5289_v5 = vadd.f32 %v11111_v1, %v5026_v51  ;;  %v5025_v52 = vmul.f32 %v11100_v18, %v4675_v36  ;;  %v4045_v19 = vpop.f32.mrb[109].mxu0  ;;  %v4685_v62 = vpop.f32.mrb[109].mxu1  ;;  %v11891_v7 = vld [vmem:[#allocation90_spill] sm:$0xff] }
 0x517   : > { %v5543_v42 = vmax.f32 %v5479_v22, 0.0  ;;  %v5353_v41 = vmax.f32 %v11887_v55, %v5161_v31  ;;  %v5160_v57 = vadd.f32 %v11111_v1, %v4897_v44  ;;  %v4900_v26 = vmul.f32 %v11100_v18, %v6871_v20 }
 0x518   : > { %5605 = vst.msk [vmem:[%s11596_s4 + $0x130] sm:$0xff] %vm5566_vm2, %v5540_v21  ;;  %v5478_v34 = vmax.f32 %v5350_v17, %v5414_v39  ;;  %v5417_v60 = vmax.f32 %v10752_v61, %v5289_v5  ;;  %v5288_v38 = vadd.f32 %v11111_v1, %v5025_v52  ;;  %v5028_v3 = vmul.f32 %v11100_v18, %v7063_v43 }
 0x519   : > { %5608 = vst.msk [vmem:[%s11596_s4 + $0x148] sm:$0xff] %vm5566_vm2, %v5543_v42  ;;  %v5352_v4 = vmax.f32 %v11888_v2, %v5160_v57  ;;  %v5163_v56 = vadd.f32 %v11111_v1, %v4900_v26  ;;  %v4899_v40 = vmul.f32 %v11100_v18, %v4045_v19  ;;  %v5027_v11 = vmul.f32 %v11100_v18, %v4685_v62  ;;  %v6874_v35 = vpop.f32.mrb[110].mxu0  ;;  %v7066_v10 = vpop.f32.mrb[110].mxu1  ;;  %v11892_v26 = vld [vmem:[#allocation91_spill] sm:$0xff] }
 0x51a   : > { %v5542_v8 = vmax.f32 %v5478_v34, 0.0  ;;  %v5481_v45 = vmax.f32 %v5353_v41, %v5417_v60  ;;  %v5416_v61 = vmax.f32 %v10762_v47, %v5288_v38  ;;  %v5291_v30 = vadd.f32 %v11111_v1, %v5028_v3  ;;  %v4055_v6 = vpop.f32.mrb[111].mxu0  ;;  %v4695_v29 = vpop.f32.mrb[111].mxu1 }
 0x51b   : > { %v5355_v23 = vmax.f32 %v10765_v33, %v5163_v56  ;;  %v5162_v32 = vadd.f32 %v11111_v1, %v4899_v40  ;;  %v5290_v48 = vadd.f32 %v11111_v1, %v5027_v11  ;;  %v4902_v13 = vmul.f32 %v11100_v18, %v6874_v35  ;;  %v11890_v33 = vld [vmem:[#allocation89_spill] sm:$0xff] }
 0x51c   : > { %5607 = vst.msk [vmem:[%s11596_s4 + $0x140] sm:$0xff] %vm5566_vm2, %v5542_v8  ;;  %v5545_v47 = vmax.f32 %v5481_v45, 0.0  ;;  %v5480_v12 = vmax.f32 %v5352_v4, %v5416_v61  ;;  %v5419_v15 = vmax.f32 %v11889_v59, %v5291_v30  ;;  %v5030_v36 = vmul.f32 %v11100_v18, %v7066_v10 }
 0x51d   : > { %v5354_v28 = vmax.f32 %v11890_v33, %v5162_v32  ;;  %v5418_v53 = vmax.f32 %v11891_v7, %v5290_v48  ;;  %v5165_v51 = vadd.f32 %v11111_v1, %v4902_v13  ;;  %v4901_v22 = vmul.f32 %v11100_v18, %v4055_v6  ;;  %v6877_v39 = vpop.f32.mrb[112].mxu0  ;;  %v7069_v5 = vpop.f32.mrb[112].mxu1  ;;  %v11894_v48 = vld [vmem:[#allocation93_spill] sm:$0xff] }
 0x51e   : > { %5610 = vst.msk [vmem:[%s11596_s4 + $0x158] sm:$0xff] %vm5566_vm2, %v5545_v47  ;;  %v5544_v17 = vmax.f32 %v5480_v12, 0.0  ;;  %v5483_v31 = vmax.f32 %v5355_v23, %v5419_v15  ;;  %v5293_v44 = vadd.f32 %v11111_v1, %v5030_v36  ;;  %v5029_v21 = vmul.f32 %v11100_v18, %v4695_v29  ;;  %v4065_v55 = vpop.f32.mrb[113].mxu0  ;;  %v4705_v41 = vpop.f32.mrb[113].mxu1 }
 0x51f   : > { %v5482_v52 = vmax.f32 %v5354_v28, %v5418_v53  ;;  %v5357_v20 = vmax.f32 %v10791_v49, %v5165_v51  ;;  %v5164_v43 = vadd.f32 %v11111_v1, %v4901_v22  ;;  %v4904_v42 = vmul.f32 %v11100_v18, %v6877_v39  ;;  %v11896_v22 = vld [vmem:[#allocation95_spill] sm:$0xff] }
 0x520   : > { %5609 = vst.msk [vmem:[%s11596_s4 + $0x150] sm:$0xff] %vm5566_vm2, %v5544_v17  ;;  %v5547_v57 = vmax.f32 %v5483_v31, 0.0  ;;  %v5421_v19 = vmax.f32 %v11892_v26, %v5293_v44  ;;  %v5292_v62 = vadd.f32 %v11111_v1, %v5029_v21  ;;  %v5032_v34 = vmul.f32 %v11100_v18, %v7069_v5 }
 0x521   : > { %v5546_v60 = vmax.f32 %v5482_v52, 0.0  ;;  %v5356_v49 = vmax.f32 %v10801_v9, %v5164_v43  ;;  %v5167_v38 = vadd.f32 %v11111_v1, %v4904_v42  ;;  %v4903_v3 = vmul.f32 %v11100_v18, %v4065_v55  ;;  %v6880_v11 = vpop.f32.mrb[114].mxu0  ;;  %v7072_v8 = vpop.f32.mrb[114].mxu1  ;;  %v11893_v9 = vld [vmem:[#allocation92_spill] sm:$0xff] }
 0x522   : > { %5612 = vst.msk [vmem:[%s11596_s4 + $0x168] sm:$0xff] %vm5566_vm2, %v5547_v57  ;;  %v5485_v2 = vmax.f32 %v5357_v20, %v5421_v19  ;;  %v5420_v4 = vmax.f32 %v10804_v24, %v5292_v62  ;;  %v5295_v56 = vadd.f32 %v11111_v1, %v5032_v34  ;;  %v5031_v40 = vmul.f32 %v11100_v18, %v4705_v41  ;;  %v4075_v24 = vpop.f32.mrb[115].mxu0  ;;  %v4715_v10 = vpop.f32.mrb[115].mxu1  ;;  %v11897_v42 = vld [vmem:[#allocation96_spill] sm:$0xff]  ;;  %v11898_v19 = vld [vmem:[#allocation97_spill] sm:$0xff] }
 0x523   : > { %5611 = vst.msk [vmem:[%s11596_s4 + $0x160] sm:$0xff] %vm5566_vm2, %v5546_v60  ;;  %v5359_v45 = vmax.f32 %v11893_v9, %v5167_v38  ;;  %v5166_v61 = vadd.f32 %v11111_v1, %v4903_v3  ;;  %v4906_v30 = vmul.f32 %v11100_v18, %v6880_v11  ;;  %v5034_v35 = vmul.f32 %v11100_v18, %v7072_v8 }
 0x524   : > { %v5549_v23 = vmax.f32 %v5485_v2, 0.0  ;;  %v5484_v32 = vmax.f32 %v5356_v49, %v5420_v4  ;;  %v5423_v13 = vmax.f32 %v11894_v48, %v5295_v56  ;;  %v5294_v6 = vadd.f32 %v11111_v1, %v5031_v40  ;;  %v11899_v2 = vld [vmem:[#allocation98_spill] sm:$0xff] }
 0x525   : > { %v5358_v29 = vmax.f32 %v10821_v46, %v5166_v61  ;;  %v5169_v47 = vadd.f32 %v11111_v1, %v4906_v30  ;;  %v5297_v12 = vadd.f32 %v11111_v1, %v5034_v35  ;;  %v4905_v59 = vmul.f32 %v11100_v18, %v4075_v24  ;;  %v6883_v7 = vpop.f32.mrb[116].mxu0  ;;  %v7075_v53 = vpop.f32.mrb[116].mxu1  ;;  %v11895_v46 = vld [vmem:[#allocation94_spill] sm:$0xff] }
 0x526   : > { %5614 = vst.msk [vmem:[%s11596_s4 + $0x178] sm:$0xff] %vm5566_vm2, %v5549_v23  ;;  %v5548_v15 = vmax.f32 %v5484_v32, 0.0  ;;  %v5487_v36 = vmax.f32 %v5359_v45, %v5423_v13  ;;  %v5422_v33 = vmax.f32 %v10824_v37, %v5294_v6  ;;  %v5033_v28 = vmul.f32 %v11100_v18, %v4715_v10  ;;  %v4085_v21 = vpop.f32.mrb[117].mxu0  ;;  %v4725_v39 = vpop.f32.mrb[117].mxu1 }
 0x527   : > { %v5361_v51 = vmax.f32 %v11895_v46, %v5169_v47  ;;  %v5425_v17 = vmax.f32 %v11896_v22, %v5297_v12  ;;  %v5168_v31 = vadd.f32 %v11111_v1, %v4905_v59  ;;  %v4908_v44 = vmul.f32 %v11100_v18, %v6883_v7 }
 0x528   : > { %5613 = vst.msk [vmem:[%s11596_s4 + $0x170] sm:$0xff] %vm5566_vm2, %v5548_v15  ;;  %v5551_v37 = vmax.f32 %v5487_v36, 0.0  ;;  %v5486_v5 = vmax.f32 %v5358_v29, %v5422_v33  ;;  %v5296_v52 = vadd.f32 %v11111_v1, %v5033_v28  ;;  %v5036_v20 = vmul.f32 %v11100_v18, %v7075_v53  ;;  %v11901_v53 = vld [vmem:[#allocation100_spill] sm:$0xff] }
 0x529   : > { %v5489_v43 = vmax.f32 %v5361_v51, %v5425_v17  ;;  %v5360_v55 = vmax.f32 %v11897_v42, %v5168_v31  ;;  %v5171_v41 = vadd.f32 %v11111_v1, %v4908_v44  ;;  %v4907_v57 = vmul.f32 %v11100_v18, %v4085_v21  ;;  %v6886_v49 = vpop.f32.mrb[118].mxu0  ;;  %v7078_v38 = vpop.f32.mrb[118].mxu1 }
 0x52a   : > { %5616 = vst.msk [vmem:[%s11596_s4 + $0x188] sm:$0xff] %vm5566_vm2, %v5551_v37  ;;  %v5550_v26 = vmax.f32 %v5486_v5, 0.0  ;;  %v5424_v62 = vmax.f32 %v11898_v19, %v5296_v52  ;;  %v5299_v34 = vadd.f32 %v11111_v1, %v5036_v20  ;;  %v5035_v60 = vmul.f32 %v11100_v18, %v4725_v39  ;;  %v4095_v11 = vpop.f32.mrb[119].mxu0  ;;  %v4735_v8 = vpop.f32.mrb[119].mxu1  ;;  %v11902_v20 = vld [vmem:[#allocation101_spill] sm:$0xff] }
 0x52b   : > { %v5553_v3 = vmax.f32 %v5489_v43, 0.0  ;;  %v5363_v4 = vmax.f32 %v11899_v2, %v5171_v41  ;;  %v5170_v56 = vadd.f32 %v11111_v1, %v4907_v57  ;;  %v4910_v40 = vmul.f32 %v11100_v18, %v6886_v49  ;;  %v11904_v49 = vld [vmem:[#allocation103_spill] sm:$0xff] }
 0x52c   : > { %5615 = vst.msk [vmem:[%s11596_s4 + $0x180] sm:$0xff] %vm5566_vm2, %v5550_v26  ;;  %v5488_v9 = vmax.f32 %v5360_v55, %v5424_v62  ;;  %v5427_v45 = vmax.f32 %v10852_v58, %v5299_v34  ;;  %v5298_v61 = vadd.f32 %v11111_v1, %v5035_v60  ;;  %v5038_v30 = vmul.f32 %v11100_v18, %v7078_v38  ;;  %v11900_v58 = vld [vmem:[#allocation99_spill] sm:$0xff]  ;;  %v11903_v26 = vld [vmem:[#allocation102_spill] sm:$0xff] }
 0x52d   : > { %5618 = vst.msk [vmem:[%s11596_s4 + $0x198] sm:$0xff] %vm5566_vm2, %v5553_v3  ;;  %v5362_v35 = vmax.f32 %v10855_v25, %v5170_v56  ;;  %v5173_v24 = vadd.f32 %v11111_v1, %v4910_v40  ;;  %v4909_v10 = vmul.f32 %v11100_v18, %v4095_v11  ;;  %v5037_v23 = vmul.f32 %v11100_v18, %v4735_v8  ;;  %v6889_v29 = vpop.f32.mrb[120].mxu0  ;;  %v7081_v47 = vpop.f32.mrb[120].mxu1  ;;  %v11905_v56 = vld [vmem:[#allocation104_spill] sm:$0xff] }
 0x52e   : > { %v5552_v32 = vmax.f32 %v5488_v9, 0.0  ;;  %v5491_v48 = vmax.f32 %v5363_v4, %v5427_v45  ;;  %v5426_v13 = vmax.f32 %v11900_v58, %v5298_v61  ;;  %v5301_v6 = vadd.f32 %v11111_v1, %v5038_v30  ;;  %v4105_v36 = vpop.f32.mrb[121].mxu0  ;;  %v4745_v33 = vpop.f32.mrb[121].mxu1  ;;  %v11906_v61 = vld [vmem:[#allocation105_spill] sm:$0xff] }
 0x52f   : > { %v5365_v12 = vmax.f32 %v10866_v27, %v5173_v24  ;;  %v5172_v59 = vadd.f32 %v11111_v1, %v4909_v10  ;;  %v5300_v25 = vadd.f32 %v11111_v1, %v5037_v23  ;;  %v4912_v15 = vmul.f32 %v11100_v18, %v6889_v29 }
 0x530   : > { %5617 = vst.msk [vmem:[%s11596_s4 + $0x190] sm:$0xff] %vm5566_vm2, %v5552_v32  ;;  %v5555_v28 = vmax.f32 %v5491_v48, 0.0  ;;  %v5490_v7 = vmax.f32 %v5362_v35, %v5426_v13  ;;  %v5429_v46 = vmax.f32 %v11901_v53, %v5301_v6  ;;  %v5040_v51 = vmul.f32 %v11100_v18, %v7081_v47  ;;  %v11907_v13 = vld [vmem:[#allocation106_spill] sm:$0xff]  ;;  %v11908_v47 = vld [vmem:[#allocation107_spill] sm:$0xff] }
 0x531   : > { %v5364_v27 = vmax.f32 %v10876_v0, %v5172_v59  ;;  %v5428_v22 = vmax.f32 %v10879_v16, %v5300_v25  ;;  %v5175_v17 = vadd.f32 %v11111_v1, %v4912_v15  ;;  %v4911_v31 = vmul.f32 %v11100_v18, %v4105_v36  ;;  %v6892_v5 = vpop.f32.mrb[122].mxu0  ;;  %v7084_v52 = vpop.f32.mrb[122].mxu1 }
 0x532   : > { %5620 = vst.msk [vmem:[%s11596_s4 + $0x1a8] sm:$0xff] %vm5566_vm2, %v5555_v28  ;;  %v5554_v44 = vmax.f32 %v5490_v7, 0.0  ;;  %v5493_v21 = vmax.f32 %v5365_v12, %v5429_v46  ;;  %v5303_v39 = vadd.f32 %v11111_v1, %v5040_v51  ;;  %v5039_v37 = vmul.f32 %v11100_v18, %v4745_v33  ;;  %v4115_v55 = vpop.f32.mrb[123].mxu0  ;;  %v4755_v41 = vpop.f32.mrb[123].mxu1  ;;  %v11909_v28 = vld [vmem:[#allocation108_spill] sm:$0xff] }
 0x533   : > { %v5492_v0 = vmax.f32 %v5364_v27, %v5428_v22  ;;  %v5367_v16 = vmax.f32 %v11902_v20, %v5175_v17  ;;  %v5174_v43 = vadd.f32 %v11111_v1, %v4911_v31  ;;  %v4914_v42 = vmul.f32 %v11100_v18, %v6892_v5  ;;  %v11910_v27 = vld [vmem:[#allocation109_spill] sm:$0xff]  ;;  %v11911_v17 = vld [vmem:[#allocation110_spill] sm:$0xff] }
 0x534   : > { %5619 = vst.msk [vmem:[%s11596_s4 + $0x1a0] sm:$0xff] %vm5566_vm2, %v5554_v44  ;;  %v5557_v57 = vmax.f32 %v5493_v21, 0.0  ;;  %v5431_v19 = vmax.f32 %v11903_v26, %v5303_v39  ;;  %v5302_v62 = vadd.f32 %v11111_v1, %v5039_v37  ;;  %v5042_v34 = vmul.f32 %v11100_v18, %v7084_v52  ;;  %v11913_v26 = vld [vmem:[#allocation112_spill] sm:$0xff] }
 0x535   : > { %v5556_v60 = vmax.f32 %v5492_v0, 0.0  ;;  %v5366_v38 = vmax.f32 %v11904_v49, %v5174_v43  ;;  %v5177_v3 = vadd.f32 %v11111_v1, %v4914_v42  ;;  %v4913_v2 = vmul.f32 %v11100_v18, %v4115_v55  ;;  %v6895_v9 = vpop.f32.mrb[124].mxu0  ;;  %v7087_v45 = vpop.f32.mrb[124].mxu1  ;;  %v11912_v43 = vld [vmem:[#allocation111_spill] sm:$0xff] }
 0x536   : > { %5622 = vst.msk [vmem:[%s11596_s4 + $0x1b8] sm:$0xff] %vm5566_vm2, %v5557_v57  ;;  %v5495_v4 = vmax.f32 %v5367_v16, %v5431_v19  ;;  %v5430_v40 = vmax.f32 %v11905_v56, %v5302_v62  ;;  %v5305_v11 = vadd.f32 %v11111_v1, %v5042_v34  ;;  %v5041_v8 = vmul.f32 %v11100_v18, %v4755_v41  ;;  %v4125_v23 = vpop.f32.mrb[125].mxu0  ;;  %v4765_v32 = vpop.f32.mrb[125].mxu1 }
 0x537   : > { %5621 = vst.msk [vmem:[%s11596_s4 + $0x1b0] sm:$0xff] %vm5566_vm2, %v5556_v60  ;;  %v5369_v30 = vmax.f32 %v11906_v61, %v5177_v3  ;;  %v5176_v35 = vadd.f32 %v11111_v1, %v4913_v2  ;;  %v4916_v24 = vmul.f32 %v11100_v18, %v6895_v9  ;;  %v5044_v10 = vmul.f32 %v11100_v18, %v7087_v45 }
 0x538   : > { %v5559_v48 = vmax.f32 %v5495_v4, 0.0  ;;  %v5494_v58 = vmax.f32 %v5366_v38, %v5430_v40  ;;  %v5433_v6 = vmax.f32 %v11907_v13, %v5305_v11  ;;  %v5304_v29 = vadd.f32 %v11111_v1, %v5041_v8 }
 0x539   : > { %v5368_v12 = vmax.f32 %v11908_v47, %v5176_v35  ;;  %v5179_v59 = vadd.f32 %v11111_v1, %v4916_v24  ;;  %v5307_v25 = vadd.f32 %v11111_v1, %v5044_v10  ;;  %v4915_v15 = vmul.f32 %v11100_v18, %v4125_v23  ;;  %v6898_v46 = vpop.f32.mrb[126].mxu0  ;;  %v7090_v51 = vpop.f32.mrb[126].mxu1 }
 0x53a   : > { %5624 = vst.msk [vmem:[%s11596_s4 + $0x1c8] sm:$0xff] %vm5566_vm2, %v5559_v48  ;;  %v5558_v36 = vmax.f32 %v5494_v58, 0.0  ;;  %v5497_v33 = vmax.f32 %v5369_v30, %v5433_v6  ;;  %v5432_v7 = vmax.f32 %v11909_v28, %v5304_v29  ;;  %v5043_v53 = vmul.f32 %v11100_v18, %v4765_v32  ;;  %v4135_v39 = vpop.f32.mrb[127].mxu0  ;;  %v4775_v37 = vpop.f32.mrb[127].mxu1 }
 0x53b   : > { %v5371_v22 = vmax.f32 %v11910_v27, %v5179_v59  ;;  %v5435_v31 = vmax.f32 %v11911_v17, %v5307_v25  ;;  %v5178_v44 = vadd.f32 %v11111_v1, %v4915_v15  ;;  %v4918_v21 = vmul.f32 %v11100_v18, %v6898_v46 }
 0x53c   : > { %5623 = vst.msk [vmem:[%s11596_s4 + $0x1c0] sm:$0xff] %vm5566_vm2, %v5558_v36  ;;  %v5561_v5 = vmax.f32 %v5497_v33, 0.0  ;;  %v5496_v52 = vmax.f32 %v5368_v12, %v5432_v7  ;;  %v5306_v0 = vadd.f32 %v11111_v1, %v5043_v53  ;;  %v5046_v20 = vmul.f32 %v11100_v18, %v7090_v51 }
 0x53d   : > { %v5499_v16 = vmax.f32 %v5371_v22, %v5435_v31  ;;  %v5370_v42 = vmax.f32 %v11912_v43, %v5178_v44  ;;  %v5181_v55 = vadd.f32 %v11111_v1, %v4918_v21  ;;  %v4917_v41 = vmul.f32 %v11100_v18, %v4135_v39 }
 0x53e   : > { %5626 = vst.msk [vmem:[%s11596_s4 + $0x1d8] sm:$0xff] %vm5566_vm2, %v5561_v5  ;;  %v5560_v57 = vmax.f32 %v5496_v52, 0.0  ;;  %v5434_v19 = vmax.f32 %v11913_v26, %v5306_v0  ;;  %v5309_v62 = vadd.f32 %v11111_v1, %v5046_v20  ;;  %v5045_v34 = vmul.f32 %v11100_v18, %v4775_v37 }
 0x53f   : > { %v5116_v60 = vadd.f32 %v11111_v1, %v10943_v50  ;;  %v5563_v49 = vmax.f32 %v5499_v16, 0.0  ;;  %v5373_v38 = vmax.f32 %v10961_v54, %v5181_v55  ;;  %v5180_v3 = vadd.f32 %v11111_v1, %v4917_v41 }
 0x540   : > { %v5244_v2 = vadd.f32 %v11111_v1, %v10965_v63  ;;  %5625 = vst.msk [vmem:[%s11596_s4 + $0x1d0] sm:$0xff] %vm5566_vm2, %v5560_v57  ;;  %v5498_v4 = vmax.f32 %v5370_v42, %v5434_v19  ;;  %v5437_v56 = vmax.f32 %v10987_v14, %v5309_v62  ;;  %v5308_v18 = vadd.f32 %v11111_v1, %v5045_v34 }
 0x541   : > { %5628 = vst.msk [vmem:[%s11596_s4 + $0x1e8] sm:$0xff] %vm5566_vm2, %v5563_v49  ;;  %v5372_v50 = vmax.f32 %v5116_v60, %v5180_v3 }
 0x542   : > { %v5562_v54 = vmax.f32 %v5498_v4, 0.0  ;;  %v5501_v40 = vmax.f32 %v5373_v38, %v5437_v56  ;;  %v5436_v11 = vmax.f32 %v5244_v2, %v5308_v18 }
 0x544   : > { %5627 = vst.msk [vmem:[%s11596_s4 + $0x1e0] sm:$0xff] %vm5566_vm2, %v5562_v54  ;;  %v5565_v63 = vmax.f32 %v5501_v40, 0.0  ;;  %v5500_v8 = vmax.f32 %v5372_v50, %v5436_v11 }
 0x546   : > { %5630 = vst.msk [vmem:[%s11596_s4 + $0x1f8] sm:$0xff] %vm5566_vm2, %v5565_v63  ;;  %v5564_v14 = vmax.f32 %v5500_v8, 0.0 }
 0x548   : > { %5629 = vst.msk [vmem:[%s11596_s4 + $0x1f0] sm:$0xff] %vm5566_vm2, %v5564_v14 }
 0x549 PF: > { %s14_s17 = sadd.s32 1, %s7238_s17   ;;  %s11914_s15 = smov %s7234_s16 }
 0x54a   : > { %p11_p6 = scmp.ge.s32.totalorder %s14_s17, 4   ;;  %s11915_s16 = smov %s11917_s18 }
 0x54c   :  { %13 = sbr.rel (!%p11_p6) target bundleno = 2 (0x2), region = 82 }

// kernel: convnet_forward.3
= control target key start
LH: loop header
LB: loop body
LE: loop exit
PB: predicated region body
PF: predicated region fallthrough
CT: control target
= control target key end

     0   :  { %11 = vsyncpa [#allocation7], 0  ;;  %s7132_s0 = inlined_call_operand.vmem [shape: f32[4,32,896], index: 0, kind: input, shape index: {}]   ;;  %s7133_s1 = inlined_call_operand.vmem [shape: f32[896,32], index: 1, kind: input, shape index: {}]   ;;  %s7134_s2 = inlined_call_operand.vmem [shape: f32[1,32], index: 2, kind: input, shape index: {}]   ;;  %s7135_s3 = inlined_call_operand.vmem [shape: f32[1,32], index: 3, kind: input, shape index: {}]   ;;  %s7136_s4 = inlined_call_operand.vmem [shape: f32[16,32,128], index: 4, kind: input, shape index: {}]   ;;  %s7137_s5 = inlined_call_operand.vmem [shape: f32[1,128], index: 5, kind: input, shape index: {}]   ;;  %s7138_s6 = inlined_call_operand.hbm [shape: f32[2,128], index: 6, kind: output, shape index: {}]  }
   0x1   :  { %13 = vsyncpa [#allocation7 + $0x1], 0  ;;  %s5016_s21 = smov 0   ;;  %s5018_s22 = smov 0  }
   0x2   :  { %s5020_s23 = smov 0  }
   0x3 LB: > { %s3463_s24 = sadd.s32 4294967295, %s4974_s23   ;;  %s3464_s25 = sadd.s32 4294967294, %s4974_s23   ;;  %s4974_s23 = sphi %s5020_s23, %s19_s23   ;;  %s4970_s22 = sphi %s5018_s22, %s7141_s22   ;;  %s4966_s21 = sphi %s5016_s21, %s7140_s21  }
   0x4   : > { %s31_s26 = sadd.s32 1, %s4970_s22  ;;  %p3467_p0 = scmp.ge.s32.totalorder %s4974_s23, 1 }
   0x5   : > { %p33_p1 = scmp.ge.s32.totalorder %s31_s26, 2  ;;  %p231_p2 = scmp.lt.s32.totalorder %s4974_s23, 3 }
   0x7   : > { %s7143_s26 = smov (%p33_p1, %s31_s26), 0  ;;  %p232_p3 = pnand %p3467_p0, %p231_p2 }
   0x8   : > { %p3468_p4 = scmp.ne.s32.totalorder (!%p232_p3), %s4966_s21, 0 }
   0x9   : > { %235 = sbr.rel (%p232_p3) target bundleno = 1234 (0x4d2), region = 44 }
  0x10   : > { %273 = sbr.rel (%p3468_p4) target bundleno = 446 (0x1be), region = 48  ;;  %v402_v0 = vld [vmem:[%s7133_s1 + $0x80] sm:$0xff] (!%p3468_p4)  ;;  %v403_v1 = vld [vmem:[%s7133_s1 + $0x88] sm:$0xff] (!%p3468_p4)  ;;  %v404_v11 = vld [vmem:[%s7133_s1 + $0x90] sm:$0xff] (!%p3468_p4)  ;;  %vm1082_vm0 = vcmask (!%p3468_p4), 253952   ;;  %vm1086_vm1 = vcmask (!%p3468_p4), 261120  }
  0x11   : > { %v434_v2 = vld [vmem:[%s7133_s1 + $0x180] sm:$0xff] (!%p3468_p4)  ;;  %v4465_v3 = vpack.c.bf16 (!%p3468_p4), %v403_v1, %v402_v0  ;;  %v435_v4 = vld [vmem:[%s7133_s1 + $0x188] sm:$0xff] (!%p3468_p4)  ;;  %v405_v13 = vld [vmem:[%s7133_s1 + $0x98] sm:$0xff] (!%p3468_p4) }
  0x12   : > { %v386_v5 = vld [vmem:[%s7133_s1] sm:$0xff] (!%p3468_p4)  ;;  %v387_v6 = vld [vmem:[%s7133_s1 + $0x8] sm:$0xff] (!%p3468_p4)  ;;  %v4497_v7 = vpack.c.bf16 (!%p3468_p4), %v435_v4, %v434_v2  ;;  %v436_v14 = vld [vmem:[%s7133_s1 + $0x190] sm:$0xff] (!%p3468_p4)  ;;  %v4469_v16 = vpack.c.bf16 (!%p3468_p4), %v405_v13, %v404_v11 }
  0x13   : > { %v4467_v8 = vpack.c.bf16 (!%p3468_p4), %v387_v6, %v386_v5  ;;  %v418_v9 = vld [vmem:[%s7133_s1 + $0x100] sm:$0xff] (!%p3468_p4)  ;;  %v419_v10 = vld [vmem:[%s7133_s1 + $0x108] sm:$0xff] (!%p3468_p4)  ;;  %4466 = vmatprep.subr.bf16.mxu0 (!%p3468_p4), %v4465_v3  ;;  %v437_v15 = vld [vmem:[%s7133_s1 + $0x198] sm:$0xff] (!%p3468_p4) }
  0x14   : > { %v4499_v12 = vpack.c.bf16 (!%p3468_p4), %v419_v10, %v418_v9  ;;  %4498 = vmatprep.subr.bf16.mxu1 (!%p3468_p4), %v4497_v7  ;;  %v4501_v17 = vpack.c.bf16 (!%p3468_p4), %v437_v15, %v436_v14  ;;  %v388_v18 = vld [vmem:[%s7133_s1 + $0x10] sm:$0xff] (!%p3468_p4)  ;;  %v389_v19 = vld [vmem:[%s7133_s1 + $0x18] sm:$0xff] (!%p3468_p4)  ;;  %v406_v23 = vld [vmem:[%s7133_s1 + $0xa0] sm:$0xff] (!%p3468_p4) }
  0x15   : > { %4468 = vmatpush3.bf16.msra.mxu0 (!%p3468_p4), %v4467_v8  ;;  %v420_v20 = vld [vmem:[%s7133_s1 + $0x110] sm:$0xff] (!%p3468_p4)  ;;  %v4471_v21 = vpack.c.bf16 (!%p3468_p4), %v389_v19, %v388_v18  ;;  %v421_v22 = vld [vmem:[%s7133_s1 + $0x118] sm:$0xff] (!%p3468_p4)  ;;  %v407_v24 = vld [vmem:[%s7133_s1 + $0xa8] sm:$0xff] (!%p3468_p4) }
  0x16   : > { %4500 = vmatpush3.bf16.msra.mxu1 (!%p3468_p4), %v4499_v12  ;;  %4470 = vmatprep.subr.bf16.mxu0 (!%p3468_p4), %v4469_v16  ;;  %v4503_v25 = vpack.c.bf16 (!%p3468_p4), %v421_v22, %v420_v20  ;;  %v4473_v26 = vpack.c.bf16 (!%p3468_p4), %v407_v24, %v406_v23  ;;  %v438_v27 = vld [vmem:[%s7133_s1 + $0x1a0] sm:$0xff] (!%p3468_p4)  ;;  %v439_v28 = vld [vmem:[%s7133_s1 + $0x1a8] sm:$0xff] (!%p3468_p4)  ;;  %v408_v35 = vld [vmem:[%s7133_s1 + $0xb0] sm:$0xff] (!%p3468_p4) }
  0x17   : > { %4502 = vmatprep.subr.bf16.mxu1 %v4501_v17  ;;  %v390_v29 = vld [vmem:[%s7133_s1 + $0x20] sm:$0xff]  ;;  %v4505_v30 = vpack.c.bf16 %v439_v28, %v438_v27  ;;  %v391_v31 = vld [vmem:[%s7133_s1 + $0x28] sm:$0xff]  ;;  %v409_v36 = vld [vmem:[%s7133_s1 + $0xb8] sm:$0xff] }
  0x18   : > { %v422_v32 = vld [vmem:[%s7133_s1 + $0x120] sm:$0xff]  ;;  %v423_v33 = vld [vmem:[%s7133_s1 + $0x128] sm:$0xff]  ;;  %v4475_v34 = vpack.c.bf16 %v391_v31, %v390_v29  ;;  %v440_v37 = vld [vmem:[%s7133_s1 + $0x1b0] sm:$0xff]  ;;  %v4477_v39 = vpack.c.bf16 %v409_v36, %v408_v35 }
  0x19   : > { %4472 = vmatpush3.bf16.msra.mxu0 %v4471_v21  ;;  %v4507_v38 = vpack.c.bf16 %v423_v33, %v422_v32  ;;  %v441_v40 = vld [vmem:[%s7133_s1 + $0x1b8] sm:$0xff]  ;;  %v392_v41 = vld [vmem:[%s7133_s1 + $0x30] sm:$0xff]  ;;  %v410_v46 = vld [vmem:[%s7133_s1 + $0xc0] sm:$0xff] }
  0x1a   : > { %4504 = vmatpush3.bf16.msra.mxu1 %v4503_v25  ;;  %4474 = vmatprep.subr.bf16.mxu0 %v4473_v26  ;;  %v393_v42 = vld [vmem:[%s7133_s1 + $0x38] sm:$0xff]  ;;  %v4509_v43 = vpack.c.bf16 %v441_v40, %v440_v37  ;;  %v424_v44 = vld [vmem:[%s7133_s1 + $0x130] sm:$0xff]  ;;  %v411_v47 = vld [vmem:[%s7133_s1 + $0xc8] sm:$0xff] }
  0x1b   : > { %4506 = vmatprep.subr.bf16.mxu1 %v4505_v30  ;;  %v425_v45 = vld [vmem:[%s7133_s1 + $0x138] sm:$0xff]  ;;  %v442_v48 = vld [vmem:[%s7133_s1 + $0x1c0] sm:$0xff]  ;;  %v443_v49 = vld [vmem:[%s7133_s1 + $0x1c8] sm:$0xff]  ;;  %v4479_v50 = vpack.c.bf16 %v393_v42, %v392_v41  ;;  %v4481_v52 = vpack.c.bf16 %v411_v47, %v410_v46 }
  0x1c   : > { %v4511_v51 = vpack.c.bf16 %v425_v45, %v424_v44  ;;  %v394_v53 = vld [vmem:[%s7133_s1 + $0x40] sm:$0xff]  ;;  %v395_v54 = vld [vmem:[%s7133_s1 + $0x48] sm:$0xff]  ;;  %v4513_v56 = vpack.c.bf16 %v443_v49, %v442_v48  ;;  %v412_v58 = vld [vmem:[%s7133_s1 + $0xd0] sm:$0xff] }
  0x1d   : > { %4476 = vmatpush3.bf16.msra.mxu0 %v4475_v34  ;;  %v426_v55 = vld [vmem:[%s7133_s1 + $0x140] sm:$0xff]  ;;  %v427_v57 = vld [vmem:[%s7133_s1 + $0x148] sm:$0xff]  ;;  %v413_v59 = vld [vmem:[%s7133_s1 + $0xd8] sm:$0xff]  ;;  %v4483_v62 = vpack.c.bf16 %v395_v54, %v394_v53 }
  0x1e   : > { %4508 = vmatpush3.bf16.msra.mxu1 %v4507_v38  ;;  %4478 = vmatprep.subr.bf16.mxu0 %v4477_v39  ;;  %v444_v60 = vld [vmem:[%s7133_s1 + $0x1d0] sm:$0xff]  ;;  %v445_v61 = vld [vmem:[%s7133_s1 + $0x1d8] sm:$0xff]  ;;  %v4515_v63 = vpack.c.bf16 %v427_v57, %v426_v55  ;;  %v4485_v0 = vpack.c.bf16 %v413_v59, %v412_v58  ;;  %v414_v6 = vld [vmem:[%s7133_s1 + $0xe0] sm:$0xff] }
  0x1f   : > { %4510 = vmatprep.subr.bf16.mxu1 %v4509_v43  ;;  %v396_v1 = vld [vmem:[%s7133_s1 + $0x50] sm:$0xff]  ;;  %v397_v2 = vld [vmem:[%s7133_s1 + $0x58] sm:$0xff]  ;;  %v4517_v4 = vpack.c.bf16 %v445_v61, %v444_v60  ;;  %v415_v7 = vld [vmem:[%s7133_s1 + $0xe8] sm:$0xff] }
  0x20   : > { %v428_v3 = vld [vmem:[%s7133_s1 + $0x150] sm:$0xff]  ;;  %v429_v5 = vld [vmem:[%s7133_s1 + $0x158] sm:$0xff]  ;;  %v446_v8 = vld [vmem:[%s7133_s1 + $0x1e0] sm:$0xff]  ;;  %v4487_v10 = vpack.c.bf16 %v397_v2, %v396_v1  ;;  %v4489_v14 = vpack.c.bf16 %v415_v7, %v414_v6 }
  0x21   : > { %4480 = vmatpush3.bf16.msra.mxu0 %v4479_v50  ;;  %v447_v9 = vld [vmem:[%s7133_s1 + $0x1e8] sm:$0xff]  ;;  %v398_v11 = vld [vmem:[%s7133_s1 + $0x60] sm:$0xff]  ;;  %v4519_v13 = vpack.c.bf16 %v429_v5, %v428_v3  ;;  %v277_v17 = vld [vmem:[%s7132_s0 + $0x18] sm:$0xff] }
  0x22   : > { %4512 = vmatpush3.bf16.msra.mxu1 %v4511_v51  ;;  %4482 = vmatprep.subr.bf16.mxu0 %v4481_v52  ;;  %v399_v12 = vld [vmem:[%s7133_s1 + $0x68] sm:$0xff]  ;;  %v430_v15 = vld [vmem:[%s7133_s1 + $0x160] sm:$0xff]  ;;  %v4521_v18 = vpack.c.bf16 %v447_v9, %v446_v8  ;;  %v416_v20 = vld [vmem:[%s7133_s1 + $0xf0] sm:$0xff] }
  0x23   : > { %4514 = vmatprep.subr.bf16.mxu1 %v4513_v56  ;;  %v275_v16 = vld [vmem:[%s7132_s0 + $0x8] sm:$0xff]  ;;  %v417_v21 = vld [vmem:[%s7133_s1 + $0xf8] sm:$0xff]  ;;  %v448_v22 = vld [vmem:[%s7133_s1 + $0x1f0] sm:$0xff]  ;;  %707 = vmatprep.mubr.f32.mxu1 %v277_v17  ;;  %v4491_v24 = vpack.c.bf16 %v399_v12, %v398_v11 }
  0x24   : > { %v431_v19 = vld [vmem:[%s7133_s1 + $0x168] sm:$0xff]  ;;  %562 = vmatprep.mubr.f32.mxu0 %v275_v16  ;;  %v449_v23 = vld [vmem:[%s7133_s1 + $0x1f8] sm:$0xff]  ;;  %v4493_v26 = vpack.c.bf16 %v417_v21, %v416_v20  ;;  %v400_v27 = vld [vmem:[%s7133_s1 + $0x70] sm:$0xff] }
  0x25   : > { %4484 = vmatpush3.bf16.msra.mxu0 %v4483_v62  ;;  %v4523_v25 = vpack.c.bf16 %v431_v19, %v430_v15  ;;  %v401_v28 = vld [vmem:[%s7133_s1 + $0x78] sm:$0xff]  ;;  %v432_v29 = vld [vmem:[%s7133_s1 + $0x170] sm:$0xff]  ;;  %v4525_v30 = vpack.c.bf16 %v449_v23, %v448_v22  ;;  %v466_v32 = vld [vmem:[%s7133_s1 + $0x280] sm:$0xff] }
  0x26   : > { %4516 = vmatpush3.bf16.msra.mxu1 %v4515_v63  ;;  %4486 = vmatprep.subr.bf16.mxu0 %v4485_v0  ;;  %v433_v31 = vld [vmem:[%s7133_s1 + $0x178] sm:$0xff]  ;;  %v467_v33 = vld [vmem:[%s7133_s1 + $0x288] sm:$0xff]  ;;  %v4495_v34 = vpack.c.bf16 %v401_v28, %v400_v27  ;;  %v450_v37 = vld [vmem:[%s7133_s1 + $0x200] sm:$0xff] }
  0x27   : > { %4518 = vmatprep.subr.bf16.mxu1 %v4517_v4  ;;  %v4527_v35 = vpack.c.bf16 %v433_v31, %v432_v29  ;;  %v4529_v36 = vpack.c.bf16 %v467_v33, %v466_v32  ;;  %v451_v38 = vld [vmem:[%s7133_s1 + $0x208] sm:$0xff]  ;;  %v468_v39 = vld [vmem:[%s7133_s1 + $0x290] sm:$0xff]  ;;  %v469_v40 = vld [vmem:[%s7133_s1 + $0x298] sm:$0xff] }
  0x28   : > { %v274_v41 = vld [vmem:[%s7132_s0] sm:$0xff]  ;;  %v4531_v42 = vpack.c.bf16 %v451_v38, %v450_v37  ;;  %v276_v43 = vld [vmem:[%s7132_s0 + $0x10] sm:$0xff]  ;;  %v4533_v46 = vpack.c.bf16 %v469_v40, %v468_v39  ;;  %v453_v48 = vld [vmem:[%s7133_s1 + $0x218] sm:$0xff] }
  0x29   : > { %4488 = vmatpush3.bf16.msra.mxu0 %v4487_v10  ;;  %v282_v44 = vld [vmem:[%s7132_s0 + $0x40] sm:$0xff]  ;;  %v284_v45 = vld [vmem:[%s7132_s0 + $0x50] sm:$0xff]  ;;  %v471_v50 = vld [vmem:[%s7133_s1 + $0x2a8] sm:$0xff] }
  0x2a   : > { %4520 = vmatpush3.bf16.msra.mxu1 %v4519_v13  ;;  %4490 = vmatprep.subr.bf16.mxu0 %v4489_v14  ;;  %v452_v47 = vld [vmem:[%s7133_s1 + $0x210] sm:$0xff]  ;;  %v470_v49 = vld [vmem:[%s7133_s1 + $0x2a0] sm:$0xff]  ;;  %v281_v51 = vld [vmem:[%s7132_s0 + $0x38] sm:$0xff] }
  0x2b   : > { %4522 = vmatprep.subr.bf16.mxu1 %v4521_v18  ;;  %v283_v52 = vld [vmem:[%s7132_s0 + $0x48] sm:$0xff]  ;;  %v289_v53 = vld [vmem:[%s7132_s0 + $0x78] sm:$0xff]  ;;  %v4535_v54 = vpack.c.bf16 %v453_v48, %v452_v47  ;;  %v4537_v56 = vpack.c.bf16 %v471_v50, %v470_v49  ;;  %v454_v57 = vld [vmem:[%s7133_s1 + $0x220] sm:$0xff] }
  0x2c   : > { %v291_v55 = vld [vmem:[%s7132_s0 + $0x88] sm:$0xff]  ;;  %v472_v59 = vld [vmem:[%s7133_s1 + $0x2b0] sm:$0xff]  ;;  %v473_v60 = vld [vmem:[%s7133_s1 + $0x2b8] sm:$0xff] }
  0x2d   : > { %4492 = vmatpush3.bf16.msra.mxu0 %v4491_v24  ;;  %v455_v58 = vld [vmem:[%s7133_s1 + $0x228] sm:$0xff]  ;;  %v288_v61 = vld [vmem:[%s7132_s0 + $0x70] sm:$0xff]  ;;  %v482_v62 = vld [vmem:[%s7133_s1 + $0x300] sm:$0xff]  ;;  %v4541_v5 = vpack.c.bf16 %v473_v60, %v472_v59 }
  0x2e   : > { %4524 = vmatpush3.bf16.msra.mxu1 %v4523_v25  ;;  %4494 = vmatprep.subr.bf16.mxu0 %v4493_v26  ;;  %v483_v63 = vld [vmem:[%s7133_s1 + $0x308] sm:$0xff]  ;;  %v290_v0 = vld [vmem:[%s7132_s0 + $0x80] sm:$0xff]  ;;  %v296_v1 = vld [vmem:[%s7132_s0 + $0xb0] sm:$0xff]  ;;  %v4539_v2 = vpack.c.bf16 %v455_v58, %v454_v57 }
  0x2f   : > { %4526 = vmatprep.subr.bf16.mxu1 %v4525_v30  ;;  %v4561_v3 = vpack.c.bf16 %v483_v63, %v482_v62  ;;  %v298_v4 = vld [vmem:[%s7132_s0 + $0xc0] sm:$0xff]  ;;  %v456_v6 = vld [vmem:[%s7133_s1 + $0x230] sm:$0xff]  ;;  %v457_v7 = vld [vmem:[%s7133_s1 + $0x238] sm:$0xff] }
  0x30   : > { %v474_v8 = vld [vmem:[%s7133_s1 + $0x2c0] sm:$0xff]  ;;  %v475_v9 = vld [vmem:[%s7133_s1 + $0x2c8] sm:$0xff]  ;;  %v484_v11 = vld [vmem:[%s7133_s1 + $0x310] sm:$0xff]  ;;  %v4543_v16 = vpack.c.bf16 %v457_v7, %v456_v6 }
  0x31   : > { %4496 = vmatpush3.bf16.msra.mxu0 %v4495_v34  ;;  %v295_v10 = vld [vmem:[%s7132_s0 + $0xa8] sm:$0xff]  ;;  %v485_v12 = vld [vmem:[%s7133_s1 + $0x318] sm:$0xff]  ;;  %v4545_v18 = vpack.c.bf16 %v475_v9, %v474_v8  ;;  %v458_v19 = vld [vmem:[%s7133_s1 + $0x240] sm:$0xff] }
  0x32   : > { %4528 = vmatpush3.bf16.msra.mxu1 %v4527_v35  ;;  %4530 = vmatprep.subr.bf16.mxu0 %v4529_v36  ;;  %v297_v13 = vld [vmem:[%s7132_s0 + $0xb8] sm:$0xff]  ;;  %v303_v14 = vld [vmem:[%s7132_s0 + $0xe8] sm:$0xff]  ;;  %v4565_v17 = vpack.c.bf16 %v485_v12, %v484_v11  ;;  %v486_v21 = vld [vmem:[%s7133_s1 + $0x320] sm:$0xff] }
  0x33   : > { %4562 = vmatprep.subr.bf16.mxu1 %v4561_v3  ;;  %v305_v15 = vld [vmem:[%s7132_s0 + $0xf8] sm:$0xff]  ;;  %v459_v20 = vld [vmem:[%s7133_s1 + $0x248] sm:$0xff]  ;;  %v476_v22 = vld [vmem:[%s7133_s1 + $0x2d0] sm:$0xff] }
  0x34   : > { %563 = vmatmul.mubr.f32.vlgmr.msra.gmra.mrb[0].mxu0 %v274_v41  ;;  %v477_v23 = vld [vmem:[%s7133_s1 + $0x2d8] sm:$0xff]  ;;  %v487_v24 = vld [vmem:[%s7133_s1 + $0x328] sm:$0xff]  ;;  %v302_v25 = vld [vmem:[%s7132_s0 + $0xe0] sm:$0xff]  ;;  %v4547_v29 = vpack.c.bf16 %v459_v20, %v458_v19 }
  0x35   : > { %708 = vmatmul.mubr.f32.vlgmr.msra.gmra.mrb[0].mxu1 %v276_v43  ;;  %4532 = vmatpush3.bf16.msra.mxu0 %v4531_v42  ;;  %v304_v26 = vld [vmem:[%s7132_s0 + $0xf0] sm:$0xff]  ;;  %v4569_v27 = vpack.c.bf16 %v487_v24, %v486_v21  ;;  %v310_v28 = vld [vmem:[%s7132_s0 + $0x120] sm:$0xff]  ;;  %v489_v31 = vld [vmem:[%s7133_s1 + $0x338] sm:$0xff]  ;;  %v4549_v33 = vpack.c.bf16 %v477_v23, %v476_v22 }
  0x36   : > { %567 = vmatprep.mubr.f32.mxu0 %v282_v44  ;;  %712 = vmatprep.mubr.f32.mxu1 %v284_v45  ;;  %v488_v30 = vld [vmem:[%s7133_s1 + $0x330] sm:$0xff]  ;;  %v461_v35 = vld [vmem:[%s7133_s1 + $0x258] sm:$0xff]  ;;  %v478_v36 = vld [vmem:[%s7133_s1 + $0x2e0] sm:$0xff] }
  0x37   : > { %4534 = vmatprep.subr.bf16.mxu0 %v4533_v46  ;;  %4564 = vmatpush3.bf16.msra.mxu1 %v4561_v3  ;;  %v312_v32 = vld [vmem:[%s7132_s0 + $0x130] sm:$0xff]  ;;  %v479_v37 = vld [vmem:[%s7133_s1 + $0x2e8] sm:$0xff]  ;;  %v4573_v38 = vpack.c.bf16 %v489_v31, %v488_v30  ;;  %v309_v39 = vld [vmem:[%s7132_s0 + $0x118] sm:$0xff] }
  0x38   : > { %568 = vmatmul.mubr.f32.gmra.mrb[2].mxu0 %v281_v51  ;;  %4566 = vmatprep.subr.bf16.mxu1 %v4565_v17  ;;  %v460_v34 = vld [vmem:[%s7133_s1 + $0x250] sm:$0xff]  ;;  %v490_v40 = vld [vmem:[%s7133_s1 + $0x340] sm:$0xff]  ;;  %v491_v41 = vld [vmem:[%s7133_s1 + $0x348] sm:$0xff]  ;;  %v4553_v46 = vpack.c.bf16 %v479_v37, %v478_v36 }
  0x39   : > { %713 = vmatmul.mubr.f32.gmra.mrb[2].mxu1 %v283_v52  ;;  %572 = vmatprep.mubr.f32.mxu0 %v289_v53  ;;  %v311_v42 = vld [vmem:[%s7132_s0 + $0x128] sm:$0xff]  ;;  %v317_v43 = vld [vmem:[%s7132_s0 + $0x158] sm:$0xff]  ;;  %v4551_v44 = vpack.c.bf16 %v461_v35, %v460_v34  ;;  %v462_v47 = vld [vmem:[%s7133_s1 + $0x260] sm:$0xff]  ;;  %v4577_v49 = vpack.c.bf16 %v491_v41, %v490_v40 }
  0x3a   : > { %717 = vmatprep.mubr.f32.mxu1 %v291_v55  ;;  %4536 = vmatpush3.bf16.msra.mxu0 %v4535_v54  ;;  %v319_v45 = vld [vmem:[%s7132_s0 + $0x168] sm:$0xff]  ;;  %v480_v50 = vld [vmem:[%s7133_s1 + $0x2f0] sm:$0xff]  ;;  %v481_v51 = vld [vmem:[%s7133_s1 + $0x2f8] sm:$0xff] }
  0x3b   : > { %4538 = vmatprep.subr.bf16.mxu0 %v4537_v56  ;;  %4568 = vmatpush3.bf16.msra.mxu1 %v4565_v17  ;;  %v463_v48 = vld [vmem:[%s7133_s1 + $0x268] sm:$0xff]  ;;  %v316_v52 = vld [vmem:[%s7132_s0 + $0x150] sm:$0xff]  ;;  %v493_v54 = vld [vmem:[%s7133_s1 + $0x358] sm:$0xff]  ;;  %v4557_v59 = vpack.c.bf16 %v481_v51, %v480_v50 }
  0x3c   : > { %573 = vmatmul.mubr.f32.gmra.mrb[4].mxu0 %v288_v61  ;;  %4570 = vmatprep.subr.bf16.mxu1 %v4569_v27  ;;  %v492_v53 = vld [vmem:[%s7133_s1 + $0x350] sm:$0xff]  ;;  %v318_v55 = vld [vmem:[%s7132_s0 + $0x160] sm:$0xff]  ;;  %v4555_v57 = vpack.c.bf16 %v463_v48, %v462_v47  ;;  %v465_v61 = vld [vmem:[%s7133_s1 + $0x278] sm:$0xff] }
  0x3d   : > { %718 = vmatmul.mubr.f32.gmra.mrb[4].mxu1 %v290_v0  ;;  %577 = vmatprep.mubr.f32.mxu0 %v296_v1  ;;  %v324_v56 = vld [vmem:[%s7132_s0 + $0x190] sm:$0xff]  ;;  %v326_v58 = vld [vmem:[%s7132_s0 + $0x1a0] sm:$0xff]  ;;  %v4581_v62 = vpack.c.bf16 %v493_v54, %v492_v53  ;;  %v323_v63 = vld [vmem:[%s7132_s0 + $0x188] sm:$0xff] }
  0x3e   : > { %722 = vmatprep.mubr.f32.mxu1 %v298_v4  ;;  %4540 = vmatpush3.bf16.msra.mxu0 %v4539_v2  ;;  %v464_v60 = vld [vmem:[%s7133_s1 + $0x270] sm:$0xff]  ;;  %v494_v0 = vld [vmem:[%s7133_s1 + $0x360] sm:$0xff]  ;;  %v495_v1 = vld [vmem:[%s7133_s1 + $0x368] sm:$0xff] }
  0x3f   : > { %4542 = vmatprep.subr.bf16.mxu0 %v4541_v5  ;;  %4572 = vmatpush3.bf16.msra.mxu1 %v4569_v27  ;;  %v325_v2 = vld [vmem:[%s7132_s0 + $0x198] sm:$0xff]  ;;  %v331_v3 = vld [vmem:[%s7132_s0 + $0x1c8] sm:$0xff]  ;;  %v4559_v4 = vpack.c.bf16 %v465_v61, %v464_v60  ;;  %v4585_v6 = vpack.c.bf16 %v495_v1, %v494_v0  ;;  %v330_v7 = vld [vmem:[%s7132_s0 + $0x1c0] sm:$0xff] }
  0x40   : > { %578 = vmatmul.mubr.f32.gmra.mrb[6].mxu0 %v295_v10  ;;  %4574 = vmatprep.subr.bf16.mxu1 %v4573_v38  ;;  %v333_v5 = vld [vmem:[%s7132_s0 + $0x1d8] sm:$0xff]  ;;  %v496_v8 = vld [vmem:[%s7133_s1 + $0x370] sm:$0xff]  ;;  %v338_v11 = vld [vmem:[%s7132_s0 + $0x200] sm:$0xff] }
  0x41   : > { %723 = vmatmul.mubr.f32.gmra.mrb[6].mxu1 %v297_v13  ;;  %582 = vmatprep.mubr.f32.mxu0 %v303_v14  ;;  %v497_v9 = vld [vmem:[%s7133_s1 + $0x378] sm:$0xff]  ;;  %v332_v10 = vld [vmem:[%s7132_s0 + $0x1d0] sm:$0xff]  ;;  %v347_v17 = vld [vmem:[%s7132_s0 + $0x248] sm:$0xff] }
  0x42   : > { %727 = vmatprep.mubr.f32.mxu1 %v305_v15  ;;  %4544 = vmatpush3.bf16.msra.mxu0 %v4543_v16  ;;  %v340_v12 = vld [vmem:[%s7132_s0 + $0x210] sm:$0xff]  ;;  %v4589_v13 = vpack.c.bf16 %v497_v9, %v496_v8  ;;  %v337_v14 = vld [vmem:[%s7132_s0 + $0x1f8] sm:$0xff]  ;;  %v339_v15 = vld [vmem:[%s7132_s0 + $0x208] sm:$0xff] }
  0x43   : > { %4546 = vmatprep.subr.bf16.mxu0 %v4545_v18  ;;  %4576 = vmatpush3.bf16.msra.mxu1 %v4573_v38  ;;  %v345_v16 = vld [vmem:[%s7132_s0 + $0x238] sm:$0xff]  ;;  %v344_v18 = vld [vmem:[%s7132_s0 + $0x230] sm:$0xff]  ;;  %v346_v19 = vld [vmem:[%s7132_s0 + $0x240] sm:$0xff] }
  0x44   : > { %583 = vmatmul.mubr.f32.gmra.mrb[8].mxu0 %v302_v25  ;;  %4578 = vmatprep.subr.bf16.mxu1 %v4577_v49  ;;  %v352_v20 = vld [vmem:[%s7132_s0 + $0x270] sm:$0xff]  ;;  %v354_v21 = vld [vmem:[%s7132_s0 + $0x280] sm:$0xff]  ;;  %v351_v22 = vld [vmem:[%s7132_s0 + $0x268] sm:$0xff] }
  0x45   : > { %728 = vmatmul.mubr.f32.gmra.mrb[8].mxu1 %v304_v26  ;;  %587 = vmatprep.mubr.f32.mxu0 %v310_v28  ;;  %v353_v23 = vld [vmem:[%s7132_s0 + $0x278] sm:$0xff]  ;;  %v359_v24 = vld [vmem:[%s7132_s0 + $0x2a8] sm:$0xff]  ;;  %v358_v26 = vld [vmem:[%s7132_s0 + $0x2a0] sm:$0xff] }
  0x46   : > { %732 = vmatprep.mubr.f32.mxu1 %v312_v32  ;;  %4548 = vmatpush3.bf16.msra.mxu0 %v4547_v29  ;;  %v361_v25 = vld [vmem:[%s7132_s0 + $0x2b8] sm:$0xff]  ;;  %v360_v27 = vld [vmem:[%s7132_s0 + $0x2b0] sm:$0xff]  ;;  %v366_v28 = vld [vmem:[%s7132_s0 + $0x2e0] sm:$0xff] }
  0x47   : > { %4550 = vmatprep.subr.bf16.mxu0 %v4549_v33  ;;  %4580 = vmatpush3.bf16.msra.mxu1 %v4577_v49  ;;  %v368_v29 = vld [vmem:[%s7132_s0 + $0x2f0] sm:$0xff]  ;;  %v365_v30 = vld [vmem:[%s7132_s0 + $0x2d8] sm:$0xff]  ;;  %v367_v31 = vld [vmem:[%s7132_s0 + $0x2e8] sm:$0xff] }
  0x48   : > { %588 = vmatmul.mubr.f32.gmra.mrb[10].mxu0 %v309_v39  ;;  %4582 = vmatprep.subr.bf16.mxu1 %v4581_v62  ;;  %v373_v32 = vld [vmem:[%s7132_s0 + $0x318] sm:$0xff]  ;;  %v375_v33 = vld [vmem:[%s7132_s0 + $0x328] sm:$0xff]  ;;  %v372_v34 = vld [vmem:[%s7132_s0 + $0x310] sm:$0xff] }
  0x49   : > { %733 = vmatmul.mubr.f32.gmra.mrb[10].mxu1 %v311_v42  ;;  %592 = vmatprep.mubr.f32.mxu0 %v317_v43  ;;  %v374_v35 = vld [vmem:[%s7132_s0 + $0x320] sm:$0xff]  ;;  %v380_v36 = vld [vmem:[%s7132_s0 + $0x350] sm:$0xff]  ;;  %v379_v38 = vld [vmem:[%s7132_s0 + $0x348] sm:$0xff] }
  0x4a   : > { %737 = vmatprep.mubr.f32.mxu1 %v319_v45  ;;  %4552 = vmatpush3.bf16.msra.mxu0 %v4551_v44  ;;  %v382_v37 = vld [vmem:[%s7132_s0 + $0x360] sm:$0xff]  ;;  %v381_v39 = vld [vmem:[%s7132_s0 + $0x358] sm:$0xff]  ;;  %v279_v40 = vld [vmem:[%s7132_s0 + $0x28] sm:$0xff] }
  0x4b   : > { %4554 = vmatprep.subr.bf16.mxu0 %v4553_v46  ;;  %4584 = vmatpush3.bf16.msra.mxu1 %v4581_v62  ;;  %v280_v41 = vld [vmem:[%s7132_s0 + $0x30] sm:$0xff]  ;;  %v278_v42 = vld [vmem:[%s7132_s0 + $0x20] sm:$0xff]  ;;  %v287_v44 = vld [vmem:[%s7132_s0 + $0x68] sm:$0xff] }
  0x4c   : > { %593 = vmatmul.mubr.f32.gmra.mrb[12].mxu0 %v316_v52  ;;  %4586 = vmatprep.subr.bf16.mxu1 %v4585_v6  ;;  %v286_v43 = vld [vmem:[%s7132_s0 + $0x60] sm:$0xff]  ;;  %v285_v46 = vld [vmem:[%s7132_s0 + $0x58] sm:$0xff]  ;;  %v308_v49 = vld [vmem:[%s7132_s0 + $0x110] sm:$0xff] }
  0x4d   : > { %738 = vmatmul.mubr.f32.gmra.mrb[12].mxu1 %v318_v55  ;;  %597 = vmatprep.mubr.f32.mxu0 %v324_v56  ;;  %v294_v45 = vld [vmem:[%s7132_s0 + $0xa0] sm:$0xff]  ;;  %v293_v47 = vld [vmem:[%s7132_s0 + $0x98] sm:$0xff]  ;;  %v292_v50 = vld [vmem:[%s7132_s0 + $0x90] sm:$0xff] }
  0x4e   : > { %742 = vmatprep.mubr.f32.mxu1 %v326_v58  ;;  %4556 = vmatpush3.bf16.msra.mxu0 %v4555_v57  ;;  %v301_v48 = vld [vmem:[%s7132_s0 + $0xd8] sm:$0xff]  ;;  %v300_v51 = vld [vmem:[%s7132_s0 + $0xd0] sm:$0xff]  ;;  %v315_v52 = vld [vmem:[%s7132_s0 + $0x148] sm:$0xff] }
  0x4f   : > { %4558 = vmatprep.subr.bf16.mxu0 %v4557_v59  ;;  %4588 = vmatpush3.bf16.msra.mxu1 %v4585_v6  ;;  %v322_v53 = vld [vmem:[%s7132_s0 + $0x180] sm:$0xff]  ;;  %v299_v54 = vld [vmem:[%s7132_s0 + $0xc8] sm:$0xff]  ;;  %v329_v56 = vld [vmem:[%s7132_s0 + $0x1b8] sm:$0xff] }
  0x50   : > { %598 = vmatmul.mubr.f32.gmra.mrb[14].mxu0 %v323_v63  ;;  %4590 = vmatprep.subr.bf16.mxu1 %v4589_v13  ;;  %v307_v55 = vld [vmem:[%s7132_s0 + $0x108] sm:$0xff]  ;;  %v336_v57 = vld [vmem:[%s7132_s0 + $0x1f0] sm:$0xff]  ;;  %v306_v58 = vld [vmem:[%s7132_s0 + $0x100] sm:$0xff] }
  0x51   : > { %743 = vmatmul.mubr.f32.gmra.mrb[14].mxu1 %v325_v2  ;;  %602 = vmatprep.mubr.f32.mxu0 %v331_v3  ;;  %v314_v59 = vld [vmem:[%s7132_s0 + $0x140] sm:$0xff]  ;;  %v343_v60 = vld [vmem:[%s7132_s0 + $0x228] sm:$0xff]  ;;  %v313_v62 = vld [vmem:[%s7132_s0 + $0x138] sm:$0xff] }
  0x52   : > { %747 = vmatprep.mubr.f32.mxu1 %v333_v5  ;;  %4560 = vmatpush3.bf16.msra.mxu0 %v4559_v4  ;;  %v350_v61 = vld [vmem:[%s7132_s0 + $0x260] sm:$0xff]  ;;  %v321_v63 = vld [vmem:[%s7132_s0 + $0x178] sm:$0xff]  ;;  %v364_v1 = vld [vmem:[%s7132_s0 + $0x2d0] sm:$0xff] }
  0x53   : > { %4592 = vmatpush3.bf16.msra.mxu1 %v4589_v13  ;;  %v357_v0 = vld [vmem:[%s7132_s0 + $0x298] sm:$0xff]  ;;  %v320_v2 = vld [vmem:[%s7132_s0 + $0x170] sm:$0xff]  ;;  %v371_v4 = vld [vmem:[%s7132_s0 + $0x308] sm:$0xff] }
  0x54   : > { %603 = vmatmul.mubr.f32.gmra.mrb[16].mxu0 %v330_v7  ;;  %v328_v3 = vld [vmem:[%s7132_s0 + $0x1b0] sm:$0xff]  ;;  %v378_v5 = vld [vmem:[%s7132_s0 + $0x340] sm:$0xff]  ;;  %v327_v6 = vld [vmem:[%s7132_s0 + $0x1a8] sm:$0xff] }
  0x55   : > { %748 = vmatmul.mubr.f32.gmra.mrb[16].mxu1 %v332_v10  ;;  %607 = vmatprep.mubr.f32.mxu0 %v338_v11  ;;  %v335_v7 = vld [vmem:[%s7132_s0 + $0x1e8] sm:$0xff]  ;;  %v385_v8 = vld [vmem:[%s7132_s0 + $0x378] sm:$0xff]  ;;  %v334_v9 = vld [vmem:[%s7132_s0 + $0x1e0] sm:$0xff] }
  0x56   : > { %752 = vmatprep.mubr.f32.mxu1 %v340_v12  ;;  %v342_v10 = vld [vmem:[%s7132_s0 + $0x220] sm:$0xff]  ;;  %v341_v11 = vld [vmem:[%s7132_s0 + $0x218] sm:$0xff]  ;;  %v348_v13 = vld [vmem:[%s7132_s0 + $0x250] sm:$0xff] }
  0x57   : > { %v349_v12 = vld [vmem:[%s7132_s0 + $0x258] sm:$0xff] }
  0x58   : > { %608 = vmatmul.mubr.f32.gmra.mrb[18].mxu0 %v337_v14  ;;  %v356_v14 = vld [vmem:[%s7132_s0 + $0x290] sm:$0xff] }
  0x59   : > { %753 = vmatmul.mubr.f32.gmra.mrb[18].mxu1 %v339_v15  ;;  %612 = vmatprep.mubr.f32.mxu0 %v345_v16  ;;  %v355_v15 = vld [vmem:[%s7132_s0 + $0x288] sm:$0xff] }
  0x5a   : > { %757 = vmatprep.mubr.f32.mxu1 %v347_v17  ;;  %v363_v16 = vld [vmem:[%s7132_s0 + $0x2c8] sm:$0xff]  ;;  %v362_v17 = vld [vmem:[%s7132_s0 + $0x2c0] sm:$0xff] }
  0x5c   : > { %613 = vmatmul.mubr.f32.gmra.mrb[20].mxu0 %v344_v18  ;;  %v370_v18 = vld [vmem:[%s7132_s0 + $0x300] sm:$0xff] }
  0x5d   : > { %758 = vmatmul.mubr.f32.gmra.mrb[20].mxu1 %v346_v19  ;;  %617 = vmatprep.mubr.f32.mxu0 %v352_v20  ;;  %v369_v19 = vld [vmem:[%s7132_s0 + $0x2f8] sm:$0xff] }
  0x5e   : > { %762 = vmatprep.mubr.f32.mxu1 %v354_v21  ;;  %v377_v20 = vld [vmem:[%s7132_s0 + $0x338] sm:$0xff]  ;;  %v376_v21 = vld [vmem:[%s7132_s0 + $0x330] sm:$0xff] }
  0x60   : > { %618 = vmatmul.mubr.f32.gmra.mrb[22].mxu0 %v351_v22  ;;  %v384_v22 = vld [vmem:[%s7132_s0 + $0x370] sm:$0xff] }
  0x61   : > { %763 = vmatmul.mubr.f32.gmra.mrb[22].mxu1 %v353_v23  ;;  %622 = vmatprep.mubr.f32.mxu0 %v359_v24  ;;  %v383_v23 = vld [vmem:[%s7132_s0 + $0x368] sm:$0xff] }
  0x62   : > { %767 = vmatprep.mubr.f32.mxu1 %v361_v25 }
  0x64   : > { %623 = vmatmul.mubr.f32.gmra.mrb[24].mxu0 %v358_v26 }
  0x65   : > { %768 = vmatmul.mubr.f32.gmra.mrb[24].mxu1 %v360_v27  ;;  %627 = vmatprep.mubr.f32.mxu0 %v366_v28 }
  0x66   : > { %772 = vmatprep.mubr.f32.mxu1 %v368_v29 }
  0x68   : > { %628 = vmatmul.mubr.f32.gmra.mrb[26].mxu0 %v365_v30 }
  0x69   : > { %773 = vmatmul.mubr.f32.gmra.mrb[26].mxu1 %v367_v31  ;;  %632 = vmatprep.mubr.f32.mxu0 %v373_v32 }
  0x6a   : > { %777 = vmatprep.mubr.f32.mxu1 %v375_v33 }
  0x6c   : > { %633 = vmatmul.mubr.f32.gmra.mrb[28].mxu0 %v372_v34  ;;  %v4976_v34 = vmov 0.0  }
  0x6d   : > { %778 = vmatmul.mubr.f32.gmra.mrb[28].mxu1 %v374_v35  ;;  %637 = vmatprep.mubr.f32.mxu0 %v380_v36  ;;  %1083 = vst.msk [vmem:[#allocation2] sm:$0x1] %vm1082_vm0, %v4976_v34  ;;  %1084 = vst.msk [vmem:[#allocation3] sm:$0x1] %vm1082_vm0, %v4976_v34 }
  0x6e   : > { %782 = vmatprep.mubr.f32.mxu1 %v382_v37 }
  0x70   : > { %638 = vmatmul.mubr.f32.gmra.mrb[30].mxu0 %v379_v38 }
  0x71   : > { %783 = vmatmul.mubr.f32.gmra.mrb[30].mxu1 %v381_v39  ;;  %852 = vmatprep.mubr.f32.mxu0 %v279_v40 }
  0x72   : > { %4209 = vmatprep.mubr.f32.mxu1 %v280_v41 }
  0x74   : > { %853 = vmatmul.mubr.f32.vlgmr.msra.gmra.mrb[32].mxu0 %v278_v42 }
  0x75   : > { %857 = vmatprep.mubr.f32.mxu0 %v286_v43  ;;  %4210 = vmatmul.mubr.f32.vlgmr.msra.gmra.mrb[32].mxu1 %v287_v44 }
  0x76   : > { %4212 = vmatprep.mubr.f32.mxu1 %v294_v45 }
  0x78   : > { %858 = vmatmul.mubr.f32.gmra.mrb[34].mxu0 %v285_v46 }
  0x79   : > { %862 = vmatprep.mubr.f32.mxu0 %v293_v47  ;;  %4213 = vmatmul.mubr.f32.gmra.mrb[34].mxu1 %v301_v48 }
  0x7a   : > { %4215 = vmatprep.mubr.f32.mxu1 %v308_v49 }
  0x7c   : > { %863 = vmatmul.mubr.f32.gmra.mrb[36].mxu0 %v292_v50 }
  0x7d   : > { %867 = vmatprep.mubr.f32.mxu0 %v300_v51  ;;  %4216 = vmatmul.mubr.f32.gmra.mrb[36].mxu1 %v315_v52 }
  0x7e   : > { %4218 = vmatprep.mubr.f32.mxu1 %v322_v53 }
  0x80   : > { %868 = vmatmul.mubr.f32.gmra.mrb[38].mxu0 %v299_v54 }
  0x81   : > { %872 = vmatprep.mubr.f32.mxu0 %v307_v55  ;;  %4219 = vmatmul.mubr.f32.gmra.mrb[38].mxu1 %v329_v56 }
  0x82   : > { %4221 = vmatprep.mubr.f32.mxu1 %v336_v57 }
  0x84   : > { %873 = vmatmul.mubr.f32.gmra.mrb[40].mxu0 %v306_v58 }
  0x85   : > { %877 = vmatprep.mubr.f32.mxu0 %v314_v59  ;;  %4222 = vmatmul.mubr.f32.gmra.mrb[40].mxu1 %v343_v60 }
  0x86   : > { %4224 = vmatprep.mubr.f32.mxu1 %v350_v61 }
  0x88   : > { %878 = vmatmul.mubr.f32.gmra.mrb[42].mxu0 %v313_v62 }
  0x89   : > { %882 = vmatprep.mubr.f32.mxu0 %v321_v63  ;;  %4225 = vmatmul.mubr.f32.gmra.mrb[42].mxu1 %v357_v0 }
  0x8a   : > { %4227 = vmatprep.mubr.f32.mxu1 %v364_v1 }
  0x8c   : > { %883 = vmatmul.mubr.f32.gmra.mrb[44].mxu0 %v320_v2 }
  0x8d   : > { %887 = vmatprep.mubr.f32.mxu0 %v328_v3  ;;  %4228 = vmatmul.mubr.f32.gmra.mrb[44].mxu1 %v371_v4 }
  0x8e   : > { %4230 = vmatprep.mubr.f32.mxu1 %v378_v5 }
  0x90   : > { %888 = vmatmul.mubr.f32.gmra.mrb[46].mxu0 %v327_v6 }
  0x91   : > { %892 = vmatprep.mubr.f32.mxu0 %v335_v7  ;;  %4231 = vmatmul.mubr.f32.gmra.mrb[46].mxu1 %v385_v8 }
  0x94   : > { %893 = vmatmul.mubr.f32.gmra.mrb[48].mxu0 %v334_v9 }
  0x95   : > { %897 = vmatprep.mubr.f32.mxu0 %v342_v10 }
  0x98   : > { %898 = vmatmul.mubr.f32.gmra.mrb[50].mxu0 %v341_v11 }
  0x99   : > { %902 = vmatprep.mubr.f32.mxu0 %v349_v12 }
  0x9c   : > { %903 = vmatmul.mubr.f32.gmra.mrb[52].mxu0 %v348_v13 }
  0x9d   : > { %907 = vmatprep.mubr.f32.mxu0 %v356_v14 }
  0xa0   : > { %908 = vmatmul.mubr.f32.gmra.mrb[54].mxu0 %v355_v15 }
  0xa1   : > { %912 = vmatprep.mubr.f32.mxu0 %v363_v16 }
  0xa4   : > { %913 = vmatmul.mubr.f32.gmra.mrb[56].mxu0 %v362_v17 }
  0xa5   : > { %917 = vmatprep.mubr.f32.mxu0 %v370_v18 }
  0xa8   : > { %918 = vmatmul.mubr.f32.gmra.mrb[58].mxu0 %v369_v19 }
  0xa9   : > { %922 = vmatprep.mubr.f32.mxu0 %v377_v20 }
  0xac   : > { %923 = vmatmul.mubr.f32.gmra.mrb[60].mxu0 %v376_v21 }
  0xad   : > { %927 = vmatprep.mubr.f32.mxu0 %v384_v22 }
  0xb0   : > { %928 = vmatmul.mubr.f32.gmra.mrb[62].mxu0 %v383_v23 }
 0x107   : > { %v3585_v24 = vpop.f32.mrb[0].mxu0 }
 0x108   : > { %v3665_v25 = vpop.f32.mrb[0].mxu1  ;;  %v3586_v26 = vpop.f32.mrb[1].mxu0 }
 0x109   : > { %v3587_v27 = vadd.f32 %v3586_v26, %v3585_v24  ;;  %v3666_v28 = vpop.f32.mrb[1].mxu1 }
 0x10a   : > { %v3667_v29 = vadd.f32 %v3666_v28, %v3665_v25 }
 0x10b   : > { %v3588_v30 = vpop.f32.mrb[2].mxu0 }
 0x10c   : > { %v5711_v31 = vadd.f32 %v3667_v29, %v3587_v27  ;;  %v3668_v32 = vpop.f32.mrb[2].mxu1  ;;  %v3589_v33 = vpop.f32.mrb[3].mxu0 }
 0x10d   : > { %v3590_v35 = vadd.f32 %v3589_v33, %v3588_v30  ;;  %v3669_v36 = vpop.f32.mrb[3].mxu1 }
 0x10e   : > { %v3670_v37 = vadd.f32 %v3669_v36, %v3668_v32 }
 0x10f   : > { %v3591_v38 = vpop.f32.mrb[4].mxu0 }
 0x110   : > { %v5715_v39 = vadd.f32 %v3670_v37, %v3590_v35  ;;  %v3671_v40 = vpop.f32.mrb[4].mxu1  ;;  %v3592_v41 = vpop.f32.mrb[5].mxu0 }
 0x111   : > { %v3593_v42 = vadd.f32 %v3592_v41, %v3591_v38  ;;  %v3672_v43 = vpop.f32.mrb[5].mxu1 }
 0x112   : > { %v3673_v44 = vadd.f32 %v3672_v43, %v3671_v40 }
 0x113   : > { %v3594_v45 = vpop.f32.mrb[6].mxu0 }
 0x114   : > { %v5717_v46 = vadd.f32 %v3673_v44, %v3593_v42  ;;  %v3674_v47 = vpop.f32.mrb[6].mxu1  ;;  %v3595_v48 = vpop.f32.mrb[7].mxu0 }
 0x115   : > { %v3596_v49 = vadd.f32 %v3595_v48, %v3594_v45  ;;  %v3675_v50 = vpop.f32.mrb[7].mxu1 }
 0x116   : > { %v3676_v51 = vadd.f32 %v3675_v50, %v3674_v47 }
 0x117   : > { %v3597_v52 = vpop.f32.mrb[8].mxu0 }
 0x118   : > { %v5719_v53 = vadd.f32 %v3676_v51, %v3596_v49  ;;  %v3677_v54 = vpop.f32.mrb[8].mxu1  ;;  %v3598_v55 = vpop.f32.mrb[9].mxu0 }
 0x119   : > { %v3599_v56 = vadd.f32 %v3598_v55, %v3597_v52  ;;  %v3678_v57 = vpop.f32.mrb[9].mxu1 }
 0x11a   : > { %v3679_v58 = vadd.f32 %v3678_v57, %v3677_v54 }
 0x11b   : > { %v3600_v59 = vpop.f32.mrb[10].mxu0 }
 0x11c   : > { %v5721_v60 = vadd.f32 %v3679_v58, %v3599_v56  ;;  %v3680_v61 = vpop.f32.mrb[10].mxu1  ;;  %v3601_v62 = vpop.f32.mrb[11].mxu0 }
 0x11d   : > { %v3602_v63 = vadd.f32 %v3601_v62, %v3600_v59  ;;  %v3681_v0 = vpop.f32.mrb[11].mxu1 }
 0x11e   : > { %v3682_v1 = vadd.f32 %v3681_v0, %v3680_v61 }
 0x11f   : > { %v3603_v2 = vpop.f32.mrb[12].mxu0 }
 0x120   : > { %v5723_v3 = vadd.f32 %v3682_v1, %v3602_v63  ;;  %v3683_v4 = vpop.f32.mrb[12].mxu1  ;;  %v3604_v5 = vpop.f32.mrb[13].mxu0 }
 0x121   : > { %v3605_v6 = vadd.f32 %v3604_v5, %v3603_v2  ;;  %v3684_v7 = vpop.f32.mrb[13].mxu1 }
 0x122   : > { %v3685_v8 = vadd.f32 %v3684_v7, %v3683_v4 }
 0x123   : > { %v3606_v9 = vpop.f32.mrb[14].mxu0 }
 0x124   : > { %v5725_v10 = vadd.f32 %v3685_v8, %v3605_v6  ;;  %v3686_v11 = vpop.f32.mrb[14].mxu1  ;;  %v3607_v12 = vpop.f32.mrb[15].mxu0 }
 0x125   : > { %v3608_v13 = vadd.f32 %v3607_v12, %v3606_v9  ;;  %v3687_v14 = vpop.f32.mrb[15].mxu1 }
 0x126   : > { %v3688_v15 = vadd.f32 %v3687_v14, %v3686_v11 }
 0x127   : > { %v3609_v16 = vpop.f32.mrb[16].mxu0 }
 0x128   : > { %v5727_v17 = vadd.f32 %v3688_v15, %v3608_v13  ;;  %v3689_v18 = vpop.f32.mrb[16].mxu1  ;;  %v3610_v19 = vpop.f32.mrb[17].mxu0 }
 0x129   : > { %v3611_v20 = vadd.f32 %v3610_v19, %v3609_v16  ;;  %v3690_v21 = vpop.f32.mrb[17].mxu1 }
 0x12a   : > { %v3691_v22 = vadd.f32 %v3690_v21, %v3689_v18 }
 0x12b   : > { %v3612_v23 = vpop.f32.mrb[18].mxu0 }
 0x12c   : > { %v5729_v24 = vadd.f32 %v3691_v22, %v3611_v20  ;;  %v3692_v25 = vpop.f32.mrb[18].mxu1  ;;  %v3613_v26 = vpop.f32.mrb[19].mxu0 }
 0x12d   : > { %v3614_v27 = vadd.f32 %v3613_v26, %v3612_v23  ;;  %v3693_v28 = vpop.f32.mrb[19].mxu1 }
 0x12e   : > { %v3694_v29 = vadd.f32 %v3693_v28, %v3692_v25 }
 0x12f   : > { %v3615_v30 = vpop.f32.mrb[20].mxu0 }
 0x130   : > { %v5731_v32 = vadd.f32 %v3694_v29, %v3614_v27  ;;  %v3695_v33 = vpop.f32.mrb[20].mxu1  ;;  %v3616_v34 = vpop.f32.mrb[21].mxu0 }
 0x131   : > { %v3617_v35 = vadd.f32 %v3616_v34, %v3615_v30  ;;  %v3696_v36 = vpop.f32.mrb[21].mxu1 }
 0x132   : > { %v3697_v37 = vadd.f32 %v3696_v36, %v3695_v33 }
 0x133   : > { %v3618_v38 = vpop.f32.mrb[22].mxu0 }
 0x134   : > { %v5733_v40 = vadd.f32 %v3697_v37, %v3617_v35  ;;  %v3698_v41 = vpop.f32.mrb[22].mxu1  ;;  %v3619_v42 = vpop.f32.mrb[23].mxu0 }
 0x135   : > { %v3620_v43 = vadd.f32 %v3619_v42, %v3618_v38  ;;  %v3699_v44 = vpop.f32.mrb[23].mxu1 }
 0x136   : > { %v3700_v45 = vadd.f32 %v3699_v44, %v3698_v41 }
 0x137   : > { %v3621_v47 = vpop.f32.mrb[24].mxu0 }
 0x138   : > { %v5735_v48 = vadd.f32 %v3700_v45, %v3620_v43  ;;  %v3701_v49 = vpop.f32.mrb[24].mxu1  ;;  %v3622_v50 = vpop.f32.mrb[25].mxu0 }
 0x139   : > { %v3623_v51 = vadd.f32 %v3622_v50, %v3621_v47  ;;  %v3702_v52 = vpop.f32.mrb[25].mxu1 }
 0x13a   : > { %v3703_v54 = vadd.f32 %v3702_v52, %v3701_v49 }
 0x13b   : > { %v3624_v55 = vpop.f32.mrb[26].mxu0 }
 0x13c   : > { %v5737_v56 = vadd.f32 %v3703_v54, %v3623_v51  ;;  %v3704_v57 = vpop.f32.mrb[26].mxu1  ;;  %v3625_v58 = vpop.f32.mrb[27].mxu0 }
 0x13d   : > { %v3626_v59 = vadd.f32 %v3625_v58, %v3624_v55  ;;  %v3705_v61 = vpop.f32.mrb[27].mxu1 }
 0x13e   : > { %v3706_v62 = vadd.f32 %v3705_v61, %v3704_v57 }
 0x13f   : > { %v3627_v63 = vpop.f32.mrb[28].mxu0 }
 0x140   : > { %v5739_v0 = vadd.f32 %v3706_v62, %v3626_v59  ;;  %v3707_v1 = vpop.f32.mrb[28].mxu1  ;;  %v3628_v2 = vpop.f32.mrb[29].mxu0 }
 0x141   : > { %v3629_v4 = vadd.f32 %v3628_v2, %v3627_v63  ;;  %v3708_v5 = vpop.f32.mrb[29].mxu1 }
 0x142   : > { %v3709_v6 = vadd.f32 %v3708_v5, %v3707_v1 }
 0x143   : > { %v3630_v7 = vpop.f32.mrb[30].mxu0 }
 0x144   : > { %v5741_v8 = vadd.f32 %v3709_v6, %v3629_v4  ;;  %v3710_v9 = vpop.f32.mrb[30].mxu1  ;;  %v3631_v11 = vpop.f32.mrb[31].mxu0 }
 0x145   : > { %v3632_v12 = vadd.f32 %v3631_v11, %v3630_v7  ;;  %v3711_v13 = vpop.f32.mrb[31].mxu1 }
 0x146   : > { %v3712_v14 = vadd.f32 %v3711_v13, %v3710_v9 }
 0x147   : > { %v3745_v15 = vpop.f32.mrb[32].mxu0 }
 0x148   : > { %v5743_v16 = vadd.f32 %v3712_v14, %v3632_v12  ;;  %v3746_v18 = vpop.f32.mrb[33].mxu0  ;;  %v4211_v19 = vpop.f32.mrb[32].mxu1 }
 0x149   : > { %v3747_v20 = vadd.f32 %v3746_v18, %v3745_v15  ;;  %v999_v21 = vpop.f32.mrb[33].mxu1 }
 0x14b   : > { %v3748_v22 = vpop.f32.mrb[34].mxu0  ;;  %v855_v23 = vadd.f32 %v3747_v20, %v5711_v31 }
 0x14c   : > { %v3749_v25 = vpop.f32.mrb[35].mxu0  ;;  %v4214_v26 = vpop.f32.mrb[34].mxu1 }
 0x14d   : > { %v3750_v27 = vadd.f32 %v3749_v25, %v3748_v22  ;;  %v1000_v28 = vadd.f32 %v999_v21, %v855_v23  ;;  %v1009_v29 = vpop.f32.mrb[35].mxu1 }
 0x14f   : > { %v860_v30 = vadd.f32 %v3750_v27, %v5715_v39  ;;  %v3751_v33 = vpop.f32.mrb[36].mxu0  ;;  %v1128_v37 = vmul.f32 %v1000_v28, %v1000_v28  ;;  %v1087_v43 = vsel %vm1086_vm1, %v1000_v28, 0.0 }
 0x150   : > { %v3752_v34 = vpop.f32.mrb[37].mxu0  ;;  %v4217_v35 = vpop.f32.mrb[36].mxu1 }
 0x151   : > { %v1005_v36 = vadd.f32 %v4211_v19, %v860_v30  ;;  %v3753_v38 = vadd.f32 %v3752_v34, %v3751_v33  ;;  %v1019_v41 = vpop.f32.mrb[37].mxu1  ;;  %v1144_v39 = vsel %vm1086_vm1, %v1128_v37, 0.0 }
 0x153   : > { %v1129_v42 = vmul.f32 %v1005_v36, %v1005_v36  ;;  %v1088_v31 = vsel %vm1086_vm1, %v1005_v36, 0.0  ;;  %v3754_v44 = vpop.f32.mrb[38].mxu0  ;;  %v865_v45 = vadd.f32 %v3753_v38, %v5717_v46 }
 0x154   : > { %v1089_v47 = vadd.f32 %v1088_v31, %v1087_v43  ;;  %v3755_v49 = vpop.f32.mrb[39].mxu0  ;;  %v4220_v50 = vpop.f32.mrb[38].mxu1 }
 0x155   : > { %v1145_v51 = vsel %vm1086_vm1, %v1129_v42, 0.0  ;;  %v3756_v52 = vadd.f32 %v3755_v49, %v3754_v44  ;;  %v1010_v54 = vadd.f32 %v1009_v29, %v865_v45  ;;  %v1029_v55 = vpop.f32.mrb[39].mxu1 }
 0x156   : > { %v1146_v57 = vadd.f32 %v1145_v51, %v1144_v39 }
 0x157   : > { %v870_v58 = vadd.f32 %v3756_v52, %v5719_v53  ;;  %v1090_v59 = vsel %vm1086_vm1, %v1010_v54, 0.0  ;;  %v1130_v61 = vmul.f32 %v1010_v54, %v1010_v54  ;;  %v3757_v62 = vpop.f32.mrb[40].mxu0 }
 0x158   : > { %v1091_v63 = vadd.f32 %v1090_v59, %v1089_v47  ;;  %v3758_v1 = vpop.f32.mrb[41].mxu0  ;;  %v5754_v46 = vpop.f32.mrb[40].mxu1 }
 0x159   : > { %v1015_v2 = vadd.f32 %v4214_v26, %v870_v58  ;;  %v1147_v4 = vsel %vm1086_vm1, %v1130_v61, 0.0  ;;  %v3759_v5 = vadd.f32 %v3758_v1, %v3757_v62  ;;  %v1039_v6 = vpop.f32.mrb[41].mxu1 }
 0x15a   : > { %v1148_v7 = vadd.f32 %v1147_v4, %v1146_v57 }
 0x15b   : > { %v1131_v9 = vmul.f32 %v1015_v2, %v1015_v2  ;;  %v3760_v11 = vpop.f32.mrb[42].mxu0  ;;  %v875_v12 = vadd.f32 %v3759_v5, %v5721_v60  ;;  %v1092_v53 = vsel %vm1086_vm1, %v1015_v2, 0.0 }
 0x15c   : > { %v3761_v13 = vpop.f32.mrb[43].mxu0  ;;  %v1093_v14 = vadd.f32 %v1092_v53, %v1091_v63  ;;  %v5759_v15 = vpop.f32.mrb[42].mxu1 }
 0x15d   : > { %v3762_v18 = vadd.f32 %v3761_v13, %v3760_v11  ;;  %v1020_v19 = vadd.f32 %v1019_v41, %v875_v12  ;;  %v1149_v20 = vsel %vm1086_vm1, %v1131_v9, 0.0  ;;  %v5762_v21 = vpop.f32.mrb[43].mxu1 }
 0x15e   : > { %v1150_v22 = vadd.f32 %v1149_v20, %v1148_v7 }
 0x15f   : > { %v880_v23 = vadd.f32 %v3762_v18, %v5723_v3  ;;  %v1094_v25 = vsel %vm1086_vm1, %v1020_v19, 0.0  ;;  %v1132_v26 = vmul.f32 %v1020_v19, %v1020_v19  ;;  %v3763_v27 = vpop.f32.mrb[44].mxu0 }
 0x160   : > { %v1095_v60 = vadd.f32 %v1094_v25, %v1093_v14  ;;  %v3764_v28 = vpop.f32.mrb[45].mxu0  ;;  %v5766_v29 = vpop.f32.mrb[44].mxu1 }
 0x161   : > { %v1025_v30 = vadd.f32 %v4217_v35, %v880_v23  ;;  %v1151_v33 = vsel %vm1086_vm1, %v1132_v26, 0.0  ;;  %v3765_v34 = vadd.f32 %v3764_v28, %v3763_v27  ;;  %v5769_v36 = vpop.f32.mrb[45].mxu1 }
 0x162   : > { %v1152_v37 = vadd.f32 %v1151_v33, %v1150_v22 }
 0x163   : > { %v1133_v38 = vmul.f32 %v1025_v30, %v1025_v30  ;;  %v3766_v41 = vpop.f32.mrb[46].mxu0  ;;  %v885_v42 = vadd.f32 %v3765_v34, %v5725_v10  ;;  %v1096_v3 = vsel %vm1086_vm1, %v1025_v30, 0.0 }
 0x164   : > { %v3767_v43 = vpop.f32.mrb[47].mxu0  ;;  %v1097_v31 = vadd.f32 %v1096_v3, %v1095_v60  ;;  %v5773_v44 = vpop.f32.mrb[46].mxu1 }
 0x165   : > { %v3768_v45 = vadd.f32 %v3767_v43, %v3766_v41  ;;  %v1030_v47 = vadd.f32 %v1029_v55, %v885_v42  ;;  %v1153_v35 = vsel %vm1086_vm1, %v1133_v38, 0.0  ;;  %v5776_v49 = vpop.f32.mrb[47].mxu1 }
 0x166   : > { %v1154_v39 = vadd.f32 %v1153_v35, %v1152_v37 }
 0x167   : > { %v890_v51 = vadd.f32 %v3768_v45, %v5727_v17  ;;  %v1098_v52 = vsel %vm1086_vm1, %v1030_v47, 0.0  ;;  %v1134_v54 = vmul.f32 %v1030_v47, %v1030_v47  ;;  %v3769_v57 = vpop.f32.mrb[48].mxu0 }
 0x168   : > { %v1099_v10 = vadd.f32 %v1098_v52, %v1097_v31  ;;  %v3770_v58 = vpop.f32.mrb[49].mxu0 }
 0x169   : > { %v1035_v59 = vadd.f32 %v4220_v50, %v890_v51  ;;  %v1155_v61 = vsel %vm1086_vm1, %v1134_v54, 0.0  ;;  %v3771_v62 = vadd.f32 %v3770_v58, %v3769_v57 }
 0x16a   : > { %v1156_v63 = vadd.f32 %v1155_v61, %v1154_v39 }
 0x16b   : > { %v1135_v1 = vmul.f32 %v1035_v59, %v1035_v59  ;;  %v3772_v55 = vpop.f32.mrb[50].mxu0  ;;  %v895_v2 = vadd.f32 %v3771_v62, %v5729_v24  ;;  %v1100_v4 = vsel %vm1086_vm1, %v1035_v59, 0.0 }
 0x16c   : > { %v3773_v5 = vpop.f32.mrb[51].mxu0  ;;  %v1101_v7 = vadd.f32 %v1100_v4, %v1099_v10 }
 0x16d   : > { %v3774_v17 = vadd.f32 %v3773_v5, %v3772_v55  ;;  %v1040_v9 = vadd.f32 %v1039_v6, %v895_v2  ;;  %v1157_v11 = vsel %vm1086_vm1, %v1135_v1, 0.0 }
 0x16e   : > { %v1158_v12 = vadd.f32 %v1157_v11, %v1156_v63 }
 0x16f   : > { %v900_v53 = vadd.f32 %v3774_v17, %v5731_v32  ;;  %v1102_v50 = vsel %vm1086_vm1, %v1040_v9, 0.0  ;;  %v1136_v13 = vmul.f32 %v1040_v9, %v1040_v9  ;;  %v3775_v14 = vpop.f32.mrb[52].mxu0 }
 0x170   : > { %v1103_v18 = vadd.f32 %v1102_v50, %v1101_v7  ;;  %v3776_v19 = vpop.f32.mrb[53].mxu0 }
 0x171   : > { %v1045_v20 = vadd.f32 %v5754_v46, %v900_v53  ;;  %v1159_v24 = vsel %vm1086_vm1, %v1136_v13, 0.0  ;;  %v3777_v22 = vadd.f32 %v3776_v19, %v3775_v14 }
 0x172   : > { %v1160_v23 = vadd.f32 %v1159_v24, %v1158_v12 }
 0x173   : > { %v1137_v25 = vmul.f32 %v1045_v20, %v1045_v20  ;;  %v3778_v26 = vpop.f32.mrb[54].mxu0  ;;  %v905_v6 = vadd.f32 %v3777_v22, %v5733_v40  ;;  %v1104_v27 = vsel %vm1086_vm1, %v1045_v20, 0.0 }
 0x174   : > { %v3779_v60 = vpop.f32.mrb[55].mxu0  ;;  %v1105_v32 = vadd.f32 %v1104_v27, %v1103_v18 }
 0x175   : > { %v3780_v28 = vadd.f32 %v3779_v60, %v3778_v26  ;;  %v1050_v30 = vadd.f32 %v5762_v21, %v905_v6  ;;  %v1161_v33 = vsel %vm1086_vm1, %v1137_v25, 0.0 }
 0x176   : > { %v1162_v34 = vadd.f32 %v1161_v33, %v1160_v23 }
 0x177   : > { %v910_v46 = vadd.f32 %v3780_v28, %v5735_v48  ;;  %v1106_v37 = vsel %vm1086_vm1, %v1050_v30, 0.0  ;;  %v1138_v38 = vmul.f32 %v1050_v30, %v1050_v30  ;;  %v3781_v41 = vpop.f32.mrb[56].mxu0 }
 0x178   : > { %v1107_v42 = vadd.f32 %v1106_v37, %v1105_v32  ;;  %v3782_v3 = vpop.f32.mrb[57].mxu0 }
 0x179   : > { %v1055_v40 = vadd.f32 %v5759_v15, %v910_v46  ;;  %v1163_v43 = vsel %vm1086_vm1, %v1138_v38, 0.0  ;;  %v3783_v31 = vadd.f32 %v3782_v3, %v3781_v41  ;;  %v1127_v46 = vld [vmem:[#allocation3] sm:$0x1] }
 0x17a   : > { %v1164_v45 = vadd.f32 %v1163_v43, %v1162_v34 }
 0x17b   : > { %v1139_v47 = vmul.f32 %v1055_v40, %v1055_v40  ;;  %v3784_v35 = vpop.f32.mrb[58].mxu0  ;;  %v915_v21 = vadd.f32 %v3783_v31, %v5737_v56  ;;  %v1108_v39 = vsel %vm1086_vm1, %v1055_v40, 0.0 }
 0x17c   : > { %v3785_v51 = vpop.f32.mrb[59].mxu0  ;;  %v1109_v48 = vadd.f32 %v1108_v39, %v1107_v42 }
 0x17d   : > { %v3786_v52 = vadd.f32 %v3785_v51, %v3784_v35  ;;  %v1060_v54 = vadd.f32 %v5769_v36, %v915_v21  ;;  %v1165_v57 = vsel %vm1086_vm1, %v1139_v47, 0.0  ;;  %v1193_v35 = vld [vmem:[%s7134_s2] sm:$0x1] }
 0x17e   : > { %v1166_v10 = vadd.f32 %v1165_v57, %v1164_v45  ;;  %v1198_v51 = vld [vmem:[%s7135_s3] sm:$0x1] }
 0x17f   : > { %v920_v15 = vadd.f32 %v3786_v52, %v5739_v0  ;;  %v1110_v58 = vsel %vm1086_vm1, %v1060_v54, 0.0  ;;  %v1140_v59 = vmul.f32 %v1060_v54, %v1060_v54  ;;  %v3787_v61 = vpop.f32.mrb[60].mxu0 }
 0x180   : > { %v1111_v62 = vadd.f32 %v1110_v58, %v1109_v48  ;;  %v3788_v63 = vpop.f32.mrb[61].mxu0 }
 0x181   : > { %v1065_v56 = vadd.f32 %v5766_v29, %v920_v15  ;;  %v1167_v1 = vsel %vm1086_vm1, %v1140_v59, 0.0  ;;  %v3789_v55 = vadd.f32 %v3788_v63, %v3787_v61 }
 0x182   : > { %v1168_v2 = vadd.f32 %v1167_v1, %v1166_v10 }
 0x183   : > { %v1141_v4 = vmul.f32 %v1065_v56, %v1065_v56  ;;  %v3790_v5 = vpop.f32.mrb[62].mxu0  ;;  %v925_v36 = vadd.f32 %v3789_v55, %v5741_v8  ;;  %v1112_v7 = vsel %vm1086_vm1, %v1065_v56, 0.0 }
 0x184   : > { %v3791_v17 = vpop.f32.mrb[63].mxu0  ;;  %v1113_v0 = vadd.f32 %v1112_v7, %v1111_v62 }
 0x185   : > { %v3792_v9 = vadd.f32 %v3791_v17, %v3790_v5  ;;  %v1070_v11 = vadd.f32 %v5776_v49, %v925_v36  ;;  %v1169_v12 = vsel %vm1086_vm1, %v1141_v4, 0.0 }
 0x186   : > { %v1170_v53 = vadd.f32 %v1169_v12, %v1168_v2 }
 0x187   : > { %v930_v29 = vadd.f32 %v3792_v9, %v5743_v16  ;;  %v1114_v50 = vsel %vm1086_vm1, %v1070_v11, 0.0  ;;  %v1142_v13 = vmul.f32 %v1070_v11, %v1070_v11 }
 0x188   : > { %v1115_v14 = vadd.f32 %v1114_v50, %v1113_v0 }
 0x189   : > { %v1075_v18 = vadd.f32 %v5773_v44, %v930_v29  ;;  %v1171_v8 = vsel %vm1086_vm1, %v1142_v13, 0.0  ;;  %v1085_v44 = vld [vmem:[#allocation2] sm:$0x1] }
 0x18a   : > { %v1172_v19 = vadd.f32 %v1171_v8, %v1170_v53 }
 0x18b   : > { %v1143_v20 = vmul.f32 %v1075_v18, %v1075_v18  ;;  %v1116_v24 = vsel %vm1086_vm1, %v1075_v18, 0.0 }
 0x18c   : > { %v1117_v22 = vadd.f32 %v1116_v24, %v1115_v14 }
 0x18d   : > { %v1173_v49 = vsel %vm1086_vm1, %v1143_v20, 0.0 }
 0x18e   : > { %v1118_v23 = vrot.slane %v1117_v22, 4  ;;  %v1174_v25 = vadd.f32 %v1173_v49, %v1172_v19 }
 0x190   : > { %v1119_v26 = vadd.f32 %v1118_v23, %v1117_v22  ;;  %v1175_v6 = vrot.slane %v1174_v25, 4 }
 0x192   : > { %v1120_v16 = vrot.slane %v1119_v26, 2  ;;  %v1176_v27 = vadd.f32 %v1175_v6, %v1174_v25 }
 0x194   : > { %v1121_v60 = vadd.f32 %v1120_v16, %v1119_v26  ;;  %v1177_v32 = vrot.slane %v1176_v27, 2 }
 0x196   : > { %v1122_v28 = vrot.slane %v1121_v60, 1  ;;  %v1178_v30 = vadd.f32 %v1177_v32, %v1176_v27 }
 0x198   : > { %v1123_v33 = vadd.f32 %v1122_v28, %v1121_v60  ;;  %v1179_v34 = vrot.slane %v1178_v30, 1 }
 0x19a   : > { %v1124_v37 = vadd.f32 %v1123_v33, %v1085_v44  ;;  %v1180_v38 = vadd.f32 %v1179_v34, %v1178_v30 }
 0x19c   : > { %1126 = vst.msk [vmem:[#allocation2] sm:$0x1] %vm1082_vm0, %v1124_v37  ;;  %v1181_v41 = vadd.f32 %v1180_v38, %v1127_v46 }
 0x19e   : > { %1182 = vst.msk [vmem:[#allocation3] sm:$0x1] %vm1082_vm0, %v1181_v41 }
 0x1a3   : > { %v1186_v42 = vld [vmem:[#allocation2] sm:$0x1] }
 0x1a4   : > { %v1188_v3 = vmul.f32 0.0078125, %v1186_v42 }
 0x1a5   : > { %v1189_v40 = vld [vmem:[#allocation3] sm:$0x1] }
 0x1a6   : > { %v1190_v43 = vmul.f32 0.0078125, %v1189_v40  ;;  %v1191_v31 = vmul.f32 %v1188_v3, %v1188_v3 }
 0x1a8   : > { %v1192_v45 = vsub.f32 %v1190_v43, %v1191_v31 }
 0x1aa   : > { %v1194_v47 = vadd.f32 1e-05, %v1192_v45 }
 0x1ac   : > { %4920 = vrsqrt.f32 %v1194_v47 }
 0x1b6   : > { %v4921_v21 = vpop.eup %4920 }
 0x1b7   : > { %v1196_v39 = vmul.f32 %v4921_v21, %v1193_v35 }
 0x1b9   : > { %1197 = vst.msk [vmem:[#allocation4] sm:$0x1] %vm1082_vm0, %v1196_v39  ;;  %v1199_v48 = vmul.f32 %v1196_v39, %v1188_v3 }
 0x1bb   : > { %v1200_v52 = vsub.f32 %v1198_v51, %v1199_v48 }
 0x1bd   : > { %1201 = vst.msk [vmem:[#allocation5] sm:$0x1] %vm1082_vm0, %v1200_v52 }
 0x1be PF: > { %p3469_p5 = scmp.ne.s32.totalorder %s4966_s21, 1 }
 0x1bf   : > { %v1334_v54 = vld [vmem:[%s7133_s1 + $0x80] sm:$0xff] (!%p3469_p5)  ;;  %v1335_v57 = vld [vmem:[%s7133_s1 + $0x88] sm:$0xff] (!%p3469_p5)  ;;  %v1336_v59 = vld [vmem:[%s7133_s1 + $0x90] sm:$0xff] (!%p3469_p5)  ;;  %vm4978_vm2 = vmmov (!%p3469_p5), 0   ;;  %vm2087_vm3 = vcmask (!%p3469_p5), 1041409   ;;  %vm2089_vm4 = vcmask (!%p3469_p5), 261120  }
 0x1c0   : > { %1205 = sbr.rel (%p3469_p5) target bundleno = 1211 (0x4bb), region = 60  ;;  %v1318_v10 = vld [vmem:[%s7133_s1] sm:$0xff] (!%p3469_p5)  ;;  %v4593_v15 = vpack.c.bf16 (!%p3469_p5), %v1335_v57, %v1334_v54  ;;  %v1319_v58 = vld [vmem:[%s7133_s1 + $0x8] sm:$0xff] (!%p3469_p5)  ;;  %v1337_v61 = vld [vmem:[%s7133_s1 + $0x98] sm:$0xff] (!%p3469_p5) }
 0x1c1   : > { %v4595_v62 = vpack.c.bf16 (!%p3469_p5), %v1319_v58, %v1318_v10  ;;  %v4597_v63 = vpack.c.bf16 (!%p3469_p5), %v1337_v61, %v1336_v59  ;;  %v1320_v56 = vld [vmem:[%s7133_s1 + $0x10] sm:$0xff] (!%p3469_p5)  ;;  %v1321_v1 = vld [vmem:[%s7133_s1 + $0x18] sm:$0xff] (!%p3469_p5)  ;;  %v1338_v55 = vld [vmem:[%s7133_s1 + $0xa0] sm:$0xff] (!%p3469_p5) }
 0x1c2   : > { %4594 = vmatprep.subr.bf16.mxu0 (!%p3469_p5), %v4593_v15  ;;  %v1339_v2 = vld [vmem:[%s7133_s1 + $0xa8] sm:$0xff] (!%p3469_p5)  ;;  %v4599_v4 = vpack.c.bf16 (!%p3469_p5), %v1321_v1, %v1320_v56  ;;  %v1322_v36 = vld [vmem:[%s7133_s1 + $0x20] sm:$0xff] (!%p3469_p5)  ;;  %v1340_v17 = vld [vmem:[%s7133_s1 + $0xb0] sm:$0xff] (!%p3469_p5) }
 0x1c3   : > { %4596 = vmatpush3.bf16.msra.mxu0 (!%p3469_p5), %v4595_v62  ;;  %v4601_v5 = vpack.c.bf16 (!%p3469_p5), %v1339_v2, %v1338_v55  ;;  %v1323_v7 = vld [vmem:[%s7133_s1 + $0x28] sm:$0xff] (!%p3469_p5)  ;;  %v1341_v0 = vld [vmem:[%s7133_s1 + $0xb8] sm:$0xff] (!%p3469_p5)  ;;  %v1324_v12 = vld [vmem:[%s7133_s1 + $0x30] sm:$0xff] (!%p3469_p5) }
 0x1c4   : > { %4598 = vmatprep.subr.bf16.mxu0 (!%p3469_p5), %v4597_v63  ;;  %v4603_v9 = vpack.c.bf16 (!%p3469_p5), %v1323_v7, %v1322_v36  ;;  %v4605_v11 = vpack.c.bf16 (!%p3469_p5), %v1341_v0, %v1340_v17  ;;  %v1325_v53 = vld [vmem:[%s7133_s1 + $0x38] sm:$0xff] (!%p3469_p5)  ;;  %v1342_v29 = vld [vmem:[%s7133_s1 + $0xc0] sm:$0xff] (!%p3469_p5)  ;;  %v1343_v50 = vld [vmem:[%s7133_s1 + $0xc8] sm:$0xff] (!%p3469_p5) }
 0x1c5   : > { %v1207_v13 = vld [vmem:[%s7132_s0 + $0x8] sm:$0xff] (!%p3469_p5)  ;;  %v1326_v14 = vld [vmem:[%s7133_s1 + $0x40] sm:$0xff] (!%p3469_p5)  ;;  %v4607_v19 = vpack.c.bf16 (!%p3469_p5), %v1325_v53, %v1324_v12  ;;  %v4609_v23 = vpack.c.bf16 (!%p3469_p5), %v1343_v50, %v1342_v29  ;;  %v1344_v25 = vld [vmem:[%s7133_s1 + $0xd0] sm:$0xff] (!%p3469_p5) }
 0x1c6   : > { %1494 = vmatprep.mubr.f32.mxu0 (!%p3469_p5), %v1207_v13  ;;  %v1366_v18 = vld [vmem:[%s7133_s1 + $0x180] sm:$0xff] (!%p3469_p5)  ;;  %v1367_v8 = vld [vmem:[%s7133_s1 + $0x188] sm:$0xff] (!%p3469_p5)  ;;  %v1368_v6 = vld [vmem:[%s7133_s1 + $0x190] sm:$0xff] (!%p3469_p5) }
 0x1c7   : > { %4600 = vmatpush3.bf16.msra.mxu0 %v4599_v4  ;;  %v1327_v20 = vld [vmem:[%s7133_s1 + $0x48] sm:$0xff]  ;;  %v5894_v24 = vpack.c.bf16 %v1367_v8, %v1366_v18  ;;  %v1350_v22 = vld [vmem:[%s7133_s1 + $0x100] sm:$0xff]  ;;  %v1369_v16 = vld [vmem:[%s7133_s1 + $0x198] sm:$0xff] }
 0x1c8   : > { %4602 = vmatprep.subr.bf16.mxu0 %v4601_v5  ;;  %v1351_v49 = vld [vmem:[%s7133_s1 + $0x108] sm:$0xff]  ;;  %v1345_v27 = vld [vmem:[%s7133_s1 + $0xd8] sm:$0xff]  ;;  %v5917_v60 = vpack.c.bf16 %v1369_v16, %v1368_v6  ;;  %v1352_v32 = vld [vmem:[%s7133_s1 + $0x110] sm:$0xff]  ;;  %v4611_v34 = vpack.c.bf16 %v1327_v20, %v1326_v14 }
 0x1c9   : > { %v5905_v26 = vpack.c.bf16 %v1351_v49, %v1350_v22  ;;  %4817 = vmatprep.subr.bf16.mxu1 %v5894_v24  ;;  %v1353_v28 = vld [vmem:[%s7133_s1 + $0x118] sm:$0xff]  ;;  %v1370_v44 = vld [vmem:[%s7133_s1 + $0x1a0] sm:$0xff]  ;;  %v1371_v33 = vld [vmem:[%s7133_s1 + $0x1a8] sm:$0xff]  ;;  %v4613_v42 = vpack.c.bf16 %v1345_v27, %v1344_v25 }
 0x1ca   : > { %v5926_v30 = vpack.c.bf16 %v1353_v28, %v1352_v32  ;;  %v1328_v46 = vld [vmem:[%s7133_s1 + $0x50] sm:$0xff]  ;;  %v5938_v37 = vpack.c.bf16 %v1371_v33, %v1370_v44  ;;  %v1354_v38 = vld [vmem:[%s7133_s1 + $0x120] sm:$0xff]  ;;  %v1355_v41 = vld [vmem:[%s7133_s1 + $0x128] sm:$0xff] }
 0x1cb   : > { %4604 = vmatpush3.bf16.msra.mxu0 %v4603_v9  ;;  %4825 = vmatpush3.bf16.msra.mxu1 %v5905_v26  ;;  %v1329_v3 = vld [vmem:[%s7133_s1 + $0x58] sm:$0xff]  ;;  %v1372_v40 = vld [vmem:[%s7133_s1 + $0x1b0] sm:$0xff]  ;;  %v1346_v31 = vld [vmem:[%s7133_s1 + $0xe0] sm:$0xff]  ;;  %v5962_v47 = vpack.c.bf16 %v1355_v41, %v1354_v38 }
 0x1cc   : > { %4606 = vmatprep.subr.bf16.mxu0 %v4605_v11  ;;  %4818 = vmatprep.subr.bf16.mxu1 %v5917_v60  ;;  %v1373_v43 = vld [vmem:[%s7133_s1 + $0x1b8] sm:$0xff]  ;;  %v1347_v45 = vld [vmem:[%s7133_s1 + $0xe8] sm:$0xff]  ;;  %v4615_v35 = vpack.c.bf16 %v1329_v3, %v1328_v46  ;;  %v1330_v21 = vld [vmem:[%s7133_s1 + $0x60] sm:$0xff] }
 0x1cd   : > { %v5968_v39 = vpack.c.bf16 %v1373_v43, %v1372_v40  ;;  %v1356_v51 = vld [vmem:[%s7133_s1 + $0x130] sm:$0xff]  ;;  %v1357_v48 = vld [vmem:[%s7133_s1 + $0x138] sm:$0xff]  ;;  %v4617_v52 = vpack.c.bf16 %v1347_v45, %v1346_v31  ;;  %v1331_v54 = vld [vmem:[%s7133_s1 + $0x68] sm:$0xff] }
 0x1ce   : > { %v1374_v57 = vld [vmem:[%s7133_s1 + $0x1c0] sm:$0xff]  ;;  %v1375_v10 = vld [vmem:[%s7133_s1 + $0x1c8] sm:$0xff]  ;;  %v1348_v15 = vld [vmem:[%s7133_s1 + $0xf0] sm:$0xff]  ;;  %v5992_v59 = vpack.c.bf16 %v1357_v48, %v1356_v51  ;;  %v4619_v61 = vpack.c.bf16 %v1331_v54, %v1330_v21 }
 0x1cf   : > { %4608 = vmatpush3.bf16.msra.mxu0 %v4607_v19  ;;  %4826 = vmatpush3.bf16.msra.mxu1 %v5926_v30  ;;  %v1349_v58 = vld [vmem:[%s7133_s1 + $0xf8] sm:$0xff]  ;;  %v1332_v62 = vld [vmem:[%s7133_s1 + $0x70] sm:$0xff]  ;;  %v5998_v63 = vpack.c.bf16 %v1375_v10, %v1374_v57  ;;  %v1358_v56 = vld [vmem:[%s7133_s1 + $0x140] sm:$0xff] }
 0x1d0   : > { %4610 = vmatprep.subr.bf16.mxu0 %v4609_v23  ;;  %4819 = vmatprep.subr.bf16.mxu1 %v5938_v37  ;;  %v1359_v1 = vld [vmem:[%s7133_s1 + $0x148] sm:$0xff]  ;;  %v4621_v55 = vpack.c.bf16 %v1349_v58, %v1348_v15  ;;  %v1333_v2 = vld [vmem:[%s7133_s1 + $0x78] sm:$0xff]  ;;  %v1376_v4 = vld [vmem:[%s7133_s1 + $0x1d0] sm:$0xff] }
 0x1d1   : > { %v1377_v5 = vld [vmem:[%s7133_s1 + $0x1d8] sm:$0xff]  ;;  %v6016_v36 = vpack.c.bf16 %v1359_v1, %v1358_v56  ;;  %v4623_v17 = vpack.c.bf16 %v1333_v2, %v1332_v62  ;;  %v1360_v9 = vld [vmem:[%s7133_s1 + $0x150] sm:$0xff]  ;;  %v1378_v12 = vld [vmem:[%s7133_s1 + $0x1e0] sm:$0xff] }
 0x1d2   : > { %v1265_v7 = vld [vmem:[%s7132_s0 + $0x1d8] sm:$0xff]  ;;  %v6022_v0 = vpack.c.bf16 %v1377_v5, %v1376_v4  ;;  %v1379_v53 = vld [vmem:[%s7133_s1 + $0x1e8] sm:$0xff]  ;;  %v1206_v50 = vld [vmem:[%s7132_s0] sm:$0xff] }
 0x1d3   : > { %4612 = vmatpush3.bf16.msra.mxu0 %v4611_v34  ;;  %4827 = vmatpush3.bf16.msra.mxu1 %v5962_v47  ;;  %v1361_v11 = vld [vmem:[%s7133_s1 + $0x158] sm:$0xff]  ;;  %v1362_v13 = vld [vmem:[%s7133_s1 + $0x160] sm:$0xff]  ;;  %v1363_v14 = vld [vmem:[%s7133_s1 + $0x168] sm:$0xff]  ;;  %v6053_v8 = vpack.c.bf16 %v1379_v53, %v1378_v12 }
 0x1d4   : > { %4614 = vmatprep.subr.bf16.mxu0 %v4613_v42  ;;  %4820 = vmatprep.subr.bf16.mxu1 %v5968_v39  ;;  %v6037_v29 = vpack.c.bf16 %v1361_v11, %v1360_v9  ;;  %v1214_v18 = vld [vmem:[%s7132_s0 + $0x40] sm:$0xff]  ;;  %v1380_v19 = vld [vmem:[%s7133_s1 + $0x1f0] sm:$0xff]  ;;  %v1381_v20 = vld [vmem:[%s7133_s1 + $0x1f8] sm:$0xff]  ;;  %v6062_v22 = vpack.c.bf16 %v1363_v14, %v1362_v13 }
 0x1d5   : > { %1679 = vmatprep.mubr.f32.mxu1 %v1265_v7  ;;  %v1364_v49 = vld [vmem:[%s7133_s1 + $0x170] sm:$0xff]  ;;  %v1365_v23 = vld [vmem:[%s7133_s1 + $0x178] sm:$0xff]  ;;  %v1227_v32 = vld [vmem:[%s7132_s0 + $0xa8] sm:$0xff] }
 0x1d6   : > { %v1221_v25 = vld [vmem:[%s7132_s0 + $0x78] sm:$0xff]  ;;  %v6082_v6 = vpack.c.bf16 %v1365_v23, %v1364_v49  ;;  %v1220_v16 = vld [vmem:[%s7132_s0 + $0x70] sm:$0xff]  ;;  %v1271_v44 = vld [vmem:[%s7132_s0 + $0x208] sm:$0xff] }
 0x1d7   : > { %4616 = vmatpush3.bf16.msra.mxu0 %v4615_v35  ;;  %4828 = vmatpush3.bf16.msra.mxu1 %v5992_v59  ;;  %v1228_v27 = vld [vmem:[%s7132_s0 + $0xb0] sm:$0xff]  ;;  %v1234_v33 = vld [vmem:[%s7132_s0 + $0xe0] sm:$0xff]  ;;  %v1279_v34 = vld [vmem:[%s7132_s0 + $0x248] sm:$0xff] }
 0x1d8   : > { %4618 = vmatprep.subr.bf16.mxu0 %v4617_v52  ;;  %4821 = vmatprep.subr.bf16.mxu1 %v5998_v63  ;;  %v1272_v28 = vld [vmem:[%s7132_s0 + $0x210] sm:$0xff]  ;;  %v1242_v46 = vld [vmem:[%s7132_s0 + $0x120] sm:$0xff]  ;;  %v1241_v38 = vld [vmem:[%s7132_s0 + $0x118] sm:$0xff] }
 0x1d9   : > { %v1286_v41 = vld [vmem:[%s7132_s0 + $0x280] sm:$0xff]  ;;  %v1249_v3 = vld [vmem:[%s7132_s0 + $0x158] sm:$0xff]  ;;  %v1415_v40 = vld [vmem:[%s7133_s1 + $0x308] sm:$0xff] }
 0x1da   : > { %v1414_v42 = vld [vmem:[%s7133_s1 + $0x300] sm:$0xff]  ;;  %v1285_v31 = vld [vmem:[%s7132_s0 + $0x278] sm:$0xff]  ;;  %v1416_v45 = vld [vmem:[%s7133_s1 + $0x310] sm:$0xff] }
 0x1db   : > { %4620 = vmatpush3.bf16.msra.mxu0 %v4619_v61  ;;  %4829 = vmatpush3.bf16.msra.mxu1 %v6016_v36  ;;  %v6142_v43 = vpack.c.bf16 %v1415_v40, %v1414_v42  ;;  %v1248_v35 = vld [vmem:[%s7132_s0 + $0x150] sm:$0xff]  ;;  %v1293_v21 = vld [vmem:[%s7132_s0 + $0x2b8] sm:$0xff]  ;;  %v1398_v51 = vld [vmem:[%s7133_s1 + $0x280] sm:$0xff] }
 0x1dc   : > { %4622 = vmatprep.subr.bf16.mxu0 %v4621_v55  ;;  %4822 = vmatprep.subr.bf16.mxu1 %v6022_v0  ;;  %v1399_v48 = vld [vmem:[%s7133_s1 + $0x288] sm:$0xff]  ;;  %v1292_v54 = vld [vmem:[%s7132_s0 + $0x2b0] sm:$0xff]  ;;  %v1418_v57 = vld [vmem:[%s7133_s1 + $0x320] sm:$0xff] }
 0x1dd   : > { %v1419_v10 = vld [vmem:[%s7133_s1 + $0x328] sm:$0xff]  ;;  %v1300_v58 = vld [vmem:[%s7132_s0 + $0x2f0] sm:$0xff]  ;;  %v4657_v61 = vpack.c.bf16 %v1399_v48, %v1398_v51  ;;  %v1421_v1 = vld [vmem:[%s7133_s1 + $0x338] sm:$0xff] }
 0x1de   : > { %v1255_v15 = vld [vmem:[%s7132_s0 + $0x188] sm:$0xff]  ;;  %v6195_v62 = vpack.c.bf16 %v1419_v10, %v1418_v57  ;;  %v1420_v56 = vld [vmem:[%s7133_s1 + $0x330] sm:$0xff]  ;;  %v1262_v55 = vld [vmem:[%s7132_s0 + $0x1c0] sm:$0xff] }
 0x1df   : > { %4624 = vmatpush3.bf16.msra.mxu0 %v4623_v17  ;;  %4830 = vmatpush3.bf16.msra.mxu1 %v6037_v29  ;;  %v1307_v2 = vld [vmem:[%s7132_s0 + $0x328] sm:$0xff]  ;;  %v1270_v4 = vld [vmem:[%s7132_s0 + $0x200] sm:$0xff]  ;;  %v6218_v5 = vpack.c.bf16 %v1421_v1, %v1420_v56  ;;  %v1277_v11 = vld [vmem:[%s7132_s0 + $0x238] sm:$0xff] }
 0x1e0   : > { %4626 = vmatprep.subr.bf16.mxu0 %v5894_v24  ;;  %v1213_v24 = vld [vmem:[%s7132_s0 + $0x38] sm:$0xff]  ;;  %4823 = vmatprep.subr.bf16.mxu1 %v6053_v8  ;;  %v1422_v7 = vld [vmem:[%s7133_s1 + $0x340] sm:$0xff]  ;;  %v1423_v17 = vld [vmem:[%s7133_s1 + $0x348] sm:$0xff] }
 0x1e1   : > { %v1314_v9 = vld [vmem:[%s7132_s0 + $0x360] sm:$0xff]  ;;  %v6240_v12 = vpack.c.bf16 %v1423_v17, %v1422_v7  ;;  %v1313_v53 = vld [vmem:[%s7132_s0 + $0x358] sm:$0xff]  ;;  %v1276_v13 = vld [vmem:[%s7132_s0 + $0x230] sm:$0xff] }
 0x1e2   : > { %1495 = vmatmul.mubr.f32.vlgmr.msra.gmra.mrb[0].mxu0 %v1206_v50  ;;  %v1425_v50 = vld [vmem:[%s7133_s1 + $0x358] sm:$0xff]  ;;  %v1254_v14 = vld [vmem:[%s7132_s0 + $0x180] sm:$0xff]  ;;  %v1428_v23 = vld [vmem:[%s7133_s1 + $0x370] sm:$0xff] }
 0x1e3   : > { %4628 = vmatpush3.bf16.msra.mxu0 %v5905_v26  ;;  %1499 = vmatprep.mubr.f32.mxu0 %v1214_v18  ;;  %v6079_v26 = vpack.c.bf16 %v1381_v20, %v1380_v19  ;;  %v1284_v18 = vld [vmem:[%s7132_s0 + $0x270] sm:$0xff]  ;;  %v1426_v19 = vld [vmem:[%s7133_s1 + $0x360] sm:$0xff]  ;;  %v1427_v20 = vld [vmem:[%s7133_s1 + $0x368] sm:$0xff] }
 0x1e4   : > { %4630 = vmatprep.subr.bf16.mxu0 %v5917_v60  ;;  %4831 = vmatpush3.bf16.msra.mxu1 %v6062_v22  ;;  %v1264_v60 = vld [vmem:[%s7132_s0 + $0x1d0] sm:$0xff]  ;;  %v6278_v49 = vpack.c.bf16 %v1427_v20, %v1426_v19  ;;  %v1401_v42 = vld [vmem:[%s7133_s1 + $0x298] sm:$0xff]  ;;  %v1403_v51 = vld [vmem:[%s7133_s1 + $0x2a8] sm:$0xff] }
 0x1e5   : > { %4824 = vmatprep.subr.bf16.mxu1 %v6079_v26  ;;  %v1208_v40 = vld [vmem:[%s7132_s0 + $0x10] sm:$0xff]  ;;  %v1289_v48 = vld [vmem:[%s7132_s0 + $0x298] sm:$0xff]  ;;  %v1215_v57 = vld [vmem:[%s7132_s0 + $0x48] sm:$0xff] }
 0x1e6   : > { %1500 = vmatmul.mubr.f32.gmra.mrb[2].mxu0 %v1213_v24  ;;  %v1291_v24 = vld [vmem:[%s7132_s0 + $0x2a8] sm:$0xff]  ;;  %v1405_v56 = vld [vmem:[%s7133_s1 + $0x2b8] sm:$0xff]  ;;  %v1388_v17 = vld [vmem:[%s7133_s1 + $0x230] sm:$0xff] }
 0x1e7   : > { %1504 = vmatprep.mubr.f32.mxu0 %v1221_v25  ;;  %4632 = vmatpush3.bf16.msra.mxu0 %v5926_v30  ;;  %v1235_v30 = vld [vmem:[%s7132_s0 + $0xe8] sm:$0xff]  ;;  %v1429_v25 = vld [vmem:[%s7133_s1 + $0x378] sm:$0xff]  ;;  %v1408_v20 = vld [vmem:[%s7133_s1 + $0x2d0] sm:$0xff] }
 0x1e8   : > { %4634 = vmatprep.subr.bf16.mxu0 %v5938_v37  ;;  %4832 = vmatpush3.bf16.msra.mxu1 %v6082_v6  ;;  %v1278_v37 = vld [vmem:[%s7132_s0 + $0x240] sm:$0xff]  ;;  %v1303_v1 = vld [vmem:[%s7132_s0 + $0x308] sm:$0xff] }
 0x1e9   : > { %4833 = vmatprep.subr.bf16.mxu1 %v6142_v43  ;;  %v1391_v19 = vld [vmem:[%s7133_s1 + $0x248] sm:$0xff] }
 0x1ea   : > { %1505 = vmatmul.mubr.f32.gmra.mrb[4].mxu0 %v1220_v16  ;;  %v6294_v16 = vpack.c.bf16 %v1429_v25, %v1428_v23  ;;  %v1244_v25 = vld [vmem:[%s7132_s0 + $0x130] sm:$0xff] }
 0x1eb   : > { %1509 = vmatprep.mubr.f32.mxu0 %v1228_v27  ;;  %4636 = vmatpush3.bf16.msra.mxu0 %v5962_v47  ;;  %v1417_v47 = vld [vmem:[%s7133_s1 + $0x318] sm:$0xff] }
 0x1ec   : > { %4638 = vmatprep.subr.bf16.mxu0 %v5968_v39  ;;  %1680 = vmatmul.mubr.f32.vlgmr.msra.gmra.mrb[0].mxu1 %v1264_v60  ;;  %v1256_v39 = vld [vmem:[%s7132_s0 + $0x190] sm:$0xff]  ;;  %v6171_v52 = vpack.c.bf16 %v1417_v47, %v1416_v45  ;;  %v1297_v27 = vld [vmem:[%s7132_s0 + $0x2d8] sm:$0xff] }
 0x1ed   : > { %1684 = vmatprep.mubr.f32.mxu1 %v1272_v28  ;;  %4841 = vmatpush3.bf16.msra.mxu1 %v6142_v43  ;;  %v1305_v60 = vld [vmem:[%s7132_s0 + $0x318] sm:$0xff]  ;;  %v1312_v28 = vld [vmem:[%s7132_s0 + $0x350] sm:$0xff] }
 0x1ee   : > { %1510 = vmatmul.mubr.f32.gmra.mrb[6].mxu0 %v1227_v32  ;;  %4834 = vmatprep.subr.bf16.mxu1 %v6171_v52  ;;  %v1304_v32 = vld [vmem:[%s7132_s0 + $0x310] sm:$0xff] }
 0x1ef   : > { %1514 = vmatprep.mubr.f32.mxu0 %v1235_v30  ;;  %4640 = vmatpush3.bf16.msra.mxu0 %v5992_v59  ;;  %v1263_v59 = vld [vmem:[%s7132_s0 + $0x1c8] sm:$0xff]  ;;  %v1261_v30 = vld [vmem:[%s7132_s0 + $0x1b8] sm:$0xff]  ;;  %v1216_v45 = vld [vmem:[%s7132_s0 + $0x50] sm:$0xff] }
 0x1f0   : > { %4642 = vmatprep.subr.bf16.mxu0 %v5998_v63  ;;  %1685 = vmatmul.mubr.f32.gmra.mrb[2].mxu1 %v1271_v44  ;;  %v1299_v63 = vld [vmem:[%s7132_s0 + $0x2e8] sm:$0xff]  ;;  %v1268_v44 = vld [vmem:[%s7132_s0 + $0x1f0] sm:$0xff] }
 0x1f1   : > { %1689 = vmatprep.mubr.f32.mxu1 %v1279_v34  ;;  %4842 = vmatpush3.bf16.msra.mxu1 %v6171_v52  ;;  %v1209_v34 = vld [vmem:[%s7132_s0 + $0x18] sm:$0xff] }
 0x1f2   : > { %1515 = vmatmul.mubr.f32.gmra.mrb[8].mxu0 %v1234_v33  ;;  %4835 = vmatprep.subr.bf16.mxu1 %v6195_v62  ;;  %v1311_v33 = vld [vmem:[%s7132_s0 + $0x348] sm:$0xff] }
 0x1f3   : > { %1519 = vmatprep.mubr.f32.mxu0 %v1242_v46  ;;  %4644 = vmatpush3.bf16.msra.mxu0 %v6016_v36  ;;  %v1306_v36 = vld [vmem:[%s7132_s0 + $0x320] sm:$0xff] }
 0x1f4   : > { %4646 = vmatprep.subr.bf16.mxu0 %v6022_v0  ;;  %1690 = vmatmul.mubr.f32.gmra.mrb[4].mxu1 %v1278_v37  ;;  %v1269_v0 = vld [vmem:[%s7132_s0 + $0x1f8] sm:$0xff]  ;;  %v1382_v46 = vld [vmem:[%s7133_s1 + $0x200] sm:$0xff]  ;;  %v1383_v37 = vld [vmem:[%s7133_s1 + $0x208] sm:$0xff] }
 0x1f5   : > { %1694 = vmatprep.mubr.f32.mxu1 %v1286_v41  ;;  %4843 = vmatpush3.bf16.msra.mxu1 %v6195_v62  ;;  %v1400_v41 = vld [vmem:[%s7133_s1 + $0x290] sm:$0xff] }
 0x1f6   : > { %1520 = vmatmul.mubr.f32.gmra.mrb[10].mxu0 %v1241_v38  ;;  %4836 = vmatprep.subr.bf16.mxu1 %v6218_v5  ;;  %v1275_v38 = vld [vmem:[%s7132_s0 + $0x228] sm:$0xff]  ;;  %v4661_v47 = vpack.c.bf16 %v1401_v42, %v1400_v41  ;;  %v1250_v41 = vld [vmem:[%s7132_s0 + $0x160] sm:$0xff] }
 0x1f7   : > { %1524 = vmatprep.mubr.f32.mxu0 %v1249_v3  ;;  %4648 = vmatpush3.bf16.msra.mxu0 %v6037_v29  ;;  %v1424_v29 = vld [vmem:[%s7133_s1 + $0x350] sm:$0xff]  ;;  %v1282_v3 = vld [vmem:[%s7132_s0 + $0x260] sm:$0xff] }
 0x1f8   : > { %4650 = vmatprep.subr.bf16.mxu0 %v6053_v8  ;;  %1695 = vmatmul.mubr.f32.gmra.mrb[6].mxu1 %v1285_v31  ;;  %v6262_v8 = vpack.c.bf16 %v1425_v50, %v1424_v29  ;;  %v4659_v31 = vpack.c.bf16 %v1383_v37, %v1382_v46  ;;  %v1229_v29 = vld [vmem:[%s7132_s0 + $0xb8] sm:$0xff]  ;;  %v1395_v46 = vld [vmem:[%s7133_s1 + $0x268] sm:$0xff]  ;;  %v1412_v37 = vld [vmem:[%s7133_s1 + $0x2f0] sm:$0xff] }
 0x1f9   : > { %1699 = vmatprep.mubr.f32.mxu1 %v1293_v21  ;;  %4844 = vmatpush3.bf16.msra.mxu1 %v6218_v5  ;;  %v1385_v21 = vld [vmem:[%s7133_s1 + $0x218] sm:$0xff] }
 0x1fa   : > { %1525 = vmatmul.mubr.f32.gmra.mrb[12].mxu0 %v1248_v35  ;;  %4837 = vmatprep.subr.bf16.mxu1 %v6240_v12  ;;  %v1384_v35 = vld [vmem:[%s7133_s1 + $0x210] sm:$0xff] }
 0x1fb   : > { %1529 = vmatprep.mubr.f32.mxu0 %v1256_v39  ;;  %4652 = vmatpush3.bf16.msra.mxu0 %v6062_v22  ;;  %v1283_v22 = vld [vmem:[%s7132_s0 + $0x268] sm:$0xff]  ;;  %v1402_v39 = vld [vmem:[%s7133_s1 + $0x2a0] sm:$0xff]  ;;  %v4663_v10 = vpack.c.bf16 %v1385_v21, %v1384_v35 }
 0x1fc   : > { %4654 = vmatprep.subr.bf16.mxu0 %v6079_v26  ;;  %1700 = vmatmul.mubr.f32.gmra.mrb[8].mxu1 %v1292_v54  ;;  %v1290_v26 = vld [vmem:[%s7132_s0 + $0x2a0] sm:$0xff]  ;;  %v1296_v54 = vld [vmem:[%s7132_s0 + $0x2d0] sm:$0xff]  ;;  %v1211_v21 = vld [vmem:[%s7132_s0 + $0x28] sm:$0xff] }
 0x1fd   : > { %1704 = vmatprep.mubr.f32.mxu1 %v1300_v58  ;;  %4845 = vmatpush3.bf16.msra.mxu1 %v6240_v12  ;;  %v4665_v58 = vpack.c.bf16 %v1403_v51, %v1402_v39  ;;  %v1210_v39 = vld [vmem:[%s7132_s0 + $0x20] sm:$0xff] }
 0x1fe   : > { %1530 = vmatmul.mubr.f32.gmra.mrb[14].mxu0 %v1255_v15  ;;  %4838 = vmatprep.subr.bf16.mxu1 %v6262_v8  ;;  %v1223_v15 = vld [vmem:[%s7132_s0 + $0x88] sm:$0xff]  ;;  %v1218_v51 = vld [vmem:[%s7132_s0 + $0x60] sm:$0xff] }
 0x1ff   : > { %1534 = vmatprep.mubr.f32.mxu0 %v1263_v59  ;;  %4656 = vmatpush3.bf16.msra.mxu0 %v6082_v6  ;;  %v1298_v6 = vld [vmem:[%s7132_s0 + $0x2e0] sm:$0xff] }
 0x200   : > { %4658 = vmatprep.subr.bf16.mxu0 %v4657_v61  ;;  %1705 = vmatmul.mubr.f32.gmra.mrb[10].mxu1 %v1299_v63  ;;  %v1386_v59 = vld [vmem:[%s7133_s1 + $0x220] sm:$0xff]  ;;  %v1387_v61 = vld [vmem:[%s7133_s1 + $0x228] sm:$0xff]  ;;  %v1404_v63 = vld [vmem:[%s7133_s1 + $0x2b0] sm:$0xff] }
 0x201   : > { %1709 = vmatprep.mubr.f32.mxu1 %v1307_v2  ;;  %4846 = vmatpush3.bf16.msra.mxu1 %v6262_v8  ;;  %v1222_v2 = vld [vmem:[%s7132_s0 + $0x80] sm:$0xff]  ;;  %v4669_v7 = vpack.c.bf16 %v1405_v56, %v1404_v63  ;;  %v1267_v63 = vld [vmem:[%s7132_s0 + $0x1e8] sm:$0xff] }
 0x202   : > { %1535 = vmatmul.mubr.f32.gmra.mrb[16].mxu0 %v1262_v55  ;;  %4839 = vmatprep.subr.bf16.mxu1 %v6278_v49  ;;  %v1310_v55 = vld [vmem:[%s7132_s0 + $0x340] sm:$0xff] }
 0x203   : > { %1539 = vmatprep.mubr.f32.mxu0 %v1270_v4  ;;  %v4667_v4 = vpack.c.bf16 %v1387_v61, %v1386_v59  ;;  %v1253_v59 = vld [vmem:[%s7132_s0 + $0x178] sm:$0xff]  ;;  %v1260_v61 = vld [vmem:[%s7132_s0 + $0x1b0] sm:$0xff]  ;;  %v1274_v56 = vld [vmem:[%s7132_s0 + $0x220] sm:$0xff] }
 0x204   : > { %1710 = vmatmul.mubr.f32.gmra.mrb[12].mxu1 %v1306_v36  ;;  %v1230_v36 = vld [vmem:[%s7132_s0 + $0xc0] sm:$0xff] }
 0x205   : > { %1714 = vmatprep.mubr.f32.mxu1 %v1314_v9  ;;  %4847 = vmatpush3.bf16.msra.mxu1 %v6278_v49  ;;  %v1406_v9 = vld [vmem:[%s7133_s1 + $0x2c0] sm:$0xff] }
 0x206   : > { %1540 = vmatmul.mubr.f32.gmra.mrb[18].mxu0 %v1269_v0  ;;  %4840 = vmatprep.subr.bf16.mxu1 %v6294_v16  ;;  %v1389_v0 = vld [vmem:[%s7133_s1 + $0x238] sm:$0xff] }
 0x207   : > { %1544 = vmatprep.mubr.f32.mxu0 %v1277_v11  ;;  %v1407_v11 = vld [vmem:[%s7133_s1 + $0x2c8] sm:$0xff]  ;;  %v4671_v50 = vpack.c.bf16 %v1389_v0, %v1388_v17  ;;  %v1301_v17 = vld [vmem:[%s7132_s0 + $0x2f8] sm:$0xff] }
 0x208   : > { %1715 = vmatmul.mubr.f32.gmra.mrb[14].mxu1 %v1313_v53  ;;  %v1317_v53 = vld [vmem:[%s7132_s0 + $0x378] sm:$0xff] }
 0x209   : > { %4274 = vmatprep.mubr.f32.mxu1 %v1254_v14  ;;  %4848 = vmatpush3.bf16.msra.mxu1 %v6294_v16  ;;  %v4673_v14 = vpack.c.bf16 %v1407_v11, %v1406_v9  ;;  %v1309_v0 = vld [vmem:[%s7132_s0 + $0x338] sm:$0xff]  ;;  %v1308_v9 = vld [vmem:[%s7132_s0 + $0x330] sm:$0xff] }
 0x20a   : > { %1545 = vmatmul.mubr.f32.gmra.mrb[20].mxu0 %v1276_v13  ;;  %v1237_v13 = vld [vmem:[%s7132_s0 + $0xf8] sm:$0xff]  ;;  %v1316_v11 = vld [vmem:[%s7132_s0 + $0x370] sm:$0xff] }
 0x20b   : > { %1549 = vmatprep.mubr.f32.mxu0 %v1284_v18  ;;  %v1390_v18 = vld [vmem:[%s7133_s1 + $0x240] sm:$0xff] }
 0x20c   : > { %4275 = vmatmul.mubr.f32.vlgmr.msra.gmra.mrb[16].mxu1 %v1261_v30  ;;  %v4675_v23 = vpack.c.bf16 %v1391_v19, %v1390_v18  ;;  %v1240_v18 = vld [vmem:[%s7132_s0 + $0x110] sm:$0xff]  ;;  %v1247_v19 = vld [vmem:[%s7132_s0 + $0x148] sm:$0xff] }
 0x20d   : > { %4277 = vmatprep.mubr.f32.mxu1 %v1268_v44  ;;  %v1251_v44 = vld [vmem:[%s7132_s0 + $0x168] sm:$0xff] }
 0x20e   : > { %1550 = vmatmul.mubr.f32.gmra.mrb[22].mxu0 %v1283_v22  ;;  %v1409_v22 = vld [vmem:[%s7133_s1 + $0x2d8] sm:$0xff] }
 0x20f   : > { %1554 = vmatprep.mubr.f32.mxu0 %v1291_v24  ;;  %v1236_v24 = vld [vmem:[%s7132_s0 + $0xf0] sm:$0xff] }
 0x210   : > { %4278 = vmatmul.mubr.f32.gmra.mrb[18].mxu1 %v1275_v38  ;;  %v1413_v38 = vld [vmem:[%s7133_s1 + $0x2f8] sm:$0xff] }
 0x211   : > { %4280 = vmatprep.mubr.f32.mxu1 %v1282_v3  ;;  %v1258_v3 = vld [vmem:[%s7132_s0 + $0x1a0] sm:$0xff] }
 0x212   : > { %1555 = vmatmul.mubr.f32.gmra.mrb[24].mxu0 %v1290_v26  ;;  %v4677_v26 = vpack.c.bf16 %v1409_v22, %v1408_v20 }
 0x213   : > { %1559 = vmatprep.mubr.f32.mxu0 %v1298_v6  ;;  %v1392_v6 = vld [vmem:[%s7133_s1 + $0x250] sm:$0xff] }
 0x214   : > { %4281 = vmatmul.mubr.f32.gmra.mrb[20].mxu1 %v1289_v48  ;;  %v1217_v48 = vld [vmem:[%s7132_s0 + $0x58] sm:$0xff] }
 0x215   : > { %4283 = vmatprep.mubr.f32.mxu1 %v1296_v54  ;;  %v1225_v54 = vld [vmem:[%s7132_s0 + $0x98] sm:$0xff] }
 0x216   : > { %1560 = vmatmul.mubr.f32.gmra.mrb[26].mxu0 %v1297_v27  ;;  %v1393_v27 = vld [vmem:[%s7133_s1 + $0x258] sm:$0xff] }
 0x217   : > { %1564 = vmatprep.mubr.f32.mxu0 %v1305_v60  ;;  %v1410_v60 = vld [vmem:[%s7133_s1 + $0x2e0] sm:$0xff]  ;;  %v4679_v30 = vpack.c.bf16 %v1393_v27, %v1392_v6 }
 0x218   : > { %4284 = vmatmul.mubr.f32.gmra.mrb[22].mxu1 %v1303_v1  ;;  %v1281_v1 = vld [vmem:[%s7132_s0 + $0x258] sm:$0xff] }
 0x219   : > { %4286 = vmatprep.mubr.f32.mxu1 %v1310_v55  ;;  %v1288_v55 = vld [vmem:[%s7132_s0 + $0x290] sm:$0xff] }
 0x21a   : > { %1565 = vmatmul.mubr.f32.gmra.mrb[28].mxu0 %v1304_v32  ;;  %v1411_v32 = vld [vmem:[%s7133_s1 + $0x2e8] sm:$0xff] }
 0x21b   : > { %1569 = vmatprep.mubr.f32.mxu0 %v1312_v28  ;;  %v1243_v28 = vld [vmem:[%s7132_s0 + $0x128] sm:$0xff] }
 0x21c   : > { %4287 = vmatmul.mubr.f32.gmra.mrb[24].mxu1 %v1317_v53  ;;  %v1315_v53 = vld [vmem:[%s7132_s0 + $0x368] sm:$0xff] }
 0x21e   : > { %1570 = vmatmul.mubr.f32.gmra.mrb[30].mxu0 %v1311_v33  ;;  %v4681_v33 = vpack.c.bf16 %v1411_v32, %v1410_v60 }
 0x21f   : > { %1639 = vmatprep.mubr.f32.mxu0 %v1209_v34  ;;  %v1394_v34 = vld [vmem:[%s7133_s1 + $0x260] sm:$0xff] }
 0x220   : > { %v4683_v42 = vpack.c.bf16 %v1395_v46, %v1394_v34 }
 0x222   : > { %1640 = vmatmul.mubr.f32.vlgmr.msra.gmra.mrb[32].mxu0 %v1208_v40  ;;  %v4685_v40 = vpack.c.bf16 %v1413_v38, %v1412_v37 }
 0x223   : > { %4660 = vmatpush3.bf16.msra.mxu0 %v4659_v31  ;;  %1644 = vmatprep.mubr.f32.mxu0 %v1216_v45  ;;  %v1396_v31 = vld [vmem:[%s7133_s1 + $0x270] sm:$0xff]  ;;  %v1397_v45 = vld [vmem:[%s7133_s1 + $0x278] sm:$0xff] }
 0x224   : > { %4662 = vmatprep.subr.bf16.mxu0 %v4661_v47  ;;  %v1257_v47 = vld [vmem:[%s7132_s0 + $0x198] sm:$0xff]  ;;  %v4687_v35 = vpack.c.bf16 %v1397_v45, %v1396_v31 }
 0x226   : > { %1645 = vmatmul.mubr.f32.gmra.mrb[34].mxu0 %v1215_v57  ;;  %v1224_v57 = vld [vmem:[%s7132_s0 + $0x90] sm:$0xff] }
 0x227   : > { %4664 = vmatpush3.bf16.msra.mxu0 %v4663_v10  ;;  %1649 = vmatprep.mubr.f32.mxu0 %v1223_v15  ;;  %v1231_v10 = vld [vmem:[%s7132_s0 + $0xc8] sm:$0xff] }
 0x228   : > { %4666 = vmatprep.subr.bf16.mxu0 %v4665_v58  ;;  %v1239_v15 = vld [vmem:[%s7132_s0 + $0x108] sm:$0xff]  ;;  %v1246_v58 = vld [vmem:[%s7132_s0 + $0x140] sm:$0xff] }
 0x22a   : > { %1650 = vmatmul.mubr.f32.gmra.mrb[36].mxu0 %v1222_v2  ;;  %v1287_v2 = vld [vmem:[%s7132_s0 + $0x288] sm:$0xff] }
 0x22b   : > { %4668 = vmatpush3.bf16.msra.mxu0 %v4667_v4  ;;  %1654 = vmatprep.mubr.f32.mxu0 %v1230_v36  ;;  %v1295_v4 = vld [vmem:[%s7132_s0 + $0x2c8] sm:$0xff]  ;;  %v1294_v36 = vld [vmem:[%s7132_s0 + $0x2c0] sm:$0xff] }
 0x22c   : > { %4670 = vmatprep.subr.bf16.mxu0 %v4669_v7  ;;  %v1302_v7 = vld [vmem:[%s7132_s0 + $0x300] sm:$0xff] }
 0x22e   : > { %1655 = vmatmul.mubr.f32.gmra.mrb[38].mxu0 %v1229_v29  ;;  %v1212_v29 = vld [vmem:[%s7132_s0 + $0x30] sm:$0xff] }
 0x22f   : > { %4672 = vmatpush3.bf16.msra.mxu0 %v4671_v50  ;;  %1659 = vmatprep.mubr.f32.mxu0 %v1237_v13  ;;  %v1219_v50 = vld [vmem:[%s7132_s0 + $0x68] sm:$0xff]  ;;  %v1226_v13 = vld [vmem:[%s7132_s0 + $0xa0] sm:$0xff] }
 0x230   : > { %4674 = vmatprep.subr.bf16.mxu0 %v4673_v14  ;;  %v1233_v14 = vld [vmem:[%s7132_s0 + $0xd8] sm:$0xff] }
 0x232   : > { %1660 = vmatmul.mubr.f32.gmra.mrb[40].mxu0 %v1236_v24 }
 0x233   : > { %4676 = vmatpush3.bf16.msra.mxu0 %v4675_v23  ;;  %1664 = vmatprep.mubr.f32.mxu0 %v1244_v25 }
 0x234   : > { %4678 = vmatprep.subr.bf16.mxu0 %v4677_v26 }
 0x236   : > { %1665 = vmatmul.mubr.f32.gmra.mrb[42].mxu0 %v1243_v28 }
 0x237   : > { %4680 = vmatpush3.bf16.msra.mxu0 %v4679_v30  ;;  %1669 = vmatprep.mubr.f32.mxu0 %v1251_v44 }
 0x238   : > { %4682 = vmatprep.subr.bf16.mxu0 %v4681_v33 }
 0x23a   : > { %1670 = vmatmul.mubr.f32.gmra.mrb[44].mxu0 %v1250_v41 }
 0x23b   : > { %4684 = vmatpush3.bf16.msra.mxu0 %v4683_v42  ;;  %1674 = vmatprep.mubr.f32.mxu0 %v1258_v3 }
 0x23c   : > { %4686 = vmatprep.subr.bf16.mxu0 %v4685_v40 }
 0x23e   : > { %1675 = vmatmul.mubr.f32.gmra.mrb[46].mxu0 %v1257_v47 }
 0x23f   : > { %4688 = vmatpush3.bf16.msra.mxu0 %v4687_v35  ;;  %1784 = vmatprep.mubr.f32.mxu0 %v1211_v21 }
 0x240   : > { %4690 = vmatprep.subr.bf16.mxu0 %v6142_v43 }
 0x242   : > { %1785 = vmatmul.mubr.f32.vlgmr.msra.gmra.mrb[48].mxu0 %v1210_v39 }
 0x243   : > { %4692 = vmatpush3.bf16.msra.mxu0 %v6142_v43  ;;  %1789 = vmatprep.mubr.f32.mxu0 %v1218_v51  ;;  %v1232_v43 = vld [vmem:[%s7132_s0 + $0xd0] sm:$0xff] }
 0x244   : > { %4694 = vmatprep.subr.bf16.mxu0 %v6171_v52 }
 0x246   : > { %1790 = vmatmul.mubr.f32.gmra.mrb[50].mxu0 %v1217_v48 }
 0x247   : > { %1794 = vmatprep.mubr.f32.mxu0 %v1225_v54  ;;  %4696 = vmatpush3.bf16.msra.mxu0 %v6171_v52  ;;  %v1238_v52 = vld [vmem:[%s7132_s0 + $0x100] sm:$0xff] }
 0x248   : > { %4698 = vmatprep.subr.bf16.mxu0 %v6195_v62 }
 0x24a   : > { %1795 = vmatmul.mubr.f32.gmra.mrb[52].mxu0 %v1224_v57 }
 0x24b   : > { %1799 = vmatprep.mubr.f32.mxu0 %v1232_v43  ;;  %4700 = vmatpush3.bf16.msra.mxu0 %v6195_v62  ;;  %v1245_v62 = vld [vmem:[%s7132_s0 + $0x138] sm:$0xff] }
 0x24c   : > { %4702 = vmatprep.subr.bf16.mxu0 %v6218_v5 }
 0x24e   : > { %1800 = vmatmul.mubr.f32.gmra.mrb[54].mxu0 %v1231_v10 }
 0x24f   : > { %1804 = vmatprep.mubr.f32.mxu0 %v1239_v15  ;;  %4704 = vmatpush3.bf16.msra.mxu0 %v6218_v5  ;;  %v1252_v5 = vld [vmem:[%s7132_s0 + $0x170] sm:$0xff] }
 0x250   : > { %4706 = vmatprep.subr.bf16.mxu0 %v6240_v12 }
 0x252   : > { %1805 = vmatmul.mubr.f32.gmra.mrb[56].mxu0 %v1238_v52 }
 0x253   : > { %1809 = vmatprep.mubr.f32.mxu0 %v1246_v58  ;;  %4708 = vmatpush3.bf16.msra.mxu0 %v6240_v12  ;;  %v1259_v12 = vld [vmem:[%s7132_s0 + $0x1a8] sm:$0xff] }
 0x254   : > { %4710 = vmatprep.subr.bf16.mxu0 %v6262_v8 }
 0x256   : > { %1810 = vmatmul.mubr.f32.gmra.mrb[58].mxu0 %v1245_v62 }
 0x257   : > { %1814 = vmatprep.mubr.f32.mxu0 %v1253_v59  ;;  %4712 = vmatpush3.bf16.msra.mxu0 %v6262_v8  ;;  %v1266_v8 = vld [vmem:[%s7132_s0 + $0x1e0] sm:$0xff] }
 0x258   : > { %4714 = vmatprep.subr.bf16.mxu0 %v6278_v49 }
 0x25a   : > { %1815 = vmatmul.mubr.f32.gmra.mrb[60].mxu0 %v1252_v5 }
 0x25b   : > { %1819 = vmatprep.mubr.f32.mxu0 %v1260_v61  ;;  %4716 = vmatpush3.bf16.msra.mxu0 %v6278_v49  ;;  %v1273_v49 = vld [vmem:[%s7132_s0 + $0x218] sm:$0xff] }
 0x25c   : > { %4718 = vmatprep.subr.bf16.mxu0 %v6294_v16 }
 0x25e   : > { %1820 = vmatmul.mubr.f32.gmra.mrb[62].mxu0 %v1259_v12 }
 0x25f   : > { %1824 = vmatprep.mubr.f32.mxu0 %v1267_v63  ;;  %4720 = vmatpush3.bf16.msra.mxu0 %v6294_v16  ;;  %v1280_v16 = vld [vmem:[%s7132_s0 + $0x250] sm:$0xff] }
 0x262   : > { %1825 = vmatmul.mubr.f32.gmra.mrb[64].mxu0 %v1266_v8 }
 0x263   : > { %1829 = vmatprep.mubr.f32.mxu0 %v1274_v56 }
 0x266   : > { %1830 = vmatmul.mubr.f32.gmra.mrb[66].mxu0 %v1273_v49 }
 0x267   : > { %1834 = vmatprep.mubr.f32.mxu0 %v1281_v1 }
 0x26a   : > { %1835 = vmatmul.mubr.f32.gmra.mrb[68].mxu0 %v1280_v16 }
 0x26b   : > { %1839 = vmatprep.mubr.f32.mxu0 %v1288_v55 }
 0x26e   : > { %1840 = vmatmul.mubr.f32.gmra.mrb[70].mxu0 %v1287_v2 }
 0x26f   : > { %1844 = vmatprep.mubr.f32.mxu0 %v1295_v4 }
 0x272   : > { %1845 = vmatmul.mubr.f32.gmra.mrb[72].mxu0 %v1294_v36 }
 0x273   : > { %1849 = vmatprep.mubr.f32.mxu0 %v1302_v7 }
 0x276   : > { %1850 = vmatmul.mubr.f32.gmra.mrb[74].mxu0 %v1301_v17  ;;  %v4977_v17 = vmov 0.0|0.0  }
 0x277   : > { %1854 = vmatprep.mubr.f32.mxu0 %v1309_v0  ;;  %4721 = vmatprep.subr.bf16.mxu1 %v4977_v17 }
 0x27a   : > { %1855 = vmatmul.mubr.f32.gmra.mrb[76].mxu0 %v1308_v9 }
 0x27b   : > { %1859 = vmatprep.mubr.f32.mxu0 %v1316_v11 }
 0x27e   : > { %1860 = vmatmul.mubr.f32.gmra.mrb[78].mxu0 %v1315_v53 }
 0x27f   : > { %4265 = vmatprep.mubr.f32.mxu0 %v1212_v29 }
 0x282   : > { %4266 = vmatmul.mubr.f32.vlgmr.msra.gmra.mrb[80].mxu0 %v1219_v50 }
 0x283   : > { %4268 = vmatprep.mubr.f32.mxu0 %v1226_v13 }
 0x286   : > { %4269 = vmatmul.mubr.f32.gmra.mrb[82].mxu0 %v1233_v14 }
 0x287   : > { %4271 = vmatprep.mubr.f32.mxu0 %v1240_v18 }
 0x28a   : > { %4272 = vmatmul.mubr.f32.gmra.mrb[84].mxu0 %v1247_v19  ;;  %v2080_v19 = vld [vmem:[%s7136_s4] sm:$0xff] }
 0x2b5   : > { %v3857_v20 = vpop.f32.mrb[0].mxu0 }
 0x2b6   : > { %v3858_v22 = vpop.f32.mrb[1].mxu0 }
 0x2b7   : > { %v6609_v24 = vadd.f32 %v3858_v22, %v3857_v20  ;;  %v2081_v20 = vld [vmem:[%s7136_s4 + $0x8] sm:$0xff] }
 0x2b9   : > { %v3860_v23 = vpop.f32.mrb[2].mxu0 }
 0x2ba   : > { %v3861_v25 = vpop.f32.mrb[3].mxu0 }
 0x2bb   : > { %v6611_v26 = vadd.f32 %v3861_v25, %v3860_v23  ;;  %v4722_v23 = vpack.c.bf16 %v2081_v20, %v2080_v19 }
 0x2bd   : > { %v3863_v6 = vpop.f32.mrb[4].mxu0  ;;  %4723 = vmatpush3.bf16.msra.mxu1 %v4722_v23 }
 0x2be   : > { %v3864_v27 = vpop.f32.mrb[5].mxu0  ;;  %4724 = vmatprep.subr.bf16.mxu1 %v4977_v17 }
 0x2bf   : > { %v6613_v60 = vadd.f32 %v3864_v27, %v3863_v6  ;;  %v3961_v32 = vpop.f32.mrb[0].mxu1 }
 0x2c0   : > { %v3962_v30 = vpop.f32.mrb[1].mxu1 }
 0x2c1   : > { %v3866_v28 = vpop.f32.mrb[6].mxu0  ;;  %v3963_v33 = vadd.f32 %v3962_v30, %v3961_v32  ;;  %v2082_v32 = vld [vmem:[%s7136_s4 + $0x10] sm:$0xff] }
 0x2c2   : > { %v3867_v44 = vpop.f32.mrb[7].mxu0 }
 0x2c3   : > { %v6615_v34 = vadd.f32 %v3867_v44, %v3866_v28  ;;  %v3964_v46 = vpop.f32.mrb[2].mxu1  ;;  %v2083_v28 = vld [vmem:[%s7136_s4 + $0x18] sm:$0xff] }
 0x2c4   : > { %v3965_v38 = vpop.f32.mrb[3].mxu1  ;;  %v4725_v44 = vpack.c.bf16 %v2083_v28, %v2082_v32 }
 0x2c5   : > { %v3869_v37 = vpop.f32.mrb[8].mxu0  ;;  %v3966_v42 = vadd.f32 %v3965_v38, %v3964_v46  ;;  %v4979_v38 = vmov 0.0  }
 0x2c6   : > { %v3870_v41 = vpop.f32.mrb[9].mxu0  ;;  %4726 = vmatpush3.bf16.msra.mxu1 %v4725_v44  ;;  %4297 = vmatprep.mubr.msk.f32.mxu1 %vm4978_vm2, %v4979_v38 }
 0x2c7   : > { %v6617_v3 = vadd.f32 %v3870_v41, %v3869_v37  ;;  %v3967_v40 = vpop.f32.mrb[4].mxu1  ;;  %4727 = vmatprep.subr.bf16.mxu1 %v4977_v17 }
 0x2c8   : > { %v3968_v45 = vpop.f32.mrb[5].mxu1 }
 0x2c9   : > { %v3872_v31 = vpop.f32.mrb[10].mxu0  ;;  %v3969_v35 = vadd.f32 %v3968_v45, %v3967_v40 }
 0x2ca   : > { %v3873_v47 = vpop.f32.mrb[11].mxu0 }
 0x2cb   : > { %v6619_v21 = vadd.f32 %v3873_v47, %v3872_v31  ;;  %v3970_v39 = vpop.f32.mrb[6].mxu1 }
 0x2cc   : > { %v3971_v48 = vpop.f32.mrb[7].mxu1 }
 0x2cd   : > { %v3875_v51 = vpop.f32.mrb[12].mxu0  ;;  %v3972_v57 = vadd.f32 %v3971_v48, %v3970_v39 }
 0x2ce   : > { %v3876_v54 = vpop.f32.mrb[13].mxu0 }
 0x2cf   : > { %v6621_v43 = vadd.f32 %v3876_v54, %v3875_v51  ;;  %v3973_v10 = vpop.f32.mrb[8].mxu1 }
 0x2d0   : > { %v3974_v52 = vpop.f32.mrb[9].mxu1 }
 0x2d1   : > { %v3878_v15 = vpop.f32.mrb[14].mxu0  ;;  %v3975_v62 = vadd.f32 %v3974_v52, %v3973_v10 }
 0x2d2   : > { %v3879_v58 = vpop.f32.mrb[15].mxu0 }
 0x2d3   : > { %v6623_v59 = vadd.f32 %v3879_v58, %v3878_v15  ;;  %v3976_v5 = vpop.f32.mrb[10].mxu1 }
 0x2d4   : > { %v3977_v12 = vpop.f32.mrb[11].mxu1 }
 0x2d5   : > { %v3881_v61 = vpop.f32.mrb[16].mxu0  ;;  %v3978_v8 = vadd.f32 %v3977_v12, %v3976_v5 }
 0x2d6   : > { %v3882_v63 = vpop.f32.mrb[17].mxu0 }
 0x2d7   : > { %v3883_v56 = vadd.f32 %v3882_v63, %v3881_v61  ;;  %v3979_v49 = vpop.f32.mrb[12].mxu1 }
 0x2d8   : > { %v3980_v55 = vpop.f32.mrb[13].mxu1 }
 0x2d9   : > { %v6625_v1 = vadd.f32 %v3963_v33, %v3883_v56  ;;  %v3884_v16 = vpop.f32.mrb[18].mxu0  ;;  %v3981_v4 = vadd.f32 %v3980_v55, %v3979_v49 }
 0x2da   : > { %v3885_v2 = vpop.f32.mrb[19].mxu0 }
 0x2db   : > { %v3886_v36 = vadd.f32 %v3885_v2, %v3884_v16  ;;  %v3982_v7 = vpop.f32.mrb[14].mxu1 }
 0x2dc   : > { %v3983_v11 = vpop.f32.mrb[15].mxu1 }
 0x2dd   : > { %v6628_v0 = vadd.f32 %v3966_v42, %v3886_v36  ;;  %v3887_v9 = vpop.f32.mrb[20].mxu0  ;;  %v3984_v29 = vadd.f32 %v3983_v11, %v3982_v7 }
 0x2de   : > { %v3888_v53 = vpop.f32.mrb[21].mxu0 }
 0x2df   : > { %v3889_v50 = vadd.f32 %v3888_v53, %v3887_v9  ;;  %v6654_v45 = vpop.f32.mrb[16].mxu1 }
 0x2e1   : > { %v6630_v13 = vadd.f32 %v3969_v35, %v3889_v50  ;;  %v3890_v14 = vpop.f32.mrb[22].mxu0  ;;  %v6656_v35 = vpop.f32.mrb[17].mxu1 }
 0x2e2   : > { %v3891_v18 = vpop.f32.mrb[23].mxu0 }
 0x2e3   : > { %v3892_v22 = vadd.f32 %v3891_v18, %v3890_v14  ;;  %v6660_v54 = vpop.f32.mrb[18].mxu1 }
 0x2e4   : > { %v6662_v10 = vpop.f32.mrb[19].mxu1 }
 0x2e5   : > { %v6638_v25 = vadd.f32 %v3972_v57, %v3892_v22  ;;  %v3893_v6 = vpop.f32.mrb[24].mxu0 }
 0x2e6   : > { %v3894_v27 = vpop.f32.mrb[25].mxu0 }
 0x2e7   : > { %v3895_v30 = vadd.f32 %v3894_v27, %v3893_v6  ;;  %v6666_v5 = vpop.f32.mrb[20].mxu1 }
 0x2e8   : > { %v6668_v61 = vpop.f32.mrb[21].mxu1 }
 0x2e9   : > { %v6647_v33 = vadd.f32 %v3975_v62, %v3895_v30  ;;  %v3896_v46 = vpop.f32.mrb[26].mxu0 }
 0x2ea   : > { %v3897_v37 = vpop.f32.mrb[27].mxu0 }
 0x2eb   : > { %v3898_v41 = vadd.f32 %v3897_v37, %v3896_v46  ;;  %v6671_v49 = vpop.f32.mrb[22].mxu1 }
 0x2ec   : > { %v6673_v16 = vpop.f32.mrb[23].mxu1 }
 0x2ed   : > { %v6652_v42 = vadd.f32 %v3978_v8, %v3898_v41  ;;  %v3899_v40 = vpop.f32.mrb[28].mxu0 }
 0x2ee   : > { %v3900_v31 = vpop.f32.mrb[29].mxu0 }
 0x2ef   : > { %v3901_v47 = vadd.f32 %v3900_v31, %v3899_v40  ;;  %v6676_v7 = vpop.f32.mrb[24].mxu1 }
 0x2f0   : > { %v6678_v9 = vpop.f32.mrb[25].mxu1 }
 0x2f1   : > { %v6658_v39 = vadd.f32 %v3981_v4, %v3901_v47  ;;  %v3902_v51 = vpop.f32.mrb[30].mxu0 }
 0x2f2   : > { %v3903_v48 = vpop.f32.mrb[31].mxu0 }
 0x2f3   : > { %v3904_v57 = vadd.f32 %v3903_v48, %v3902_v51 }
 0x2f5   : > { %v6664_v15 = vadd.f32 %v3984_v29, %v3904_v57  ;;  %v3937_v52 = vpop.f32.mrb[32].mxu0 }
 0x2f6   : > { %v3938_v58 = vpop.f32.mrb[33].mxu0 }
 0x2f7   : > { %v3939_v62 = vadd.f32 %v3938_v58, %v3937_v52 }
 0x2f9   : > { %v1642_v12 = vadd.f32 %v3939_v62, %v6609_v24  ;;  %v3940_v63 = vpop.f32.mrb[34].mxu0 }
 0x2fa   : > { %v3941_v8 = vpop.f32.mrb[35].mxu0 }
 0x2fb   : > { %v3942_v56 = vadd.f32 %v3941_v8, %v3940_v63 }
 0x2fd   : > { %v1647_v55 = vadd.f32 %v3942_v56, %v6611_v26  ;;  %v3943_v2 = vpop.f32.mrb[36].mxu0 }
 0x2fe   : > { %v3944_v4 = vpop.f32.mrb[37].mxu0 }
 0x2ff   : > { %v3945_v36 = vadd.f32 %v3944_v4, %v3943_v2 }
 0x301   : > { %v1652_v11 = vadd.f32 %v3945_v36, %v6613_v60  ;;  %v3946_v53 = vpop.f32.mrb[38].mxu0 }
 0x302   : > { %v3947_v24 = vpop.f32.mrb[39].mxu0 }
 0x303   : > { %v3948_v29 = vadd.f32 %v3947_v24, %v3946_v53 }
 0x305   : > { %v1657_v50 = vadd.f32 %v3948_v29, %v6615_v34  ;;  %v3949_v14 = vpop.f32.mrb[40].mxu0 }
 0x306   : > { %v3950_v18 = vpop.f32.mrb[41].mxu0 }
 0x307   : > { %v3951_v19 = vadd.f32 %v3950_v18, %v3949_v14 }
 0x309   : > { %v1662_v20 = vadd.f32 %v3951_v19, %v6617_v3  ;;  %v3952_v26 = vpop.f32.mrb[42].mxu0 }
 0x30a   : > { %v3953_v22 = vpop.f32.mrb[43].mxu0 }
 0x30b   : > { %v3954_v23 = vadd.f32 %v3953_v22, %v3952_v26 }
 0x30d   : > { %v1667_v6 = vadd.f32 %v3954_v23, %v6619_v21  ;;  %v3955_v27 = vpop.f32.mrb[44].mxu0 }
 0x30e   : > { %v3956_v32 = vpop.f32.mrb[45].mxu0 }
 0x30f   : > { %v3957_v28 = vadd.f32 %v3956_v32, %v3955_v27 }
 0x311   : > { %v1672_v60 = vadd.f32 %v3957_v28, %v6621_v43  ;;  %v3958_v30 = vpop.f32.mrb[46].mxu0  ;;  %v6702_v28 = vld [vmem:[#allocation4] ss:$0 sm:$0xff] }
 0x312   : > { %v3959_v44 = vpop.f32.mrb[47].mxu0 }
 0x313   : > { %v3960_v46 = vadd.f32 %v3959_v44, %v3958_v30 }
 0x315   : > { %v1677_v34 = vadd.f32 %v3960_v46, %v6623_v59  ;;  %v4017_v37 = vpop.f32.mrb[48].mxu0  ;;  %v6706_v46 = vld [vmem:[#allocation5] ss:$0 sm:$0xff] }
 0x316   : > { %v4018_v41 = vpop.f32.mrb[49].mxu0 }
 0x317   : > { %v4019_v40 = vadd.f32 %v4018_v41, %v4017_v37 }
 0x319   : > { %v4020_v31 = vpop.f32.mrb[50].mxu0  ;;  %v6686_v3 = vadd.f32 %v4019_v40, %v1642_v12 }
 0x31a   : > { %v4021_v47 = vpop.f32.mrb[51].mxu0 }
 0x31b   : > { %v4022_v51 = vadd.f32 %v4021_v47, %v4020_v31 }
 0x31d   : > { %v4023_v48 = vpop.f32.mrb[52].mxu0  ;;  %v6688_v21 = vadd.f32 %v4022_v51, %v1647_v55 }
 0x31e   : > { %v4024_v57 = vpop.f32.mrb[53].mxu0 }
 0x31f   : > { %v4025_v52 = vadd.f32 %v4024_v57, %v4023_v48 }
 0x321   : > { %v4026_v58 = vpop.f32.mrb[54].mxu0  ;;  %v6690_v43 = vadd.f32 %v4025_v52, %v1652_v11 }
 0x322   : > { %v4027_v62 = vpop.f32.mrb[55].mxu0 }
 0x323   : > { %v4028_v63 = vadd.f32 %v4027_v62, %v4026_v58 }
 0x325   : > { %v4029_v8 = vpop.f32.mrb[56].mxu0  ;;  %v6692_v59 = vadd.f32 %v4028_v63, %v1657_v50 }
 0x326   : > { %v4030_v56 = vpop.f32.mrb[57].mxu0 }
 0x327   : > { %v4031_v2 = vadd.f32 %v4030_v56, %v4029_v8 }
 0x329   : > { %v4032_v4 = vpop.f32.mrb[58].mxu0  ;;  %v6694_v12 = vadd.f32 %v4031_v2, %v1662_v20 }
 0x32a   : > { %v4033_v36 = vpop.f32.mrb[59].mxu0 }
 0x32b   : > { %v4034_v53 = vadd.f32 %v4033_v36, %v4032_v4 }
 0x32d   : > { %v4035_v24 = vpop.f32.mrb[60].mxu0  ;;  %v6696_v55 = vadd.f32 %v4034_v53, %v1667_v6 }
 0x32e   : > { %v4036_v29 = vpop.f32.mrb[61].mxu0 }
 0x32f   : > { %v4037_v14 = vadd.f32 %v4036_v29, %v4035_v24 }
 0x331   : > { %v4038_v18 = vpop.f32.mrb[62].mxu0  ;;  %v1817_v11 = vadd.f32 %v4037_v14, %v1672_v60 }
 0x332   : > { %v4039_v19 = vpop.f32.mrb[63].mxu0 }
 0x333   : > { %v4040_v26 = vadd.f32 %v4039_v19, %v4038_v18  ;;  %v6699_v22 = vadd.f32 %v6656_v35, %v1817_v11 }
 0x335   : > { %v1822_v50 = vadd.f32 %v4040_v26, %v1677_v34  ;;  %v4041_v23 = vpop.f32.mrb[64].mxu0 }
 0x336   : > { %v4042_v27 = vpop.f32.mrb[65].mxu0 }
 0x337   : > { %v1967_v20 = vadd.f32 %v6654_v45, %v1822_v50  ;;  %v4043_v32 = vadd.f32 %v4042_v27, %v4041_v23 }
 0x339   : > { %v2024_v6 = vmul.f32 %v6702_v28, %v1967_v20  ;;  %v4044_v30 = vpop.f32.mrb[66].mxu0  ;;  %v1827_v44 = vadd.f32 %v4043_v32, %v6625_v1 }
 0x33a   : > { %v4045_v60 = vpop.f32.mrb[67].mxu0 }
 0x33b   : > { %v4046_v37 = vadd.f32 %v4045_v60, %v4044_v30  ;;  %v1972_v35 = vadd.f32 %v6662_v10, %v1827_v44  ;;  %v6710_v34 = vadd.f32 %v6706_v46, %v2024_v6 }
 0x33d   : > { %v1832_v41 = vadd.f32 %v4046_v37, %v6628_v0  ;;  %v4047_v45 = vpop.f32.mrb[68].mxu0  ;;  %v2025_v36 = vmul.f32 %v6702_v28, %v1972_v35 }
 0x33e   : > { %v4048_v40 = vpop.f32.mrb[69].mxu0 }
 0x33f   : > { %v1977_v31 = vadd.f32 %v6660_v54, %v1832_v41  ;;  %v4049_v47 = vadd.f32 %v4048_v40, %v4047_v45  ;;  %v6730_v18 = vadd.f32 %v6706_v46, %v2025_v36 }
 0x341   : > { %v2026_v51 = vmul.f32 %v6702_v28, %v1977_v31  ;;  %v4050_v48 = vpop.f32.mrb[70].mxu0  ;;  %v1837_v1 = vadd.f32 %v4049_v47, %v6630_v13 }
 0x342   : > { %v4051_v57 = vpop.f32.mrb[71].mxu0 }
 0x343   : > { %v6717_v52 = vadd.f32 %v6706_v46, %v2026_v51  ;;  %v4052_v10 = vadd.f32 %v4051_v57, %v4050_v48  ;;  %v1982_v58 = vadd.f32 %v6668_v61, %v1837_v1  ;;  %v2023_v1 = vmul.f32 %v6702_v28, %v6699_v22 }
 0x345   : > { %v1842_v62 = vadd.f32 %v4052_v10, %v6638_v25  ;;  %v4053_v0 = vpop.f32.mrb[72].mxu0  ;;  %v2027_v27 = vmul.f32 %v6702_v28, %v1982_v58 }
 0x346   : > { %v4054_v63 = vpop.f32.mrb[73].mxu0 }
 0x347   : > { %v1987_v8 = vadd.f32 %v6666_v5, %v1842_v62  ;;  %v4055_v54 = vadd.f32 %v4054_v63, %v4053_v0 }
 0x349   : > { %v2028_v56 = vmul.f32 %v6702_v28, %v1987_v8  ;;  %v4056_v2 = vpop.f32.mrb[74].mxu0  ;;  %v1847_v4 = vadd.f32 %v4055_v54, %v6647_v33 }
 0x34a   : > { %v4057_v13 = vpop.f32.mrb[75].mxu0 }
 0x34b   : > { %v2051_v53 = vadd.f32 %v6706_v46, %v2028_v56  ;;  %v4058_v24 = vadd.f32 %v4057_v13, %v4056_v2  ;;  %v1992_v61 = vadd.f32 %v6673_v16, %v1847_v4 }
 0x34d   : > { %v1852_v25 = vadd.f32 %v4058_v24, %v6652_v42  ;;  %v2029_v29 = vmul.f32 %v6702_v28, %v1992_v61  ;;  %v4059_v14 = vpop.f32.mrb[76].mxu0 }
 0x34e   : > { %v4060_v5 = vpop.f32.mrb[77].mxu0 }
 0x34f   : > { %v1997_v11 = vadd.f32 %v6671_v49, %v1852_v25  ;;  %v6734_v33 = vadd.f32 %v6706_v46, %v2029_v29  ;;  %v4061_v19 = vadd.f32 %v4060_v5, %v4059_v14 }
 0x351   : > { %v2030_v26 = vmul.f32 %v6702_v28, %v1997_v11  ;;  %v2060_v16 = vmax.f32 %v6730_v18, %v6734_v33  ;;  %v4062_v50 = vpop.f32.mrb[78].mxu0  ;;  %v1857_v42 = vadd.f32 %v4061_v19, %v6658_v39  ;;  %v2050_v39 = vadd.f32 %v6706_v46, %v2027_v27 }
 0x352   : > { %v4063_v23 = vpop.f32.mrb[79].mxu0 }
 0x353   : > { %v2053_v20 = vadd.f32 %v6706_v46, %v2030_v26  ;;  %v4064_v32 = vadd.f32 %v4063_v23, %v4062_v50  ;;  %v2002_v49 = vadd.f32 %v6678_v9, %v1857_v42 }
 0x355   : > { %v1862_v6 = vadd.f32 %v4064_v32, %v6664_v15  ;;  %v2031_v30 = vmul.f32 %v6702_v28, %v2002_v49  ;;  %v4267_v44 = vpop.f32.mrb[80].mxu0  ;;  %v2061_v60 = vmax.f32 %v6717_v52, %v2053_v20 }
 0x356   : > { %v1937_v37 = vadd.f32 %v4267_v44, %v6688_v21  ;;  %v1931_v35 = vpop.f32.mrb[81].mxu0 }
 0x357   : > { %v2007_v41 = vadd.f32 %v6676_v7, %v1862_v6  ;;  %v2054_v45 = vadd.f32 %v6706_v46, %v2031_v30  ;;  %v1932_v40 = vadd.f32 %v1931_v35, %v6686_v3 }
 0x358   : > { %v2018_v9 = vmul.f32 %v6702_v28, %v1937_v37 }
 0x359   : > { %v2032_v15 = vmul.f32 %v6702_v28, %v2007_v41  ;;  %v2062_v31 = vmax.f32 %v2050_v39, %v2054_v45  ;;  %v4270_v47 = vpop.f32.mrb[82].mxu0  ;;  %v2017_v8 = vmul.f32 %v6702_v28, %v1932_v40 }
 0x35a   : > { %v2041_v51 = vadd.f32 %v6706_v46, %v2018_v9  ;;  %v1947_v48 = vadd.f32 %v4270_v47, %v6692_v59  ;;  %v1941_v21 = vpop.f32.mrb[83].mxu0  ;;  %v2046_v59 = vadd.f32 %v6706_v46, %v2023_v1 }
 0x35b   : > { %v2055_v7 = vadd.f32 %v6706_v46, %v2032_v15  ;;  %v1942_v57 = vadd.f32 %v1941_v21, %v6690_v43 }
 0x35c   : > { %v2020_v3 = vmul.f32 %v6702_v28, %v1947_v48 }
 0x35d   : > { %v2063_v52 = vmax.f32 %v2051_v53, %v2055_v7  ;;  %v2019_v10 = vmul.f32 %v6702_v28, %v1942_v57  ;;  %v4273_v58 = vpop.f32.mrb[84].mxu0  ;;  %v3475_v53 = vld [vmem:[%s7136_s4 + $0x28] sm:$0xff] }
 0x35e   : > { %v2043_v62 = vadd.f32 %v6706_v46, %v2020_v3  ;;  %v1957_v0 = vadd.f32 %v4273_v58, %v6696_v55  ;;  %v1951_v63 = vpop.f32.mrb[85].mxu0  ;;  %v3474_v55 = vld [vmem:[%s7136_s4 + $0x20] sm:$0xff] }
 0x35f   : > { %v2042_v22 = vadd.f32 %v6706_v46, %v2019_v10  ;;  %v1952_v54 = vadd.f32 %v1951_v63, %v6694_v12  ;;  %v6780_v12 = vld [vmem:[%s7136_s4 + $0x30] sm:$0xff]  ;;  %v4728_v11 = vpack.c.bf16 %v3475_v53, %v3474_v55  ;;  %v3479_v3 = vld [vmem:[%s7136_s4 + $0x40] sm:$0xff] }
 0x360   : > { %v2059_v43 = vmax.f32 %v2043_v62, %v6710_v34  ;;  %v2022_v56 = vmul.f32 %v6702_v28, %v1957_v0  ;;  %v2040_v34 = vadd.f32 %v6706_v46, %v2017_v8 }
 0x361   : > { %v2058_v2 = vmax.f32 %v2042_v22, %v2046_v59  ;;  %v2021_v4 = vmul.f32 %v6702_v28, %v1952_v54  ;;  %v3477_v28 = vld [vmem:[%s7136_s4 + $0x38] sm:$0xff] }
 0x362   : > { %v2067_v13 = vmax.f32 %v2059_v43, %v2063_v52  ;;  %v2045_v36 = vadd.f32 %v6706_v46, %v2022_v56  ;;  %v4731_v19 = vpack.c.bf16 %v3477_v28, %v6780_v12  ;;  %v3480_v52 = vld [vmem:[%s7136_s4 + $0x48] sm:$0xff] }
 0x363   : > { %v2066_v24 = vmax.f32 %v2058_v2, %v2062_v31  ;;  %v2044_v61 = vadd.f32 %v6706_v46, %v2021_v4  ;;  %v4734_v4 = vpack.c.bf16 %v3480_v52, %v3479_v3  ;;  %v3516_v3 = vld [vmem:[%s7136_s4 + $0x130] sm:$0xff]  ;;  %v3517_v52 = vld [vmem:[%s7136_s4 + $0x138] sm:$0xff] }
 0x364   : > { %v6787_v25 = vmax.f32 %v2067_v13, 0.0  ;;  %v2057_v29 = vmax.f32 %v2041_v51, %v2045_v36  ;;  %v3481_v13 = vld [vmem:[%s7136_s4 + $0x50] sm:$0xff]  ;;  %v3482_v36 = vld [vmem:[%s7136_s4 + $0x58] sm:$0xff] }
 0x365   : > { %v2070_v14 = vmax.f32 %v2066_v24, 0.0  ;;  %v2056_v5 = vmax.f32 %v2040_v34, %v2044_v61  ;;  %v4737_v34 = vpack.c.bf16 %v3482_v36, %v3481_v13  ;;  %v3484_v24 = vld [vmem:[%s7136_s4 + $0x60] sm:$0xff]  ;;  %v3485_v61 = vld [vmem:[%s7136_s4 + $0x68] sm:$0xff] }
 0x366   : > { %v2065_v26 = vmax.f32 %v2057_v29, %v2061_v60  ;;  %v2736_v50 = vrot.slane %v6787_v25, 7  ;;  %v2897_v42 = vrot.slane %v6787_v25, 1  ;;  %v2978_v23 = vrot.slane %v6787_v25, 2  ;;  %v3486_v29 = vld [vmem:[%s7136_s4 + $0x70] sm:$0xff]  ;;  %v3529_v36 = vld [vmem:[%s7136_s4 + $0x180] sm:$0xff] }
 0x367   : > { %v2064_v46 = vmax.f32 %v2056_v5, %v2060_v16  ;;  %v2086_v27 = vrot.slane %v2070_v14, 7  ;;  %v2249_v20 = vrot.slane %v2070_v14, 1  ;;  %v2330_v32 = vrot.slane %v2070_v14, 2 }
 0x368   : > { %v2069_v49 = vmax.f32 %v2065_v26, 0.0  ;;  %v2411_v6 = vrot.slane %v2070_v14, 3  ;;  %v2492_v30 = vrot.slane %v2070_v14, 4  ;;  %v2573_v44 = vrot.slane %v2070_v14, 5 }
 0x369   : > { %v2068_v37 = vmax.f32 %v2064_v46, 0.0  ;;  %v2654_v35 = vrot.slane %v2070_v14, 6  ;;  %v3059_v60 = vrot.slane %v6787_v25, 3  ;;  %v3140_v39 = vrot.slane %v6787_v25, 4  ;;  %v3494_v46 = vld [vmem:[%s7136_s4 + $0xa0] sm:$0xff] }
 0x36a   : > { %v6799_v41 = vsel %vm2087_vm3, %v2736_v50, %v2069_v49  ;;  %v2816_v45 = vrot.slane %v2069_v49, 1  ;;  %v2896_v40 = vrot.slane %v2069_v49, 2  ;;  %v2977_v18 = vrot.slane %v2069_v49, 3  ;;  %v3491_v50 = vld [vmem:[%s7136_s4 + $0x90] sm:$0xff] }
 0x36b   : > { %v2088_v33 = vsel %vm2087_vm3, %v2086_v27, %v2068_v37  ;;  %v2168_v16 = vrot.slane %v2068_v37, 1  ;;  %v2248_v9 = vrot.slane %v2068_v37, 2  ;;  %v2329_v15 = vrot.slane %v2068_v37, 3  ;;  %v3495_v27 = vld [vmem:[%s7136_s4 + $0xa8] sm:$0xff] }
 0x36c   : > { %4298 = vmatmul.mubr.msk.f32.vlgmr.msra.gmra.mrb[26].mxu1 %vm2089_vm4, %v2088_v33  ;;  %v2410_v31 = vrot.slane %v2068_v37, 4  ;;  %v2491_v47 = vrot.slane %v2068_v37, 5  ;;  %v2572_v51 = vrot.slane %v2068_v37, 6  ;;  %v2653_v48 = vrot.slane %v2068_v37, 7  ;;  %v3506_v33 = vld [vmem:[%s7136_s4 + $0xf0] sm:$0xff] }
 0x36d   : > { %4729 = vmatpush3.bf16.msra.mxu1 %v4728_v11  ;;  %4308 = vmatprep.mubr.msk.f32.mxu1 %vm4978_vm2, %v4979_v38  ;;  %v2169_v21 = vsel %vm2087_vm3, %v2070_v14, %v2168_v16  ;;  %v2250_v1 = vsel %vm2087_vm3, %v2249_v20, %v2248_v9  ;;  %v2331_v7 = vsel %vm2087_vm3, %v2330_v32, %v2329_v15  ;;  %v3058_v57 = vrot.slane %v2069_v49, 4  ;;  %v3487_v14 = vld [vmem:[%s7136_s4 + $0x78] sm:$0xff]  ;;  %v3489_v11 = vld [vmem:[%s7136_s4 + $0x80] sm:$0xff]  ;;  %v3496_v32 = vld [vmem:[%s7136_s4 + $0xb0] sm:$0xff] }
 0x36e   : > { %4730 = vmatprep.subr.bf16.mxu1 %v4977_v17  ;;  %v2412_v10 = vsel %vm2087_vm3, %v2411_v6, %v2410_v31  ;;  %v6817_v58 = vsel %vm2087_vm3, %v2492_v30, %v2491_v47  ;;  %v6820_v62 = vsel %vm2087_vm3, %v2573_v44, %v2572_v51  ;;  %v6823_v0 = vsel %vm2087_vm3, %v2654_v35, %v2653_v48  ;;  %v3499_v30 = vld [vmem:[%s7136_s4 + $0xc0] sm:$0xff]  ;;  %v3500_v44 = vld [vmem:[%s7136_s4 + $0xc8] sm:$0xff]  ;;  %v3501_v35 = vld [vmem:[%s7136_s4 + $0xd0] sm:$0xff] }
 0x36f   : > { %v6827_v63 = vsel %vm2087_vm3, %v6787_v25, %v2816_v45  ;;  %v6830_v59 = vsel %vm2087_vm3, %v2897_v42, %v2896_v40  ;;  %v6833_v8 = vsel %vm2087_vm3, %v2978_v23, %v2977_v18  ;;  %v6836_v22 = vsel %vm2087_vm3, %v3059_v60, %v3058_v57  ;;  %v3492_v42 = vld [vmem:[%s7136_s4 + $0x98] sm:$0xff]  ;;  %v3504_v45 = vld [vmem:[%s7136_s4 + $0xe0] sm:$0xff]  ;;  %v3505_v40 = vld [vmem:[%s7136_s4 + $0xe8] sm:$0xff] }
 0x370   : > { %v3139_v54 = vrot.slane %v2069_v49, 5  ;;  %v3220_v43 = vrot.slane %v2069_v49, 6  ;;  %v3221_v56 = vrot.slane %v6787_v25, 5  ;;  %v3301_v2 = vrot.slane %v2069_v49, 7  ;;  %v3497_v49 = vld [vmem:[%s7136_s4 + $0xb8] sm:$0xff]  ;;  %v3509_v15 = vld [vmem:[%s7136_s4 + $0x100] sm:$0xff] }
 0x371   : > { %4732 = vmatpush3.bf16.msra.mxu1 %v4731_v19  ;;  %v3302_v55 = vrot.slane %v6787_v25, 6  ;;  %v4740_v25 = vpack.c.bf16 %v3485_v61, %v3484_v24  ;;  %v4743_v5 = vpack.c.bf16 %v3487_v14, %v3486_v29  ;;  %v3490_v19 = vld [vmem:[%s7136_s4 + $0x88] sm:$0xff]  ;;  %v4749_v23 = vpack.c.bf16 %v3492_v42, %v3491_v50  ;;  %v3502_v60 = vld [vmem:[%s7136_s4 + $0xd8] sm:$0xff]  ;;  %v3511_v51 = vld [vmem:[%s7136_s4 + $0x110] sm:$0xff] }
 0x372   : > { %4733 = vmatprep.subr.bf16.mxu1 %v4977_v17  ;;  %v6848_v53 = vsel %vm2087_vm3, %v3140_v39, %v3139_v54  ;;  %v6851_v12 = vsel %vm2087_vm3, %v3221_v56, %v3220_v43  ;;  %v4746_v26 = vpack.c.bf16 %v3490_v19, %v3489_v11  ;;  %v4752_v20 = vpack.c.bf16 %v3495_v27, %v3494_v46  ;;  %v3507_v16 = vld [vmem:[%s7136_s4 + $0xf8] sm:$0xff]  ;;  %v3510_v31 = vld [vmem:[%s7136_s4 + $0x108] sm:$0xff]  ;;  %v3524_v56 = vld [vmem:[%s7136_s4 + $0x160] sm:$0xff] }
 0x373   : > { %v6854_v28 = vsel %vm2087_vm3, %v3302_v55, %v3301_v2  ;;  %v4755_v6 = vpack.c.bf16 %v3497_v49, %v3496_v32  ;;  %v4758_v37 = vpack.c.bf16 %v3500_v44, %v3499_v30  ;;  %v4761_v39 = vpack.c.bf16 %v3502_v60, %v3501_v35  ;;  %v3512_v48 = vld [vmem:[%s7136_s4 + $0x118] sm:$0xff]  ;;  %v3525_v2 = vld [vmem:[%s7136_s4 + $0x168] sm:$0xff]  ;;  %v3534_v29 = vld [vmem:[%s7136_s4 + $0x1a0] sm:$0xff] }
 0x374   : > { %4309 = vmatmul.mubr.msk.f32.vlgmr.msra.gmra.mrb[26].mxu1 %vm2089_vm4, %v2169_v21  ;;  %v4764_v18 = vpack.c.bf16 %v3505_v40, %v3504_v45  ;;  %v4767_v9 = vpack.c.bf16 %v3507_v16, %v3506_v33  ;;  %v4770_v47 = vpack.c.bf16 %v3510_v31, %v3509_v15  ;;  %v4773_v21 = vpack.c.bf16 %v3512_v48, %v3511_v51  ;;  %v3522_v54 = vld [vmem:[%s7136_s4 + $0x158] sm:$0xff]  ;;  %v3535_v14 = vld [vmem:[%s7136_s4 + $0x1a8] sm:$0xff]  ;;  %v3544_v27 = vld [vmem:[%s7136_s4 + $0x1e0] sm:$0xff] }
 0x375   : > { %4735 = vmatpush3.bf16.msra.mxu1 %v4734_v4  ;;  %4319 = vmatprep.mubr.msk.f32.mxu1 %vm4978_vm2, %v4979_v38  ;;  %v4788_v4 = vpack.c.bf16 %v3525_v2, %v3524_v56  ;;  %v3527_v55 = vld [vmem:[%s7136_s4 + $0x178] sm:$0xff]  ;;  %v3540_v50 = vld [vmem:[%s7136_s4 + $0x1c8] sm:$0xff]  ;;  %v3472_v30 = vld [vmem:[%s7137_s5] ss:$0 sm:$0xff] }
 0x376   : > { %4736 = vmatprep.subr.bf16.mxu1 %v4977_v17  ;;  %v3532_v61 = vld [vmem:[%s7136_s4 + $0x198] sm:$0xff] }
 0x377   : > { %v3537_v11 = vld [vmem:[%s7136_s4 + $0x1b8] sm:$0xff] }
 0x378   : > { %v3547_v49 = vld [vmem:[%s7136_s4 + $0x1f8] sm:$0xff] }
 0x379   : > { %4738 = vmatpush3.bf16.msra.mxu1 %v4737_v34  ;;  %v3530_v34 = vld [vmem:[%s7136_s4 + $0x188] sm:$0xff] }
 0x37a   : > { %4739 = vmatprep.subr.bf16.mxu1 %v4977_v17  ;;  %v4794_v24 = vpack.c.bf16 %v3530_v34, %v3529_v36 }
 0x37c   : > { %4320 = vmatmul.mubr.msk.f32.vlgmr.msra.gmra.mrb[26].mxu1 %vm2089_vm4, %v2250_v1  ;;  %v3514_v1 = vld [vmem:[%s7136_s4 + $0x120] sm:$0xff] }
 0x37d   : > { %4741 = vmatpush3.bf16.msra.mxu1 %v4740_v25  ;;  %4330 = vmatprep.mubr.msk.f32.mxu1 %vm4978_vm2, %v4979_v38 }
 0x37e   : > { %4742 = vmatprep.subr.bf16.mxu1 %v4977_v17 }
 0x381   : > { %4744 = vmatpush3.bf16.msra.mxu1 %v4743_v5  ;;  %v4800_v5 = vpack.c.bf16 %v3535_v14, %v3534_v29 }
 0x382   : > { %4745 = vmatprep.subr.bf16.mxu1 %v4977_v17 }
 0x384   : > { %4331 = vmatmul.mubr.msk.f32.vlgmr.msra.gmra.mrb[26].mxu1 %vm2089_vm4, %v2331_v7  ;;  %v3515_v7 = vld [vmem:[%s7136_s4 + $0x128] sm:$0xff] }
 0x385   : > { %4747 = vmatpush3.bf16.msra.mxu1 %v4746_v26  ;;  %4341 = vmatprep.mubr.msk.f32.mxu1 %vm4978_vm2, %v4979_v38  ;;  %v4776_v57 = vpack.c.bf16 %v3515_v7, %v3514_v1  ;;  %v3539_v26 = vld [vmem:[%s7136_s4 + $0x1c0] sm:$0xff] }
 0x386   : > { %4748 = vmatprep.subr.bf16.mxu1 %v4977_v17  ;;  %v4806_v42 = vpack.c.bf16 %v3540_v50, %v3539_v26 }
 0x389   : > { %4750 = vmatpush3.bf16.msra.mxu1 %v4749_v23  ;;  %v3542_v23 = vld [vmem:[%s7136_s4 + $0x1d8] sm:$0xff] }
 0x38a   : > { %4751 = vmatprep.subr.bf16.mxu1 %v4977_v17 }
 0x38c   : > { %4342 = vmatmul.mubr.msk.f32.vlgmr.msra.gmra.mrb[26].mxu1 %vm2089_vm4, %v2412_v10  ;;  %v4779_v10 = vpack.c.bf16 %v3517_v52, %v3516_v3 }
 0x38d   : > { %4753 = vmatpush3.bf16.msra.mxu1 %v4752_v20  ;;  %4352 = vmatprep.mubr.msk.f32.mxu1 %vm4978_vm2, %v4979_v38  ;;  %v3545_v20 = vld [vmem:[%s7136_s4 + $0x1e8] sm:$0xff] }
 0x38e   : > { %4754 = vmatprep.subr.bf16.mxu1 %v4977_v17  ;;  %v4812_v32 = vpack.c.bf16 %v3545_v20, %v3544_v27 }
 0x391   : > { %4756 = vmatpush3.bf16.msra.mxu1 %v4755_v6 }
 0x392   : > { %4757 = vmatprep.subr.bf16.mxu1 %v4977_v17 }
 0x394   : > { %4353 = vmatmul.mubr.msk.f32.vlgmr.msra.gmra.mrb[26].mxu1 %vm2089_vm4, %v6817_v58  ;;  %v3519_v58 = vld [vmem:[%s7136_s4 + $0x140] sm:$0xff] }
 0x395   : > { %4759 = vmatpush3.bf16.msra.mxu1 %v4758_v37  ;;  %4363 = vmatprep.mubr.msk.f32.mxu1 %vm4978_vm2, %v4979_v38 }
 0x396   : > { %4760 = vmatprep.subr.bf16.mxu1 %v4977_v17 }
 0x399   : > { %4762 = vmatpush3.bf16.msra.mxu1 %v4761_v39 }
 0x39a   : > { %4763 = vmatprep.subr.bf16.mxu1 %v4977_v17 }
 0x39c   : > { %4364 = vmatmul.mubr.msk.f32.vlgmr.msra.gmra.mrb[26].mxu1 %vm2089_vm4, %v6820_v62  ;;  %v3520_v62 = vld [vmem:[%s7136_s4 + $0x148] sm:$0xff] }
 0x39d   : > { %4765 = vmatpush3.bf16.msra.mxu1 %v4764_v18  ;;  %4374 = vmatprep.mubr.msk.f32.mxu1 %vm4978_vm2, %v4979_v38 }
 0x39e   : > { %4766 = vmatprep.subr.bf16.mxu1 %v4977_v17 }
 0x3a1   : > { %4768 = vmatpush3.bf16.msra.mxu1 %v4767_v9 }
 0x3a2   : > { %4769 = vmatprep.subr.bf16.mxu1 %v4977_v17 }
 0x3a4   : > { %4375 = vmatmul.mubr.msk.f32.vlgmr.msra.gmra.mrb[26].mxu1 %vm2089_vm4, %v6823_v0  ;;  %v4782_v0 = vpack.c.bf16 %v3520_v62, %v3519_v58 }
 0x3a5   : > { %4771 = vmatpush3.bf16.msra.mxu1 %v4770_v47  ;;  %4385 = vmatprep.mubr.msk.f32.mxu1 %vm4978_vm2, %v4979_v38 }
 0x3a6   : > { %4772 = vmatprep.subr.bf16.mxu1 %v4977_v17 }
 0x3a9   : > { %4774 = vmatpush3.bf16.msra.mxu1 %v4773_v21 }
 0x3aa   : > { %4775 = vmatprep.subr.bf16.mxu1 %v4977_v17 }
 0x3ac   : > { %4386 = vmatmul.mubr.msk.f32.vlgmr.msra.gmra.mrb[26].mxu1 %vm2089_vm4, %v6799_v41  ;;  %v3521_v41 = vld [vmem:[%s7136_s4 + $0x150] sm:$0xff] }
 0x3ad   : > { %4777 = vmatpush3.bf16.msra.mxu1 %v4776_v57  ;;  %4396 = vmatprep.mubr.msk.f32.mxu1 %vm4978_vm2, %v4979_v38  ;;  %v4785_v43 = vpack.c.bf16 %v3522_v54, %v3521_v41 }
 0x3ae   : > { %4778 = vmatprep.subr.bf16.mxu1 %v4977_v17 }
 0x3b1   : > { %4780 = vmatpush3.bf16.msra.mxu1 %v4779_v10 }
 0x3b2   : > { %4781 = vmatprep.subr.bf16.mxu1 %v4977_v17 }
 0x3b4   : > { %4397 = vmatmul.mubr.msk.f32.vlgmr.msra.gmra.mrb[26].mxu1 %vm2089_vm4, %v6827_v63  ;;  %v3526_v63 = vld [vmem:[%s7136_s4 + $0x170] sm:$0xff] }
 0x3b5   : > { %4783 = vmatpush3.bf16.msra.mxu1 %v4782_v0  ;;  %4407 = vmatprep.mubr.msk.f32.mxu1 %vm4978_vm2, %v4979_v38  ;;  %v4791_v13 = vpack.c.bf16 %v3527_v55, %v3526_v63 }
 0x3b6   : > { %4784 = vmatprep.subr.bf16.mxu1 %v4977_v17 }
 0x3b9   : > { %4786 = vmatpush3.bf16.msra.mxu1 %v4785_v43 }
 0x3ba   : > { %4787 = vmatprep.subr.bf16.mxu1 %v4977_v17 }
 0x3bc   : > { %4408 = vmatmul.mubr.msk.f32.vlgmr.msra.gmra.mrb[26].mxu1 %vm2089_vm4, %v6830_v59  ;;  %v3531_v59 = vld [vmem:[%s7136_s4 + $0x190] sm:$0xff] }
 0x3bd   : > { %4789 = vmatpush3.bf16.msra.mxu1 %v4788_v4  ;;  %4418 = vmatprep.mubr.msk.f32.mxu1 %vm4978_vm2, %v4979_v38  ;;  %v4797_v25 = vpack.c.bf16 %v3532_v61, %v3531_v59 }
 0x3be   : > { %4790 = vmatprep.subr.bf16.mxu1 %v4977_v17 }
 0x3c1   : > { %4792 = vmatpush3.bf16.msra.mxu1 %v4791_v13 }
 0x3c2   : > { %4793 = vmatprep.subr.bf16.mxu1 %v4977_v17 }
 0x3c4   : > { %4419 = vmatmul.mubr.msk.f32.vlgmr.msra.gmra.mrb[26].mxu1 %vm2089_vm4, %v6833_v8  ;;  %v3536_v8 = vld [vmem:[%s7136_s4 + $0x1b0] sm:$0xff] }
 0x3c5   : > { %4795 = vmatpush3.bf16.msra.mxu1 %v4794_v24  ;;  %4429 = vmatprep.mubr.msk.f32.mxu1 %vm4978_vm2, %v4979_v38  ;;  %v4803_v19 = vpack.c.bf16 %v3537_v11, %v3536_v8 }
 0x3c6   : > { %4796 = vmatprep.subr.bf16.mxu1 %v4977_v17 }
 0x3c9   : > { %4798 = vmatpush3.bf16.msra.mxu1 %v4797_v25 }
 0x3ca   : > { %4799 = vmatprep.subr.bf16.mxu1 %v4977_v17 }
 0x3cc   : > { %4430 = vmatmul.mubr.msk.f32.vlgmr.msra.gmra.mrb[26].mxu1 %vm2089_vm4, %v6836_v22  ;;  %v3541_v22 = vld [vmem:[%s7136_s4 + $0x1d0] sm:$0xff] }
 0x3cd   : > { %4801 = vmatpush3.bf16.msra.mxu1 %v4800_v5  ;;  %4440 = vmatprep.mubr.msk.f32.mxu1 %vm4978_vm2, %v4979_v38  ;;  %v4809_v46 = vpack.c.bf16 %v3542_v23, %v3541_v22 }
 0x3ce   : > { %4802 = vmatprep.subr.bf16.mxu1 %v4977_v17 }
 0x3d1   : > { %4804 = vmatpush3.bf16.msra.mxu1 %v4803_v19 }
 0x3d2   : > { %4805 = vmatprep.subr.bf16.mxu1 %v4977_v17 }
 0x3d4   : > { %4441 = vmatmul.mubr.msk.f32.vlgmr.msra.gmra.mrb[26].mxu1 %vm2089_vm4, %v6848_v53  ;;  %v3546_v53 = vld [vmem:[%s7136_s4 + $0x1f0] sm:$0xff] }
 0x3d5   : > { %4807 = vmatpush3.bf16.msra.mxu1 %v4806_v42  ;;  %4451 = vmatprep.mubr.msk.f32.mxu1 %vm4978_vm2, %v4979_v38  ;;  %v4815_v6 = vpack.c.bf16 %v3547_v49, %v3546_v53 }
 0x3d6   : > { %4808 = vmatprep.subr.bf16.mxu1 %v4977_v17 }
 0x3d9   : > { %4810 = vmatpush3.bf16.msra.mxu1 %v4809_v46 }
 0x3da   : > { %4811 = vmatprep.subr.bf16.mxu1 %v4977_v17 }
 0x3dc   : > { %4452 = vmatmul.mubr.msk.f32.vlgmr.msra.gmra.mrb[26].mxu1 %vm2089_vm4, %v6851_v12 }
 0x3dd   : > { %4813 = vmatpush3.bf16.msra.mxu1 %v4812_v32  ;;  %4462 = vmatprep.mubr.msk.f32.mxu1 %vm4978_vm2, %v4979_v38 }
 0x3de   : > { %4814 = vmatprep.subr.bf16.mxu1 %v4977_v17 }
 0x3e1   : > { %4816 = vmatpush3.bf16.msra.mxu1 %v4815_v6 }
 0x3e4   : > { %4463 = vmatmul.mubr.msk.f32.vlgmr.msra.gmra.mrb[26].mxu1 %vm2089_vm4, %v6854_v28 }
 0x4b7   : > { %v3372_v44 = vpop.f32.mrb[26].mxu1 }
 0x4b8   : > { %v4849_v37 = vadd.f32 %v3472_v30, %v3372_v44  ;;  %v4464_v35 = vpop.f32.mrb[27].mxu1 }
 0x4ba   : > { %3377 = vst [vmem:[#allocation6] sm:$0x3] %v4849_v37 }
 0x4bb PF: > { %p7098_p6 = scmp.eq.s32.totalorder %s3463_s24, 1  ;;  %s4980_s21 = smov [#allocation6]  }
 0x4bc   : > { %s3393_s14 = sshll.u32 %s4980_s21, 4  ;;  %s3394_s14 = int_to_ptr.vmem [resolvable:$true] %s3393_s14 }
 0x4bd   : > { %s4922_s15 = scalar_lea.vmem %s3394_s14, 32  ;;  %s4928_s16 = scalar_lea.vmem %s3394_s14, 64 }
 0x4be   : > { %p4923_p7 = scmp.ne.s32.totalorder %s3394_s14, %s4922_s15  ;;  %p4929_p10 = scmp.lt.s32.totalorder %s3394_s14, %s3394_s14 }
 0x4bf   : > { %p4930_p11 = scmp.lt.s32.totalorder %s4928_s16, %s4922_s15 }
 0x4c0   : > { %p4924_p8 = pnand %p4923_p7, %p7098_p6 }
 0x4c1   : > { %p4931_p12 = por %p4930_p11, %p4929_p10 }
 0x4c2   : > { %p4925_p9 = pneg %p4924_p8 }
 0x4c4   : > { %p4932_p13 = pnand %p4931_p12, %p4925_p9 }
 0x4c6   : > { %4935 = shalt.err (!%p4932_p13)
}
 0x4c7   : > { %s4936_s18 = scalar_lea.hbm %s7138_s6, 32 }
 0x4c8   : > { %p4937_p0 = scmp.ne.s32.totalorder %s7138_s6, %s4936_s18  ;;  %p4942_p3 = scmp.lt.u32.totalorder %s4936_s18, %s7138_s6 }
 0x4ca   : > { %p4938_p1 = pnand %p4937_p0, %p7098_p6 }
 0x4cc   : > { %p4939_p2 = pneg %p4938_p1 }
 0x4ce   : > { %p4944_p4 = pnand %p4942_p3, %p4939_p2 }
 0x4d0   : > { %4947 = shalt.err (!%p4944_p4)
}
 0x4d1   : > { %4881 = dma.vmem_to_hbm [thread:$0]  (%p7098_p6), %s3394_s14, 32, %s7138_s6, [#allocation7]  }
 0x4d2 PF: > { %p4889_p5 = scmp.ge.s32.totalorder %s4974_s23, 2  ;;  %p4890_p7 = scmp.eq.s32.totalorder %s3464_s25, 1 }
 0x4d4   : > { %p4885_p8 = pnand %p4890_p7, %p4889_p5 }
 0x4d6   : > { %4961 = dma.done.wait (!%p4885_p8), [#allocation7], 32  }
 0x4d7   : > { %4963 = vsyncadd (!%p4885_p8), [#allocation7], 4294967264  ;;  %s19_s23 = sadd.s32 1, %s4974_s23   ;;  %s7140_s21 = smov %s4970_s22 }
 0x4d8   : > { %p16_p9 = scmp.ge.s32.totalorder %s19_s23, 4   ;;  %s7141_s22 = smov %s7143_s26 }
 0x4da   :  { %18 = sbr.rel (!%p16_p9) target bundleno = 3 (0x3), region = 110 }
 0x4e1   :  { %3411 = vsyncpa [#allocation7], 1 }
 0x4e2   :  { %3413 = vsyncpa [#allocation7 + $0x1], 1 }

</bundles_post_ra>
